<compile_context>
chip_gen: v5e
topology: v5e:2x2
jax: 0.10.0
libtpu: 0.0.40
codegen_flags: <defaults>
</compile_context>

<pallas_src>
import functools

import jax
import jax.numpy as jnp
from jax.experimental import pallas as pl
from jax.experimental.pallas import tpu as pltpu

BN_EPS = 1e-5
IN_FEATURES = 5
IN_PAD = 8                # pad K of layer 1 to an even, sublane-friendly size
HIDDEN = 500
HIDDEN_PAD = 512          # 4 x 128 lanes: unmasked tiles on all TPU generations
OUT_FEATURES = 1
OUT_ROWS = 8              # compact output rows (row 0 real), sublane-aligned


def _putnet_kernel(x_ref, w1_ref, b1_ref, w2_ref, b2_ref, w3_ref, b3_ref,
                   w4_ref, b4_ref, w5_ref, b5_ref, o_ref, *, n_sub):
    """One batch tile (TB, 8) -> compact (1, 8, TB) output (row 0 = prediction).

    The tile is processed in `n_sub` static sub-chunks so chunk c's
    bias/ReLU/cast epilogue overlaps chunk c+1's matmuls on the MXU.
    """
    f32 = jnp.float32
    bf16 = jnp.bfloat16
    tb = x_ref.shape[0]
    sub = tb // n_sub
    b5 = b5_ref[0, 0]                                                # SMEM scalar

    for c in range(n_sub):                                           # static unroll
        rows = slice(c * sub, (c + 1) * sub)
        x = x_ref[rows, :]                                           # (sub, 8) f32
        # Layer 1 stays f32: BN fold rescales w1 by 1/sqrt(var) which can be
        # large; at K=8 the f32 MXU cost is negligible.
        h = jnp.dot(x, w1_ref[...], preferred_element_type=f32) + b1_ref[...]
        h = jnp.maximum(h, 0.0)                                      # (sub, 512) f32
        h = jnp.dot(h.astype(bf16), w2_ref[...],
                    preferred_element_type=f32) + b2_ref[...]
        h = jnp.maximum(h, 0.0)
        h = jnp.dot(h.astype(bf16), w3_ref[...],
                    preferred_element_type=f32) + b3_ref[...]
        h = jnp.maximum(h, 0.0)
        h = jnp.dot(h.astype(bf16), w4_ref[...],
                    preferred_element_type=f32) + b4_ref[...]
        h = jnp.maximum(h, 0.0)
        # Final layer emitted lane-dense: (8, 512) . (sub, 512)^T -> (8, sub),
        # i.e. batch on lanes, so the writeback is 8 rows, not a 128-wide slab.
        out8 = jax.lax.dot_general(
            w5_ref[...], h.astype(bf16),
            dimension_numbers=(((1,), (1,)), ((), ())),
            preferred_element_type=f32) + b5
        o_ref[0, :, rows] = out8


def _round_up(n, m):
    return ((n + m - 1) // m) * m


def _fold_batchnorm(x_f32, params):
    """Fold training-mode BatchNorm1d (full-batch stats, biased var) into Linear #1."""
    mean = jnp.mean(x_f32, axis=0, keepdims=True)                    # (1, 5)
    var = jnp.mean(jnp.square(x_f32 - mean), axis=0, keepdims=True)  # (1, 5)
    scale = params["bn_gamma"] * jax.lax.rsqrt(var + BN_EPS)         # (1, 5)
    shift = params["bn_beta"] - mean * scale                         # (1, 5)
    scale = jnp.pad(scale, ((0, 0), (0, IN_PAD - IN_FEATURES)))      # (1, 8)
    shift = jnp.pad(shift, ((0, 0), (0, IN_PAD - IN_FEATURES)))      # (1, 8)
    w1 = params["w1"]                                                # (8, 512) f32
    w1_eff = w1 * scale.reshape(IN_PAD, 1)                           # stays f32
    b1_eff = params["b1"] + shift @ w1                               # (1, 512) f32
    return w1_eff, b1_eff


def _choose_tiling(batch, tile_cap):
    """>=2 batch tiles, tile a multiple of 256, capped for v7x's 64 MiB VMEM."""
    tb = min(_round_up(max(1, (batch + 1) // 2), 256), tile_cap)
    num_tiles = max(2, -(-batch // tb))
    # In-kernel sub-chunking: largest of 4/2/1 keeping 128-lane-aligned,
    # >=256-row chunks (epilogue/MXU overlap).
    n_sub = 1
    for d in (4, 2):
        if tb % (d * 128) == 0 and tb // d >= 256:
            n_sub = d
            break
    return tb, num_tiles, n_sub


def putnet_forward(x, params, *, tile_b=2048):
    """x: (B, 5) float32.  Returns (B, 1) float32 matching PutNet.forward
    (BatchNorm1d in training mode: full-batch statistics, biased variance)."""
    B = x.shape[0]
    xf = x.astype(jnp.float32)

    # BN statistics are a tiny (B,5) reduction over the FULL (unpadded) batch,
    # folded into layer 1 so the kernel tiles the batch without changing math.
    w1_eff, b1_eff = _fold_batchnorm(xf, params)

    tile_cap = max(256, _round_up(tile_b, 256))
    tb, num_tiles, n_sub = _choose_tiling(B, tile_cap)
    b_pad = num_tiles * tb

    xp = jnp.pad(xf, ((0, b_pad - B), (0, IN_PAD - IN_FEATURES)))

    def resident(shape):
        # Constant index_map -> block index never changes -> single DMA;
        # weights stay resident in VMEM across all batch tiles.
        return pl.BlockSpec(shape, lambda i: (0, 0))

    grid_spec = pltpu.PrefetchScalarGridSpec(
        num_scalar_prefetch=0,
        grid=(num_tiles,),
        in_specs=[
            pl.BlockSpec((tb, IN_PAD), lambda i: (i, 0)),       # x tile (pipelined)
            resident((IN_PAD, HIDDEN_PAD)),                     # w1 (BN-folded, f32)
            resident((1, HIDDEN_PAD)),                          # b1 (BN-folded)
            resident((HIDDEN_PAD, HIDDEN_PAD)),                 # w2 (bf16)
            resident((1, HIDDEN_PAD)),                          # b2
            resident((HIDDEN_PAD, HIDDEN_PAD)),                 # w3
            resident((1, HIDDEN_PAD)),                          # b3
            resident((HIDDEN_PAD, HIDDEN_PAD)),                 # w4
            resident((1, HIDDEN_PAD)),                          # b4
            resident((OUT_ROWS, HIDDEN_PAD)),                   # w5 row-major (bf16)
            pl.BlockSpec(memory_space=pltpu.MemorySpace.SMEM),  # b5 scalar
        ],
        out_specs=pl.BlockSpec((1, OUT_ROWS, tb), lambda i: (i, 0, 0)),
    )

    out = pl.pallas_call(
        functools.partial(_putnet_kernel, n_sub=n_sub),
        out_shape=jax.ShapeDtypeStruct((num_tiles, OUT_ROWS, tb), jnp.float32),
        grid_spec=grid_spec,
        compiler_params=pltpu.CompilerParams(
            dimension_semantics=("parallel",),   # shard batch tiles across TCs
            vmem_limit_bytes=48 << 20,           # > v5e's 16 MiB default, < v7x's 64 MiB
        ),
    )(xp, w1_eff, b1_eff,
      params["w2"], params["b2"],
      params["w3"], params["b3"],
      params["w4"], params["b4"],
      params["w5"], params["b5"])

    # Row 0 of each tile's compact (8, tb) slab holds the predictions.
    return out[:, 0, :].reshape(-1)[:B].reshape(B, OUT_FEATURES)


def _linear_params(key, fan_in, fan_out, pad_in, pad_out, dtype):
    # PyTorch nn.Linear default init: U(-1/sqrt(fan_in), +1/sqrt(fan_in)).
    kw, kb = jax.random.split(key)
    bound = 1.0 / jnp.sqrt(jnp.float32(fan_in))
    w = jax.random.uniform(kw, (fan_in, fan_out), jnp.float32, -bound, bound)
    b = jax.random.uniform(kb, (1, fan_out), jnp.float32, -bound, bound)
    # Padded rows/cols and bias lanes are zero, so ReLU keeps them at exactly 0.
    w = jnp.pad(w, ((0, pad_in - fan_in), (0, pad_out - fan_out))).astype(dtype)
    b = jnp.pad(b, ((0, 0), (0, pad_out - fan_out)))
    return w, b


def init_params(key):
    k1, k2, k3, k4, k5 = jax.random.split(key, 5)
    # w1 stays f32 (tiny) because the BatchNorm fold rescales it per forward call.
    w1, b1 = _linear_params(k1, IN_FEATURES, HIDDEN, IN_PAD, HIDDEN_PAD, jnp.float32)
    w2, b2 = _linear_params(k2, HIDDEN, HIDDEN, HIDDEN_PAD, HIDDEN_PAD, jnp.bfloat16)
    w3, b3 = _linear_params(k3, HIDDEN, HIDDEN, HIDDEN_PAD, HIDDEN_PAD, jnp.bfloat16)
    w4, b4 = _linear_params(k4, HIDDEN, HIDDEN, HIDDEN_PAD, HIDDEN_PAD, jnp.bfloat16)
    # Layer 5 stored row-major ((out, in), like PyTorch) padded to (8, 512) so
    # the kernel emits a lane-dense (8, tb) output directly; b5 is an SMEM scalar.
    kw5, kb5 = jax.random.split(k5)
    bound5 = 1.0 / jnp.sqrt(jnp.float32(HIDDEN))
    w5 = jax.random.uniform(kw5, (OUT_FEATURES, HIDDEN), jnp.float32, -bound5, bound5)
    b5 = jax.random.uniform(kb5, (1, 1), jnp.float32, -bound5, bound5)
    w5 = jnp.pad(w5, ((0, OUT_ROWS - OUT_FEATURES),
                      (0, HIDDEN_PAD - HIDDEN))).astype(jnp.bfloat16)
    return {
        "bn_gamma": jnp.ones((1, IN_FEATURES), jnp.float32),  # BatchNorm1d default weight
        "bn_beta": jnp.zeros((1, IN_FEATURES), jnp.float32),  # BatchNorm1d default bias
        "w1": w1, "b1": b1, "w2": w2, "b2": b2, "w3": w3, "b3": b3,
        "w4": w4, "b4": b4, "w5": w5, "b5": b5,
    }


def _reference_forward_bf16(x, p):
    """Pure-JAX reference using the same f32-layer-1 / bf16-operand /
    f32-accumulate matmul policy as the kernel (tight correctness check)."""
    xf = x.astype(jnp.float32)
    w1_eff, b1_eff = _fold_batchnorm(xf, p)
    xp = jnp.pad(xf, ((0, 0), (0, IN_PAD - IN_FEATURES)))

    def mm(a, w):
        return jnp.dot(a.astype(jnp.bfloat16), w, preferred_element_type=jnp.float32)

    h = jnp.maximum(jnp.dot(xp, w1_eff, preferred_element_type=jnp.float32) + b1_eff, 0.0)
    h = jnp.maximum(mm(h, p["w2"]) + p["b2"], 0.0)
    h = jnp.maximum(mm(h, p["w3"]) + p["b3"], 0.0)
    h = jnp.maximum(mm(h, p["w4"]) + p["b4"], 0.0)
    out = mm(h, p["w5"].T) + p["b5"][0, 0]
    return out[:, :OUT_FEATURES]


def _reference_forward_f32(x, p):
    """All-f32 reference of the original PutNet forward (loose check: only the
    intentional bf16 operand rounding separates the kernel from this)."""
    xf = x.astype(jnp.float32)
    mean = jnp.mean(xf, axis=0, keepdims=True)
    var = jnp.mean(jnp.square(xf - mean), axis=0, keepdims=True)
    h = (xf - mean) * jax.lax.rsqrt(var + BN_EPS) * p["bn_gamma"] + p["bn_beta"]
    h = jnp.pad(h, ((0, 0), (0, IN_PAD - IN_FEATURES)))
    h = jnp.maximum(h @ p["w1"] + p["b1"], 0.0)
    h = jnp.maximum(h @ p["w2"].astype(jnp.float32) + p["b2"], 0.0)
    h = jnp.maximum(h @ p["w3"].astype(jnp.float32) + p["b3"], 0.0)
    h = jnp.maximum(h @ p["w4"].astype(jnp.float32) + p["b4"], 0.0)
    out = h @ p["w5"].astype(jnp.float32).T + p["b5"][0, 0]
    return out[:, :OUT_FEATURES]


if __name__ == "__main__":
    key = jax.random.PRNGKey(0)
    k_params, k_x = jax.random.split(key)
    params = init_params(k_params)

    batch = 8
    x = jax.random.normal(k_x, (batch, IN_FEATURES), jnp.float32)

    out = jax.block_until_ready(putnet_forward(x, params))
    assert out.shape == (batch, OUT_FEATURES)

    # Tight check vs. a reference with an identical matmul-precision policy.
    ref = _reference_forward_bf16(x, params)
    assert jnp.allclose(out, ref, atol=5e-3, rtol=5e-3)

    # Loose check vs. the all-f32 PutNet forward (bf16 operand rounding only).
    ref32 = _reference_forward_f32(x, params)
    assert jnp.allclose(out, ref32, atol=1e-1, rtol=1e-1)

    print("KERNEL_OK")
</pallas_src>

<mosaic_0001>
module attributes {stable_mosaic.version = 11 : i64} {
  func.func @_putnet_kernel(%arg0: i32, %arg1: memref<256x8xf32, #tpu.memory_space<vmem>>, %arg2: memref<8x512xf32, #tpu.memory_space<vmem>>, %arg3: memref<1x512xf32, #tpu.memory_space<vmem>>, %arg4: memref<512x512xbf16, #tpu.memory_space<vmem>>, %arg5: memref<1x512xf32, #tpu.memory_space<vmem>>, %arg6: memref<512x512xbf16, #tpu.memory_space<vmem>>, %arg7: memref<1x512xf32, #tpu.memory_space<vmem>>, %arg8: memref<512x512xbf16, #tpu.memory_space<vmem>>, %arg9: memref<1x512xf32, #tpu.memory_space<vmem>>, %arg10: memref<8x512xbf16, #tpu.memory_space<vmem>>, %arg11: memref<1x1xf32, #tpu.memory_space<smem>>, %arg12: memref<1x8x256xf32, #tpu.memory_space<vmem>>) attributes {dimension_semantics = [#tpu.dimension_semantics<parallel>], iteration_bounds = array<i64: 2>, scalar_prefetch = 0 : i64, scratch_operands = 0 : i64, tpu.core_type = #tpu.core_type<tc>, window_params = [{transform_indices = @transform_0, window_bounds = array<i64: 256, 8>}, {pipeline_mode = #tpu.pipeline_mode<synchronous>, transform_indices = @transform_1, window_bounds = array<i64: 8, 512>}, {pipeline_mode = #tpu.pipeline_mode<synchronous>, transform_indices = @transform_2, window_bounds = array<i64: 1, 512>}, {pipeline_mode = #tpu.pipeline_mode<synchronous>, transform_indices = @transform_3, window_bounds = array<i64: 512, 512>}, {pipeline_mode = #tpu.pipeline_mode<synchronous>, transform_indices = @transform_4, window_bounds = array<i64: 1, 512>}, {pipeline_mode = #tpu.pipeline_mode<synchronous>, transform_indices = @transform_5, window_bounds = array<i64: 512, 512>}, {pipeline_mode = #tpu.pipeline_mode<synchronous>, transform_indices = @transform_6, window_bounds = array<i64: 1, 512>}, {pipeline_mode = #tpu.pipeline_mode<synchronous>, transform_indices = @transform_7, window_bounds = array<i64: 512, 512>}, {pipeline_mode = #tpu.pipeline_mode<synchronous>, transform_indices = @transform_8, window_bounds = array<i64: 1, 512>}, {pipeline_mode = #tpu.pipeline_mode<synchronous>, transform_indices = @transform_9, window_bounds = array<i64: 8, 512>}, {transform_indices = @transform_10, window_bounds = array<i64: 1, 1>}, {transform_indices = @transform_11, window_bounds = array<i64: 1, 8, 256>}]} {
    %c0 = arith.constant 0 : index
    %c0_0 = arith.constant 0 : index
    %0 = memref.load %arg11[%c0, %c0_0] : memref<1x1xf32, #tpu.memory_space<smem>>
    %c0_1 = arith.constant 0 : index
    %c0_2 = arith.constant 0 : index
    %1 = vector.load %arg1[%c0_1, %c0_2] : memref<256x8xf32, #tpu.memory_space<vmem>>, vector<256x8xf32>
    %c0_3 = arith.constant 0 : index
    %c0_4 = arith.constant 0 : index
    %2 = vector.load %arg2[%c0_3, %c0_4] : memref<8x512xf32, #tpu.memory_space<vmem>>, vector<8x512xf32>
    %cst = arith.constant dense<0.000000e+00> : vector<256x512xf32>
    %3 = tpu.matmul %1, %2, %cst {dimension_numbers = #tpu.dot_dimension_numbers<[1], [0], [0], [1], [0, 0, 1, 1], [], []>} : vector<256x8xf32>, vector<8x512xf32>, vector<256x512xf32> -> vector<256x512xf32>
    %c0_5 = arith.constant 0 : index
    %c0_6 = arith.constant 0 : index
    %4 = vector.load %arg3[%c0_5, %c0_6] : memref<1x512xf32, #tpu.memory_space<vmem>>, vector<1x512xf32>
    %5 = vector.broadcast %4 : vector<1x512xf32> to vector<256x512xf32>
    %6 = arith.addf %3, %5 : vector<256x512xf32>
    %cst_7 = arith.constant 0.000000e+00 : f32
    %7 = vector.broadcast %cst_7 : f32 to vector<256x512xf32>
    %8 = arith.maximumf %6, %7 : vector<256x512xf32>
    %9 = arith.truncf %8 : vector<256x512xf32> to vector<256x512xbf16>
    %c0_8 = arith.constant 0 : index
    %c0_9 = arith.constant 0 : index
    %10 = vector.load %arg4[%c0_8, %c0_9] : memref<512x512xbf16, #tpu.memory_space<vmem>>, vector<512x512xbf16>
    %cst_10 = arith.constant dense<0.000000e+00> : vector<256x512xf32>
    %11 = tpu.matmul %9, %10, %cst_10 {dimension_numbers = #tpu.dot_dimension_numbers<[1], [0], [0], [1], [0, 0, 1, 1], [], []>} : vector<256x512xbf16>, vector<512x512xbf16>, vector<256x512xf32> -> vector<256x512xf32>
    %c0_11 = arith.constant 0 : index
    %c0_12 = arith.constant 0 : index
    %12 = vector.load %arg5[%c0_11, %c0_12] : memref<1x512xf32, #tpu.memory_space<vmem>>, vector<1x512xf32>
    %13 = vector.broadcast %12 : vector<1x512xf32> to vector<256x512xf32>
    %14 = arith.addf %11, %13 : vector<256x512xf32>
    %cst_13 = arith.constant 0.000000e+00 : f32
    %15 = vector.broadcast %cst_13 : f32 to vector<256x512xf32>
    %16 = arith.maximumf %14, %15 : vector<256x512xf32>
    %17 = arith.truncf %16 : vector<256x512xf32> to vector<256x512xbf16>
    %c0_14 = arith.constant 0 : index
    %c0_15 = arith.constant 0 : index
    %18 = vector.load %arg6[%c0_14, %c0_15] : memref<512x512xbf16, #tpu.memory_space<vmem>>, vector<512x512xbf16>
    %cst_16 = arith.constant dense<0.000000e+00> : vector<256x512xf32>
    %19 = tpu.matmul %17, %18, %cst_16 {dimension_numbers = #tpu.dot_dimension_numbers<[1], [0], [0], [1], [0, 0, 1, 1], [], []>} : vector<256x512xbf16>, vector<512x512xbf16>, vector<256x512xf32> -> vector<256x512xf32>
    %c0_17 = arith.constant 0 : index
    %c0_18 = arith.constant 0 : index
    %20 = vector.load %arg7[%c0_17, %c0_18] : memref<1x512xf32, #tpu.memory_space<vmem>>, vector<1x512xf32>
    %21 = vector.broadcast %20 : vector<1x512xf32> to vector<256x512xf32>
    %22 = arith.addf %19, %21 : vector<256x512xf32>
    %cst_19 = arith.constant 0.000000e+00 : f32
    %23 = vector.broadcast %cst_19 : f32 to vector<256x512xf32>
    %24 = arith.maximumf %22, %23 : vector<256x512xf32>
    %25 = arith.truncf %24 : vector<256x512xf32> to vector<256x512xbf16>
    %c0_20 = arith.constant 0 : index
    %c0_21 = arith.constant 0 : index
    %26 = vector.load %arg8[%c0_20, %c0_21] : memref<512x512xbf16, #tpu.memory_space<vmem>>, vector<512x512xbf16>
    %cst_22 = arith.constant dense<0.000000e+00> : vector<256x512xf32>
    %27 = tpu.matmul %25, %26, %cst_22 {dimension_numbers = #tpu.dot_dimension_numbers<[1], [0], [0], [1], [0, 0, 1, 1], [], []>} : vector<256x512xbf16>, vector<512x512xbf16>, vector<256x512xf32> -> vector<256x512xf32>
    %c0_23 = arith.constant 0 : index
    %c0_24 = arith.constant 0 : index
    %28 = vector.load %arg9[%c0_23, %c0_24] : memref<1x512xf32, #tpu.memory_space<vmem>>, vector<1x512xf32>
    %29 = vector.broadcast %28 : vector<1x512xf32> to vector<256x512xf32>
    %30 = arith.addf %27, %29 : vector<256x512xf32>
    %cst_25 = arith.constant 0.000000e+00 : f32
    %31 = vector.broadcast %cst_25 : f32 to vector<256x512xf32>
    %32 = arith.maximumf %30, %31 : vector<256x512xf32>
    %c0_26 = arith.constant 0 : index
    %c0_27 = arith.constant 0 : index
    %33 = vector.load %arg10[%c0_26, %c0_27] : memref<8x512xbf16, #tpu.memory_space<vmem>>, vector<8x512xbf16>
    %34 = arith.truncf %32 : vector<256x512xf32> to vector<256x512xbf16>
    %cst_28 = arith.constant dense<0.000000e+00> : vector<8x256xf32>
    %35 = tpu.matmul %33, %34, %cst_28 {dimension_numbers = #tpu.dot_dimension_numbers<[1], [1], [0], [0], [0, 0, 1, 0], [], []>} : vector<8x512xbf16>, vector<256x512xbf16>, vector<8x256xf32> -> vector<8x256xf32>
    %36 = vector.broadcast %0 : f32 to vector<8x256xf32>
    %37 = arith.addf %35, %36 : vector<8x256xf32>
    %c0_29 = arith.constant 0 : index
    %c0_30 = arith.constant 0 : index
    %c0_31 = arith.constant 0 : index
    %38 = vector.load %arg12[%c0_29, %c0_30, %c0_31] : memref<1x8x256xf32, #tpu.memory_space<vmem>>, vector<1x8x256xf32>
    %39 = vector.shape_cast %38 : vector<1x8x256xf32> to vector<8x256xf32>
    %40 = vector.shape_cast %37 : vector<8x256xf32> to vector<1x8x256xf32>
    tpu.vector_store %arg12[%c0_29, %c0_30, %c0_31], %40 {strides = array<i32>} : memref<1x8x256xf32, #tpu.memory_space<vmem>>, vector<1x8x256xf32>,
    return
  }
  func.func @transform_0(%arg0: i32) -> (i32, i32) {
    %c0_i32 = arith.constant 0 : i32
    %c0_i32_0 = arith.constant 0 : i32
    return %arg0, %c0_i32 : i32, i32
  }
  func.func @transform_1(%arg0: i32) -> (i32, i32) {
    %c0_i32 = arith.constant 0 : i32
    %c0_i32_0 = arith.constant 0 : i32
    %c0_i32_1 = arith.constant 0 : i32
    return %c0_i32, %c0_i32_0 : i32, i32
  }
  func.func @transform_2(%arg0: i32) -> (i32, i32) {
    %c0_i32 = arith.constant 0 : i32
    %c0_i32_0 = arith.constant 0 : i32
    %c0_i32_1 = arith.constant 0 : i32
    return %c0_i32, %c0_i32_0 : i32, i32
  }
  func.func @transform_3(%arg0: i32) -> (i32, i32) {
    %c0_i32 = arith.constant 0 : i32
    %c0_i32_0 = arith.constant 0 : i32
    %c0_i32_1 = arith.constant 0 : i32
    return %c0_i32, %c0_i32_0 : i32, i32
  }
  func.func @transform_4(%arg0: i32) -> (i32, i32) {
    %c0_i32 = arith.constant 0 : i32
    %c0_i32_0 = arith.constant 0 : i32
    %c0_i32_1 = arith.constant 0 : i32
    return %c0_i32, %c0_i32_0 : i32, i32
  }
  func.func @transform_5(%arg0: i32) -> (i32, i32) {
    %c0_i32 = arith.constant 0 : i32
    %c0_i32_0 = arith.constant 0 : i32
    %c0_i32_1 = arith.constant 0 : i32
    return %c0_i32, %c0_i32_0 : i32, i32
  }
  func.func @transform_6(%arg0: i32) -> (i32, i32) {
    %c0_i32 = arith.constant 0 : i32
    %c0_i32_0 = arith.constant 0 : i32
    %c0_i32_1 = arith.constant 0 : i32
    return %c0_i32, %c0_i32_0 : i32, i32
  }
  func.func @transform_7(%arg0: i32) -> (i32, i32) {
    %c0_i32 = arith.constant 0 : i32
    %c0_i32_0 = arith.constant 0 : i32
    %c0_i32_1 = arith.constant 0 : i32
    return %c0_i32, %c0_i32_0 : i32, i32
  }
  func.func @transform_8(%arg0: i32) -> (i32, i32) {
    %c0_i32 = arith.constant 0 : i32
    %c0_i32_0 = arith.constant 0 : i32
    %c0_i32_1 = arith.constant 0 : i32
    return %c0_i32, %c0_i32_0 : i32, i32
  }
  func.func @transform_9(%arg0: i32) -> (i32, i32) {
    %c0_i32 = arith.constant 0 : i32
    %c0_i32_0 = arith.constant 0 : i32
    %c0_i32_1 = arith.constant 0 : i32
    return %c0_i32, %c0_i32_0 : i32, i32
  }
  func.func @transform_10(%arg0: i32) -> (i32, i32) {
    %c0_i32 = arith.constant 0 : i32
    %c0_i32_0 = arith.constant 0 : i32
    %c0_i32_1 = arith.constant 0 : i32
    return %c0_i32, %c0_i32_0 : i32, i32
  }
  func.func @transform_11(%arg0: i32) -> (i32, i32, i32) {
    %c0_i32 = arith.constant 0 : i32
    %c0_i32_0 = arith.constant 0 : i32
    %c0_i32_1 = arith.constant 0 : i32
    return %arg0, %c0_i32, %c0_i32_0 : i32, i32, i32
  }
}

</mosaic_0001>

<bundles_post_ra>
// kernel: tpu_custom_call.1
= control target key start
LH: loop header
LB: loop body
LE: loop exit
PB: predicated region body
PF: predicated region fallthrough
CT: control target
= control target key end

     0   :  { %s13348_s0 = inlined_call_operand.vmem [shape: f32[512,8], index: 0, kind: input, shape index: {}]   ;;  %s13349_s1 = inlined_call_operand.vmem [shape: f32[8,512], index: 1, kind: input, shape index: {}]   ;;  %s13350_s2 = inlined_call_operand.vmem [shape: f32[1,512], index: 2, kind: input, shape index: {}]   ;;  %s13351_s3 = inlined_call_operand.hbm [shape: bf16[512,512], index: 3, kind: input, shape index: {}]   ;;  %s13352_s4 = inlined_call_operand.vmem [shape: f32[1,512], index: 4, kind: input, shape index: {}]   ;;  %s13353_s5 = inlined_call_operand.hbm [shape: bf16[512,512], index: 5, kind: input, shape index: {}]   ;;  %s13354_s6 = inlined_call_operand.vmem [shape: f32[1,512], index: 6, kind: input, shape index: {}]   ;;  %s13355_s7 = inlined_call_operand.hbm [shape: bf16[512,512], index: 7, kind: input, shape index: {}]   ;;  %s13356_s8 = inlined_call_operand.vmem [shape: f32[1,512], index: 8, kind: input, shape index: {}]   ;;  %s13357_s9 = inlined_call_operand.vmem [shape: bf16[8,512], index: 9, kind: input, shape index: {}]   ;;  %s13358_s10 = inlined_call_operand.<no memory space> [shape: f32[1,1], index: 10, kind: input, shape index: {}]   ;;  %s13359_s11 = inlined_call_operand.hbm [shape: f32[2,8,256], index: 11, kind: output, shape index: {}]  }
   0x1   :  { %13608 = sst [smem:[#allocation88_spill]] %s13351_s3 }
   0x2   :  { %13609 = sst [smem:[#allocation89_spill]] %s13353_s5 }
   0x3   :  { %16 = sst [smem:[#allocation2]] %s13358_s10 }
   0x4   :  { %17 = vsyncpa [#allocation4], 0 }
   0x5   :  { %18 = vsyncpa [#allocation7], 0 }
   0x6   :  { %19 = vsyncpa [#allocation5], 0 }
   0x7   :  { %21 = vsyncpa [#allocation5 + $0x1], 0  ;;  %s11011_s19 = smov 0   ;;  %s11013_s20 = smov 0  }
   0x8   :  { %s11015_s21 = smov 0   ;;  %s11017_s22 = smov 0  }
   0x9 LB: > { %13610 = sst [smem:[#allocation13_spill]] %s10937_s21  ;;  %s11032_s10 = sadd.s32 4294967295, %s10941_s22   ;;  %s10941_s22 = sphi %s11017_s22, %s14159_s22   ;;  %s10937_s21 = sphi %s11015_s21, %s14156_s21   ;;  %s10933_s20 = sphi %s11013_s20, %s14158_s20   ;;  %s10929_s19 = sphi %s11011_s19, %s14157_s19  }
   0xa   : > { %s8638_s23 = sadd.s32 4294967294, %s10941_s22   ;;  %s11036_s24 = sadd.s32 1, %s10941_s22  }
   0xb   : > { %s270_s25 = sadd.s32 1, %s10937_s21  ;;  %s267_s26 = ssub.s32 %s10941_s22, %s11036_s24 }
   0xc   : > { %p280_p0 = scmp.ne.s32.totalorder %s10937_s21, %s10933_s20  ;;  %p268_p1 = scmp.eq.s32.totalorder %s267_s26, 0 }
   0xd   : > { %p281_p2 = scmp.eq.s32.totalorder %s11032_s10, 1  ;;  %p286_p3 = scmp.ne.s32.totalorder %s10933_s20, %s10929_s19 }
   0xe   : > { %p287_p4 = scmp.eq.s32.totalorder %s8638_s23, 1  ;;  %p8639_p7 = scmp.ge.s32.totalorder %s10941_s22, 1 }
   0xf   : > { %s11047_s27 = scalar_select %p268_p1, %s10937_s21, %s270_s25  }
  0x10   : > { %p11049_p5 = por %p281_p2, %p280_p0  ;;  %p11053_p6 = por %p287_p4, %p286_p3 }
  0x11   : > { %13611 = sst [smem:[#allocation14_spill]] %s11047_s27  ;;  %p294_p8 = scmp.lt.s32.totalorder %s10941_s22, 3 }
  0x12   : > { %p10733_p9 = scmp.eq.s32.totalorder %s11032_s10, 0  ;;  %s13615_s5 = sld [smem:[#allocation89_spill]] }
  0x13   : > { %p11060_p10 = pnand %p8639_p7, %p294_p8  ;;  %s13616_s3 = sld [smem:[#allocation88_spill]] }
  0x14   : > { %s10943_s23 = smov [#allocation6]   ;;  %s10944_s26 = smov 256  }
  0x15   : > { %p10719_p11 = pneg %p11060_p10  ;;  %s330_s25 = sshll.u32 %s10943_s23, 4  ;;  %s331_s25 = int_to_ptr.vmem [resolvable:$true] %s330_s25 }
  0x16   : > { %s10945_s12 = smov 16   ;;  %s10946_s13 = smov [#allocation3]  }
  0x17   : > { %p11074_p12 = pnand %p10733_p9, %p10719_p11  ;;  %s10947_s27 = smov [#allocation8]  }
  0x18   : > { %s328_s14 = sshll.u32 %s13615_s5, 4  ;;  %s313_s5 = sshll.u32 %s10946_s13, 4  ;;  %s329_s14 = int_to_ptr.hbm [resolvable:$true] %s328_s14  ;;  %s314_s5 = int_to_ptr.vmem [resolvable:$true] %s313_s5 }
  0x19   : > { %s311_s17 = sshll.u32 %s13616_s3, 4  ;;  %s345_s3 = sshll.u32 %s13355_s7, 4  ;;  %s312_s17 = int_to_ptr.hbm [resolvable:$true] %s311_s17  ;;  %s346_s3 = int_to_ptr.hbm [resolvable:$true] %s345_s3 }
  0x1a   : > { %10725 = dma.hbm_to_vmem [thread:$0]  (!%p11074_p12), %s329_s14, 16384, %s331_s25, [#allocation7], %s10944_s26, %s10944_s26, %s10945_s12  }
  0x1b   : > { %10722 = dma.hbm_to_vmem [thread:$0]  (!%p11074_p12), %s312_s17, 16384, %s314_s5, [#allocation4], %s10944_s26, %s10944_s26, %s10945_s12  }
  0x1c   : > { %s347_s21 = sshll.u32 %s10947_s27, 4  ;;  %381 = sbr.rel (%p11060_p10) target bundleno = 3707 (0xe7b), region = 64  ;;  %s348_s21 = int_to_ptr.vmem [resolvable:$true] %s347_s21 }
  0x1d   : > { %10728 = dma.hbm_to_vmem [thread:$0]  (!%p11074_p12), %s346_s3, 16384, %s348_s21, [#allocation7], %s10944_s26, %s10944_s26, %s10945_s12  }
  0x21   : > { %10916 = dma.done.wait (%p10733_p9), [#allocation4], 16384  }
  0x22   : > { %10918 = vsyncadd (%p10733_p9), [#allocation4], 4294950912 }
  0x23   : > { %10920 = dma.done.wait (%p10733_p9), [#allocation7], 32768  }
  0x24   : > { %10922 = vsyncadd (%p10733_p9), [#allocation7], 4294934528  ;;  %s8649_s5 = sshll.u32 %s11032_s10, 5  ;;  %v471_v0 = vld [vmem:[%s13349_s1] sm:$0xff]  ;;  %v472_v1 = vld [vmem:[%s13349_s1 + $0x8] sm:$0xff]  ;;  %vm485_vm0 = vcmask 64512  }
  0x25   : > { %p433_p13 = scmp.lt.s32.totalorder %s8649_s5, 63  ;;  %v473_v2 = vld [vmem:[%s13349_s1 + $0x10] sm:$0xff]  ;;  %597 = vmatpush.msra.mxu0 %v471_v0  ;;  %710 = vmatpush.msra.mxu1 %v472_v1  ;;  %v474_v3 = vld [vmem:[%s13349_s1 + $0x18] sm:$0xff]  ;;  %v9149_v11 = vld [vmem:[#allocation3 + $0x2e0] sm:$0xf]  ;;  %s438_s27 = sld [smem:[#allocation2]] }
  0x26   : > { %823 = vmatpush.msra.mxu2 %v473_v2  ;;  %936 = vmatpush.msra.mxu3 %v474_v3  ;;  %v10414_v12 = vld [vmem:[#allocation3 + $0x2ec] sm:$0xf0]  ;;  %v8893_v13 = vld [vmem:[#allocation3 + $0xe0] sm:$0xf]  ;;  %s10704_s18 = sshll.u32 %s11032_s10, 4  ;;  %s10891_s21 = scalar_lea.hbm %s13359_s11, 32 }
  0x27   : > { %s14161_s5 = smov (!%p433_p13, %s8649_s5), 63  ;;  %v9150_v14 = vor.u32 %v10414_v12, %v9149_v11  ;;  %v10350_v15 = vld [vmem:[#allocation3 + $0xec] sm:$0xf0]  ;;  %v9277_v16 = vld [vmem:[#allocation3 + $0x3e0] sm:$0xf]  ;;  %s8543_s26 = scalar_lea.hbm %s13359_s11, %s10704_s18 }
  0x28   : > { %s8650_s3 = sshll.u32 %s14161_s5, 3  ;;  %v10446_v17 = vld [vmem:[#allocation3 + $0x3ec] sm:$0xf0]  ;;  %v8894_v18 = vor.u32 %v10350_v15, %v8893_v13  ;;  %v9021_v20 = vld [vmem:[#allocation3 + $0x1e0] sm:$0xf]  ;;  %s8547_s13 = sshll.u32 %s8543_s26, 4  ;;  %s8548_s13 = int_to_ptr.hbm [resolvable:$true] %s8547_s13 }
  0x29   : > { %s11101_s30 = scalar_lea.vmem %s13348_s0, %s8650_s3  ;;  %v9278_v19 = vor.u32 %v10446_v17, %v9277_v16  ;;  %v10382_v21 = vld [vmem:[#allocation3 + $0x1ec] sm:$0xf0]  ;;  %2182 = vmatpush.bf16.msrb.mxu2 %v9150_v14  ;;  %v9133_v27 = vld [vmem:[#allocation3 + $0x2c0] sm:$0xf]  ;;  %s10885_s16 = sshra.s32 %s8548_s13, 4  ;;  %s10886_s16 = int_to_ptr.hbm [resolvable:$true] %s10885_s16 }
  0x2a   : > { %v439_v4 = vld [vmem:[%s11101_s30] sm:$0xff]  ;;  %v440_v5 = vld [vmem:[%s11101_s30 + $0x8] sm:$0xff]  ;;  %v441_v6 = vld [vmem:[%s11101_s30 + $0x10] sm:$0xff]  ;;  %v9022_v22 = vor.u32 %v10382_v21, %v9021_v20  ;;  %2004 = vmatpush.bf16.msrb.mxu0 %v8894_v18  ;;  %s10887_s5 = scalar_lea.hbm %s10886_s16, 16  ;;  %p10892_p3 = scmp.lt.s32.totalorder %s10886_s16, %s13359_s11 }
  0x2b   : > { %8651 = vmatmul.msk.f32.vlgmr.msra.gmra.mxu0 %vm485_vm0, %v439_v4  ;;  %8683 = vmatmul.msk.f32.vlgmr.msra.gmra.mxu1 %vm485_vm0, %v439_v4  ;;  %v442_v7 = vld [vmem:[%s11101_s30 + $0x18] sm:$0xff]  ;;  %v443_v8 = vld [vmem:[%s11101_s30 + $0x20] sm:$0xff]  ;;  %v444_v9 = vld [vmem:[%s11101_s30 + $0x28] sm:$0xff]  ;;  %p10888_p0 = scmp.ne.s32.totalorder %s10886_s16, %s10887_s5  ;;  %p10893_p4 = scmp.lt.s32.totalorder %s10891_s21, %s10887_s5 }
  0x2c   : > { %8715 = vmatmul.msk.f32.vlgmr.msra.gmra.mxu2 %vm485_vm0, %v439_v4  ;;  %8747 = vmatmul.msk.f32.vlgmr.msra.gmra.mxu3 %vm485_vm0, %v439_v4  ;;  %v445_v10 = vld [vmem:[%s11101_s30 + $0x30] sm:$0xff]  ;;  %v446_v23 = vld [vmem:[%s11101_s30 + $0x38] sm:$0xff]  ;;  %v447_v24 = vld [vmem:[%s11101_s30 + $0x40] sm:$0xff] }
  0x2d   : > { %2271 = vmatpush.bf16.msrb.mxu3 %v9278_v19  ;;  %2093 = vmatpush.bf16.msrb.mxu1 %v9022_v22  ;;  %v448_v25 = vld [vmem:[%s11101_s30 + $0x48] sm:$0xff]  ;;  %v449_v26 = vld [vmem:[%s11101_s30 + $0x50] sm:$0xff]  ;;  %v8877_v29 = vld [vmem:[#allocation3 + $0xc0] sm:$0xf]  ;;  %p10889_p1 = pnand %p10888_p0, %p11049_p5  ;;  %p10894_p7 = por %p10893_p4, %p10892_p3 }
  0x2e   : > { %v10410_v28 = vld [vmem:[#allocation3 + $0x2cc] sm:$0xf0]  ;;  %v9261_v32 = vld [vmem:[#allocation3 + $0x3c0] sm:$0xf]  ;;  %v450_v39 = vld [vmem:[%s11101_s30 + $0x58] sm:$0xff] }
  0x2f   : > { %v9134_v30 = vor.u32 %v10410_v28, %v9133_v27  ;;  %v10346_v31 = vld [vmem:[#allocation3 + $0xcc] sm:$0xf0]  ;;  %v9005_v36 = vld [vmem:[#allocation3 + $0x1c0] sm:$0xf]  ;;  %v452_v41 = vld [vmem:[%s11101_s30 + $0x68] sm:$0xff]  ;;  %p10890_p2 = pneg %p10889_p1 }
  0x30   : > { %v10442_v33 = vld [vmem:[#allocation3 + $0x3cc] sm:$0xf0]  ;;  %v8878_v34 = vor.u32 %v10346_v31, %v8877_v29  ;;  %v451_v40 = vld [vmem:[%s11101_s30 + $0x60] sm:$0xff]  ;;  %v454_v46 = vld [vmem:[%s11101_s30 + $0x78] sm:$0xff] }
  0x31   : > { %v9262_v35 = vor.u32 %v10442_v33, %v9261_v32  ;;  %v10378_v37 = vld [vmem:[#allocation3 + $0x1cc] sm:$0xf0]  ;;  %2183 = vmatpush.bf16.msrb.mxu2 %v9134_v30  ;;  %v9117_v43 = vld [vmem:[#allocation3 + $0x2a0] sm:$0xf]  ;;  %v456_v63 = vld [vmem:[%s11101_s30 + $0x88] sm:$0xff]  ;;  %p10895_p8 = pnand %p10894_p7, %p10890_p2 }
  0x32   : > { %v9006_v38 = vor.u32 %v10378_v37, %v9005_v36  ;;  %2005 = vmatpush.bf16.msrb.mxu0 %v8878_v34  ;;  %v453_v42 = vld [vmem:[%s11101_s30 + $0x70] sm:$0xff]  ;;  %v8861_v47 = vld [vmem:[#allocation3 + $0xa0] sm:$0xf] }
  0x33   : > { %8652 = vmatmul.msk.f32.gmra.mxu0 %vm485_vm0, %v440_v5  ;;  %8684 = vmatmul.msk.f32.gmra.mxu1 %vm485_vm0, %v440_v5  ;;  %v10406_v44 = vld [vmem:[#allocation3 + $0x2ac] sm:$0xf0]  ;;  %v9245_v49 = vld [vmem:[#allocation3 + $0x3a0] sm:$0xf] }
  0x34   : > { %8716 = vmatmul.msk.f32.gmra.mxu2 %vm485_vm0, %v440_v5  ;;  %8748 = vmatmul.msk.f32.gmra.mxu3 %vm485_vm0, %v440_v5  ;;  %v9118_v45 = vor.u32 %v10406_v44, %v9117_v43  ;;  %v10342_v48 = vld [vmem:[#allocation3 + $0xac] sm:$0xf0]  ;;  %v8989_v53 = vld [vmem:[#allocation3 + $0x1a0] sm:$0xf] }
  0x35   : > { %2272 = vmatpush.bf16.msrb.mxu3 %v9262_v35  ;;  %2094 = vmatpush.bf16.msrb.mxu1 %v9006_v38  ;;  %v8862_v50 = vor.u32 %v10342_v48, %v8861_v47  ;;  %v10438_v51 = vld [vmem:[#allocation3 + $0x3ac] sm:$0xf0]  ;;  %v455_v58 = vld [vmem:[%s11101_s30 + $0x80] sm:$0xff] }
  0x36   : > { %2184 = vmatpush.bf16.msrb.mxu2 %v9118_v45  ;;  %v9246_v52 = vor.u32 %v10438_v51, %v9245_v49  ;;  %v10374_v54 = vld [vmem:[#allocation3 + $0x1ac] sm:$0xf0]  ;;  %v11212_v0 = vld [vmem:[%s13350_s2] sm:$0xf] }
  0x37   : > { %2006 = vmatpush.bf16.msrb.mxu0 %v8862_v50  ;;  %v8990_v55 = vor.u32 %v10374_v54, %v8989_v53  ;;  %v11215_v1 = vperm.slane %v11212_v0, 2  ;;  %v11218_v2 = vperm.slane %v11212_v0, 3  ;;  %v457_v11 = vld [vmem:[%s11101_s30 + $0x90] sm:$0xff]  ;;  %v9101_v18 = vld [vmem:[#allocation3 + $0x280] sm:$0xf]  ;;  %v460_v54 = vld [vmem:[%s11101_s30 + $0xa8] sm:$0xff] }
  0x38   : > { %v10402_v19 = vld [vmem:[#allocation3 + $0x28c] sm:$0xf0]  ;;  %v9229_v29 = vld [vmem:[#allocation3 + $0x380] sm:$0xf] }
  0x39   : > { %2273 = vmatpush.bf16.msrb.mxu3 %v9246_v52  ;;  %2095 = vmatpush.bf16.msrb.mxu1 %v8990_v55  ;;  %v9102_v20 = vor.u32 %v10402_v19, %v9101_v18  ;;  %v10338_v27 = vld [vmem:[#allocation3 + $0x8c] sm:$0xf0]  ;;  %v8973_v32 = vld [vmem:[#allocation3 + $0x180] sm:$0xf] }
  0x3a   : > { %v10434_v30 = vld [vmem:[#allocation3 + $0x38c] sm:$0xf0]  ;;  %v459_v43 = vld [vmem:[%s11101_s30 + $0xa0] sm:$0xff] }
  0x3b   : > { %8653 = vmatmul.msk.f32.gmra.mxu0 %vm485_vm0, %v441_v6  ;;  %8685 = vmatmul.msk.f32.gmra.mxu1 %vm485_vm0, %v441_v6  ;;  %v9230_v31 = vor.u32 %v10434_v30, %v9229_v29  ;;  %v10370_v33 = vld [vmem:[#allocation3 + $0x18c] sm:$0xf0]  ;;  %v9213_v30 = vld [vmem:[#allocation3 + $0x360] sm:$0xf] }
  0x3c   : > { %8717 = vmatmul.msk.f32.gmra.mxu2 %vm485_vm0, %v441_v6  ;;  %8749 = vmatmul.msk.f32.gmra.mxu3 %vm485_vm0, %v441_v6  ;;  %v8974_v36 = vor.u32 %v10370_v33, %v8973_v32  ;;  %v10398_v18 = vld [vmem:[#allocation3 + $0x26c] sm:$0xf0]  ;;  %v8957_v33 = vld [vmem:[#allocation3 + $0x160] sm:$0xf] }
  0x3d   : > { %2185 = vmatpush.bf16.msrb.mxu2 %v9102_v20  ;;  %2274 = vmatpush.bf16.msrb.mxu3 %v9230_v31  ;;  %v10430_v31 = vld [vmem:[#allocation3 + $0x36c] sm:$0xf0] }
  0x3e   : > { %2096 = vmatpush.bf16.msrb.mxu1 %v8974_v36  ;;  %v9214_v32 = vor.u32 %v10430_v31, %v9213_v30 }
  0x41   : > { %2275 = vmatpush.bf16.msrb.mxu3 %v9214_v32 }
  0x43   : > { %8654 = vmatmul.msk.f32.gmra.mxu0 %vm485_vm0, %v442_v7  ;;  %8686 = vmatmul.msk.f32.gmra.mxu1 %vm485_vm0, %v442_v7 }
  0x44   : > { %8718 = vmatmul.msk.f32.gmra.mxu2 %vm485_vm0, %v442_v7  ;;  %8750 = vmatmul.msk.f32.gmra.mxu3 %vm485_vm0, %v442_v7 }
  0x4b   : > { %8655 = vmatmul.msk.f32.gmra.mxu0 %vm485_vm0, %v443_v8  ;;  %8687 = vmatmul.msk.f32.gmra.mxu1 %vm485_vm0, %v443_v8 }
  0x4c   : > { %8719 = vmatmul.msk.f32.gmra.mxu2 %vm485_vm0, %v443_v8  ;;  %8751 = vmatmul.msk.f32.gmra.mxu3 %vm485_vm0, %v443_v8 }
  0x53   : > { %8656 = vmatmul.msk.f32.gmra.mxu0 %vm485_vm0, %v444_v9  ;;  %8688 = vmatmul.msk.f32.gmra.mxu1 %vm485_vm0, %v444_v9 }
  0x54   : > { %8720 = vmatmul.msk.f32.gmra.mxu2 %vm485_vm0, %v444_v9  ;;  %8752 = vmatmul.msk.f32.gmra.mxu3 %vm485_vm0, %v444_v9 }
  0x5b   : > { %8657 = vmatmul.msk.f32.gmra.mxu0 %vm485_vm0, %v445_v10  ;;  %8689 = vmatmul.msk.f32.gmra.mxu1 %vm485_vm0, %v445_v10 }
  0x5c   : > { %8721 = vmatmul.msk.f32.gmra.mxu2 %vm485_vm0, %v445_v10  ;;  %8753 = vmatmul.msk.f32.gmra.mxu3 %vm485_vm0, %v445_v10 }
  0x63   : > { %8658 = vmatmul.msk.f32.gmra.mxu0 %vm485_vm0, %v446_v23  ;;  %8690 = vmatmul.msk.f32.gmra.mxu1 %vm485_vm0, %v446_v23 }
  0x64   : > { %8722 = vmatmul.msk.f32.gmra.mxu2 %vm485_vm0, %v446_v23  ;;  %8754 = vmatmul.msk.f32.gmra.mxu3 %vm485_vm0, %v446_v23 }
  0x6b   : > { %8659 = vmatmul.msk.f32.gmra.mxu0 %vm485_vm0, %v447_v24  ;;  %8691 = vmatmul.msk.f32.gmra.mxu1 %vm485_vm0, %v447_v24 }
  0x6c   : > { %8723 = vmatmul.msk.f32.gmra.mxu2 %vm485_vm0, %v447_v24  ;;  %8755 = vmatmul.msk.f32.gmra.mxu3 %vm485_vm0, %v447_v24 }
  0x73   : > { %8660 = vmatmul.msk.f32.gmra.mxu0 %vm485_vm0, %v448_v25  ;;  %8692 = vmatmul.msk.f32.gmra.mxu1 %vm485_vm0, %v448_v25 }
  0x74   : > { %8724 = vmatmul.msk.f32.gmra.mxu2 %vm485_vm0, %v448_v25  ;;  %8756 = vmatmul.msk.f32.gmra.mxu3 %vm485_vm0, %v448_v25  ;;  %v458_v25 = vld [vmem:[%s11101_s30 + $0x98] sm:$0xff] }
  0x7b   : > { %8661 = vmatmul.msk.f32.gmra.mxu0 %vm485_vm0, %v449_v26  ;;  %8693 = vmatmul.msk.f32.gmra.mxu1 %vm485_vm0, %v449_v26 }
  0x7c   : > { %8725 = vmatmul.msk.f32.gmra.mxu2 %vm485_vm0, %v449_v26  ;;  %8757 = vmatmul.msk.f32.gmra.mxu3 %vm485_vm0, %v449_v26  ;;  %v8845_v26 = vld [vmem:[#allocation3 + $0x80] sm:$0xf] }
  0x7d   : > { %v8846_v28 = vor.u32 %v10338_v27, %v8845_v26  ;;  %v462_v26 = vld [vmem:[%s11101_s30 + $0xb8] sm:$0xff]  ;;  %v8829_v27 = vld [vmem:[#allocation3 + $0x60] sm:$0xf] }
  0x7f   : > { %2007 = vmatpush.bf16.msrb.mxu0 %v8846_v28  ;;  %v10334_v28 = vld [vmem:[#allocation3 + $0x6c] sm:$0xf0] }
  0x80   : > { %v8830_v29 = vor.u32 %v10334_v28, %v8829_v27 }
  0x83   : > { %8662 = vmatmul.msk.f32.gmra.mxu0 %vm485_vm0, %v450_v39  ;;  %8694 = vmatmul.msk.f32.gmra.mxu1 %vm485_vm0, %v450_v39 }
  0x84   : > { %8726 = vmatmul.msk.f32.gmra.mxu2 %vm485_vm0, %v450_v39  ;;  %8758 = vmatmul.msk.f32.gmra.mxu3 %vm485_vm0, %v450_v39 }
  0x85   : > { %2008 = vmatpush.bf16.msrb.mxu0 %v8830_v29 }
  0x8b   : > { %8663 = vmatmul.msk.f32.gmra.mxu0 %vm485_vm0, %v451_v40  ;;  %8695 = vmatmul.msk.f32.gmra.mxu1 %vm485_vm0, %v451_v40 }
  0x8c   : > { %8727 = vmatmul.msk.f32.gmra.mxu2 %vm485_vm0, %v451_v40  ;;  %8759 = vmatmul.msk.f32.gmra.mxu3 %vm485_vm0, %v451_v40 }
  0x93   : > { %8664 = vmatmul.msk.f32.gmra.mxu0 %vm485_vm0, %v452_v41  ;;  %8696 = vmatmul.msk.f32.gmra.mxu1 %vm485_vm0, %v452_v41 }
  0x94   : > { %8728 = vmatmul.msk.f32.gmra.mxu2 %vm485_vm0, %v452_v41  ;;  %8760 = vmatmul.msk.f32.gmra.mxu3 %vm485_vm0, %v452_v41 }
  0x9b   : > { %8665 = vmatmul.msk.f32.gmra.mxu0 %vm485_vm0, %v453_v42  ;;  %8697 = vmatmul.msk.f32.gmra.mxu1 %vm485_vm0, %v453_v42 }
  0x9c   : > { %8729 = vmatmul.msk.f32.gmra.mxu2 %vm485_vm0, %v453_v42  ;;  %8761 = vmatmul.msk.f32.gmra.mxu3 %vm485_vm0, %v453_v42 }
  0xa3   : > { %8666 = vmatmul.msk.f32.gmra.mxu0 %vm485_vm0, %v454_v46  ;;  %8698 = vmatmul.msk.f32.gmra.mxu1 %vm485_vm0, %v454_v46 }
  0xa4   : > { %8730 = vmatmul.msk.f32.gmra.mxu2 %vm485_vm0, %v454_v46  ;;  %8762 = vmatmul.msk.f32.gmra.mxu3 %vm485_vm0, %v454_v46 }
  0xa8   : > { %v11195_v56 = vpop.f32.mrf.mxu0  ;;  %v11197_v57 = vpop.f32.mrf.mxu1 }
  0xab   : > { %8667 = vmatmul.msk.f32.gmra.mxu0 %vm485_vm0, %v455_v58  ;;  %8699 = vmatmul.msk.f32.gmra.mxu1 %vm485_vm0, %v455_v58 }
  0xac   : > { %8731 = vmatmul.msk.f32.gmra.mxu2 %vm485_vm0, %v455_v58  ;;  %8763 = vmatmul.msk.f32.gmra.mxu3 %vm485_vm0, %v455_v58 }
  0xaf   : > { %v825_v59 = vpop.f32.mrf.mxu2  ;;  %v938_v60 = vpop.f32.mrf.mxu3 }
  0xb0   : > { %v11204_v61 = vpop.f32.mrf.mxu0  ;;  %v11206_v62 = vpop.f32.mrf.mxu1  ;;  %v826_v3 = vadd.f32 %v825_v59, %v11215_v1  ;;  %v939_v4 = vadd.f32 %v938_v60, %v11218_v2 }
  0xb2   : > { %v1036_v12 = vmax.f32 %v826_v3, 0.0  ;;  %v1037_v13 = vmax.f32 %v939_v4, 0.0 }
  0xb3   : > { %8668 = vmatmul.msk.f32.gmra.mxu0 %vm485_vm0, %v456_v63  ;;  %8700 = vmatmul.msk.f32.gmra.mxu1 %vm485_vm0, %v456_v63 }
  0xb4   : > { %8732 = vmatmul.msk.f32.gmra.mxu2 %vm485_vm0, %v456_v63  ;;  %8764 = vmatmul.msk.f32.gmra.mxu3 %vm485_vm0, %v456_v63 }
  0xb7   : > { %v828_v5 = vpop.f32.mrf.mxu2  ;;  %v941_v6 = vpop.f32.mrf.mxu3 }
  0xb8   : > { %v829_v7 = vadd.f32 %v828_v5, %v11215_v1  ;;  %v942_v8 = vadd.f32 %v941_v6, %v11218_v2  ;;  %v11228_v9 = vpop.f32.mrf.mxu0  ;;  %v11230_v10 = vpop.f32.mrf.mxu1  ;;  %v461_v6 = vld [vmem:[%s11101_s30 + $0xb0] sm:$0xff] }
  0xba   : > { %v1040_v14 = vmax.f32 %v829_v7, 0.0  ;;  %v1041_v15 = vmax.f32 %v942_v8, 0.0 }
  0xbb   : > { %8669 = vmatmul.msk.f32.gmra.mxu0 %vm485_vm0, %v457_v11  ;;  %8701 = vmatmul.msk.f32.gmra.mxu1 %vm485_vm0, %v457_v11 }
  0xbc   : > { %v11235_v16 = vpack.c.bf16 %v1040_v14, %v1036_v12  ;;  %v11237_v17 = vpack.c.bf16 %v1041_v15, %v1037_v13  ;;  %8733 = vmatmul.msk.f32.gmra.mxu2 %vm485_vm0, %v457_v11  ;;  %8765 = vmatmul.msk.f32.gmra.mxu3 %vm485_vm0, %v457_v11  ;;  %v9085_v15 = vld [vmem:[#allocation3 + $0x260] sm:$0xf] }
  0xbd   : > { %v9086_v19 = vor.u32 %v10398_v18, %v9085_v15 }
  0xbf   : > { %v831_v21 = vpop.f32.mrf.mxu2  ;;  %v944_v22 = vpop.f32.mrf.mxu3  ;;  %2186 = vmatpush.bf16.msrb.mxu2 %v9086_v19 }
  0xc0   : > { %v11241_v23 = vpop.f32.mrf.mxu0  ;;  %v11243_v24 = vpop.f32.mrf.mxu1  ;;  %v832_v34 = vadd.f32 %v831_v21, %v11215_v1  ;;  %v945_v35 = vadd.f32 %v944_v22, %v11218_v2 }
  0xc2   : > { %v1044_v44 = vmax.f32 %v832_v34, 0.0  ;;  %v1045_v45 = vmax.f32 %v945_v35, 0.0  ;;  %v10366_v34 = vld [vmem:[#allocation3 + $0x16c] sm:$0xf0] }
  0xc3   : > { %8670 = vmatmul.msk.f32.gmra.mxu0 %vm485_vm0, %v458_v25  ;;  %8702 = vmatmul.msk.f32.gmra.mxu1 %vm485_vm0, %v458_v25 }
  0xc4   : > { %8734 = vmatmul.msk.f32.gmra.mxu2 %vm485_vm0, %v458_v25  ;;  %8766 = vmatmul.msk.f32.gmra.mxu3 %vm485_vm0, %v458_v25 }
  0xc7   : > { %v834_v37 = vpop.f32.mrf.mxu2  ;;  %v947_v38 = vpop.f32.mrf.mxu3 }
  0xc8   : > { %v835_v39 = vadd.f32 %v834_v37, %v11215_v1  ;;  %v948_v40 = vadd.f32 %v947_v38, %v11218_v2  ;;  %v11254_v41 = vpop.f32.mrf.mxu0  ;;  %v11256_v42 = vpop.f32.mrf.mxu1  ;;  %v8958_v37 = vor.u32 %v10366_v34, %v8957_v33 }
  0xca   : > { %v1048_v46 = vmax.f32 %v835_v39, 0.0  ;;  %v1049_v47 = vmax.f32 %v948_v40, 0.0  ;;  %2097 = vmatpush.bf16.msrb.mxu1 %v8958_v37 }
  0xcb   : > { %8671 = vmatmul.msk.f32.gmra.mxu0 %vm485_vm0, %v459_v43  ;;  %8703 = vmatmul.msk.f32.gmra.mxu1 %vm485_vm0, %v459_v43 }
  0xcc   : > { %v11261_v48 = vpack.c.bf16 %v1048_v46, %v1044_v44  ;;  %v11263_v49 = vpack.c.bf16 %v1049_v47, %v1045_v45  ;;  %8735 = vmatmul.msk.f32.gmra.mxu2 %vm485_vm0, %v459_v43  ;;  %8767 = vmatmul.msk.f32.gmra.mxu3 %vm485_vm0, %v459_v43  ;;  %v463_v46 = vld [vmem:[%s11101_s30 + $0xc0] sm:$0xff] }
  0xce   : > { %13618 = vst [vmem:[#allocation15_spill] sm:$0xff] %v11263_v49 }
  0xcf   : > { %v837_v50 = vpop.f32.mrf.mxu2  ;;  %v950_v51 = vpop.f32.mrf.mxu3 }
  0xd0   : > { %v11267_v52 = vpop.f32.mrf.mxu0  ;;  %v11269_v53 = vpop.f32.mrf.mxu1  ;;  %v838_v55 = vadd.f32 %v837_v50, %v11215_v1  ;;  %v951_v58 = vadd.f32 %v950_v51, %v11218_v2 }
  0xd2   : > { %v1052_v7 = vmax.f32 %v838_v55, 0.0  ;;  %v1053_v8 = vmax.f32 %v951_v58, 0.0 }
  0xd3   : > { %8672 = vmatmul.msk.f32.gmra.mxu0 %vm485_vm0, %v460_v54  ;;  %8704 = vmatmul.msk.f32.gmra.mxu1 %vm485_vm0, %v460_v54 }
  0xd4   : > { %8736 = vmatmul.msk.f32.gmra.mxu2 %vm485_vm0, %v460_v54  ;;  %8768 = vmatmul.msk.f32.gmra.mxu3 %vm485_vm0, %v460_v54 }
  0xd7   : > { %v840_v59 = vpop.f32.mrf.mxu2  ;;  %v953_v60 = vpop.f32.mrf.mxu3 }
  0xd8   : > { %v841_v63 = vadd.f32 %v840_v59, %v11215_v1  ;;  %v954_v3 = vadd.f32 %v953_v60, %v11218_v2  ;;  %v11280_v4 = vpop.f32.mrf.mxu0  ;;  %v11282_v5 = vpop.f32.mrf.mxu1  ;;  %v11316_v59 = vperm.slane %v11212_v0, 0  ;;  %v11319_v60 = vperm.slane %v11212_v0, 1 }
  0xda   : > { %v1056_v11 = vmax.f32 %v841_v63, 0.0  ;;  %v1057_v12 = vmax.f32 %v954_v3, 0.0 }
  0xdb   : > { %8673 = vmatmul.msk.f32.gmra.mxu0 %vm485_vm0, %v461_v6  ;;  %8705 = vmatmul.msk.f32.gmra.mxu1 %vm485_vm0, %v461_v6 }
  0xdc   : > { %v11287_v13 = vpack.c.bf16 %v1056_v11, %v1052_v7  ;;  %v11289_v14 = vpack.c.bf16 %v1057_v12, %v1053_v8  ;;  %8737 = vmatmul.msk.f32.gmra.mxu2 %vm485_vm0, %v461_v6  ;;  %8769 = vmatmul.msk.f32.gmra.mxu3 %vm485_vm0, %v461_v6  ;;  %v464_v12 = vld [vmem:[%s11101_s30 + $0xc8] sm:$0xff] }
  0xde   : > { %13619 = vst [vmem:[#allocation16_spill] sm:$0xff] %v11287_v13 }
  0xdf   : > { %13620 = vst [vmem:[#allocation17_spill] sm:$0xff] %v11289_v14  ;;  %v843_v20 = vpop.f32.mrf.mxu2  ;;  %v956_v21 = vpop.f32.mrf.mxu3 }
  0xe0   : > { %v11293_v22 = vpop.f32.mrf.mxu0  ;;  %v11295_v25 = vpop.f32.mrf.mxu1  ;;  %v844_v35 = vadd.f32 %v843_v20, %v11215_v1  ;;  %v957_v36 = vadd.f32 %v956_v21, %v11218_v2 }
  0xe2   : > { %v1060_v47 = vmax.f32 %v844_v35, 0.0  ;;  %v1061_v50 = vmax.f32 %v957_v36, 0.0  ;;  %v465_v36 = vld [vmem:[%s11101_s30 + $0xd0] sm:$0xff] }
  0xe3   : > { %8674 = vmatmul.msk.f32.gmra.mxu0 %vm485_vm0, %v462_v26  ;;  %8706 = vmatmul.msk.f32.gmra.mxu1 %vm485_vm0, %v462_v26 }
  0xe4   : > { %8738 = vmatmul.msk.f32.gmra.mxu2 %vm485_vm0, %v462_v26  ;;  %8770 = vmatmul.msk.f32.gmra.mxu3 %vm485_vm0, %v462_v26 }
  0xe7   : > { %v846_v38 = vpop.f32.mrf.mxu2  ;;  %v959_v39 = vpop.f32.mrf.mxu3 }
  0xe8   : > { %v847_v40 = vadd.f32 %v846_v38, %v11215_v1  ;;  %v960_v43 = vadd.f32 %v959_v39, %v11218_v2  ;;  %v623_v44 = vpop.f32.mrf.mxu0  ;;  %v736_v45 = vpop.f32.mrf.mxu1 }
  0xe9   : > { %v624_v63 = vadd.f32 %v623_v44, %v11316_v59  ;;  %v737_v3 = vadd.f32 %v736_v45, %v11319_v60  ;;  %v9069_v45 = vld [vmem:[#allocation3 + $0x240] sm:$0xf] }
  0xea   : > { %v1064_v51 = vmax.f32 %v847_v40, 0.0  ;;  %v1065_v54 = vmax.f32 %v960_v43, 0.0 }
  0xeb   : > { %8675 = vmatmul.msk.f32.gmra.mxu0 %vm485_vm0, %v463_v46  ;;  %8707 = vmatmul.msk.f32.gmra.mxu1 %vm485_vm0, %v463_v46  ;;  %v1066_v19 = vmax.f32 %v624_v63, 0.0  ;;  %v1067_v20 = vmax.f32 %v737_v3, 0.0  ;;  %v9197_v63 = vld [vmem:[#allocation3 + $0x340] sm:$0xf] }
  0xec   : > { %v11309_v55 = vpack.c.bf16 %v1064_v51, %v1060_v47  ;;  %v11311_v58 = vpack.c.bf16 %v1065_v54, %v1061_v50  ;;  %8739 = vmatmul.msk.f32.gmra.mxu2 %vm485_vm0, %v463_v46  ;;  %8771 = vmatmul.msk.f32.gmra.mxu3 %vm485_vm0, %v463_v46  ;;  %v10394_v46 = vld [vmem:[#allocation3 + $0x24c] sm:$0xf0]  ;;  %v8813_v51 = vld [vmem:[#allocation3 + $0x40] sm:$0xf] }
  0xed   : > { %v9070_v47 = vor.u32 %v10394_v46, %v9069_v45  ;;  %v10330_v54 = vld [vmem:[#allocation3 + $0x4c] sm:$0xf0] }
  0xee   : > { %13621 = vst [vmem:[#allocation18_spill] sm:$0xff] %v11309_v55  ;;  %v10390_v45 = vld [vmem:[#allocation3 + $0x22c] sm:$0xf0] }
  0xef   : > { %13622 = vst [vmem:[#allocation19_spill] sm:$0xff] %v11311_v58  ;;  %v849_v6 = vpop.f32.mrf.mxu2  ;;  %v962_v7 = vpop.f32.mrf.mxu3  ;;  %2187 = vmatpush.bf16.msrb.mxu2 %v9070_v47 }
  0xf0   : > { %v626_v8 = vpop.f32.mrf.mxu0  ;;  %v739_v11 = vpop.f32.mrf.mxu1  ;;  %v850_v28 = vadd.f32 %v849_v6, %v11215_v1  ;;  %v963_v29 = vadd.f32 %v962_v7, %v11218_v2 }
  0xf1   : > { %v627_v15 = vadd.f32 %v626_v8, %v11316_v59  ;;  %v740_v18 = vadd.f32 %v739_v11, %v11319_v60  ;;  %v8814_v8 = vor.u32 %v10330_v54, %v8813_v51  ;;  %v10426_v11 = vld [vmem:[#allocation3 + $0x34c] sm:$0xf0]  ;;  %v9181_v54 = vld [vmem:[#allocation3 + $0x320] sm:$0xf] }
  0xf2   : > { %v1068_v37 = vmax.f32 %v850_v28, 0.0  ;;  %v1069_v38 = vmax.f32 %v963_v29, 0.0 }
  0xf3   : > { %v1070_v21 = vmax.f32 %v627_v15, 0.0  ;;  %v1071_v26 = vmax.f32 %v740_v18, 0.0  ;;  %8676 = vmatmul.msk.f32.gmra.mxu0 %vm485_vm0, %v464_v12  ;;  %8708 = vmatmul.msk.f32.gmra.mxu1 %vm485_vm0, %v464_v12  ;;  %v10362_v15 = vld [vmem:[#allocation3 + $0x14c] sm:$0xf0] }
  0xf4   : > { %8740 = vmatmul.msk.f32.gmra.mxu2 %vm485_vm0, %v464_v12  ;;  %8772 = vmatmul.msk.f32.gmra.mxu3 %vm485_vm0, %v464_v12  ;;  %v8941_v12 = vld [vmem:[#allocation3 + $0x140] sm:$0xf] }
  0xf5   : > { %v11330_v0 = vpack.c.bf16 %v1070_v21, %v1066_v19  ;;  %v11332_v27 = vpack.c.bf16 %v1071_v26, %v1067_v20  ;;  %v466_v20 = vld [vmem:[%s11101_s30 + $0xd8] sm:$0xff]  ;;  %v9198_v21 = vor.u32 %v10426_v11, %v9197_v63  ;;  %v8942_v26 = vor.u32 %v10362_v15, %v8941_v12  ;;  %2009 = vmatpush.bf16.msrb.mxu0 %v8814_v8  ;;  %v10422_v63 = vld [vmem:[#allocation3 + $0x32c] sm:$0xf0]  ;;  %v8909_v12 = vld [vmem:[#allocation3 + $0x100] sm:$0xf] }
  0xf6   : > { %v9182_v8 = vor.u32 %v10422_v63, %v9181_v54  ;;  %v10322_v11 = vld [vmem:[#allocation3 + $0xc] sm:$0xf0] }
  0xf7   : > { %13623 = vst [vmem:[#allocation20_spill] sm:$0xff] %v11330_v0  ;;  %v852_v30 = vpop.f32.mrf.mxu2  ;;  %v965_v31 = vpop.f32.mrf.mxu3  ;;  %2276 = vmatpush.bf16.msrb.mxu3 %v9198_v21  ;;  %2098 = vmatpush.bf16.msrb.mxu1 %v8942_v26  ;;  %v9037_v21 = vld [vmem:[#allocation3 + $0x200] sm:$0xf]  ;;  %v10386_v26 = vld [vmem:[#allocation3 + $0x20c] sm:$0xf0] }
  0xf8   : > { %13624 = vst [vmem:[#allocation21_spill] sm:$0xff] %v11332_v27  ;;  %v853_v32 = vadd.f32 %v852_v30, %v11215_v1  ;;  %v966_v33 = vadd.f32 %v965_v31, %v11218_v2  ;;  %v629_v34 = vpop.f32.mrf.mxu0  ;;  %v742_v35 = vpop.f32.mrf.mxu1  ;;  %v8797_v31 = vld [vmem:[#allocation3 + $0x20] sm:$0xf] }
  0xf9   : > { %v630_v50 = vadd.f32 %v629_v34, %v11316_v59  ;;  %v743_v3 = vadd.f32 %v742_v35, %v11319_v60 }
  0xfa   : > { %v1072_v39 = vmax.f32 %v853_v32, 0.0  ;;  %v1073_v40 = vmax.f32 %v966_v33, 0.0  ;;  %v10326_v32 = vld [vmem:[#allocation3 + $0x2c] sm:$0xf0] }
  0xfb   : > { %8677 = vmatmul.msk.f32.gmra.mxu0 %vm485_vm0, %v465_v36  ;;  %8709 = vmatmul.msk.f32.gmra.mxu1 %vm485_vm0, %v465_v36  ;;  %v1074_v30 = vmax.f32 %v630_v50, 0.0  ;;  %v1075_v33 = vmax.f32 %v743_v3, 0.0 }
  0xfc   : > { %v11341_v43 = vpack.c.bf16 %v1072_v39, %v1068_v37  ;;  %v11343_v44 = vpack.c.bf16 %v1073_v40, %v1069_v38  ;;  %8741 = vmatmul.msk.f32.gmra.mxu2 %vm485_vm0, %v465_v36  ;;  %8773 = vmatmul.msk.f32.gmra.mxu3 %vm485_vm0, %v465_v36  ;;  %v8798_v36 = vor.u32 %v10326_v32, %v8797_v31  ;;  %v8925_v37 = vld [vmem:[#allocation3 + $0x120] sm:$0xf]  ;;  %v10358_v39 = vld [vmem:[#allocation3 + $0x12c] sm:$0xf0] }
  0xfd   : > { %v9053_v40 = vld [vmem:[#allocation3 + $0x220] sm:$0xf]  ;;  %v8926_v50 = vor.u32 %v10358_v39, %v8925_v37  ;;  %2277 = vmatpush.bf16.msrb.mxu3 %v9182_v8 }
  0xfe   : > { %13625 = vst [vmem:[#allocation22_spill] sm:$0xff] %v11341_v43  ;;  %2010 = vmatpush.bf16.msrb.mxu0 %v8798_v36  ;;  %v9054_v51 = vor.u32 %v10390_v45, %v9053_v40  ;;  %v9165_v32 = vld [vmem:[#allocation3 + $0x300] sm:$0xf]  ;;  %v9038_v36 = vor.u32 %v10386_v26, %v9037_v21 }
  0xff   : > { %13626 = vst [vmem:[#allocation23_spill] sm:$0xff] %v11343_v44  ;;  %v855_v6 = vpop.f32.mrf.mxu2  ;;  %v968_v7 = vpop.f32.mrf.mxu3  ;;  %2099 = vmatpush.bf16.msrb.mxu1 %v8926_v50 }
 0x100   : > { %v632_v18 = vpop.f32.mrf.mxu0  ;;  %v745_v19 = vpop.f32.mrf.mxu1  ;;  %v856_v38 = vadd.f32 %v855_v6, %v11215_v1  ;;  %v969_v3 = vadd.f32 %v968_v7, %v11218_v2  ;;  %v8781_v6 = vld [vmem:[#allocation3] sm:$0xf]  ;;  %2188 = vmatpush.bf16.msrb.mxu2 %v9054_v51 }
 0x101   : > { %v633_v28 = vadd.f32 %v632_v18, %v11316_v59  ;;  %v746_v29 = vadd.f32 %v745_v19, %v11319_v60  ;;  %v8782_v19 = vor.u32 %v10322_v11, %v8781_v6  ;;  %v467_v7 = vld [vmem:[%s11101_s30 + $0xe0] sm:$0xff]  ;;  %v468_v11 = vld [vmem:[%s11101_s30 + $0xe8] sm:$0xff] }
 0x102   : > { %v1077_v37 = vmax.f32 %v969_v3, 0.0 }
 0x103   : > { %v1078_v34 = vmax.f32 %v633_v28, 0.0  ;;  %v1079_v35 = vmax.f32 %v746_v29, 0.0  ;;  %8678 = vmatmul.msk.f32.gmra.mxu0 %vm485_vm0, %v466_v20  ;;  %8710 = vmatmul.msk.f32.gmra.mxu1 %vm485_vm0, %v466_v20 }
 0x104   : > { %8742 = vmatmul.msk.f32.gmra.mxu2 %vm485_vm0, %v466_v20  ;;  %8774 = vmatmul.msk.f32.gmra.mxu3 %vm485_vm0, %v466_v20  ;;  %v10354_v20 = vld [vmem:[#allocation3 + $0x10c] sm:$0xf0] }
 0x105   : > { %v11357_v46 = vpack.c.bf16 %v1078_v34, %v1074_v30  ;;  %v11359_v47 = vpack.c.bf16 %v1079_v35, %v1075_v33  ;;  %v10418_v33 = vld [vmem:[#allocation3 + $0x30c] sm:$0xf0]  ;;  %v1076_v34 = vmax.f32 %v856_v38, 0.0  ;;  %2011 = vmatpush.bf16.msrb.mxu0 %v8782_v19  ;;  %v8910_v35 = vor.u32 %v10354_v20, %v8909_v12  ;;  %2189 = vmatpush.bf16.msrb.mxu2 %v9038_v36 }
 0x106   : > { %v9166_v45 = vor.u32 %v10418_v33, %v9165_v32  ;;  %v469_v36 = vld [vmem:[%s11101_s30 + $0xf0] sm:$0xff] }
 0x107   : > { %13627 = vst [vmem:[#allocation24_spill] sm:$0xff] %v11357_v46  ;;  %v858_v15 = vpop.f32.mrf.mxu2  ;;  %v971_v18 = vpop.f32.mrf.mxu3  ;;  %2100 = vmatpush.bf16.msrb.mxu1 %v8910_v35 }
 0x108   : > { %13628 = vst [vmem:[#allocation25_spill] sm:$0xff] %v11359_v47  ;;  %v859_v28 = vadd.f32 %v858_v15, %v11215_v1  ;;  %v972_v29 = vadd.f32 %v971_v18, %v11218_v2  ;;  %v635_v30 = vpop.f32.mrf.mxu0  ;;  %v748_v31 = vpop.f32.mrf.mxu1  ;;  %2278 = vmatpush.bf16.msrb.mxu3 %v9166_v45 }
 0x109   : > { %v636_v38 = vadd.f32 %v635_v30, %v11316_v59  ;;  %v749_v54 = vadd.f32 %v748_v31, %v11319_v60 }
 0x10a   : > { %v1080_v39 = vmax.f32 %v859_v28, 0.0  ;;  %v1081_v40 = vmax.f32 %v972_v29, 0.0 }
 0x10b   : > { %8679 = vmatmul.msk.f32.gmra.mxu0 %vm485_vm0, %v467_v7  ;;  %8711 = vmatmul.msk.f32.gmra.mxu1 %vm485_vm0, %v467_v7  ;;  %v1082_v18 = vmax.f32 %v636_v38, 0.0  ;;  %v1083_v19 = vmax.f32 %v749_v54, 0.0 }
 0x10c   : > { %v11367_v50 = vpack.c.bf16 %v1080_v39, %v1076_v34  ;;  %v11369_v51 = vpack.c.bf16 %v1081_v40, %v1077_v37  ;;  %8743 = vmatmul.msk.f32.gmra.mxu2 %vm485_vm0, %v467_v7  ;;  %8775 = vmatmul.msk.f32.gmra.mxu3 %vm485_vm0, %v467_v7 }
 0x10e   : > { %13629 = vst [vmem:[#allocation26_spill] sm:$0xff] %v11367_v50 }
 0x10f   : > { %13630 = vst [vmem:[#allocation27_spill] sm:$0xff] %v11369_v51  ;;  %v861_v63 = vpop.f32.mrf.mxu2  ;;  %v974_v3 = vpop.f32.mrf.mxu3 }
 0x110   : > { %v638_v8 = vpop.f32.mrf.mxu0  ;;  %v751_v6 = vpop.f32.mrf.mxu1  ;;  %v862_v29 = vadd.f32 %v861_v63, %v11215_v1  ;;  %v975_v30 = vadd.f32 %v974_v3, %v11218_v2 }
 0x111   : > { %v639_v12 = vadd.f32 %v638_v8, %v11316_v59  ;;  %v752_v15 = vadd.f32 %v751_v6, %v11319_v60 }
 0x112   : > { %v1084_v37 = vmax.f32 %v862_v29, 0.0  ;;  %v1085_v39 = vmax.f32 %v975_v30, 0.0  ;;  %v600_v29 = vadd.f32 %v11195_v56, %v11316_v59  ;;  %v713_v30 = vadd.f32 %v11197_v57, %v11319_v60 }
 0x113   : > { %v1086_v20 = vmax.f32 %v639_v12, 0.0  ;;  %v1087_v21 = vmax.f32 %v752_v15, 0.0  ;;  %8680 = vmatmul.msk.f32.gmra.mxu0 %vm485_vm0, %v468_v11  ;;  %8712 = vmatmul.msk.f32.gmra.mxu1 %vm485_vm0, %v468_v11  ;;  %v470_v15 = vld [vmem:[%s11101_s30 + $0xf8] sm:$0xff]  ;;  %s429_s30 = sand.u32 1, %s10933_s20  }
 0x114   : > { %8744 = vmatmul.msk.f32.gmra.mxu2 %vm485_vm0, %v468_v11  ;;  %8776 = vmatmul.msk.f32.gmra.mxu3 %vm485_vm0, %v468_v11  ;;  %s8648_s14 = sshll.u32 %s429_s30, 4  ;;  %s8532_s15 = scalar_lea.sflag [#allocation5], %s429_s30 }
 0x115   : > { %v11382_v26 = vpack.c.bf16 %v1086_v20, %v1082_v18  ;;  %v11384_v28 = vpack.c.bf16 %v1087_v21, %v1083_v19  ;;  %v603_v18 = vadd.f32 %v11204_v61, %v11316_v59  ;;  %v716_v19 = vadd.f32 %v11206_v62, %v11319_v60  ;;  %s431_s17 = scalar_lea.vmem [#allocation9], %s8648_s14 }
 0x116   : > { %s8545_s12 = sshll.u32 %s431_s17, 4  ;;  %s8546_s12 = int_to_ptr.vmem [resolvable:$true] %s8545_s12 }
 0x117   : > { %13631 = vst [vmem:[#allocation28_spill] sm:$0xff] %v11382_v26  ;;  %v864_v31 = vpop.f32.mrf.mxu2  ;;  %v977_v7 = vpop.f32.mrf.mxu3  ;;  %v1038_v61 = vmax.f32 %v603_v18, 0.0  ;;  %v1039_v62 = vmax.f32 %v716_v19, 0.0 }
 0x118   : > { %13632 = vst [vmem:[#allocation29_spill] sm:$0xff] %v11384_v28  ;;  %v865_v32 = vadd.f32 %v864_v31, %v11215_v1  ;;  %v978_v33 = vadd.f32 %v977_v7, %v11218_v2  ;;  %v641_v34 = vpop.f32.mrf.mxu0  ;;  %v754_v35 = vpop.f32.mrf.mxu1 }
 0x119   : > { %v642_v63 = vadd.f32 %v641_v34, %v11316_v59  ;;  %v755_v3 = vadd.f32 %v754_v35, %v11319_v60 }
 0x11a   : > { %v1088_v40 = vmax.f32 %v865_v32, 0.0  ;;  %v1089_v45 = vmax.f32 %v978_v33, 0.0 }
 0x11b   : > { %8681 = vmatmul.msk.f32.gmra.mxu0 %vm485_vm0, %v469_v36  ;;  %8713 = vmatmul.msk.f32.gmra.mxu1 %vm485_vm0, %v469_v36  ;;  %v1090_v31 = vmax.f32 %v642_v63, 0.0  ;;  %v1091_v7 = vmax.f32 %v755_v3, 0.0 }
 0x11c   : > { %v11393_v38 = vpack.c.bf16 %v1088_v40, %v1084_v37  ;;  %v11395_v54 = vpack.c.bf16 %v1089_v45, %v1085_v39  ;;  %8745 = vmatmul.msk.f32.gmra.mxu2 %vm485_vm0, %v469_v36  ;;  %8777 = vmatmul.msk.f32.gmra.mxu3 %vm485_vm0, %v469_v36  ;;  %v1034_v36 = vmax.f32 %v600_v29, 0.0  ;;  %v1035_v37 = vmax.f32 %v713_v30, 0.0 }
 0x11e   : > { %13633 = vst [vmem:[#allocation30_spill] sm:$0xff] %v11393_v38 }
 0x11f   : > { %13634 = vst [vmem:[#allocation31_spill] sm:$0xff] %v11395_v54  ;;  %v867_v8 = vpop.f32.mrf.mxu2  ;;  %v980_v6 = vpop.f32.mrf.mxu3 }
 0x120   : > { %v644_v11 = vpop.f32.mrf.mxu0  ;;  %v757_v12 = vpop.f32.mrf.mxu1  ;;  %v868_v57 = vadd.f32 %v867_v8, %v11215_v1  ;;  %v981_v35 = vadd.f32 %v980_v6, %v11218_v2 }
 0x121   : > { %v645_v20 = vadd.f32 %v644_v11, %v11316_v59  ;;  %v758_v21 = vadd.f32 %v757_v12, %v11319_v60  ;;  %v11424_v12 = vpack.c.bf16 %v1038_v61, %v1034_v36  ;;  %v609_v61 = vadd.f32 %v11241_v23, %v11316_v59 }
 0x122   : > { %v1092_v18 = vmax.f32 %v868_v57, 0.0  ;;  %v1093_v19 = vmax.f32 %v981_v35, 0.0  ;;  %v606_v36 = vadd.f32 %v11228_v9, %v11316_v59 }
 0x123   : > { %v1094_v32 = vmax.f32 %v645_v20, 0.0  ;;  %v1095_v33 = vmax.f32 %v758_v21, 0.0  ;;  %8682 = vmatmul.msk.f32.gmra.mxu0 %vm485_vm0, %v470_v15  ;;  %8714 = vmatmul.msk.f32.gmra.mxu1 %vm485_vm0, %v470_v15 }
 0x124   : > { %8746 = vmatmul.msk.f32.gmra.mxu2 %vm485_vm0, %v470_v15  ;;  %8778 = vmatmul.msk.f32.gmra.mxu3 %vm485_vm0, %v470_v15  ;;  %v11426_v15 = vpack.c.bf16 %v1039_v62, %v1035_v37  ;;  %v722_v62 = vadd.f32 %v11243_v24, %v11319_v60  ;;  %v719_v37 = vadd.f32 %v11230_v10, %v11319_v60 }
 0x125   : > { %v11416_v34 = vpack.c.bf16 %v1094_v32, %v1090_v31  ;;  %v11418_v56 = vpack.c.bf16 %v1095_v33, %v1091_v7 }
 0x127   : > { %13635 = vst [vmem:[#allocation32_spill] sm:$0xff] %v11416_v34  ;;  %v870_v39 = vpop.f32.mrf.mxu2  ;;  %v983_v40 = vpop.f32.mrf.mxu3 }
 0x128   : > { %13636 = vst [vmem:[#allocation33_spill] sm:$0xff] %v11418_v56  ;;  %v871_v45 = vadd.f32 %v870_v39, %v11215_v1  ;;  %v984_v63 = vadd.f32 %v983_v40, %v11218_v2  ;;  %v647_v3 = vpop.f32.mrf.mxu0  ;;  %v760_v11 = vpop.f32.mrf.mxu1 }
 0x129   : > { %v648_v29 = vadd.f32 %v647_v3, %v11316_v59  ;;  %v761_v30 = vadd.f32 %v760_v11, %v11319_v60  ;;  %v1046_v3 = vmax.f32 %v609_v61, 0.0  ;;  %v1047_v11 = vmax.f32 %v722_v62, 0.0 }
 0x12a   : > { %v1096_v20 = vmax.f32 %v871_v45, 0.0  ;;  %v1097_v8 = vmax.f32 %v984_v63, 0.0 }
 0x12b   : > { %2012 = vmatmul.bf16.vlgmr.msrb.gmra.mxu0 %v11424_v12  ;;  %2101 = vmatmul.bf16.vlgmr.msrb.gmra.mxu1 %v11426_v15  ;;  %v1098_v39 = vmax.f32 %v648_v29, 0.0  ;;  %v1099_v40 = vmax.f32 %v761_v30, 0.0 }
 0x12c   : > { %v11430_v6 = vpack.c.bf16 %v1096_v20, %v1092_v18  ;;  %v11432_v21 = vpack.c.bf16 %v1097_v8, %v1093_v19  ;;  %2190 = vmatmul.bf16.vlgmr.msrb.gmra.mxu2 %v11235_v16  ;;  %2279 = vmatmul.bf16.vlgmr.msrb.gmra.mxu3 %v11237_v17  ;;  %v1042_v20 = vmax.f32 %v606_v36, 0.0  ;;  %v1043_v8 = vmax.f32 %v719_v37, 0.0 }
 0x12e   : > { %13637 = vst [vmem:[#allocation34_spill] sm:$0xff] %v11430_v6  ;;  %v11456_v61 = vpack.c.bf16 %v1046_v3, %v1042_v20  ;;  %v11458_v62 = vpack.c.bf16 %v1047_v11, %v1043_v8 }
 0x12f   : > { %13638 = vst [vmem:[#allocation35_spill] sm:$0xff] %v11432_v21  ;;  %v873_v31 = vpop.f32.mrf.mxu2  ;;  %v986_v7 = vpop.f32.mrf.mxu3 }
 0x130   : > { %v650_v32 = vpop.f32.mrf.mxu0  ;;  %v763_v33 = vpop.f32.mrf.mxu1  ;;  %v874_v24 = vadd.f32 %v873_v31, %v11215_v1  ;;  %v987_v19 = vadd.f32 %v986_v7, %v11218_v2 }
 0x131   : > { %v651_v57 = vadd.f32 %v650_v32, %v11316_v59  ;;  %v764_v35 = vadd.f32 %v763_v33, %v11319_v60 }
 0x133   : > { %v1102_v45 = vmax.f32 %v651_v57, 0.0  ;;  %v1103_v63 = vmax.f32 %v764_v35, 0.0  ;;  %v1100_v57 = vmax.f32 %v874_v24, 0.0  ;;  %v1101_v35 = vmax.f32 %v987_v19, 0.0 }
 0x134   : > { %v615_v24 = vadd.f32 %v11267_v52, %v11316_v59  ;;  %v728_v19 = vadd.f32 %v11269_v53, %v11319_v60 }
 0x135   : > { %v11448_v23 = vpack.c.bf16 %v1102_v45, %v1098_v39  ;;  %v11450_v18 = vpack.c.bf16 %v1103_v63, %v1099_v40 }
 0x137   : > { %v876_v9 = vpop.f32.mrf.mxu2  ;;  %v989_v32 = vpop.f32.mrf.mxu3 }
 0x138   : > { %v877_v10 = vadd.f32 %v876_v9, %v11215_v1  ;;  %v990_v29 = vadd.f32 %v989_v32, %v11218_v2  ;;  %v653_v30 = vpop.f32.mrf.mxu0  ;;  %v766_v33 = vpop.f32.mrf.mxu1  ;;  %v612_v9 = vadd.f32 %v11254_v41, %v11316_v59  ;;  %v725_v32 = vadd.f32 %v11256_v42, %v11319_v60 }
 0x139   : > { %v654_v37 = vadd.f32 %v653_v30, %v11316_v59  ;;  %v767_v40 = vadd.f32 %v766_v33, %v11319_v60 }
 0x13a   : > { %v1104_v39 = vmax.f32 %v877_v10, 0.0  ;;  %v1105_v31 = vmax.f32 %v990_v29, 0.0 }
 0x13b   : > { %2017 = vmatmul.bf16.gmra.mxu0 %v11456_v61  ;;  %2106 = vmatmul.bf16.gmra.mxu1 %v11458_v62  ;;  %v1106_v10 = vmax.f32 %v654_v37, 0.0  ;;  %v1107_v29 = vmax.f32 %v767_v40, 0.0 }
 0x13c   : > { %v11462_v7 = vpack.c.bf16 %v1104_v39, %v1100_v57  ;;  %v11464_v36 = vpack.c.bf16 %v1105_v31, %v1101_v35  ;;  %2195 = vmatmul.bf16.gmra.mxu2 %v11261_v48  ;;  %2284 = vmatmul.bf16.gmra.mxu3 %v11263_v49  ;;  %v1054_v57 = vmax.f32 %v615_v24, 0.0  ;;  %v1055_v35 = vmax.f32 %v728_v19, 0.0 }
 0x13e   : > { %13639 = vst [vmem:[#allocation36_spill] sm:$0xff] %v11464_v36 }
 0x13f   : > { %v879_v45 = vpop.f32.mrf.mxu2  ;;  %v992_v63 = vpop.f32.mrf.mxu3 }
 0x140   : > { %v656_v3 = vpop.f32.mrf.mxu0  ;;  %v769_v11 = vpop.f32.mrf.mxu1  ;;  %v880_v53 = vadd.f32 %v879_v45, %v11215_v1  ;;  %v993_v31 = vadd.f32 %v992_v63, %v11218_v2 }
 0x141   : > { %v657_v20 = vadd.f32 %v656_v3, %v11316_v59  ;;  %v770_v8 = vadd.f32 %v769_v11, %v11319_v60  ;;  %v1050_v3 = vmax.f32 %v612_v9, 0.0  ;;  %v1051_v11 = vmax.f32 %v725_v32, 0.0 }
 0x143   : > { %v1110_v30 = vmax.f32 %v657_v20, 0.0  ;;  %v1111_v33 = vmax.f32 %v770_v8, 0.0  ;;  %v11488_v24 = vpack.c.bf16 %v1054_v57, %v1050_v3  ;;  %v11490_v19 = vpack.c.bf16 %v1055_v35, %v1051_v11 }
 0x144   : > { %v1108_v8 = vmax.f32 %v880_v53, 0.0  ;;  %v621_v53 = vadd.f32 %v11293_v22, %v11316_v59 }
 0x145   : > { %v11480_v52 = vpack.c.bf16 %v1110_v30, %v1106_v10  ;;  %v11482_v39 = vpack.c.bf16 %v1111_v33, %v1107_v29  ;;  %v1109_v10 = vmax.f32 %v993_v31, 0.0  ;;  %v734_v31 = vadd.f32 %v11295_v25, %v11319_v60 }
 0x147   : > { %13640 = vst [vmem:[#allocation37_spill] sm:$0xff] %v11482_v39  ;;  %v882_v41 = vpop.f32.mrf.mxu2  ;;  %v995_v49 = vpop.f32.mrf.mxu3 }
 0x148   : > { %v883_v42 = vadd.f32 %v882_v41, %v11215_v1  ;;  %v996_v37 = vadd.f32 %v995_v49, %v11218_v2  ;;  %v659_v40 = vpop.f32.mrf.mxu0  ;;  %v772_v20 = vpop.f32.mrf.mxu1  ;;  %v618_v41 = vadd.f32 %v11280_v4, %v11316_v59 }
 0x149   : > { %v660_v49 = vadd.f32 %v659_v40, %v11316_v59  ;;  %v773_v32 = vadd.f32 %v772_v20, %v11319_v60 }
 0x14a   : > { %v1112_v29 = vmax.f32 %v883_v42, 0.0  ;;  %v1113_v45 = vmax.f32 %v996_v37, 0.0  ;;  %v731_v42 = vadd.f32 %v11282_v5, %v11319_v60 }
 0x14b   : > { %2022 = vmatmul.bf16.gmra.mxu0 %v11488_v24  ;;  %2111 = vmatmul.bf16.gmra.mxu1 %v11490_v19  ;;  %v1114_v37 = vmax.f32 %v660_v49, 0.0  ;;  %v1115_v40 = vmax.f32 %v773_v32, 0.0 }
 0x14c   : > { %v11494_v63 = vpack.c.bf16 %v1112_v29, %v1108_v8  ;;  %v11496_v9 = vpack.c.bf16 %v1113_v45, %v1109_v10  ;;  %2200 = vmatmul.bf16.gmra.mxu2 %v11287_v13  ;;  %2289 = vmatmul.bf16.gmra.mxu3 %v11289_v14  ;;  %v1062_v10 = vmax.f32 %v621_v53, 0.0  ;;  %v1063_v29 = vmax.f32 %v734_v31, 0.0 }
 0x14d   : > { %v1059_v14 = vmax.f32 %v731_v42, 0.0  ;;  %v9151_v42 = vld [vmem:[#allocation3 + $0x2f0] sm:$0xf0] }
 0x14e   : > { %13641 = vst [vmem:[#allocation38_spill] sm:$0xff] %v11494_v63 }
 0x14f   : > { %13642 = vst [vmem:[#allocation39_spill] sm:$0xff] %v11496_v9  ;;  %v885_v30 = vpop.f32.mrf.mxu2  ;;  %v998_v33 = vpop.f32.mrf.mxu3  ;;  %v11522_v31 = vpack.c.bf16 %v1063_v29, %v1059_v14 }
 0x150   : > { %v662_v57 = vpop.f32.mrf.mxu0  ;;  %v775_v35 = vpop.f32.mrf.mxu1  ;;  %v886_v25 = vadd.f32 %v885_v30, %v11215_v1 }
 0x151   : > { %v663_v3 = vadd.f32 %v662_v57, %v11316_v59  ;;  %v776_v11 = vadd.f32 %v775_v35, %v11319_v60  ;;  %v999_v57 = vadd.f32 %v998_v33, %v11218_v2  ;;  %v1058_v35 = vmax.f32 %v618_v41, 0.0  ;;  %13644 = vst [vmem:[#allocation41_spill] sm:$0xff] %v11522_v31 }
 0x153   : > { %v1118_v20 = vmax.f32 %v663_v3, 0.0  ;;  %v1119_v8 = vmax.f32 %v776_v11, 0.0  ;;  %v11520_v53 = vpack.c.bf16 %v1062_v10, %v1058_v35  ;;  %v1116_v11 = vmax.f32 %v886_v25, 0.0 }
 0x155   : > { %v11512_v22 = vpack.c.bf16 %v1118_v20, %v1114_v37  ;;  %v11514_v45 = vpack.c.bf16 %v1119_v8, %v1115_v40  ;;  %13643 = vst [vmem:[#allocation40_spill] sm:$0xff] %v11520_v53  ;;  %v1117_v37 = vmax.f32 %v999_v57, 0.0 }
 0x157   : > { %v888_v4 = vpop.f32.mrf.mxu2  ;;  %v1001_v13 = vpop.f32.mrf.mxu3 }
 0x158   : > { %v889_v5 = vadd.f32 %v888_v4, %v11215_v1  ;;  %v1002_v49 = vadd.f32 %v1001_v13, %v11218_v2  ;;  %v665_v32 = vpop.f32.mrf.mxu0  ;;  %v778_v3 = vpop.f32.mrf.mxu1  ;;  %v10412_v13 = vld [vmem:[#allocation3 + $0x2e4] sm:$0xf] }
 0x159   : > { %v9154_v14 = vor.u32 %v10412_v13, %v9151_v42  ;;  %v666_v20 = vadd.f32 %v665_v32, %v11316_v59  ;;  %v779_v8 = vadd.f32 %v778_v3, %v11319_v60  ;;  %v10444_v42 = vld [vmem:[#allocation3 + $0x3e4] sm:$0xf]  ;;  %v9279_v32 = vld [vmem:[#allocation3 + $0x3f0] sm:$0xf0] }
 0x15a   : > { %v1120_v40 = vmax.f32 %v889_v5, 0.0  ;;  %v1121_v30 = vmax.f32 %v1002_v49, 0.0 }
 0x15b   : > { %2027 = vmatmul.bf16.gmra.mxu0 %v11520_v53  ;;  %2116 = vmatmul.bf16.gmra.mxu1 %v11522_v31  ;;  %v1122_v5 = vmax.f32 %v666_v20, 0.0  ;;  %v1123_v49 = vmax.f32 %v779_v8, 0.0  ;;  %v9023_v31 = vld [vmem:[#allocation3 + $0x1f0] sm:$0xf0]  ;;  %v10372_v53 = vld [vmem:[#allocation3 + $0x1a4] sm:$0xf] }
 0x15c   : > { %v11526_v33 = vpack.c.bf16 %v1120_v40, %v1116_v11  ;;  %v11528_v41 = vpack.c.bf16 %v1121_v30, %v1117_v37  ;;  %2205 = vmatmul.bf16.gmra.mxu2 %v11309_v55  ;;  %2294 = vmatmul.bf16.gmra.mxu3 %v11311_v58  ;;  %v10348_v11 = vld [vmem:[#allocation3 + $0xe4] sm:$0xf]  ;;  %v8895_v37 = vld [vmem:[#allocation3 + $0xf0] sm:$0xf0]  ;;  %v9282_v58 = vor.u32 %v10444_v42, %v9279_v32 }
 0x15d   : > { %2538 = vmatpush.bf16.msra.mxu2 %v9154_v14  ;;  %v8898_v13 = vor.u32 %v10348_v11, %v8895_v37  ;;  %v10380_v14 = vld [vmem:[#allocation3 + $0x1e4] sm:$0xf] }
 0x15e   : > { %2627 = vmatpush.bf16.msra.mxu3 %v9282_v58  ;;  %v9026_v8 = vor.u32 %v10380_v14, %v9023_v31 }
 0x15f   : > { %v891_v10 = vpop.f32.mrf.mxu2  ;;  %v1004_v29 = vpop.f32.mrf.mxu3  ;;  %2360 = vmatpush.bf16.msra.mxu0 %v8898_v13 }
 0x160   : > { %v668_v25 = vpop.f32.mrf.mxu0  ;;  %v781_v57 = vpop.f32.mrf.mxu1  ;;  %v1005_v20 = vadd.f32 %v1004_v29, %v11218_v2  ;;  %2449 = vmatpush.bf16.msra.mxu1 %v9026_v8 }
 0x161   : > { %v669_v35 = vadd.f32 %v668_v25, %v11316_v59  ;;  %v782_v4 = vadd.f32 %v781_v57, %v11319_v60  ;;  %v892_v25 = vadd.f32 %v891_v10, %v11215_v1 }
 0x163   : > { %v1126_v40 = vmax.f32 %v669_v35, 0.0  ;;  %v1127_v30 = vmax.f32 %v782_v4, 0.0 }
 0x165   : > { %v11536_v3 = vpack.c.bf16 %v1126_v40, %v1122_v5  ;;  %v11538_v55 = vpack.c.bf16 %v1127_v30, %v1123_v49  ;;  %v1124_v49 = vmax.f32 %v892_v25, 0.0  ;;  %v1125_v40 = vmax.f32 %v1005_v20, 0.0 }
 0x167   : > { %v894_v57 = vpop.f32.mrf.mxu2  ;;  %v1007_v35 = vpop.f32.mrf.mxu3 }
 0x168   : > { %v895_v4 = vadd.f32 %v894_v57, %v11215_v1  ;;  %v1008_v11 = vadd.f32 %v1007_v35, %v11218_v2  ;;  %v671_v37 = vpop.f32.mrf.mxu0  ;;  %v784_v5 = vpop.f32.mrf.mxu1 }
 0x169   : > { %v672_v31 = vadd.f32 %v671_v37, %v11316_v59  ;;  %v785_v29 = vadd.f32 %v784_v5, %v11319_v60 }
 0x16a   : > { %v1128_v30 = vmax.f32 %v895_v4, 0.0  ;;  %v1129_v13 = vmax.f32 %v1008_v11, 0.0 }
 0x16b   : > { %2032 = vmatmul.bf16.gmra.mxu0 %v11330_v0  ;;  %2121 = vmatmul.bf16.gmra.mxu1 %v11332_v27  ;;  %v1130_v57 = vmax.f32 %v672_v31, 0.0  ;;  %v1131_v35 = vmax.f32 %v785_v29, 0.0  ;;  %v9007_v0 = vld [vmem:[#allocation3 + $0x1d0] sm:$0xf0] }
 0x16c   : > { %v11546_v10 = vpack.c.bf16 %v1128_v30, %v1124_v49  ;;  %v11548_v58 = vpack.c.bf16 %v1129_v13, %v1125_v40  ;;  %2210 = vmatmul.bf16.gmra.mxu2 %v11341_v43  ;;  %2299 = vmatmul.bf16.gmra.mxu3 %v11343_v44 }
 0x16e   : > { %13645 = vst [vmem:[#allocation42_spill] sm:$0xff] %v11548_v58 }
 0x16f   : > { %v897_v42 = vpop.f32.mrf.mxu2  ;;  %v1010_v32 = vpop.f32.mrf.mxu3 }
 0x170   : > { %v674_v14 = vpop.f32.mrf.mxu0  ;;  %v787_v25 = vpop.f32.mrf.mxu1  ;;  %v898_v37 = vadd.f32 %v897_v42, %v11215_v1  ;;  %v1011_v5 = vadd.f32 %v1010_v32, %v11218_v2  ;;  %v10408_v32 = vld [vmem:[#allocation3 + $0x2c4] sm:$0xf] }
 0x171   : > { %v675_v20 = vadd.f32 %v674_v14, %v11316_v59  ;;  %v788_v8 = vadd.f32 %v787_v25, %v11319_v60 }
 0x172   : > { %v1132_v31 = vmax.f32 %v898_v37, 0.0  ;;  %v1133_v29 = vmax.f32 %v1011_v5, 0.0 }
 0x173   : > { %v1134_v4 = vmax.f32 %v675_v20, 0.0  ;;  %v1135_v11 = vmax.f32 %v788_v8, 0.0 }
 0x175   : > { %v11556_v49 = vpack.c.bf16 %v1134_v4, %v1130_v57  ;;  %v11558_v40 = vpack.c.bf16 %v1135_v11, %v1131_v35  ;;  %v9135_v35 = vld [vmem:[#allocation3 + $0x2d0] sm:$0xf0] }
 0x176   : > { %v9138_v4 = vor.u32 %v10408_v32, %v9135_v35  ;;  %v10440_v35 = vld [vmem:[#allocation3 + $0x3c4] sm:$0xf] }
 0x177   : > { %13646 = vst [vmem:[#allocation43_spill] sm:$0xff] %v11556_v49  ;;  %v900_v30 = vpop.f32.mrf.mxu2  ;;  %v1013_v13 = vpop.f32.mrf.mxu3 }
 0x178   : > { %13647 = vst [vmem:[#allocation44_spill] sm:$0xff] %v11558_v40  ;;  %v901_v44 = vadd.f32 %v900_v30, %v11215_v1  ;;  %v1014_v14 = vadd.f32 %v1013_v13, %v11218_v2  ;;  %v677_v43 = vpop.f32.mrf.mxu0  ;;  %v790_v25 = vpop.f32.mrf.mxu1  ;;  %2539 = vmatpush.bf16.msra.mxu2 %v9138_v4  ;;  %v10376_v4 = vld [vmem:[#allocation3 + $0x1c4] sm:$0xf] }
 0x179   : > { %v678_v11 = vadd.f32 %v677_v43, %v11316_v59  ;;  %v9263_v43 = vld [vmem:[#allocation3 + $0x3d0] sm:$0xf0] }
 0x17a   : > { %v1136_v20 = vmax.f32 %v901_v44, 0.0  ;;  %v1137_v8 = vmax.f32 %v1014_v14, 0.0  ;;  %v791_v44 = vadd.f32 %v790_v25, %v11319_v60 }
 0x17b   : > { %2037 = vmatmul.bf16.gmra.mxu0 %v11357_v46  ;;  %2126 = vmatmul.bf16.gmra.mxu1 %v11359_v47  ;;  %v9266_v46 = vor.u32 %v10440_v35, %v9263_v43 }
 0x17c   : > { %v11566_v57 = vpack.c.bf16 %v1136_v20, %v1132_v31  ;;  %v11568_v42 = vpack.c.bf16 %v1137_v8, %v1133_v29  ;;  %2215 = vmatmul.bf16.gmra.mxu2 %v11367_v50  ;;  %2304 = vmatmul.bf16.gmra.mxu3 %v11369_v51  ;;  %v1138_v29 = vmax.f32 %v678_v11, 0.0  ;;  %v1139_v20 = vmax.f32 %v791_v44, 0.0  ;;  %v10344_v8 = vld [vmem:[#allocation3 + $0xc4] sm:$0xf]  ;;  %v8879_v51 = vld [vmem:[#allocation3 + $0xd0] sm:$0xf0] }
 0x17d   : > { %v8882_v32 = vor.u32 %v10344_v8, %v8879_v51  ;;  %2628 = vmatpush.bf16.msra.mxu3 %v9266_v46  ;;  %v9010_v44 = vor.u32 %v10376_v4, %v9007_v0 }
 0x17e   : > { %13648 = vst [vmem:[#allocation45_spill] sm:$0xff] %v11566_v57 }
 0x17f   : > { %13649 = vst [vmem:[#allocation46_spill] sm:$0xff] %v11568_v42  ;;  %v903_v37 = vpop.f32.mrf.mxu2  ;;  %v1016_v5 = vpop.f32.mrf.mxu3  ;;  %2361 = vmatpush.bf16.msra.mxu0 %v8882_v32  ;;  %2450 = vmatpush.bf16.msra.mxu1 %v9010_v44 }
 0x180   : > { %v680_v30 = vpop.f32.mrf.mxu0  ;;  %v793_v13 = vpop.f32.mrf.mxu1  ;;  %v1017_v11 = vadd.f32 %v1016_v5, %v11218_v2 }
 0x181   : > { %v681_v14 = vadd.f32 %v680_v30, %v11316_v59  ;;  %v794_v31 = vadd.f32 %v793_v13, %v11319_v60  ;;  %v904_v30 = vadd.f32 %v903_v37, %v11215_v1 }
 0x183   : > { %v1142_v50 = vmax.f32 %v681_v14, 0.0  ;;  %v1143_v47 = vmax.f32 %v794_v31, 0.0 }
 0x185   : > { %v11576_v25 = vpack.c.bf16 %v1142_v50, %v1138_v29  ;;  %v11578_v27 = vpack.c.bf16 %v1143_v47, %v1139_v20  ;;  %v1140_v47 = vmax.f32 %v904_v30, 0.0  ;;  %v1141_v29 = vmax.f32 %v1017_v11, 0.0 }
 0x187   : > { %13650 = vst [vmem:[#allocation47_spill] sm:$0xff] %v11576_v25  ;;  %v906_v13 = vpop.f32.mrf.mxu2  ;;  %v1019_v14 = vpop.f32.mrf.mxu3 }
 0x188   : > { %13651 = vst [vmem:[#allocation48_spill] sm:$0xff] %v11578_v27  ;;  %v907_v51 = vadd.f32 %v906_v13, %v11215_v1  ;;  %v1020_v31 = vadd.f32 %v1019_v14, %v11218_v2  ;;  %v683_v8 = vpop.f32.mrf.mxu0  ;;  %v796_v50 = vpop.f32.mrf.mxu1 }
 0x189   : > { %v684_v46 = vadd.f32 %v683_v8, %v11316_v59  ;;  %v797_v5 = vadd.f32 %v796_v50, %v11319_v60 }
 0x18a   : > { %v1144_v20 = vmax.f32 %v907_v51, 0.0  ;;  %v1145_v32 = vmax.f32 %v1020_v31, 0.0 }
 0x18b   : > { %2042 = vmatmul.bf16.gmra.mxu0 %v11382_v26  ;;  %2131 = vmatmul.bf16.gmra.mxu1 %v11384_v28  ;;  %v1146_v13 = vmax.f32 %v684_v46, 0.0  ;;  %v1147_v14 = vmax.f32 %v797_v5, 0.0 }
 0x18c   : > { %v11586_v37 = vpack.c.bf16 %v1144_v20, %v1140_v47  ;;  %v11588_v0 = vpack.c.bf16 %v1145_v32, %v1141_v29  ;;  %2220 = vmatmul.bf16.gmra.mxu2 %v11393_v38  ;;  %2309 = vmatmul.bf16.gmra.mxu3 %v11395_v54 }
 0x18e   : > { %13652 = vst [vmem:[#allocation49_spill] sm:$0xff] %v11586_v37 }
 0x18f   : > { %13653 = vst [vmem:[#allocation50_spill] sm:$0xff] %v11588_v0  ;;  %v909_v35 = vpop.f32.mrf.mxu2  ;;  %v1022_v43 = vpop.f32.mrf.mxu3 }
 0x190   : > { %v686_v4 = vpop.f32.mrf.mxu0  ;;  %v799_v30 = vpop.f32.mrf.mxu1  ;;  %v910_v8 = vadd.f32 %v909_v35, %v11215_v1  ;;  %v1023_v50 = vadd.f32 %v1022_v43, %v11218_v2  ;;  %v10404_v43 = vld [vmem:[#allocation3 + $0x2a4] sm:$0xf] }
 0x191   : > { %v687_v11 = vadd.f32 %v686_v4, %v11316_v59  ;;  %v800_v44 = vadd.f32 %v799_v30, %v11319_v60 }
 0x192   : > { %v1148_v46 = vmax.f32 %v910_v8, 0.0  ;;  %v1149_v5 = vmax.f32 %v1023_v50, 0.0  ;;  %v1354_v50 = vld [vmem:[%s13352_s4] sm:$0xf] }
 0x193   : > { %v1150_v51 = vmax.f32 %v687_v11, 0.0  ;;  %v1151_v31 = vmax.f32 %v800_v44, 0.0 }
 0x195   : > { %v11596_v47 = vpack.c.bf16 %v1150_v51, %v1146_v13  ;;  %v11598_v29 = vpack.c.bf16 %v1151_v31, %v1147_v14  ;;  %v9119_v14 = vld [vmem:[#allocation3 + $0x2b0] sm:$0xf0] }
 0x197   : > { %v912_v20 = vpop.f32.mrf.mxu2  ;;  %v1025_v32 = vpop.f32.mrf.mxu3 }
 0x198   : > { %v913_v54 = vadd.f32 %v912_v20, %v11215_v1  ;;  %v1026_v4 = vadd.f32 %v1025_v32, %v11218_v2  ;;  %v689_v38 = vpop.f32.mrf.mxu0  ;;  %v802_v30 = vpop.f32.mrf.mxu1  ;;  %v9122_v20 = vor.u32 %v10404_v43, %v9119_v14  ;;  %v9247_v14 = vld [vmem:[#allocation3 + $0x3b0] sm:$0xf0] }
 0x199   : > { %v690_v51 = vadd.f32 %v689_v38, %v11316_v59  ;;  %v803_v31 = vadd.f32 %v802_v30, %v11319_v60 }
 0x19a   : > { %v1152_v11 = vmax.f32 %v913_v54, 0.0  ;;  %v1153_v44 = vmax.f32 %v1026_v4, 0.0  ;;  %2540 = vmatpush.bf16.msra.mxu2 %v9122_v20 }
 0x19b   : > { %2047 = vmatmul.bf16.gmra.mxu0 %v11416_v34  ;;  %2136 = vmatmul.bf16.gmra.mxu1 %v11418_v56  ;;  %v1155_v38 = vmax.f32 %v803_v31, 0.0  ;;  %v8863_v56 = vld [vmem:[#allocation3 + $0xb0] sm:$0xf0]  ;;  %v10436_v34 = vld [vmem:[#allocation3 + $0x3a4] sm:$0xf] }
 0x19c   : > { %v11606_v13 = vpack.c.bf16 %v1152_v11, %v1148_v46  ;;  %v11608_v35 = vpack.c.bf16 %v1153_v44, %v1149_v5  ;;  %2225 = vmatmul.bf16.gmra.mxu2 %v11430_v6  ;;  %2314 = vmatmul.bf16.gmra.mxu3 %v11432_v21  ;;  %v11619_v11 = vperm.slane %v1354_v50, 0  ;;  %v1154_v44 = vmax.f32 %v690_v51, 0.0  ;;  %v10340_v6 = vld [vmem:[#allocation3 + $0xa4] sm:$0xf] }
 0x19d   : > { %v8866_v43 = vor.u32 %v10340_v6, %v8863_v56  ;;  %v9250_v20 = vor.u32 %v10436_v34, %v9247_v14 }
 0x19f   : > { %v915_v54 = vpop.f32.mrf.mxu2  ;;  %v1028_v8 = vpop.f32.mrf.mxu3  ;;  %2362 = vmatpush.bf16.msra.mxu0 %v8866_v43  ;;  %2629 = vmatpush.bf16.msra.mxu3 %v9250_v20 }
 0x1a0   : > { %v692_v32 = vpop.f32.mrf.mxu0  ;;  %v805_v4 = vpop.f32.mrf.mxu1  ;;  %v1029_v50 = vadd.f32 %v1028_v8, %v11218_v2 }
 0x1a1   : > { %v693_v46 = vadd.f32 %v692_v32, %v11316_v59  ;;  %v806_v5 = vadd.f32 %v805_v4, %v11319_v60  ;;  %v8991_v59 = vld [vmem:[#allocation3 + $0x1b0] sm:$0xf0]  ;;  %v916_v60 = vadd.f32 %v915_v54, %v11215_v1 }
 0x1a2   : > { %v8994_v51 = vor.u32 %v10372_v53, %v8991_v59 }
 0x1a3   : > { %v1158_v21 = vmax.f32 %v693_v46, 0.0  ;;  %v1159_v30 = vmax.f32 %v806_v5, 0.0  ;;  %v1156_v6 = vmax.f32 %v916_v60, 0.0 }
 0x1a4   : > { %2451 = vmatpush.bf16.msra.mxu1 %v8994_v51 }
 0x1a5   : > { %v11621_v28 = vpack.c.bf16 %v1158_v21, %v1154_v44  ;;  %v11623_v26 = vpack.c.bf16 %v1159_v30, %v1155_v38  ;;  %v1157_v44 = vmax.f32 %v1029_v50, 0.0 }
 0x1a7   : > { %v918_v31 = vpop.f32.mrf.mxu2  ;;  %v1031_v32 = vpop.f32.mrf.mxu3 }
 0x1a8   : > { %v919_v4 = vadd.f32 %v918_v31, %v11215_v1  ;;  %v1032_v21 = vadd.f32 %v1031_v32, %v11218_v2  ;;  %v2013_v46 = vpop.f32.mrf.mxu0  ;;  %v2102_v5 = vpop.f32.mrf.mxu1 }
 0x1a9   : > { %v2014_v56 = vadd.f32 %v2013_v46, %v11619_v11 }
 0x1aa   : > { %v1160_v54 = vmax.f32 %v919_v4, 0.0  ;;  %v1161_v38 = vmax.f32 %v1032_v21, 0.0 }
 0x1ab   : > { %v2103_v8 = vadd.f32 %v2102_v5, %v2014_v56  ;;  %2052 = vmatmul.bf16.gmra.mxu0 %v11448_v23  ;;  %2141 = vmatmul.bf16.gmra.mxu1 %v11450_v18 }
 0x1ac   : > { %v11632_v34 = vpack.c.bf16 %v1160_v54, %v1156_v6  ;;  %v11634_v1 = vpack.c.bf16 %v1161_v38, %v1157_v44  ;;  %2230 = vmatmul.bf16.gmra.mxu2 %v11462_v7  ;;  %2319 = vmatmul.bf16.gmra.mxu3 %v11464_v36  ;;  %v10400_v54 = vld [vmem:[#allocation3 + $0x284] sm:$0xf]  ;;  %v9103_v38 = vld [vmem:[#allocation3 + $0x290] sm:$0xf0] }
 0x1af   : > { %v2191_v2 = vpop.f32.mrf.mxu2  ;;  %v2280_v53 = vpop.f32.mrf.mxu3 }
 0x1b0   : > { %v2192_v30 = vadd.f32 %v2191_v2, %v2103_v8  ;;  %v2015_v43 = vpop.f32.mrf.mxu0  ;;  %v2104_v14 = vpop.f32.mrf.mxu1 }
 0x1b1   : > { %v2016_v59 = vadd.f32 %v2015_v43, %v11619_v11 }
 0x1b2   : > { %v2281_v60 = vadd.f32 %v2280_v53, %v2192_v30  ;;  %v9106_v53 = vor.u32 %v10400_v54, %v9103_v38 }
 0x1b3   : > { %v2105_v50 = vadd.f32 %v2104_v14, %v2016_v59 }
 0x1b4   : > { %v3428_v56 = vmax.f32 %v2281_v60, 0.0  ;;  %2541 = vmatpush.bf16.msra.mxu2 %v9106_v53 }
 0x1b7   : > { %v2193_v20 = vpop.f32.mrf.mxu2  ;;  %v2282_v51 = vpop.f32.mrf.mxu3 }
 0x1b8   : > { %v2194_v31 = vadd.f32 %v2193_v20, %v2105_v50  ;;  %v2018_v32 = vpop.f32.mrf.mxu0  ;;  %v2107_v4 = vpop.f32.mrf.mxu1  ;;  %v10336_v20 = vld [vmem:[#allocation3 + $0x84] sm:$0xf] }
 0x1b9   : > { %v2019_v21 = vadd.f32 %v2018_v32, %v11619_v11  ;;  %v10432_v32 = vld [vmem:[#allocation3 + $0x384] sm:$0xf] }
 0x1ba   : > { %v2283_v46 = vadd.f32 %v2282_v51, %v2194_v31  ;;  %v8847_v51 = vld [vmem:[#allocation3 + $0x90] sm:$0xf0] }
 0x1bb   : > { %v2108_v5 = vadd.f32 %v2107_v4, %v2019_v21  ;;  %2057 = vmatmul.bf16.gmra.mxu0 %v11480_v52  ;;  %2146 = vmatmul.bf16.gmra.mxu1 %v11482_v39  ;;  %v8850_v31 = vor.u32 %v10336_v20, %v8847_v51  ;;  %v9231_v4 = vld [vmem:[#allocation3 + $0x390] sm:$0xf0]  ;;  %v10368_v21 = vld [vmem:[#allocation3 + $0x184] sm:$0xf] }
 0x1bc   : > { %v3432_v6 = vmax.f32 %v2283_v46, 0.0  ;;  %2235 = vmatmul.bf16.gmra.mxu2 %v11494_v63  ;;  %2324 = vmatmul.bf16.gmra.mxu3 %v11496_v9  ;;  %v9234_v46 = vor.u32 %v10432_v32, %v9231_v4 }
 0x1bd   : > { %2363 = vmatpush.bf16.msra.mxu0 %v8850_v31 }
 0x1be   : > { %v11644_v44 = vpack.c.bf16 %v3432_v6, %v3428_v56  ;;  %v8975_v56 = vld [vmem:[#allocation3 + $0x190] sm:$0xf0]  ;;  %2630 = vmatpush.bf16.msra.mxu3 %v9234_v46 }
 0x1bf   : > { %v2196_v8 = vpop.f32.mrf.mxu2  ;;  %v2285_v2 = vpop.f32.mrf.mxu3  ;;  %v8978_v54 = vor.u32 %v10368_v21, %v8975_v56 }
 0x1c0   : > { %13654 = vst [vmem:[#allocation51_spill] sm:$0xff] %v11644_v44  ;;  %v2197_v30 = vadd.f32 %v2196_v8, %v2108_v5  ;;  %v2020_v43 = vpop.f32.mrf.mxu0  ;;  %v2109_v14 = vpop.f32.mrf.mxu1 }
 0x1c1   : > { %v2021_v59 = vadd.f32 %v2020_v43, %v11619_v11  ;;  %2452 = vmatpush.bf16.msra.mxu1 %v8978_v54 }
 0x1c2   : > { %v2286_v50 = vadd.f32 %v2285_v2, %v2197_v30 }
 0x1c3   : > { %v2110_v60 = vadd.f32 %v2109_v14, %v2021_v59 }
 0x1c4   : > { %v3436_v43 = vmax.f32 %v2286_v50, 0.0 }
 0x1c7   : > { %v2198_v6 = vpop.f32.mrf.mxu2  ;;  %v2287_v44 = vpop.f32.mrf.mxu3 }
 0x1c8   : > { %v2199_v5 = vadd.f32 %v2198_v6, %v2110_v60  ;;  %v2023_v38 = vpop.f32.mrf.mxu0  ;;  %v2112_v8 = vpop.f32.mrf.mxu1 }
 0x1c9   : > { %v2024_v53 = vadd.f32 %v2023_v38, %v11619_v11 }
 0x1ca   : > { %v2288_v2 = vadd.f32 %v2287_v44, %v2199_v5 }
 0x1cb   : > { %v2113_v30 = vadd.f32 %v2112_v8, %v2024_v53  ;;  %2062 = vmatmul.bf16.gmra.mxu0 %v11512_v22  ;;  %2151 = vmatmul.bf16.gmra.mxu1 %v11514_v45 }
 0x1cc   : > { %v3440_v14 = vmax.f32 %v2288_v2, 0.0  ;;  %2240 = vmatmul.bf16.gmra.mxu2 %v11526_v33  ;;  %2329 = vmatmul.bf16.gmra.mxu3 %v11528_v41 }
 0x1ce   : > { %v11652_v59 = vpack.c.bf16 %v3440_v14, %v3436_v43  ;;  %v10396_v43 = vld [vmem:[#allocation3 + $0x264] sm:$0xf]  ;;  %v9087_v14 = vld [vmem:[#allocation3 + $0x270] sm:$0xf0] }
 0x1cf   : > { %v2201_v60 = vpop.f32.mrf.mxu2  ;;  %v2290_v20 = vpop.f32.mrf.mxu3 }
 0x1d0   : > { %13655 = vst [vmem:[#allocation52_spill] sm:$0xff] %v11652_v59  ;;  %v2202_v51 = vadd.f32 %v2201_v60, %v2113_v30  ;;  %v2025_v31 = vpop.f32.mrf.mxu0  ;;  %v2114_v32 = vpop.f32.mrf.mxu1 }
 0x1d1   : > { %v2026_v44 = vadd.f32 %v2025_v31, %v11619_v11 }
 0x1d2   : > { %v2291_v4 = vadd.f32 %v2290_v20, %v2202_v51  ;;  %v9090_v51 = vor.u32 %v10396_v43, %v9087_v14 }
 0x1d3   : > { %v2115_v21 = vadd.f32 %v2114_v32, %v2026_v44 }
 0x1d4   : > { %v3444_v53 = vmax.f32 %v2291_v4, 0.0  ;;  %2542 = vmatpush.bf16.msra.mxu2 %v9090_v51 }
 0x1d7   : > { %v2203_v46 = vpop.f32.mrf.mxu2  ;;  %v2292_v56 = vpop.f32.mrf.mxu3 }
 0x1d8   : > { %v2204_v6 = vadd.f32 %v2203_v46, %v2115_v21  ;;  %v2028_v50 = vpop.f32.mrf.mxu0  ;;  %v2117_v54 = vpop.f32.mrf.mxu1 }
 0x1d9   : > { %v2029_v5 = vadd.f32 %v2028_v50, %v11619_v11 }
 0x1da   : > { %v2293_v38 = vadd.f32 %v2292_v56, %v2204_v6  ;;  %v10332_v56 = vld [vmem:[#allocation3 + $0x64] sm:$0xf]  ;;  %v8831_v6 = vld [vmem:[#allocation3 + $0x70] sm:$0xf0] }
 0x1db   : > { %v2118_v8 = vadd.f32 %v2117_v54, %v2029_v5  ;;  %2067 = vmatmul.bf16.gmra.mxu0 %v11536_v3  ;;  %2156 = vmatmul.bf16.gmra.mxu1 %v11538_v55  ;;  %v8834_v50 = vor.u32 %v10332_v56, %v8831_v6  ;;  %v10428_v54 = vld [vmem:[#allocation3 + $0x364] sm:$0xf]  ;;  %v9215_v5 = vld [vmem:[#allocation3 + $0x370] sm:$0xf0] }
 0x1dc   : > { %v3448_v2 = vmax.f32 %v2293_v38, 0.0  ;;  %2245 = vmatmul.bf16.gmra.mxu2 %v11546_v10  ;;  %2334 = vmatmul.bf16.gmra.mxu3 %v11548_v58  ;;  %v10364_v38 = vld [vmem:[#allocation3 + $0x164] sm:$0xf] }
 0x1dd   : > { %2364 = vmatpush.bf16.msra.mxu0 %v8834_v50 }
 0x1de   : > { %v11660_v30 = vpack.c.bf16 %v3448_v2, %v3444_v53  ;;  %v9218_v53 = vor.u32 %v10428_v54, %v9215_v5  ;;  %v8959_v2 = vld [vmem:[#allocation3 + $0x170] sm:$0xf0] }
 0x1df   : > { %v2206_v60 = vpop.f32.mrf.mxu2  ;;  %v2295_v20 = vpop.f32.mrf.mxu3  ;;  %v8962_v43 = vor.u32 %v10364_v38, %v8959_v2 }
 0x1e0   : > { %13656 = vst [vmem:[#allocation53_spill] sm:$0xff] %v11660_v30  ;;  %v2207_v31 = vadd.f32 %v2206_v60, %v2118_v8  ;;  %v2030_v32 = vpop.f32.mrf.mxu0  ;;  %v2119_v44 = vpop.f32.mrf.mxu1  ;;  %2631 = vmatpush.bf16.msra.mxu3 %v9218_v53 }
 0x1e1   : > { %v2031_v21 = vadd.f32 %v2030_v32, %v11619_v11  ;;  %2453 = vmatpush.bf16.msra.mxu1 %v8962_v43 }
 0x1e2   : > { %v2296_v46 = vadd.f32 %v2295_v20, %v2207_v31 }
 0x1e3   : > { %v2120_v4 = vadd.f32 %v2119_v44, %v2031_v21 }
 0x1e4   : > { %v3452_v32 = vmax.f32 %v2296_v46, 0.0 }
 0x1e7   : > { %v2208_v30 = vpop.f32.mrf.mxu2  ;;  %v2297_v59 = vpop.f32.mrf.mxu3 }
 0x1e8   : > { %v2209_v8 = vadd.f32 %v2208_v30, %v2120_v4  ;;  %v2033_v14 = vpop.f32.mrf.mxu0  ;;  %v2122_v60 = vpop.f32.mrf.mxu1 }
 0x1e9   : > { %v2034_v51 = vadd.f32 %v2033_v14, %v11619_v11 }
 0x1ea   : > { %v2298_v20 = vadd.f32 %v2297_v59, %v2209_v8 }
 0x1eb   : > { %v2123_v31 = vadd.f32 %v2122_v60, %v2034_v51  ;;  %2072 = vmatmul.bf16.gmra.mxu0 %v11556_v49  ;;  %2161 = vmatmul.bf16.gmra.mxu1 %v11558_v40 }
 0x1ec   : > { %v3456_v44 = vmax.f32 %v2298_v20, 0.0  ;;  %2250 = vmatmul.bf16.gmra.mxu2 %v11566_v57  ;;  %2339 = vmatmul.bf16.gmra.mxu3 %v11568_v42 }
 0x1ee   : > { %v11668_v21 = vpack.c.bf16 %v3456_v44, %v3452_v32  ;;  %v10392_v32 = vld [vmem:[#allocation3 + $0x244] sm:$0xf]  ;;  %v9071_v44 = vld [vmem:[#allocation3 + $0x250] sm:$0xf0] }
 0x1ef   : > { %v2211_v30 = vpop.f32.mrf.mxu2  ;;  %v2300_v4 = vpop.f32.mrf.mxu3 }
 0x1f0   : > { %13657 = vst [vmem:[#allocation54_spill] sm:$0xff] %v11668_v21  ;;  %v2212_v56 = vadd.f32 %v2211_v30, %v2123_v31  ;;  %v2035_v6 = vpop.f32.mrf.mxu0  ;;  %v2124_v50 = vpop.f32.mrf.mxu1  ;;  %v10328_v30 = vld [vmem:[#allocation3 + $0x44] sm:$0xf]  ;;  %v8799_v21 = vld [vmem:[#allocation3 + $0x30] sm:$0xf0] }
 0x1f1   : > { %v2036_v59 = vadd.f32 %v2035_v6, %v11619_v11  ;;  %v9074_v6 = vor.u32 %v10392_v32, %v9071_v44  ;;  %v10356_v32 = vld [vmem:[#allocation3 + $0x124] sm:$0xf] }
 0x1f2   : > { %v2301_v54 = vadd.f32 %v2300_v4, %v2212_v56 }
 0x1f3   : > { %v2125_v5 = vadd.f32 %v2124_v50, %v2036_v59  ;;  %v8815_v50 = vld [vmem:[#allocation3 + $0x50] sm:$0xf0]  ;;  %v10424_v59 = vld [vmem:[#allocation3 + $0x344] sm:$0xf]  ;;  %2543 = vmatpush.bf16.msra.mxu2 %v9074_v6 }
 0x1f4   : > { %v3460_v51 = vmax.f32 %v2301_v54, 0.0  ;;  %v8818_v54 = vor.u32 %v10328_v30, %v8815_v50  ;;  %v10320_v6 = vld [vmem:[#allocation3 + $0x4] sm:$0xf] }
 0x1f6   : > { %2365 = vmatpush.bf16.msra.mxu0 %v8818_v54 }
 0x1f7   : > { %v2213_v38 = vpop.f32.mrf.mxu2  ;;  %v2302_v53 = vpop.f32.mrf.mxu3 }
 0x1f8   : > { %v2214_v2 = vadd.f32 %v2213_v38, %v2125_v5  ;;  %v2038_v46 = vpop.f32.mrf.mxu0  ;;  %v2127_v43 = vpop.f32.mrf.mxu1  ;;  %v9199_v5 = vld [vmem:[#allocation3 + $0x350] sm:$0xf0] }
 0x1f9   : > { %v2039_v8 = vadd.f32 %v2038_v46, %v11619_v11  ;;  %v9202_v46 = vor.u32 %v10424_v59, %v9199_v5  ;;  %v10420_v59 = vld [vmem:[#allocation3 + $0x324] sm:$0xf]  ;;  %v9183_v5 = vld [vmem:[#allocation3 + $0x330] sm:$0xf0] }
 0x1fa   : > { %v2303_v14 = vadd.f32 %v2302_v53, %v2214_v2 }
 0x1fb   : > { %v2128_v60 = vadd.f32 %v2127_v43, %v2039_v8  ;;  %2077 = vmatmul.bf16.gmra.mxu0 %v11576_v25  ;;  %2166 = vmatmul.bf16.gmra.mxu1 %v11578_v27  ;;  %v10360_v43 = vld [vmem:[#allocation3 + $0x144] sm:$0xf]  ;;  %v8943_v8 = vld [vmem:[#allocation3 + $0x150] sm:$0xf0]  ;;  %v9186_v27 = vor.u32 %v10420_v59, %v9183_v5 }
 0x1fc   : > { %v3464_v20 = vmax.f32 %v2303_v14, 0.0  ;;  %2255 = vmatmul.bf16.gmra.mxu2 %v11586_v37  ;;  %2344 = vmatmul.bf16.gmra.mxu3 %v11588_v0  ;;  %v9055_v37 = vld [vmem:[#allocation3 + $0x230] sm:$0xf0] }
 0x1fd   : > { %2632 = vmatpush.bf16.msra.mxu3 %v9202_v46  ;;  %v8911_v46 = vld [vmem:[#allocation3 + $0x110] sm:$0xf0] }
 0x1fe   : > { %v11676_v31 = vpack.c.bf16 %v3464_v20, %v3460_v51  ;;  %v8946_v51 = vor.u32 %v10360_v43, %v8943_v8 }
 0x1ff   : > { %v2216_v4 = vpop.f32.mrf.mxu2  ;;  %v2305_v56 = vpop.f32.mrf.mxu3 }
 0x200   : > { %13658 = vst [vmem:[#allocation55_spill] sm:$0xff] %v11676_v31  ;;  %v2217_v38 = vadd.f32 %v2216_v4, %v2128_v60  ;;  %v2040_v53 = vpop.f32.mrf.mxu0  ;;  %v2129_v2 = vpop.f32.mrf.mxu1  ;;  %v10324_v31 = vld [vmem:[#allocation3 + $0x24] sm:$0xf]  ;;  %2454 = vmatpush.bf16.msra.mxu1 %v8946_v51  ;;  %v8927_v60 = vld [vmem:[#allocation3 + $0x130] sm:$0xf0] }
 0x201   : > { %v2041_v14 = vadd.f32 %v2040_v53, %v11619_v11  ;;  %v8802_v0 = vor.u32 %v10324_v31, %v8799_v21  ;;  %v10388_v4 = vld [vmem:[#allocation3 + $0x224] sm:$0xf]  ;;  %v8930_v30 = vor.u32 %v10356_v32, %v8927_v60  ;;  %2633 = vmatpush.bf16.msra.mxu3 %v9186_v27  ;;  %v9039_v31 = vld [vmem:[#allocation3 + $0x210] sm:$0xf0] }
 0x202   : > { %v2306_v20 = vadd.f32 %v2305_v56, %v2217_v38  ;;  %v9058_v50 = vor.u32 %v10388_v4, %v9055_v37  ;;  %v8783_v56 = vld [vmem:[#allocation3 + $0x10] sm:$0xf0]  ;;  %v10352_v38 = vld [vmem:[#allocation3 + $0x104] sm:$0xf] }
 0x203   : > { %v2130_v44 = vadd.f32 %v2129_v2, %v2041_v14  ;;  %2366 = vmatpush.bf16.msra.mxu0 %v8802_v0  ;;  %v8786_v2 = vor.u32 %v10320_v6, %v8783_v56  ;;  %v10384_v21 = vld [vmem:[#allocation3 + $0x204] sm:$0xf]  ;;  %v9167_v32 = vld [vmem:[#allocation3 + $0x310] sm:$0xf0]  ;;  %v8914_v60 = vor.u32 %v10352_v38, %v8911_v46 }
 0x204   : > { %2544 = vmatpush.bf16.msra.mxu2 %v9058_v50  ;;  %2455 = vmatpush.bf16.msra.mxu1 %v8930_v30  ;;  %v9042_v37 = vor.u32 %v10384_v21, %v9039_v31  ;;  %v10416_v51 = vld [vmem:[#allocation3 + $0x304] sm:$0xf]  ;;  %v3468_v27 = vmax.f32 %v2306_v20, 0.0 }
 0x205   : > { %v9170_v4 = vor.u32 %v10416_v51, %v9167_v32 }
 0x207   : > { %v2218_v53 = vpop.f32.mrf.mxu2  ;;  %v2307_v54 = vpop.f32.mrf.mxu3  ;;  %2367 = vmatpush.bf16.msra.mxu0 %v8786_v2  ;;  %2634 = vmatpush.bf16.msra.mxu3 %v9170_v4 }
 0x208   : > { %v2219_v43 = vadd.f32 %v2218_v53, %v2130_v44  ;;  %v2043_v8 = vpop.f32.mrf.mxu0  ;;  %v2132_v14 = vpop.f32.mrf.mxu1  ;;  %2545 = vmatpush.bf16.msra.mxu2 %v9042_v37  ;;  %2456 = vmatpush.bf16.msra.mxu1 %v8914_v60 }
 0x209   : > { %v2044_v0 = vadd.f32 %v2043_v8, %v11619_v11 }
 0x20a   : > { %v2308_v50 = vadd.f32 %v2307_v54, %v2219_v43 }
 0x20b   : > { %v2133_v59 = vadd.f32 %v2132_v14, %v2044_v0  ;;  %2082 = vmatmul.bf16.gmra.mxu0 %v11596_v47  ;;  %2171 = vmatmul.bf16.gmra.mxu1 %v11598_v29 }
 0x20c   : > { %v3472_v30 = vmax.f32 %v2308_v50, 0.0  ;;  %2260 = vmatmul.bf16.gmra.mxu2 %v11606_v13  ;;  %2349 = vmatmul.bf16.gmra.mxu3 %v11608_v35 }
 0x20e   : > { %v11684_v44 = vpack.c.bf16 %v3472_v30, %v3468_v27 }
 0x20f   : > { %v2221_v5 = vpop.f32.mrf.mxu2  ;;  %v2310_v6 = vpop.f32.mrf.mxu3 }
 0x210   : > { %13659 = vst [vmem:[#allocation56_spill] sm:$0xff] %v11684_v44  ;;  %v2222_v56 = vadd.f32 %v2221_v5, %v2133_v59  ;;  %v2045_v38 = vpop.f32.mrf.mxu0  ;;  %v2134_v53 = vpop.f32.mrf.mxu1 }
 0x211   : > { %v2046_v54 = vadd.f32 %v2045_v38, %v11619_v11 }
 0x212   : > { %v2311_v2 = vadd.f32 %v2310_v6, %v2222_v56 }
 0x213   : > { %v2135_v46 = vadd.f32 %v2134_v53, %v2046_v54 }
 0x214   : > { %v3476_v32 = vmax.f32 %v2311_v2, 0.0 }
 0x217   : > { %v2223_v21 = vpop.f32.mrf.mxu2  ;;  %v2312_v20 = vpop.f32.mrf.mxu3 }
 0x218   : > { %v2224_v31 = vadd.f32 %v2223_v21, %v2135_v46  ;;  %v2048_v43 = vpop.f32.mrf.mxu0  ;;  %v2137_v8 = vpop.f32.mrf.mxu1 }
 0x219   : > { %v2049_v14 = vadd.f32 %v2048_v43, %v11619_v11 }
 0x21a   : > { %v2313_v37 = vadd.f32 %v2312_v20, %v2224_v31 }
 0x21b   : > { %v2138_v51 = vadd.f32 %v2137_v8, %v2049_v14  ;;  %2087 = vmatmul.bf16.gmra.mxu0 %v11621_v28  ;;  %2176 = vmatmul.bf16.gmra.mxu1 %v11623_v26 }
 0x21c   : > { %v3480_v0 = vmax.f32 %v2313_v37, 0.0  ;;  %2265 = vmatmul.bf16.gmra.mxu2 %v11632_v34  ;;  %2354 = vmatmul.bf16.gmra.mxu3 %v11634_v1 }
 0x21e   : > { %v11692_v60 = vpack.c.bf16 %v3480_v0, %v3476_v32 }
 0x21f   : > { %v2226_v4 = vpop.f32.mrf.mxu2  ;;  %v2315_v50 = vpop.f32.mrf.mxu3 }
 0x220   : > { %13660 = vst [vmem:[#allocation57_spill] sm:$0xff] %v11692_v60  ;;  %v2227_v59 = vadd.f32 %v2226_v4, %v2138_v51  ;;  %v2050_v27 = vpop.f32.mrf.mxu0  ;;  %v2139_v30 = vpop.f32.mrf.mxu1  ;;  %v10351_v60 = vld [vmem:[#allocation3 + $0xf4] sm:$0xf0] }
 0x221   : > { %v2051_v5 = vadd.f32 %v2050_v27, %v11619_v11 }
 0x222   : > { %v2316_v6 = vadd.f32 %v2315_v50, %v2227_v59 }
 0x223   : > { %v2140_v56 = vadd.f32 %v2139_v30, %v2051_v5 }
 0x224   : > { %v3484_v43 = vmax.f32 %v2316_v6, 0.0 }
 0x227   : > { %v2228_v38 = vpop.f32.mrf.mxu2  ;;  %v2317_v53 = vpop.f32.mrf.mxu3 }
 0x228   : > { %v2229_v54 = vadd.f32 %v2228_v38, %v2140_v56  ;;  %v2053_v2 = vpop.f32.mrf.mxu0  ;;  %v2142_v46 = vpop.f32.mrf.mxu1 }
 0x229   : > { %v2054_v21 = vadd.f32 %v2053_v2, %v11619_v11 }
 0x22a   : > { %v2318_v20 = vadd.f32 %v2317_v53, %v2229_v54 }
 0x22b   : > { %v2143_v31 = vadd.f32 %v2142_v46, %v2054_v21  ;;  %2368 = vmatmul.bf16.vlgmr.msra.gmra.mxu0 %v11424_v12  ;;  %2457 = vmatmul.bf16.vlgmr.msra.gmra.mxu1 %v11426_v15 }
 0x22c   : > { %v3488_v8 = vmax.f32 %v2318_v20, 0.0  ;;  %2546 = vmatmul.bf16.vlgmr.msra.gmra.mxu2 %v11235_v16  ;;  %2635 = vmatmul.bf16.vlgmr.msra.gmra.mxu3 %v11237_v17  ;;  %v13662_v20 = vld [vmem:[#allocation15_spill] sm:$0xff] }
 0x22e   : > { %v11700_v14 = vpack.c.bf16 %v3488_v8, %v3484_v43 }
 0x22f   : > { %v2231_v37 = vpop.f32.mrf.mxu2  ;;  %v2320_v51 = vpop.f32.mrf.mxu3 }
 0x230   : > { %13661 = vst [vmem:[#allocation58_spill] sm:$0xff] %v11700_v14  ;;  %v2232_v32 = vadd.f32 %v2231_v37, %v2143_v31  ;;  %v2055_v0 = vpop.f32.mrf.mxu0  ;;  %v2144_v4 = vpop.f32.mrf.mxu1 }
 0x231   : > { %v2056_v50 = vadd.f32 %v2055_v0, %v11619_v11 }
 0x232   : > { %v2321_v59 = vadd.f32 %v2320_v51, %v2232_v32 }
 0x233   : > { %v2145_v27 = vadd.f32 %v2144_v4, %v2056_v50 }
 0x234   : > { %v3492_v46 = vmax.f32 %v2321_v59, 0.0 }
 0x237   : > { %v2233_v30 = vpop.f32.mrf.mxu2  ;;  %v2322_v5 = vpop.f32.mrf.mxu3 }
 0x238   : > { %v2234_v56 = vadd.f32 %v2233_v30, %v2145_v27  ;;  %v2058_v6 = vpop.f32.mrf.mxu0  ;;  %v2147_v38 = vpop.f32.mrf.mxu1 }
 0x239   : > { %v2059_v53 = vadd.f32 %v2058_v6, %v11619_v11 }
 0x23a   : > { %v2323_v54 = vadd.f32 %v2322_v5, %v2234_v56 }
 0x23b   : > { %v2148_v2 = vadd.f32 %v2147_v38, %v2059_v53  ;;  %2373 = vmatmul.bf16.gmra.mxu0 %v11456_v61  ;;  %2462 = vmatmul.bf16.gmra.mxu1 %v11458_v62 }
 0x23c   : > { %v3496_v21 = vmax.f32 %v2323_v54, 0.0  ;;  %2551 = vmatmul.bf16.gmra.mxu2 %v11261_v48  ;;  %2640 = vmatmul.bf16.gmra.mxu3 %v13662_v20 }
 0x23e   : > { %v11708_v31 = vpack.c.bf16 %v3496_v21, %v3492_v46  ;;  %v13664_v46 = vld [vmem:[#allocation16_spill] sm:$0xff]  ;;  %v13665_v21 = vld [vmem:[#allocation17_spill] sm:$0xff] }
 0x23f   : > { %v2236_v43 = vpop.f32.mrf.mxu2  ;;  %v2325_v8 = vpop.f32.mrf.mxu3 }
 0x240   : > { %13663 = vst [vmem:[#allocation15_spill] sm:$0xff] %v11708_v31  ;;  %v2237_v37 = vadd.f32 %v2236_v43, %v2148_v2  ;;  %v2060_v51 = vpop.f32.mrf.mxu0  ;;  %v2149_v32 = vpop.f32.mrf.mxu1 }
 0x241   : > { %v2061_v0 = vadd.f32 %v2060_v51, %v11619_v11 }
 0x242   : > { %v2326_v4 = vadd.f32 %v2325_v8, %v2237_v37 }
 0x243   : > { %v2150_v50 = vadd.f32 %v2149_v32, %v2061_v0 }
 0x244   : > { %v3500_v54 = vmax.f32 %v2326_v4, 0.0 }
 0x247   : > { %v2238_v27 = vpop.f32.mrf.mxu2  ;;  %v2327_v30 = vpop.f32.mrf.mxu3 }
 0x248   : > { %v2239_v5 = vadd.f32 %v2238_v27, %v2150_v50  ;;  %v2063_v59 = vpop.f32.mrf.mxu0  ;;  %v2152_v56 = vpop.f32.mrf.mxu1 }
 0x249   : > { %v2064_v6 = vadd.f32 %v2063_v59, %v11619_v11 }
 0x24a   : > { %v2328_v38 = vadd.f32 %v2327_v30, %v2239_v5 }
 0x24b   : > { %v2153_v53 = vadd.f32 %v2152_v56, %v2064_v6  ;;  %2378 = vmatmul.bf16.gmra.mxu0 %v11488_v24  ;;  %2467 = vmatmul.bf16.gmra.mxu1 %v11490_v19 }
 0x24c   : > { %v3504_v2 = vmax.f32 %v2328_v38, 0.0  ;;  %2556 = vmatmul.bf16.gmra.mxu2 %v13664_v46  ;;  %2645 = vmatmul.bf16.gmra.mxu3 %v13665_v21 }
 0x24e   : > { %v11716_v43 = vpack.c.bf16 %v3504_v2, %v3500_v54  ;;  %v13667_v54 = vld [vmem:[#allocation40_spill] sm:$0xff]  ;;  %v13668_v2 = vld [vmem:[#allocation41_spill] sm:$0xff] }
 0x24f   : > { %v2241_v8 = vpop.f32.mrf.mxu2  ;;  %v2330_v37 = vpop.f32.mrf.mxu3 }
 0x250   : > { %13666 = vst [vmem:[#allocation16_spill] sm:$0xff] %v11716_v43  ;;  %v2242_v51 = vadd.f32 %v2241_v8, %v2153_v53  ;;  %v2065_v32 = vpop.f32.mrf.mxu0  ;;  %v2154_v0 = vpop.f32.mrf.mxu1  ;;  %v13669_v43 = vld [vmem:[#allocation18_spill] sm:$0xff] }
 0x251   : > { %v2066_v50 = vadd.f32 %v2065_v32, %v11619_v11  ;;  %v13670_v32 = vld [vmem:[#allocation19_spill] sm:$0xff] }
 0x252   : > { %v2331_v27 = vadd.f32 %v2330_v37, %v2242_v51  ;;  %v9157_v51 = vld [vmem:[#allocation3 + $0x2e8] sm:$0xf] }
 0x253   : > { %v2155_v30 = vadd.f32 %v2154_v0, %v2066_v50  ;;  %v10415_v0 = vld [vmem:[#allocation3 + $0x2f4] sm:$0xf0] }
 0x254   : > { %v3508_v53 = vmax.f32 %v2331_v27, 0.0 }
 0x257   : > { %v2243_v5 = vpop.f32.mrf.mxu2  ;;  %v2332_v59 = vpop.f32.mrf.mxu3 }
 0x258   : > { %v2244_v56 = vadd.f32 %v2243_v5, %v2155_v30  ;;  %v2068_v4 = vpop.f32.mrf.mxu0  ;;  %v2157_v6 = vpop.f32.mrf.mxu1  ;;  %v9158_v5 = vor.u32 %v10415_v0, %v9157_v51 }
 0x259   : > { %v2069_v38 = vadd.f32 %v2068_v4, %v11619_v11 }
 0x25a   : > { %v2333_v31 = vadd.f32 %v2332_v59, %v2244_v56  ;;  %2894 = vmatpush.bf16.msrb.mxu2 %v9158_v5 }
 0x25b   : > { %v2158_v14 = vadd.f32 %v2157_v6, %v2069_v38  ;;  %2383 = vmatmul.bf16.gmra.mxu0 %v13667_v54  ;;  %2472 = vmatmul.bf16.gmra.mxu1 %v13668_v2 }
 0x25c   : > { %v3512_v8 = vmax.f32 %v2333_v31, 0.0  ;;  %2561 = vmatmul.bf16.gmra.mxu2 %v13669_v43  ;;  %2650 = vmatmul.bf16.gmra.mxu3 %v13670_v32  ;;  %v8901_v31 = vld [vmem:[#allocation3 + $0xe8] sm:$0xf]  ;;  %v10447_v32 = vld [vmem:[#allocation3 + $0x3f4] sm:$0xf0] }
 0x25d   : > { %v8902_v44 = vor.u32 %v10351_v60, %v8901_v31  ;;  %v9285_v43 = vld [vmem:[#allocation3 + $0x3e8] sm:$0xf]  ;;  %v13673_v60 = vld [vmem:[#allocation21_spill] sm:$0xff] }
 0x25e   : > { %v11724_v37 = vpack.c.bf16 %v3512_v8, %v3508_v53  ;;  %v9029_v53 = vld [vmem:[#allocation3 + $0x1e8] sm:$0xf]  ;;  %v9286_v8 = vor.u32 %v10447_v32, %v9285_v43  ;;  %v13674_v32 = vld [vmem:[#allocation22_spill] sm:$0xff] }
 0x25f   : > { %v2246_v50 = vpop.f32.mrf.mxu2  ;;  %v2335_v30 = vpop.f32.mrf.mxu3  ;;  %2716 = vmatpush.bf16.msrb.mxu0 %v8902_v44 }
 0x260   : > { %13671 = vst [vmem:[#allocation17_spill] sm:$0xff] %v11724_v37  ;;  %v2247_v4 = vadd.f32 %v2246_v50, %v2158_v14  ;;  %v2070_v59 = vpop.f32.mrf.mxu0  ;;  %v2159_v56 = vpop.f32.mrf.mxu1  ;;  %v10383_v37 = vld [vmem:[#allocation3 + $0x1f4] sm:$0xf0]  ;;  %2983 = vmatpush.bf16.msrb.mxu3 %v9286_v8 }
 0x261   : > { %v2071_v6 = vadd.f32 %v2070_v59, %v11619_v11  ;;  %v9030_v51 = vor.u32 %v10383_v37, %v9029_v53  ;;  %v13672_v59 = vld [vmem:[#allocation20_spill] sm:$0xff] }
 0x262   : > { %v2336_v38 = vadd.f32 %v2335_v30, %v2247_v4 }
 0x263   : > { %v2160_v27 = vadd.f32 %v2159_v56, %v2071_v6  ;;  %2805 = vmatpush.bf16.msrb.mxu1 %v9030_v51  ;;  %v13675_v6 = vld [vmem:[#allocation23_spill] sm:$0xff] }
 0x264   : > { %v3516_v56 = vmax.f32 %v2336_v38, 0.0 }
 0x267   : > { %v2248_v2 = vpop.f32.mrf.mxu2  ;;  %v2337_v54 = vpop.f32.mrf.mxu3 }
 0x268   : > { %v2249_v14 = vadd.f32 %v2248_v2, %v2160_v27  ;;  %v2073_v0 = vpop.f32.mrf.mxu0  ;;  %v2162_v50 = vpop.f32.mrf.mxu1 }
 0x269   : > { %v2074_v5 = vadd.f32 %v2073_v0, %v11619_v11 }
 0x26a   : > { %v2338_v30 = vadd.f32 %v2337_v54, %v2249_v14 }
 0x26b   : > { %v2163_v4 = vadd.f32 %v2162_v50, %v2074_v5  ;;  %2388 = vmatmul.bf16.gmra.mxu0 %v13672_v59  ;;  %2477 = vmatmul.bf16.gmra.mxu1 %v13673_v60 }
 0x26c   : > { %v3520_v43 = vmax.f32 %v2338_v30, 0.0  ;;  %2566 = vmatmul.bf16.gmra.mxu2 %v13674_v32  ;;  %2655 = vmatmul.bf16.gmra.mxu3 %v13675_v6 }
 0x26e   : > { %v11732_v44 = vpack.c.bf16 %v3520_v43, %v3516_v56  ;;  %v13677_v56 = vld [vmem:[#allocation24_spill] sm:$0xff]  ;;  %v13678_v43 = vld [vmem:[#allocation25_spill] sm:$0xff] }
 0x26f   : > { %v2251_v2 = vpop.f32.mrf.mxu2  ;;  %v2340_v37 = vpop.f32.mrf.mxu3 }
 0x270   : > { %13676 = vst [vmem:[#allocation59_spill] sm:$0xff] %v11732_v44  ;;  %v2252_v27 = vadd.f32 %v2251_v2, %v2163_v4  ;;  %v2075_v31 = vpop.f32.mrf.mxu0  ;;  %v2164_v53 = vpop.f32.mrf.mxu1  ;;  %v13679_v44 = vld [vmem:[#allocation26_spill] sm:$0xff] }
 0x271   : > { %v2076_v54 = vadd.f32 %v2075_v31, %v11619_v11  ;;  %v13680_v31 = vld [vmem:[#allocation27_spill] sm:$0xff] }
 0x272   : > { %v2341_v8 = vadd.f32 %v2340_v37, %v2252_v27  ;;  %v9141_v27 = vld [vmem:[#allocation3 + $0x2c8] sm:$0xf] }
 0x273   : > { %v2165_v51 = vadd.f32 %v2164_v53, %v2076_v54  ;;  %v10411_v53 = vld [vmem:[#allocation3 + $0x2d4] sm:$0xf0] }
 0x274   : > { %v3524_v4 = vmax.f32 %v2341_v8, 0.0 }
 0x277   : > { %v2253_v14 = vpop.f32.mrf.mxu2  ;;  %v2342_v0 = vpop.f32.mrf.mxu3 }
 0x278   : > { %v2254_v50 = vadd.f32 %v2253_v14, %v2165_v51  ;;  %v2078_v38 = vpop.f32.mrf.mxu0  ;;  %v2167_v5 = vpop.f32.mrf.mxu1  ;;  %v9142_v14 = vor.u32 %v10411_v53, %v9141_v27 }
 0x279   : > { %v2079_v30 = vadd.f32 %v2078_v38, %v11619_v11 }
 0x27a   : > { %v2343_v32 = vadd.f32 %v2342_v0, %v2254_v50  ;;  %2895 = vmatpush.bf16.msrb.mxu2 %v9142_v14 }
 0x27b   : > { %v2168_v6 = vadd.f32 %v2167_v5, %v2079_v30  ;;  %2393 = vmatmul.bf16.gmra.mxu0 %v13677_v56  ;;  %2482 = vmatmul.bf16.gmra.mxu1 %v13678_v43  ;;  %v10347_v43 = vld [vmem:[#allocation3 + $0xd4] sm:$0xf0]  ;;  %v9269_v56 = vld [vmem:[#allocation3 + $0x3c8] sm:$0xf] }
 0x27c   : > { %v3528_v2 = vmax.f32 %v2343_v32, 0.0  ;;  %2571 = vmatmul.bf16.gmra.mxu2 %v13679_v44  ;;  %2660 = vmatmul.bf16.gmra.mxu3 %v13680_v31  ;;  %v8885_v32 = vld [vmem:[#allocation3 + $0xc8] sm:$0xf]  ;;  %v10443_v31 = vld [vmem:[#allocation3 + $0x3d4] sm:$0xf0] }
 0x27d   : > { %v8886_v44 = vor.u32 %v10347_v43, %v8885_v32  ;;  %v13683_v43 = vld [vmem:[#allocation29_spill] sm:$0xff] }
 0x27e   : > { %v11740_v37 = vpack.c.bf16 %v3528_v2, %v3524_v4  ;;  %v9013_v4 = vld [vmem:[#allocation3 + $0x1c8] sm:$0xf]  ;;  %v9270_v2 = vor.u32 %v10443_v31, %v9269_v56  ;;  %v13684_v31 = vld [vmem:[#allocation30_spill] sm:$0xff] }
 0x27f   : > { %v2256_v54 = vpop.f32.mrf.mxu2  ;;  %v2345_v51 = vpop.f32.mrf.mxu3  ;;  %2717 = vmatpush.bf16.msrb.mxu0 %v8886_v44 }
 0x280   : > { %13681 = vst [vmem:[#allocation60_spill] sm:$0xff] %v11740_v37  ;;  %v2257_v38 = vadd.f32 %v2256_v54, %v2168_v6  ;;  %v2080_v0 = vpop.f32.mrf.mxu0  ;;  %v2169_v50 = vpop.f32.mrf.mxu1  ;;  %v10379_v37 = vld [vmem:[#allocation3 + $0x1d4] sm:$0xf0]  ;;  %2984 = vmatpush.bf16.msrb.mxu3 %v9270_v2 }
 0x281   : > { %v2081_v5 = vadd.f32 %v2080_v0, %v11619_v11  ;;  %v9014_v27 = vor.u32 %v10379_v37, %v9013_v4  ;;  %v13682_v0 = vld [vmem:[#allocation28_spill] sm:$0xff] }
 0x282   : > { %v2346_v30 = vadd.f32 %v2345_v51, %v2257_v38 }
 0x283   : > { %v2170_v8 = vadd.f32 %v2169_v50, %v2081_v5  ;;  %2806 = vmatpush.bf16.msrb.mxu1 %v9014_v27  ;;  %v13685_v5 = vld [vmem:[#allocation31_spill] sm:$0xff] }
 0x284   : > { %v3532_v50 = vmax.f32 %v2346_v30, 0.0 }
 0x287   : > { %v2258_v60 = vpop.f32.mrf.mxu2  ;;  %v2347_v59 = vpop.f32.mrf.mxu3 }
 0x288   : > { %v2259_v6 = vadd.f32 %v2258_v60, %v2170_v8  ;;  %v2083_v53 = vpop.f32.mrf.mxu0  ;;  %v2172_v54 = vpop.f32.mrf.mxu1 }
 0x289   : > { %v2084_v14 = vadd.f32 %v2083_v53, %v11619_v11 }
 0x28a   : > { %v2348_v51 = vadd.f32 %v2347_v59, %v2259_v6 }
 0x28b   : > { %v2173_v38 = vadd.f32 %v2172_v54, %v2084_v14  ;;  %2398 = vmatmul.bf16.gmra.mxu0 %v13682_v0  ;;  %2487 = vmatmul.bf16.gmra.mxu1 %v13683_v43 }
 0x28c   : > { %v3536_v56 = vmax.f32 %v2348_v51, 0.0  ;;  %2576 = vmatmul.bf16.gmra.mxu2 %v13684_v31  ;;  %2665 = vmatmul.bf16.gmra.mxu3 %v13685_v5 }
 0x28e   : > { %v11748_v44 = vpack.c.bf16 %v3536_v56, %v3532_v50  ;;  %v13687_v50 = vld [vmem:[#allocation32_spill] sm:$0xff]  ;;  %v13688_v56 = vld [vmem:[#allocation33_spill] sm:$0xff] }
 0x28f   : > { %v2261_v60 = vpop.f32.mrf.mxu2  ;;  %v2350_v37 = vpop.f32.mrf.mxu3 }
 0x290   : > { %13686 = vst [vmem:[#allocation28_spill] sm:$0xff] %v11748_v44  ;;  %v2262_v8 = vadd.f32 %v2261_v60, %v2173_v38  ;;  %v2085_v32 = vpop.f32.mrf.mxu0  ;;  %v2174_v4 = vpop.f32.mrf.mxu1  ;;  %v13689_v44 = vld [vmem:[#allocation34_spill] sm:$0xff] }
 0x291   : > { %v2086_v59 = vadd.f32 %v2085_v32, %v11619_v11  ;;  %v13690_v32 = vld [vmem:[#allocation35_spill] sm:$0xff] }
 0x292   : > { %v2351_v2 = vadd.f32 %v2350_v37, %v2262_v8  ;;  %v9125_v8 = vld [vmem:[#allocation3 + $0x2a8] sm:$0xf] }
 0x293   : > { %v2175_v27 = vadd.f32 %v2174_v4, %v2086_v59  ;;  %v10407_v4 = vld [vmem:[#allocation3 + $0x2b4] sm:$0xf0] }
 0x294   : > { %v3540_v38 = vmax.f32 %v2351_v2, 0.0 }
 0x297   : > { %v2263_v6 = vpop.f32.mrf.mxu2  ;;  %v2352_v53 = vpop.f32.mrf.mxu3 }
 0x298   : > { %v2264_v54 = vadd.f32 %v2263_v6, %v2175_v27  ;;  %v2088_v30 = vpop.f32.mrf.mxu0  ;;  %v2177_v14 = vpop.f32.mrf.mxu1  ;;  %v9126_v6 = vor.u32 %v10407_v4, %v9125_v8  ;;  %v9253_v8 = vld [vmem:[#allocation3 + $0x3a8] sm:$0xf] }
 0x299   : > { %v2089_v51 = vadd.f32 %v2088_v30, %v11619_v11  ;;  %v8997_v4 = vld [vmem:[#allocation3 + $0x1a8] sm:$0xf] }
 0x29a   : > { %v2353_v31 = vadd.f32 %v2352_v53, %v2264_v54  ;;  %2896 = vmatpush.bf16.msrb.mxu2 %v9126_v6 }
 0x29b   : > { %v2178_v5 = vadd.f32 %v2177_v14, %v2089_v51  ;;  %2403 = vmatmul.bf16.gmra.mxu0 %v13687_v50  ;;  %2492 = vmatmul.bf16.gmra.mxu1 %v13688_v56 }
 0x29c   : > { %v3544_v60 = vmax.f32 %v2353_v31, 0.0  ;;  %2581 = vmatmul.bf16.gmra.mxu2 %v13689_v44  ;;  %2670 = vmatmul.bf16.gmra.mxu3 %v13690_v32  ;;  %v11762_v31 = vld [vmem:[%s13352_s4] sm:$0xf]  ;;  %v10375_v44 = vld [vmem:[#allocation3 + $0x1b4] sm:$0xf0] }
 0x29d   : > { %13692 = vst [vmem:[#allocation61_spill] sm:$0xff] %v11762_v31 }
 0x29e   : > { %v11756_v37 = vpack.c.bf16 %v3544_v60, %v3540_v38  ;;  %v11765_v38 = vperm.slane %v11762_v31, 1  ;;  %v8869_v60 = vld [vmem:[#allocation3 + $0xa8] sm:$0xf] }
 0x29f   : > { %v2266_v59 = vpop.f32.mrf.mxu2  ;;  %v2355_v27 = vpop.f32.mrf.mxu3 }
 0x2a0   : > { %13691 = vst [vmem:[#allocation29_spill] sm:$0xff] %v11756_v37  ;;  %v2267_v30 = vadd.f32 %v2266_v59, %v2178_v5  ;;  %v2090_v53 = vpop.f32.mrf.mxu0  ;;  %v2179_v54 = vpop.f32.mrf.mxu1  ;;  %v10343_v37 = vld [vmem:[#allocation3 + $0xb4] sm:$0xf0] }
 0x2a1   : > { %v2091_v14 = vadd.f32 %v2090_v53, %v11619_v11  ;;  %v8870_v32 = vor.u32 %v10343_v37, %v8869_v60  ;;  %v10439_v5 = vld [vmem:[#allocation3 + $0x3b4] sm:$0xf0] }
 0x2a2   : > { %v2356_v51 = vadd.f32 %v2355_v27, %v2267_v30  ;;  %v9254_v59 = vor.u32 %v10439_v5, %v9253_v8  ;;  %v8998_v27 = vor.u32 %v10375_v44, %v8997_v4 }
 0x2a3   : > { %v2180_v2 = vadd.f32 %v2179_v54, %v2091_v14  ;;  %2718 = vmatpush.bf16.msrb.mxu0 %v8870_v32 }
 0x2a4   : > { %2985 = vmatpush.bf16.msrb.mxu3 %v9254_v59  ;;  %2807 = vmatpush.bf16.msrb.mxu1 %v8998_v27  ;;  %v3548_v37 = vmax.f32 %v2356_v51, 0.0 }
 0x2a7   : > { %v2268_v11 = vpop.f32.mrf.mxu2  ;;  %v2357_v6 = vpop.f32.mrf.mxu3 }
 0x2a8   : > { %v2269_v30 = vadd.f32 %v2268_v11, %v2180_v2  ;;  %v2369_v53 = vpop.f32.mrf.mxu0  ;;  %v2458_v54 = vpop.f32.mrf.mxu1 }
 0x2a9   : > { %v2370_v14 = vadd.f32 %v2369_v53, %v11765_v38 }
 0x2aa   : > { %v2358_v31 = vadd.f32 %v2357_v6, %v2269_v30 }
 0x2ab   : > { %v2459_v56 = vadd.f32 %v2458_v54, %v2370_v14  ;;  %2408 = vmatmul.bf16.gmra.mxu0 %v11448_v23  ;;  %2497 = vmatmul.bf16.gmra.mxu1 %v11450_v18 }
 0x2ac   : > { %v3552_v60 = vmax.f32 %v2358_v31, 0.0  ;;  %2586 = vmatmul.bf16.gmra.mxu2 %v11462_v7  ;;  %2675 = vmatmul.bf16.gmra.mxu3 %v11464_v36 }
 0x2ae   : > { %v11772_v44 = vpack.c.bf16 %v3552_v60, %v3548_v37 }
 0x2af   : > { %v2547_v32 = vpop.f32.mrf.mxu2  ;;  %v2636_v2 = vpop.f32.mrf.mxu3 }
 0x2b0   : > { %13693 = vst [vmem:[#allocation62_spill] sm:$0xff] %v11772_v44  ;;  %v2548_v8 = vadd.f32 %v2547_v32, %v2459_v56  ;;  %v2371_v5 = vpop.f32.mrf.mxu0  ;;  %v2460_v4 = vpop.f32.mrf.mxu1  ;;  %v9109_v32 = vld [vmem:[#allocation3 + $0x288] sm:$0xf]  ;;  %v10435_v44 = vld [vmem:[#allocation3 + $0x394] sm:$0xf0] }
 0x2b1   : > { %v2372_v59 = vadd.f32 %v2371_v5, %v11765_v38 }
 0x2b2   : > { %v2637_v11 = vadd.f32 %v2636_v2, %v2548_v8  ;;  %v10403_v2 = vld [vmem:[#allocation3 + $0x294] sm:$0xf0] }
 0x2b3   : > { %v2461_v6 = vadd.f32 %v2460_v4, %v2372_v59  ;;  %v9110_v4 = vor.u32 %v10403_v2, %v9109_v32 }
 0x2b4   : > { %v3429_v56 = vmax.f32 %v2637_v11, 0.0 }
 0x2b5   : > { %2897 = vmatpush.bf16.msrb.mxu2 %v9110_v4 }
 0x2b7   : > { %v2549_v27 = vpop.f32.mrf.mxu2  ;;  %v2638_v30 = vpop.f32.mrf.mxu3 }
 0x2b8   : > { %v2550_v53 = vadd.f32 %v2549_v27, %v2461_v6  ;;  %v2374_v51 = vpop.f32.mrf.mxu0  ;;  %v2463_v31 = vpop.f32.mrf.mxu1 }
 0x2b9   : > { %v2375_v54 = vadd.f32 %v2374_v51, %v11765_v38  ;;  %v8853_v51 = vld [vmem:[#allocation3 + $0x88] sm:$0xf] }
 0x2ba   : > { %v2639_v14 = vadd.f32 %v2638_v30, %v2550_v53 }
 0x2bb   : > { %v2464_v36 = vadd.f32 %v2463_v31, %v2375_v54  ;;  %2413 = vmatmul.bf16.gmra.mxu0 %v11480_v52  ;;  %2502 = vmatmul.bf16.gmra.mxu1 %v11482_v39  ;;  %v10339_v31 = vld [vmem:[#allocation3 + $0x94] sm:$0xf0] }
 0x2bc   : > { %v3433_v37 = vmax.f32 %v2639_v14, 0.0  ;;  %2591 = vmatmul.bf16.gmra.mxu2 %v11494_v63  ;;  %2680 = vmatmul.bf16.gmra.mxu3 %v11496_v9  ;;  %v8854_v54 = vor.u32 %v10339_v31, %v8853_v51  ;;  %v9237_v14 = vld [vmem:[#allocation3 + $0x388] sm:$0xf] }
 0x2be   : > { %v11780_v60 = vpack.c.bf16 %v3433_v37, %v3429_v56  ;;  %v8981_v56 = vld [vmem:[#allocation3 + $0x188] sm:$0xf]  ;;  %v9238_v37 = vor.u32 %v10435_v44, %v9237_v14  ;;  %2719 = vmatpush.bf16.msrb.mxu0 %v8854_v54 }
 0x2bf   : > { %v2552_v8 = vpop.f32.mrf.mxu2  ;;  %v2641_v5 = vpop.f32.mrf.mxu3 }
 0x2c0   : > { %13694 = vst [vmem:[#allocation63_spill] sm:$0xff] %v11780_v60  ;;  %v2553_v59 = vadd.f32 %v2552_v8, %v2464_v36  ;;  %v2376_v6 = vpop.f32.mrf.mxu0  ;;  %v2465_v27 = vpop.f32.mrf.mxu1  ;;  %v10371_v60 = vld [vmem:[#allocation3 + $0x194] sm:$0xf0]  ;;  %2986 = vmatpush.bf16.msrb.mxu3 %v9238_v37 }
 0x2c1   : > { %v2377_v30 = vadd.f32 %v2376_v6, %v11765_v38  ;;  %v8982_v32 = vor.u32 %v10371_v60, %v8981_v56 }
 0x2c2   : > { %v2642_v53 = vadd.f32 %v2641_v5, %v2553_v59 }
 0x2c3   : > { %v2466_v11 = vadd.f32 %v2465_v27, %v2377_v30  ;;  %2808 = vmatpush.bf16.msrb.mxu1 %v8982_v32 }
 0x2c4   : > { %v3437_v6 = vmax.f32 %v2642_v53, 0.0 }
 0x2c7   : > { %v2554_v9 = vpop.f32.mrf.mxu2  ;;  %v2643_v63 = vpop.f32.mrf.mxu3 }
 0x2c8   : > { %v2555_v36 = vadd.f32 %v2554_v9, %v2466_v11  ;;  %v2379_v2 = vpop.f32.mrf.mxu0  ;;  %v2468_v8 = vpop.f32.mrf.mxu1 }
 0x2c9   : > { %v2380_v4 = vadd.f32 %v2379_v2, %v11765_v38 }
 0x2ca   : > { %v2644_v5 = vadd.f32 %v2643_v63, %v2555_v36 }
 0x2cb   : > { %v2469_v59 = vadd.f32 %v2468_v8, %v2380_v4  ;;  %2418 = vmatmul.bf16.gmra.mxu0 %v11512_v22  ;;  %2507 = vmatmul.bf16.gmra.mxu1 %v11514_v45 }
 0x2cc   : > { %v3441_v44 = vmax.f32 %v2644_v5, 0.0  ;;  %2596 = vmatmul.bf16.gmra.mxu2 %v11526_v33  ;;  %2685 = vmatmul.bf16.gmra.mxu3 %v11528_v41 }
 0x2ce   : > { %v11788_v60 = vpack.c.bf16 %v3441_v44, %v3437_v6  ;;  %v9093_v6 = vld [vmem:[#allocation3 + $0x268] sm:$0xf]  ;;  %v10399_v44 = vld [vmem:[#allocation3 + $0x274] sm:$0xf0] }
 0x2cf   : > { %v2557_v9 = vpop.f32.mrf.mxu2  ;;  %v2646_v27 = vpop.f32.mrf.mxu3 }
 0x2d0   : > { %13695 = vst [vmem:[#allocation64_spill] sm:$0xff] %v11788_v60  ;;  %v2558_v30 = vadd.f32 %v2557_v9, %v2469_v59  ;;  %v2381_v11 = vpop.f32.mrf.mxu0  ;;  %v2470_v51 = vpop.f32.mrf.mxu1 }
 0x2d1   : > { %v2382_v63 = vadd.f32 %v2381_v11, %v11765_v38 }
 0x2d2   : > { %v2647_v31 = vadd.f32 %v2646_v27, %v2558_v30  ;;  %v9094_v30 = vor.u32 %v10399_v44, %v9093_v6 }
 0x2d3   : > { %v2471_v54 = vadd.f32 %v2470_v51, %v2382_v63 }
 0x2d4   : > { %v3445_v4 = vmax.f32 %v2647_v31, 0.0  ;;  %2898 = vmatpush.bf16.msrb.mxu2 %v9094_v30 }
 0x2d7   : > { %v2559_v14 = vpop.f32.mrf.mxu2  ;;  %v2648_v56 = vpop.f32.mrf.mxu3 }
 0x2d8   : > { %v2560_v37 = vadd.f32 %v2559_v14, %v2471_v54  ;;  %v2384_v53 = vpop.f32.mrf.mxu0  ;;  %v2473_v32 = vpop.f32.mrf.mxu1 }
 0x2d9   : > { %v2385_v36 = vadd.f32 %v2384_v53, %v11765_v38 }
 0x2da   : > { %v2649_v2 = vadd.f32 %v2648_v56, %v2560_v37  ;;  %v8837_v56 = vld [vmem:[#allocation3 + $0x68] sm:$0xf]  ;;  %v10335_v37 = vld [vmem:[#allocation3 + $0x74] sm:$0xf0] }
 0x2db   : > { %v2474_v8 = vadd.f32 %v2473_v32, %v2385_v36  ;;  %2423 = vmatmul.bf16.gmra.mxu0 %v11536_v3  ;;  %2512 = vmatmul.bf16.gmra.mxu1 %v11538_v55  ;;  %v8838_v53 = vor.u32 %v10335_v37, %v8837_v56  ;;  %v9221_v32 = vld [vmem:[#allocation3 + $0x368] sm:$0xf]  ;;  %v10431_v36 = vld [vmem:[#allocation3 + $0x374] sm:$0xf0] }
 0x2dc   : > { %v3449_v5 = vmax.f32 %v2649_v2, 0.0  ;;  %2601 = vmatmul.bf16.gmra.mxu2 %v11546_v10  ;;  %2690 = vmatmul.bf16.gmra.mxu3 %v11548_v58  ;;  %v8965_v2 = vld [vmem:[#allocation3 + $0x168] sm:$0xf] }
 0x2dd   : > { %2720 = vmatpush.bf16.msrb.mxu0 %v8838_v53 }
 0x2de   : > { %v11796_v59 = vpack.c.bf16 %v3449_v5, %v3445_v4  ;;  %v9222_v4 = vor.u32 %v10431_v36, %v9221_v32  ;;  %v10367_v5 = vld [vmem:[#allocation3 + $0x174] sm:$0xf0] }
 0x2df   : > { %v2562_v9 = vpop.f32.mrf.mxu2  ;;  %v2651_v27 = vpop.f32.mrf.mxu3  ;;  %v8966_v6 = vor.u32 %v10367_v5, %v8965_v2 }
 0x2e0   : > { %13696 = vst [vmem:[#allocation65_spill] sm:$0xff] %v11796_v59  ;;  %v2563_v11 = vadd.f32 %v2562_v9, %v2474_v8  ;;  %v2386_v51 = vpop.f32.mrf.mxu0  ;;  %v2475_v63 = vpop.f32.mrf.mxu1  ;;  %2987 = vmatpush.bf16.msrb.mxu3 %v9222_v4 }
 0x2e1   : > { %v2387_v54 = vadd.f32 %v2386_v51, %v11765_v38  ;;  %2809 = vmatpush.bf16.msrb.mxu1 %v8966_v6 }
 0x2e2   : > { %v2652_v14 = vadd.f32 %v2651_v27, %v2563_v11 }
 0x2e3   : > { %v2476_v31 = vadd.f32 %v2475_v63, %v2387_v54 }
 0x2e4   : > { %v3453_v51 = vmax.f32 %v2652_v14, 0.0 }
 0x2e7   : > { %v2564_v59 = vpop.f32.mrf.mxu2  ;;  %v2653_v60 = vpop.f32.mrf.mxu3 }
 0x2e8   : > { %v2565_v8 = vadd.f32 %v2564_v59, %v2476_v31  ;;  %v2389_v44 = vpop.f32.mrf.mxu0  ;;  %v2478_v9 = vpop.f32.mrf.mxu1 }
 0x2e9   : > { %v2390_v30 = vadd.f32 %v2389_v44, %v11765_v38 }
 0x2ea   : > { %v2654_v27 = vadd.f32 %v2653_v60, %v2565_v8 }
 0x2eb   : > { %v2479_v11 = vadd.f32 %v2478_v9, %v2390_v30  ;;  %2428 = vmatmul.bf16.gmra.mxu0 %v11556_v49  ;;  %2517 = vmatmul.bf16.gmra.mxu1 %v11558_v40  ;;  %v13698_v30 = vld [vmem:[#allocation48_spill] sm:$0xff] }
 0x2ec   : > { %v3457_v63 = vmax.f32 %v2654_v27, 0.0  ;;  %2606 = vmatmul.bf16.gmra.mxu2 %v11566_v57  ;;  %2695 = vmatmul.bf16.gmra.mxu3 %v11568_v42  ;;  %v10391_v42 = vld [vmem:[#allocation3 + $0x234] sm:$0xf0] }
 0x2ee   : > { %v11804_v54 = vpack.c.bf16 %v3457_v63, %v3453_v51  ;;  %v13699_v51 = vld [vmem:[#allocation49_spill] sm:$0xff]  ;;  %v13700_v63 = vld [vmem:[#allocation50_spill] sm:$0xff] }
 0x2ef   : > { %v2567_v59 = vpop.f32.mrf.mxu2  ;;  %v2656_v31 = vpop.f32.mrf.mxu3 }
 0x2f0   : > { %13697 = vst [vmem:[#allocation66_spill] sm:$0xff] %v11804_v54  ;;  %v2568_v56 = vadd.f32 %v2567_v59, %v2479_v11  ;;  %v2391_v37 = vpop.f32.mrf.mxu0  ;;  %v2480_v53 = vpop.f32.mrf.mxu1  ;;  %v8949_v54 = vld [vmem:[#allocation3 + $0x148] sm:$0xf] }
 0x2f1   : > { %v2392_v60 = vadd.f32 %v2391_v37, %v11765_v38  ;;  %v8821_v37 = vld [vmem:[#allocation3 + $0x48] sm:$0xf] }
 0x2f2   : > { %v2657_v32 = vadd.f32 %v2656_v31, %v2568_v56  ;;  %v9077_v31 = vld [vmem:[#allocation3 + $0x248] sm:$0xf]  ;;  %v10395_v56 = vld [vmem:[#allocation3 + $0x254] sm:$0xf0] }
 0x2f3   : > { %v2481_v36 = vadd.f32 %v2480_v53, %v2392_v60 }
 0x2f4   : > { %v3461_v27 = vmax.f32 %v2657_v32, 0.0 }
 0x2f7   : > { %v2569_v2 = vpop.f32.mrf.mxu2  ;;  %v2658_v4 = vpop.f32.mrf.mxu3 }
 0x2f8   : > { %v2570_v5 = vadd.f32 %v2569_v2, %v2481_v36  ;;  %v2394_v14 = vpop.f32.mrf.mxu0  ;;  %v2483_v6 = vpop.f32.mrf.mxu1  ;;  %v9078_v36 = vor.u32 %v10395_v56, %v9077_v31  ;;  %v10331_v2 = vld [vmem:[#allocation3 + $0x54] sm:$0xf0]  ;;  %v8933_v31 = vld [vmem:[#allocation3 + $0x128] sm:$0xf] }
 0x2f9   : > { %v2395_v8 = vadd.f32 %v2394_v14, %v11765_v38  ;;  %v8822_v32 = vor.u32 %v10331_v2, %v8821_v37 }
 0x2fa   : > { %v2659_v44 = vadd.f32 %v2658_v4, %v2570_v5  ;;  %v9205_v4 = vld [vmem:[#allocation3 + $0x348] sm:$0xf]  ;;  %v10427_v5 = vld [vmem:[#allocation3 + $0x354] sm:$0xf0]  ;;  %2899 = vmatpush.bf16.msrb.mxu2 %v9078_v36 }
 0x2fb   : > { %v2484_v9 = vadd.f32 %v2483_v6, %v2395_v8  ;;  %2433 = vmatmul.bf16.gmra.mxu0 %v11576_v25  ;;  %2522 = vmatmul.bf16.gmra.mxu1 %v13698_v30  ;;  %v10327_v30 = vld [vmem:[#allocation3 + $0x34] sm:$0xf0] }
 0x2fc   : > { %v3465_v11 = vmax.f32 %v2659_v44, 0.0  ;;  %2611 = vmatmul.bf16.gmra.mxu2 %v13699_v51  ;;  %2700 = vmatmul.bf16.gmra.mxu3 %v13700_v63  ;;  %v9206_v44 = vor.u32 %v10427_v5, %v9205_v4  ;;  %v10363_v51 = vld [vmem:[#allocation3 + $0x154] sm:$0xf0]  ;;  %v9189_v4 = vld [vmem:[#allocation3 + $0x328] sm:$0xf] }
 0x2fd   : > { %2721 = vmatpush.bf16.msrb.mxu0 %v8822_v32  ;;  %v10423_v5 = vld [vmem:[#allocation3 + $0x334] sm:$0xf0] }
 0x2fe   : > { %v11812_v59 = vpack.c.bf16 %v3465_v11, %v3461_v27  ;;  %v8950_v27 = vor.u32 %v10363_v51, %v8949_v54  ;;  %2988 = vmatpush.bf16.msrb.mxu3 %v9206_v44  ;;  %v9190_v57 = vor.u32 %v10423_v5, %v9189_v4  ;;  %v8789_v54 = vld [vmem:[#allocation3 + $0x8] sm:$0xf]  ;;  %v10323_v51 = vld [vmem:[#allocation3 + $0x14] sm:$0xf0] }
 0x2ff   : > { %v2572_v53 = vpop.f32.mrf.mxu2  ;;  %v2661_v60 = vpop.f32.mrf.mxu3 }
 0x300   : > { %13701 = vst [vmem:[#allocation67_spill] sm:$0xff] %v11812_v59  ;;  %v2573_v14 = vadd.f32 %v2572_v53, %v2484_v9  ;;  %v2396_v6 = vpop.f32.mrf.mxu0  ;;  %v2485_v8 = vpop.f32.mrf.mxu1  ;;  %v8805_v59 = vld [vmem:[#allocation3 + $0x28] sm:$0xf]  ;;  %2810 = vmatpush.bf16.msrb.mxu1 %v8950_v27  ;;  %v10359_v9 = vld [vmem:[#allocation3 + $0x134] sm:$0xf0] }
 0x301   : > { %v2397_v63 = vadd.f32 %v2396_v6, %v11765_v38  ;;  %v8806_v25 = vor.u32 %v10327_v30, %v8805_v59  ;;  %v9061_v53 = vld [vmem:[#allocation3 + $0x228] sm:$0xf]  ;;  %v8934_v37 = vor.u32 %v10359_v9, %v8933_v31  ;;  %v10355_v6 = vld [vmem:[#allocation3 + $0x114] sm:$0xf0] }
 0x302   : > { %v2662_v11 = vadd.f32 %v2661_v60, %v2573_v14  ;;  %v9062_v2 = vor.u32 %v10391_v42, %v9061_v53  ;;  %v8917_v60 = vld [vmem:[#allocation3 + $0x108] sm:$0xf]  ;;  %2989 = vmatpush.bf16.msrb.mxu3 %v9190_v57  ;;  %v10387_v59 = vld [vmem:[#allocation3 + $0x214] sm:$0xf0] }
 0x303   : > { %v2486_v56 = vadd.f32 %v2485_v8, %v2397_v63  ;;  %2722 = vmatpush.bf16.msrb.mxu0 %v8806_v25  ;;  %v8790_v63 = vor.u32 %v10323_v51, %v8789_v54  ;;  %v9045_v30 = vld [vmem:[#allocation3 + $0x208] sm:$0xf]  ;;  %v10419_v31 = vld [vmem:[#allocation3 + $0x314] sm:$0xf0]  ;;  %v8918_v9 = vor.u32 %v10355_v6, %v8917_v60 }
 0x304   : > { %2900 = vmatpush.bf16.msrb.mxu2 %v9062_v2  ;;  %2811 = vmatpush.bf16.msrb.mxu1 %v8934_v37  ;;  %v9046_v42 = vor.u32 %v10387_v59, %v9045_v30  ;;  %v9173_v27 = vld [vmem:[#allocation3 + $0x308] sm:$0xf]  ;;  %v3469_v57 = vmax.f32 %v2662_v11, 0.0 }
 0x305   : > { %v9174_v53 = vor.u32 %v10419_v31, %v9173_v27 }
 0x307   : > { %v2574_v36 = vpop.f32.mrf.mxu2  ;;  %v2663_v14 = vpop.f32.mrf.mxu3  ;;  %2723 = vmatpush.bf16.msrb.mxu0 %v8790_v63  ;;  %2990 = vmatpush.bf16.msrb.mxu3 %v9174_v53 }
 0x308   : > { %v2575_v8 = vadd.f32 %v2574_v36, %v2486_v56  ;;  %v2399_v32 = vpop.f32.mrf.mxu0  ;;  %v2488_v44 = vpop.f32.mrf.mxu1  ;;  %2901 = vmatpush.bf16.msrb.mxu2 %v9046_v42  ;;  %2812 = vmatpush.bf16.msrb.mxu1 %v8918_v9 }
 0x309   : > { %v2400_v25 = vadd.f32 %v2399_v32, %v11765_v38 }
 0x30a   : > { %v2664_v2 = vadd.f32 %v2663_v14, %v2575_v8 }
 0x30b   : > { %v2489_v4 = vadd.f32 %v2488_v44, %v2400_v25  ;;  %2438 = vmatmul.bf16.gmra.mxu0 %v11596_v47  ;;  %2527 = vmatmul.bf16.gmra.mxu1 %v11598_v29 }
 0x30c   : > { %v3473_v37 = vmax.f32 %v2664_v2, 0.0  ;;  %2616 = vmatmul.bf16.gmra.mxu2 %v11606_v13  ;;  %2705 = vmatmul.bf16.gmra.mxu3 %v11608_v35 }
 0x30e   : > { %v11820_v56 = vpack.c.bf16 %v3473_v37, %v3469_v57 }
 0x30f   : > { %v2577_v5 = vpop.f32.mrf.mxu2  ;;  %v2666_v54 = vpop.f32.mrf.mxu3 }
 0x310   : > { %13702 = vst [vmem:[#allocation68_spill] sm:$0xff] %v11820_v56  ;;  %v2578_v51 = vadd.f32 %v2577_v5, %v2489_v4  ;;  %v2401_v60 = vpop.f32.mrf.mxu0  ;;  %v2490_v36 = vpop.f32.mrf.mxu1 }
 0x311   : > { %v2402_v14 = vadd.f32 %v2401_v60, %v11765_v38 }
 0x312   : > { %v2667_v63 = vadd.f32 %v2666_v54, %v2578_v51 }
 0x313   : > { %v2491_v6 = vadd.f32 %v2490_v36, %v2402_v14 }
 0x314   : > { %v3477_v31 = vmax.f32 %v2667_v63, 0.0 }
 0x317   : > { %v2579_v30 = vpop.f32.mrf.mxu2  ;;  %v2668_v11 = vpop.f32.mrf.mxu3 }
 0x318   : > { %v2580_v59 = vadd.f32 %v2579_v30, %v2491_v6  ;;  %v2404_v8 = vpop.f32.mrf.mxu0  ;;  %v2493_v32 = vpop.f32.mrf.mxu1 }
 0x319   : > { %v2405_v44 = vadd.f32 %v2404_v8, %v11765_v38 }
 0x31a   : > { %v2669_v42 = vadd.f32 %v2668_v11, %v2580_v59 }
 0x31b   : > { %v2494_v27 = vadd.f32 %v2493_v32, %v2405_v44  ;;  %2443 = vmatmul.bf16.gmra.mxu0 %v11621_v28  ;;  %2532 = vmatmul.bf16.gmra.mxu1 %v11623_v26 }
 0x31c   : > { %v3481_v25 = vmax.f32 %v2669_v42, 0.0  ;;  %2621 = vmatmul.bf16.gmra.mxu2 %v11632_v34  ;;  %2710 = vmatmul.bf16.gmra.mxu3 %v11634_v1 }
 0x31e   : > { %v11828_v9 = vpack.c.bf16 %v3481_v25, %v3477_v31 }
 0x31f   : > { %v2582_v53 = vpop.f32.mrf.mxu2  ;;  %v2671_v2 = vpop.f32.mrf.mxu3 }
 0x320   : > { %13703 = vst [vmem:[#allocation69_spill] sm:$0xff] %v11828_v9  ;;  %v2583_v4 = vadd.f32 %v2582_v53, %v2494_v27  ;;  %v2406_v57 = vpop.f32.mrf.mxu0  ;;  %v2495_v37 = vpop.f32.mrf.mxu1  ;;  %v9287_v9 = vld [vmem:[#allocation3 + $0x3f8] sm:$0xf0] }
 0x321   : > { %v2407_v5 = vadd.f32 %v2406_v57, %v11765_v38 }
 0x322   : > { %v2672_v54 = vadd.f32 %v2671_v2, %v2583_v4 }
 0x323   : > { %v2496_v51 = vadd.f32 %v2495_v37, %v2407_v5 }
 0x324   : > { %v3485_v8 = vmax.f32 %v2672_v54, 0.0 }
 0x327   : > { %v2584_v60 = vpop.f32.mrf.mxu2  ;;  %v2673_v36 = vpop.f32.mrf.mxu3 }
 0x328   : > { %v2585_v14 = vadd.f32 %v2584_v60, %v2496_v51  ;;  %v2409_v63 = vpop.f32.mrf.mxu0  ;;  %v2498_v6 = vpop.f32.mrf.mxu1 }
 0x329   : > { %v2410_v30 = vadd.f32 %v2409_v63, %v11765_v38 }
 0x32a   : > { %v2674_v11 = vadd.f32 %v2673_v36, %v2585_v14 }
 0x32b   : > { %v2499_v59 = vadd.f32 %v2498_v6, %v2410_v30  ;;  %2724 = vmatmul.bf16.vlgmr.msrb.gmra.mxu0 %v11424_v12  ;;  %2813 = vmatmul.bf16.vlgmr.msrb.gmra.mxu1 %v11426_v15 }
 0x32c   : > { %v3489_v32 = vmax.f32 %v2674_v11, 0.0  ;;  %2902 = vmatmul.bf16.vlgmr.msrb.gmra.mxu2 %v11235_v16  ;;  %2991 = vmatmul.bf16.vlgmr.msrb.gmra.mxu3 %v11237_v17 }
 0x32e   : > { %v11836_v44 = vpack.c.bf16 %v3489_v32, %v3485_v8 }
 0x32f   : > { %v2587_v42 = vpop.f32.mrf.mxu2  ;;  %v2676_v27 = vpop.f32.mrf.mxu3 }
 0x330   : > { %13704 = vst [vmem:[#allocation70_spill] sm:$0xff] %v11836_v44  ;;  %v2588_v31 = vadd.f32 %v2587_v42, %v2499_v59  ;;  %v2411_v25 = vpop.f32.mrf.mxu0  ;;  %v2500_v53 = vpop.f32.mrf.mxu1  ;;  %v10445_v44 = vld [vmem:[#allocation3 + $0x3ec] sm:$0xf] }
 0x331   : > { %v2412_v2 = vadd.f32 %v2411_v25, %v11765_v38 }
 0x332   : > { %v2677_v4 = vadd.f32 %v2676_v27, %v2588_v31 }
 0x333   : > { %v2501_v57 = vadd.f32 %v2500_v53, %v2412_v2 }
 0x334   : > { %v3493_v6 = vmax.f32 %v2677_v4, 0.0 }
 0x337   : > { %v2589_v37 = vpop.f32.mrf.mxu2  ;;  %v2678_v5 = vpop.f32.mrf.mxu3 }
 0x338   : > { %v2590_v51 = vadd.f32 %v2589_v37, %v2501_v57  ;;  %v2414_v54 = vpop.f32.mrf.mxu0  ;;  %v2503_v60 = vpop.f32.mrf.mxu1 }
 0x339   : > { %v2415_v36 = vadd.f32 %v2414_v54, %v11765_v38 }
 0x33a   : > { %v2679_v14 = vadd.f32 %v2678_v5, %v2590_v51 }
 0x33b   : > { %v2504_v63 = vadd.f32 %v2503_v60, %v2415_v36  ;;  %2729 = vmatmul.bf16.gmra.mxu0 %v11456_v61  ;;  %2818 = vmatmul.bf16.gmra.mxu1 %v11458_v62 }
 0x33c   : > { %v3497_v30 = vmax.f32 %v2679_v14, 0.0  ;;  %2907 = vmatmul.bf16.gmra.mxu2 %v11261_v48  ;;  %2996 = vmatmul.bf16.gmra.mxu3 %v13662_v20 }
 0x33e   : > { %v11844_v11 = vpack.c.bf16 %v3497_v30, %v3493_v6 }
 0x33f   : > { %v2592_v59 = vpop.f32.mrf.mxu2  ;;  %v2681_v8 = vpop.f32.mrf.mxu3 }
 0x340   : > { %13705 = vst [vmem:[#allocation71_spill] sm:$0xff] %v11844_v11  ;;  %v2593_v32 = vadd.f32 %v2592_v59, %v2504_v63  ;;  %v2416_v42 = vpop.f32.mrf.mxu0  ;;  %v2505_v27 = vpop.f32.mrf.mxu1 }
 0x341   : > { %v2417_v31 = vadd.f32 %v2416_v42, %v11765_v38 }
 0x342   : > { %v2682_v25 = vadd.f32 %v2681_v8, %v2593_v32 }
 0x343   : > { %v2506_v53 = vadd.f32 %v2505_v27, %v2417_v31 }
 0x344   : > { %v3501_v36 = vmax.f32 %v2682_v25, 0.0 }
 0x347   : > { %v2594_v2 = vpop.f32.mrf.mxu2  ;;  %v2683_v57 = vpop.f32.mrf.mxu3 }
 0x348   : > { %v2595_v37 = vadd.f32 %v2594_v2, %v2506_v53  ;;  %v2419_v4 = vpop.f32.mrf.mxu0  ;;  %v2508_v5 = vpop.f32.mrf.mxu1 }
 0x349   : > { %v2420_v51 = vadd.f32 %v2419_v4, %v11765_v38 }
 0x34a   : > { %v2684_v54 = vadd.f32 %v2683_v57, %v2595_v37 }
 0x34b   : > { %v2509_v60 = vadd.f32 %v2508_v5, %v2420_v51  ;;  %2734 = vmatmul.bf16.gmra.mxu0 %v11488_v24  ;;  %2823 = vmatmul.bf16.gmra.mxu1 %v11490_v19 }
 0x34c   : > { %v3505_v14 = vmax.f32 %v2684_v54, 0.0  ;;  %2912 = vmatmul.bf16.gmra.mxu2 %v13664_v46  ;;  %3001 = vmatmul.bf16.gmra.mxu3 %v13665_v21  ;;  %v13707_v54 = vld [vmem:[#allocation40_spill] sm:$0xff] }
 0x34e   : > { %v11852_v63 = vpack.c.bf16 %v3505_v14, %v3501_v36  ;;  %v13708_v36 = vld [vmem:[#allocation41_spill] sm:$0xff] }
 0x34f   : > { %v2597_v6 = vpop.f32.mrf.mxu2  ;;  %v2686_v30 = vpop.f32.mrf.mxu3 }
 0x350   : > { %13706 = vst [vmem:[#allocation72_spill] sm:$0xff] %v11852_v63  ;;  %v2598_v59 = vadd.f32 %v2597_v6, %v2509_v60  ;;  %v2421_v8 = vpop.f32.mrf.mxu0  ;;  %v2510_v32 = vpop.f32.mrf.mxu1  ;;  %v13709_v6 = vld [vmem:[#allocation18_spill] sm:$0xff] }
 0x351   : > { %v2422_v42 = vadd.f32 %v2421_v8, %v11765_v38  ;;  %v13710_v8 = vld [vmem:[#allocation19_spill] sm:$0xff]  ;;  %v8903_v63 = vld [vmem:[#allocation3 + $0xf8] sm:$0xf0] }
 0x352   : > { %v2687_v27 = vadd.f32 %v2686_v30, %v2598_v59  ;;  %v10413_v59 = vld [vmem:[#allocation3 + $0x2ec] sm:$0xf] }
 0x353   : > { %v2511_v31 = vadd.f32 %v2510_v32, %v2422_v42  ;;  %v9159_v32 = vld [vmem:[#allocation3 + $0x2f8] sm:$0xf0] }
 0x354   : > { %v3509_v60 = vmax.f32 %v2687_v27, 0.0 }
 0x357   : > { %v2599_v53 = vpop.f32.mrf.mxu2  ;;  %v2688_v2 = vpop.f32.mrf.mxu3 }
 0x358   : > { %v2600_v57 = vadd.f32 %v2599_v53, %v2511_v31  ;;  %v2424_v25 = vpop.f32.mrf.mxu0  ;;  %v2513_v37 = vpop.f32.mrf.mxu1  ;;  %v9162_v53 = vor.u32 %v10413_v59, %v9159_v32 }
 0x359   : > { %v2425_v4 = vadd.f32 %v2424_v25, %v11765_v38 }
 0x35a   : > { %v2689_v5 = vadd.f32 %v2688_v2, %v2600_v57  ;;  %3250 = vmatpush.bf16.msra.mxu2 %v9162_v53 }
 0x35b   : > { %v2514_v51 = vadd.f32 %v2513_v37, %v2425_v4  ;;  %2739 = vmatmul.bf16.gmra.mxu0 %v13707_v54  ;;  %2828 = vmatmul.bf16.gmra.mxu1 %v13708_v36 }
 0x35c   : > { %v3513_v14 = vmax.f32 %v2689_v5, 0.0  ;;  %2917 = vmatmul.bf16.gmra.mxu2 %v13709_v6  ;;  %3006 = vmatmul.bf16.gmra.mxu3 %v13710_v8  ;;  %v10349_v5 = vld [vmem:[#allocation3 + $0xec] sm:$0xf] }
 0x35d   : > { %v8906_v11 = vor.u32 %v10349_v5, %v8903_v63  ;;  %v13713_v63 = vld [vmem:[#allocation21_spill] sm:$0xff] }
 0x35e   : > { %v11860_v30 = vpack.c.bf16 %v3513_v14, %v3509_v60  ;;  %v10381_v60 = vld [vmem:[#allocation3 + $0x1ec] sm:$0xf]  ;;  %v9290_v14 = vor.u32 %v10445_v44, %v9287_v9  ;;  %v13714_v44 = vld [vmem:[#allocation22_spill] sm:$0xff] }
 0x35f   : > { %v2602_v42 = vpop.f32.mrf.mxu2  ;;  %v2691_v31 = vpop.f32.mrf.mxu3  ;;  %3072 = vmatpush.bf16.msra.mxu0 %v8906_v11 }
 0x360   : > { %13711 = vst [vmem:[#allocation40_spill] sm:$0xff] %v11860_v30  ;;  %v2603_v25 = vadd.f32 %v2602_v42, %v2514_v51  ;;  %v2426_v2 = vpop.f32.mrf.mxu0  ;;  %v2515_v57 = vpop.f32.mrf.mxu1  ;;  %v9031_v30 = vld [vmem:[#allocation3 + $0x1f8] sm:$0xf0]  ;;  %3339 = vmatpush.bf16.msra.mxu3 %v9290_v14 }
 0x361   : > { %v2427_v37 = vadd.f32 %v2426_v2, %v11765_v38  ;;  %v9034_v59 = vor.u32 %v10381_v60, %v9031_v30  ;;  %v13712_v2 = vld [vmem:[#allocation20_spill] sm:$0xff] }
 0x362   : > { %v2692_v4 = vadd.f32 %v2691_v31, %v2603_v25 }
 0x363   : > { %v2516_v27 = vadd.f32 %v2515_v57, %v2427_v37  ;;  %3161 = vmatpush.bf16.msra.mxu1 %v9034_v59  ;;  %v13715_v37 = vld [vmem:[#allocation23_spill] sm:$0xff] }
 0x364   : > { %v3517_v57 = vmax.f32 %v2692_v4, 0.0 }
 0x367   : > { %v2604_v56 = vpop.f32.mrf.mxu2  ;;  %v2693_v8 = vpop.f32.mrf.mxu3 }
 0x368   : > { %v2605_v51 = vadd.f32 %v2604_v56, %v2516_v27  ;;  %v2429_v32 = vpop.f32.mrf.mxu0  ;;  %v2518_v42 = vpop.f32.mrf.mxu1 }
 0x369   : > { %v2430_v53 = vadd.f32 %v2429_v32, %v11765_v38 }
 0x36a   : > { %v2694_v31 = vadd.f32 %v2693_v8, %v2605_v51 }
 0x36b   : > { %v2519_v25 = vadd.f32 %v2518_v42, %v2430_v53  ;;  %2744 = vmatmul.bf16.gmra.mxu0 %v13712_v2  ;;  %2833 = vmatmul.bf16.gmra.mxu1 %v13713_v63 }
 0x36c   : > { %v3521_v9 = vmax.f32 %v2694_v31, 0.0  ;;  %2922 = vmatmul.bf16.gmra.mxu2 %v13714_v44  ;;  %3011 = vmatmul.bf16.gmra.mxu3 %v13715_v37 }
 0x36e   : > { %v11868_v11 = vpack.c.bf16 %v3521_v9, %v3517_v57  ;;  %v13717_v57 = vld [vmem:[#allocation24_spill] sm:$0xff]  ;;  %v13718_v9 = vld [vmem:[#allocation25_spill] sm:$0xff] }
 0x36f   : > { %v2607_v56 = vpop.f32.mrf.mxu2  ;;  %v2696_v30 = vpop.f32.mrf.mxu3 }
 0x370   : > { %13716 = vst [vmem:[#allocation41_spill] sm:$0xff] %v11868_v11  ;;  %v2608_v27 = vadd.f32 %v2607_v56, %v2519_v25  ;;  %v2431_v5 = vpop.f32.mrf.mxu0  ;;  %v2520_v60 = vpop.f32.mrf.mxu1  ;;  %v13719_v11 = vld [vmem:[#allocation26_spill] sm:$0xff] }
 0x371   : > { %v2432_v8 = vadd.f32 %v2431_v5, %v11765_v38  ;;  %v13720_v5 = vld [vmem:[#allocation27_spill] sm:$0xff] }
 0x372   : > { %v2697_v14 = vadd.f32 %v2696_v30, %v2608_v27  ;;  %v10409_v27 = vld [vmem:[#allocation3 + $0x2cc] sm:$0xf] }
 0x373   : > { %v2521_v59 = vadd.f32 %v2520_v60, %v2432_v8  ;;  %v9143_v60 = vld [vmem:[#allocation3 + $0x2d8] sm:$0xf0] }
 0x374   : > { %v3525_v25 = vmax.f32 %v2697_v14, 0.0 }
 0x377   : > { %v2609_v51 = vpop.f32.mrf.mxu2  ;;  %v2698_v32 = vpop.f32.mrf.mxu3 }
 0x378   : > { %v2610_v42 = vadd.f32 %v2609_v51, %v2521_v59  ;;  %v2434_v4 = vpop.f32.mrf.mxu0  ;;  %v2523_v53 = vpop.f32.mrf.mxu1  ;;  %v9146_v51 = vor.u32 %v10409_v27, %v9143_v60 }
 0x379   : > { %v2435_v31 = vadd.f32 %v2434_v4, %v11765_v38 }
 0x37a   : > { %v2699_v44 = vadd.f32 %v2698_v32, %v2610_v42  ;;  %3251 = vmatpush.bf16.msra.mxu2 %v9146_v51 }
 0x37b   : > { %v2524_v37 = vadd.f32 %v2523_v53, %v2435_v31  ;;  %2749 = vmatmul.bf16.gmra.mxu0 %v13717_v57  ;;  %2838 = vmatmul.bf16.gmra.mxu1 %v13718_v9  ;;  %v8887_v9 = vld [vmem:[#allocation3 + $0xd8] sm:$0xf0]  ;;  %v10441_v57 = vld [vmem:[#allocation3 + $0x3cc] sm:$0xf] }
 0x37c   : > { %v3529_v56 = vmax.f32 %v2699_v44, 0.0  ;;  %2927 = vmatmul.bf16.gmra.mxu2 %v13719_v11  ;;  %3016 = vmatmul.bf16.gmra.mxu3 %v13720_v5  ;;  %v10345_v44 = vld [vmem:[#allocation3 + $0xcc] sm:$0xf]  ;;  %v9271_v5 = vld [vmem:[#allocation3 + $0x3d8] sm:$0xf0] }
 0x37d   : > { %v8890_v11 = vor.u32 %v10345_v44, %v8887_v9 }
 0x37e   : > { %v11876_v30 = vpack.c.bf16 %v3529_v56, %v3525_v25  ;;  %v10377_v25 = vld [vmem:[#allocation3 + $0x1cc] sm:$0xf]  ;;  %v9274_v56 = vor.u32 %v10441_v57, %v9271_v5  ;;  %v13722_v5 = vld [vmem:[#allocation30_spill] sm:$0xff] }
 0x37f   : > { %v2612_v8 = vpop.f32.mrf.mxu2  ;;  %v2701_v59 = vpop.f32.mrf.mxu3  ;;  %3073 = vmatpush.bf16.msra.mxu0 %v8890_v11 }
 0x380   : > { %13721 = vst [vmem:[#allocation18_spill] sm:$0xff] %v11876_v30  ;;  %v2613_v4 = vadd.f32 %v2612_v8, %v2524_v37  ;;  %v2436_v32 = vpop.f32.mrf.mxu0  ;;  %v2525_v42 = vpop.f32.mrf.mxu1  ;;  %v9015_v30 = vld [vmem:[#allocation3 + $0x1d8] sm:$0xf0]  ;;  %3340 = vmatpush.bf16.msra.mxu3 %v9274_v56 }
 0x381   : > { %v2437_v53 = vadd.f32 %v2436_v32, %v11765_v38  ;;  %v9018_v27 = vor.u32 %v10377_v25, %v9015_v30  ;;  %v13723_v32 = vld [vmem:[#allocation31_spill] sm:$0xff] }
 0x382   : > { %v2702_v31 = vadd.f32 %v2701_v59, %v2613_v4 }
 0x383   : > { %v2526_v14 = vadd.f32 %v2525_v42, %v2437_v53  ;;  %3162 = vmatpush.bf16.msra.mxu1 %v9018_v27 }
 0x384   : > { %v3533_v9 = vmax.f32 %v2702_v31, 0.0 }
 0x387   : > { %v2614_v63 = vpop.f32.mrf.mxu2  ;;  %v2703_v2 = vpop.f32.mrf.mxu3 }
 0x388   : > { %v2615_v37 = vadd.f32 %v2614_v63, %v2526_v14  ;;  %v2439_v60 = vpop.f32.mrf.mxu0  ;;  %v2528_v8 = vpop.f32.mrf.mxu1 }
 0x389   : > { %v2440_v51 = vadd.f32 %v2439_v60, %v11765_v38 }
 0x38a   : > { %v2704_v59 = vadd.f32 %v2703_v2, %v2615_v37 }
 0x38b   : > { %v2529_v4 = vadd.f32 %v2528_v8, %v2440_v51  ;;  %2754 = vmatmul.bf16.gmra.mxu0 %v13682_v0  ;;  %2843 = vmatmul.bf16.gmra.mxu1 %v13683_v43 }
 0x38c   : > { %v3537_v57 = vmax.f32 %v2704_v59, 0.0  ;;  %2932 = vmatmul.bf16.gmra.mxu2 %v13722_v5  ;;  %3021 = vmatmul.bf16.gmra.mxu3 %v13723_v32  ;;  %v8999_v32 = vld [vmem:[#allocation3 + $0x1b8] sm:$0xf0] }
 0x38e   : > { %v11884_v11 = vpack.c.bf16 %v3537_v57, %v3533_v9  ;;  %v13725_v9 = vld [vmem:[#allocation33_spill] sm:$0xff] }
 0x38f   : > { %v2617_v63 = vpop.f32.mrf.mxu2  ;;  %v2706_v30 = vpop.f32.mrf.mxu3 }
 0x390   : > { %13724 = vst [vmem:[#allocation30_spill] sm:$0xff] %v11884_v11  ;;  %v2618_v42 = vadd.f32 %v2617_v63, %v2529_v4  ;;  %v2441_v53 = vpop.f32.mrf.mxu0  ;;  %v2530_v14 = vpop.f32.mrf.mxu1  ;;  %v13726_v63 = vld [vmem:[#allocation34_spill] sm:$0xff] }
 0x391   : > { %v2442_v2 = vadd.f32 %v2441_v53, %v11765_v38  ;;  %v13727_v53 = vld [vmem:[#allocation35_spill] sm:$0xff] }
 0x392   : > { %v2707_v44 = vadd.f32 %v2706_v30, %v2618_v42  ;;  %v10405_v42 = vld [vmem:[#allocation3 + $0x2ac] sm:$0xf] }
 0x393   : > { %v2531_v25 = vadd.f32 %v2530_v14, %v2442_v2  ;;  %v9127_v14 = vld [vmem:[#allocation3 + $0x2b8] sm:$0xf0] }
 0x394   : > { %v3541_v4 = vmax.f32 %v2707_v44, 0.0 }
 0x397   : > { %v2619_v56 = vpop.f32.mrf.mxu2  ;;  %v2708_v27 = vpop.f32.mrf.mxu3 }
 0x398   : > { %v2620_v37 = vadd.f32 %v2619_v56, %v2531_v25  ;;  %v2444_v31 = vpop.f32.mrf.mxu0  ;;  %v2533_v60 = vpop.f32.mrf.mxu1  ;;  %v9130_v56 = vor.u32 %v10405_v42, %v9127_v14 }
 0x399   : > { %v2445_v8 = vadd.f32 %v2444_v31, %v11765_v38 }
 0x39a   : > { %v2709_v51 = vadd.f32 %v2708_v27, %v2620_v37  ;;  %3252 = vmatpush.bf16.msra.mxu2 %v9130_v56 }
 0x39b   : > { %v2534_v59 = vadd.f32 %v2533_v60, %v2445_v8  ;;  %2759 = vmatmul.bf16.gmra.mxu0 %v13687_v50  ;;  %2848 = vmatmul.bf16.gmra.mxu1 %v13725_v9  ;;  %v10373_v9 = vld [vmem:[#allocation3 + $0x1ac] sm:$0xf] }
 0x39c   : > { %v3545_v57 = vmax.f32 %v2709_v51, 0.0  ;;  %2937 = vmatmul.bf16.gmra.mxu2 %v13726_v63  ;;  %3026 = vmatmul.bf16.gmra.mxu3 %v13727_v53  ;;  %v13729_v51 = vld [vmem:[#allocation61_spill] sm:$0xff]  ;;  %v10341_v63 = vld [vmem:[#allocation3 + $0xac] sm:$0xf]  ;;  %v8871_v53 = vld [vmem:[#allocation3 + $0xb8] sm:$0xf0]  ;;  %v9002_v14 = vor.u32 %v10373_v9, %v8999_v32 }
 0x39d   : > { %v11896_v11 = vperm.slane %v13729_v51, 2 }
 0x39e   : > { %v11892_v30 = vpack.c.bf16 %v3545_v57, %v3541_v4  ;;  %v8874_v4 = vor.u32 %v10341_v63, %v8871_v53  ;;  %v10437_v57 = vld [vmem:[#allocation3 + $0x3ac] sm:$0xf]  ;;  %3163 = vmatpush.bf16.msra.mxu1 %v9002_v14 }
 0x39f   : > { %v2622_v2 = vpop.f32.mrf.mxu2  ;;  %v2711_v25 = vpop.f32.mrf.mxu3 }
 0x3a0   : > { %13728 = vst [vmem:[#allocation73_spill] sm:$0xff] %v11892_v30  ;;  %v2623_v31 = vadd.f32 %v2622_v2, %v2534_v59  ;;  %v2446_v27 = vpop.f32.mrf.mxu0  ;;  %v2535_v37 = vpop.f32.mrf.mxu1  ;;  %v9255_v30 = vld [vmem:[#allocation3 + $0x3b8] sm:$0xf0]  ;;  %3074 = vmatpush.bf16.msra.mxu0 %v8874_v4 }
 0x3a1   : > { %v2447_v60 = vadd.f32 %v2446_v27, %v11765_v38  ;;  %v9258_v50 = vor.u32 %v10437_v57, %v9255_v30  ;;  %v13730_v30 = vld [vmem:[#allocation36_spill] sm:$0xff] }
 0x3a2   : > { %v2712_v8 = vadd.f32 %v2711_v25, %v2623_v31 }
 0x3a3   : > { %v2536_v44 = vadd.f32 %v2535_v37, %v2447_v60  ;;  %3341 = vmatpush.bf16.msra.mxu3 %v9258_v50 }
 0x3a4   : > { %v3549_v63 = vmax.f32 %v2712_v8, 0.0 }
 0x3a7   : > { %v2624_v42 = vpop.f32.mrf.mxu2  ;;  %v2713_v59 = vpop.f32.mrf.mxu3 }
 0x3a8   : > { %v2625_v2 = vadd.f32 %v2624_v42, %v2536_v44  ;;  %v2725_v38 = vpop.f32.mrf.mxu0  ;;  %v2814_v56 = vpop.f32.mrf.mxu1 }
 0x3a9   : > { %v2726_v25 = vadd.f32 %v2725_v38, %v11896_v11 }
 0x3aa   : > { %v2714_v31 = vadd.f32 %v2713_v59, %v2625_v2 }
 0x3ab   : > { %v2815_v27 = vadd.f32 %v2814_v56, %v2726_v25  ;;  %2764 = vmatmul.bf16.gmra.mxu0 %v11448_v23  ;;  %2853 = vmatmul.bf16.gmra.mxu1 %v11450_v18 }
 0x3ac   : > { %v3553_v53 = vmax.f32 %v2714_v31, 0.0  ;;  %2942 = vmatmul.bf16.gmra.mxu2 %v11462_v7  ;;  %3031 = vmatmul.bf16.gmra.mxu3 %v13730_v30 }
 0x3ae   : > { %v11903_v32 = vpack.c.bf16 %v3553_v53, %v3549_v63  ;;  %v13732_v63 = vld [vmem:[#allocation38_spill] sm:$0xff]  ;;  %v13733_v53 = vld [vmem:[#allocation39_spill] sm:$0xff] }
 0x3af   : > { %v2903_v9 = vpop.f32.mrf.mxu2  ;;  %v2992_v37 = vpop.f32.mrf.mxu3 }
 0x3b0   : > { %13731 = vst [vmem:[#allocation61_spill] sm:$0xff] %v11903_v32  ;;  %v2904_v50 = vadd.f32 %v2903_v9, %v2815_v27  ;;  %v2727_v60 = vpop.f32.mrf.mxu0  ;;  %v2816_v44 = vpop.f32.mrf.mxu1  ;;  %v10433_v32 = vld [vmem:[#allocation3 + $0x38c] sm:$0xf] }
 0x3b1   : > { %v2728_v51 = vadd.f32 %v2727_v60, %v11896_v11 }
 0x3b2   : > { %v2993_v4 = vadd.f32 %v2992_v37, %v2904_v50  ;;  %v10401_v37 = vld [vmem:[#allocation3 + $0x28c] sm:$0xf]  ;;  %v9111_v50 = vld [vmem:[#allocation3 + $0x298] sm:$0xf0] }
 0x3b3   : > { %v2817_v57 = vadd.f32 %v2816_v44, %v2728_v51  ;;  %v9114_v51 = vor.u32 %v10401_v37, %v9111_v50 }
 0x3b4   : > { %v3430_v31 = vmax.f32 %v2993_v4, 0.0 }
 0x3b5   : > { %3253 = vmatpush.bf16.msra.mxu2 %v9114_v51 }
 0x3b7   : > { %v2905_v42 = vpop.f32.mrf.mxu2  ;;  %v2994_v59 = vpop.f32.mrf.mxu3 }
 0x3b8   : > { %v2906_v14 = vadd.f32 %v2905_v42, %v2817_v57  ;;  %v2730_v8 = vpop.f32.mrf.mxu0  ;;  %v2819_v2 = vpop.f32.mrf.mxu1 }
 0x3b9   : > { %v2731_v38 = vadd.f32 %v2730_v8, %v11896_v11 }
 0x3ba   : > { %v2995_v56 = vadd.f32 %v2994_v59, %v2906_v14 }
 0x3bb   : > { %v2820_v25 = vadd.f32 %v2819_v2, %v2731_v38  ;;  %2769 = vmatmul.bf16.gmra.mxu0 %v11480_v52  ;;  %2858 = vmatmul.bf16.gmra.mxu1 %v11482_v39  ;;  %v10337_v2 = vld [vmem:[#allocation3 + $0x8c] sm:$0xf]  ;;  %v8855_v38 = vld [vmem:[#allocation3 + $0x98] sm:$0xf0] }
 0x3bc   : > { %v3434_v27 = vmax.f32 %v2995_v56, 0.0  ;;  %2947 = vmatmul.bf16.gmra.mxu2 %v13732_v63  ;;  %3036 = vmatmul.bf16.gmra.mxu3 %v13733_v53  ;;  %v8858_v56 = vor.u32 %v10337_v2, %v8855_v38  ;;  %v9239_v53 = vld [vmem:[#allocation3 + $0x398] sm:$0xf0] }
 0x3be   : > { %v11911_v9 = vpack.c.bf16 %v3434_v27, %v3430_v31  ;;  %v10369_v31 = vld [vmem:[#allocation3 + $0x18c] sm:$0xf]  ;;  %v9242_v27 = vor.u32 %v10433_v32, %v9239_v53  ;;  %3075 = vmatpush.bf16.msra.mxu0 %v8858_v56 }
 0x3bf   : > { %v2908_v60 = vpop.f32.mrf.mxu2  ;;  %v2997_v44 = vpop.f32.mrf.mxu3 }
 0x3c0   : > { %13734 = vst [vmem:[#allocation36_spill] sm:$0xff] %v11911_v9  ;;  %v2909_v57 = vadd.f32 %v2908_v60, %v2820_v25  ;;  %v2732_v42 = vpop.f32.mrf.mxu0  ;;  %v2821_v59 = vpop.f32.mrf.mxu1  ;;  %v8983_v9 = vld [vmem:[#allocation3 + $0x198] sm:$0xf0]  ;;  %3342 = vmatpush.bf16.msra.mxu3 %v9242_v27 }
 0x3c1   : > { %v2733_v14 = vadd.f32 %v2732_v42, %v11896_v11  ;;  %v8986_v37 = vor.u32 %v10369_v31, %v8983_v9 }
 0x3c2   : > { %v2998_v8 = vadd.f32 %v2997_v44, %v2909_v57 }
 0x3c3   : > { %v2822_v4 = vadd.f32 %v2821_v59, %v2733_v14  ;;  %3164 = vmatpush.bf16.msra.mxu1 %v8986_v37 }
 0x3c4   : > { %v3438_v42 = vmax.f32 %v2998_v8, 0.0 }
 0x3c7   : > { %v2910_v63 = vpop.f32.mrf.mxu2  ;;  %v2999_v39 = vpop.f32.mrf.mxu3 }
 0x3c8   : > { %v2911_v25 = vadd.f32 %v2910_v63, %v2822_v4  ;;  %v2735_v50 = vpop.f32.mrf.mxu0  ;;  %v2824_v60 = vpop.f32.mrf.mxu1 }
 0x3c9   : > { %v2736_v51 = vadd.f32 %v2735_v50, %v11896_v11 }
 0x3ca   : > { %v3000_v44 = vadd.f32 %v2999_v39, %v2911_v25 }
 0x3cb   : > { %v2825_v57 = vadd.f32 %v2824_v60, %v2736_v51  ;;  %2774 = vmatmul.bf16.gmra.mxu0 %v11512_v22  ;;  %2863 = vmatmul.bf16.gmra.mxu1 %v11514_v45 }
 0x3cc   : > { %v3442_v32 = vmax.f32 %v3000_v44, 0.0  ;;  %2952 = vmatmul.bf16.gmra.mxu2 %v11526_v33  ;;  %3041 = vmatmul.bf16.gmra.mxu3 %v11528_v41 }
 0x3ce   : > { %v11919_v53 = vpack.c.bf16 %v3442_v32, %v3438_v42  ;;  %v10397_v42 = vld [vmem:[#allocation3 + $0x26c] sm:$0xf]  ;;  %v9095_v32 = vld [vmem:[#allocation3 + $0x278] sm:$0xf0] }
 0x3cf   : > { %v2913_v63 = vpop.f32.mrf.mxu2  ;;  %v3002_v9 = vpop.f32.mrf.mxu3 }
 0x3d0   : > { %13735 = vst [vmem:[#allocation74_spill] sm:$0xff] %v11919_v53  ;;  %v2914_v59 = vadd.f32 %v2913_v63, %v2825_v57  ;;  %v2737_v14 = vpop.f32.mrf.mxu0  ;;  %v2826_v4 = vpop.f32.mrf.mxu1 }
 0x3d1   : > { %v2738_v39 = vadd.f32 %v2737_v14, %v11896_v11 }
 0x3d2   : > { %v3003_v2 = vadd.f32 %v3002_v9, %v2914_v59  ;;  %v9098_v59 = vor.u32 %v10397_v42, %v9095_v32 }
 0x3d3   : > { %v2827_v38 = vadd.f32 %v2826_v4, %v2738_v39 }
 0x3d4   : > { %v3446_v51 = vmax.f32 %v3003_v2, 0.0  ;;  %3254 = vmatpush.bf16.msra.mxu2 %v9098_v59 }
 0x3d7   : > { %v2915_v56 = vpop.f32.mrf.mxu2  ;;  %v3004_v31 = vpop.f32.mrf.mxu3 }
 0x3d8   : > { %v2916_v27 = vadd.f32 %v2915_v56, %v2827_v38  ;;  %v2740_v8 = vpop.f32.mrf.mxu0  ;;  %v2829_v37 = vpop.f32.mrf.mxu1 }
 0x3d9   : > { %v2741_v25 = vadd.f32 %v2740_v8, %v11896_v11 }
 0x3da   : > { %v3005_v50 = vadd.f32 %v3004_v31, %v2916_v27  ;;  %v10333_v31 = vld [vmem:[#allocation3 + $0x6c] sm:$0xf]  ;;  %v8839_v27 = vld [vmem:[#allocation3 + $0x78] sm:$0xf0] }
 0x3db   : > { %v2830_v60 = vadd.f32 %v2829_v37, %v2741_v25  ;;  %2779 = vmatmul.bf16.gmra.mxu0 %v11536_v3  ;;  %2868 = vmatmul.bf16.gmra.mxu1 %v11538_v55  ;;  %v8842_v8 = vor.u32 %v10333_v31, %v8839_v27  ;;  %v10429_v37 = vld [vmem:[#allocation3 + $0x36c] sm:$0xf]  ;;  %v9223_v25 = vld [vmem:[#allocation3 + $0x378] sm:$0xf0] }
 0x3dc   : > { %v3450_v44 = vmax.f32 %v3005_v50, 0.0  ;;  %2957 = vmatmul.bf16.gmra.mxu2 %v11546_v10  ;;  %3046 = vmatmul.bf16.gmra.mxu3 %v11548_v58  ;;  %v10365_v50 = vld [vmem:[#allocation3 + $0x16c] sm:$0xf]  ;;  %v13738_v31 = vld [vmem:[#allocation46_spill] sm:$0xff] }
 0x3dd   : > { %3076 = vmatpush.bf16.msra.mxu0 %v8842_v8 }
 0x3de   : > { %v11927_v57 = vpack.c.bf16 %v3450_v44, %v3446_v51  ;;  %v9226_v51 = vor.u32 %v10429_v37, %v9223_v25  ;;  %v8967_v44 = vld [vmem:[#allocation3 + $0x178] sm:$0xf0] }
 0x3df   : > { %v2918_v63 = vpop.f32.mrf.mxu2  ;;  %v3007_v9 = vpop.f32.mrf.mxu3  ;;  %v8970_v42 = vor.u32 %v10365_v50, %v8967_v44 }
 0x3e0   : > { %13736 = vst [vmem:[#allocation75_spill] sm:$0xff] %v11927_v57  ;;  %v2919_v14 = vadd.f32 %v2918_v63, %v2830_v60  ;;  %v2742_v4 = vpop.f32.mrf.mxu0  ;;  %v2831_v39 = vpop.f32.mrf.mxu1  ;;  %3343 = vmatpush.bf16.msra.mxu3 %v9226_v51 }
 0x3e1   : > { %v2743_v38 = vadd.f32 %v2742_v4, %v11896_v11  ;;  %3165 = vmatpush.bf16.msra.mxu1 %v8970_v42 }
 0x3e2   : > { %v3008_v56 = vadd.f32 %v3007_v9, %v2919_v14 }
 0x3e3   : > { %v2832_v2 = vadd.f32 %v2831_v39, %v2743_v38  ;;  %v13737_v38 = vld [vmem:[#allocation45_spill] sm:$0xff] }
 0x3e4   : > { %v3454_v4 = vmax.f32 %v3008_v56, 0.0 }
 0x3e7   : > { %v2920_v57 = vpop.f32.mrf.mxu2  ;;  %v3009_v53 = vpop.f32.mrf.mxu3 }
 0x3e8   : > { %v2921_v60 = vadd.f32 %v2920_v57, %v2832_v2  ;;  %v2745_v32 = vpop.f32.mrf.mxu0  ;;  %v2834_v63 = vpop.f32.mrf.mxu1 }
 0x3e9   : > { %v2746_v59 = vadd.f32 %v2745_v32, %v11896_v11 }
 0x3ea   : > { %v3010_v9 = vadd.f32 %v3009_v53, %v2921_v60 }
 0x3eb   : > { %v2835_v14 = vadd.f32 %v2834_v63, %v2746_v59  ;;  %2784 = vmatmul.bf16.gmra.mxu0 %v11556_v49  ;;  %2873 = vmatmul.bf16.gmra.mxu1 %v11558_v40  ;;  %v9063_v49 = vld [vmem:[#allocation3 + $0x238] sm:$0xf0] }
 0x3ec   : > { %v3458_v39 = vmax.f32 %v3010_v9, 0.0  ;;  %2962 = vmatmul.bf16.gmra.mxu2 %v13737_v38  ;;  %3051 = vmatmul.bf16.gmra.mxu3 %v13738_v31  ;;  %v10361_v31 = vld [vmem:[#allocation3 + $0x14c] sm:$0xf]  ;;  %v8807_v38 = vld [vmem:[#allocation3 + $0x38] sm:$0xf0] }
 0x3ee   : > { %v11935_v27 = vpack.c.bf16 %v3458_v39, %v3454_v4  ;;  %v13740_v4 = vld [vmem:[#allocation47_spill] sm:$0xff]  ;;  %v13741_v39 = vld [vmem:[#allocation48_spill] sm:$0xff] }
 0x3ef   : > { %v2923_v57 = vpop.f32.mrf.mxu2  ;;  %v3012_v2 = vpop.f32.mrf.mxu3 }
 0x3f0   : > { %13739 = vst [vmem:[#allocation76_spill] sm:$0xff] %v11935_v27  ;;  %v2924_v8 = vadd.f32 %v2923_v57, %v2835_v14  ;;  %v2747_v37 = vpop.f32.mrf.mxu0  ;;  %v2836_v25 = vpop.f32.mrf.mxu1  ;;  %v13742_v27 = vld [vmem:[#allocation49_spill] sm:$0xff] }
 0x3f1   : > { %v2748_v53 = vadd.f32 %v2747_v37, %v11896_v11  ;;  %v13743_v37 = vld [vmem:[#allocation50_spill] sm:$0xff] }
 0x3f2   : > { %v3013_v50 = vadd.f32 %v3012_v2, %v2924_v8  ;;  %v10393_v8 = vld [vmem:[#allocation3 + $0x24c] sm:$0xf] }
 0x3f3   : > { %v2837_v51 = vadd.f32 %v2836_v25, %v2748_v53  ;;  %v9079_v25 = vld [vmem:[#allocation3 + $0x258] sm:$0xf0]  ;;  %v10329_v53 = vld [vmem:[#allocation3 + $0x4c] sm:$0xf] }
 0x3f4   : > { %v3462_v14 = vmax.f32 %v3013_v50, 0.0 }
 0x3f7   : > { %v2925_v44 = vpop.f32.mrf.mxu2  ;;  %v3014_v42 = vpop.f32.mrf.mxu3 }
 0x3f8   : > { %v2926_v60 = vadd.f32 %v2925_v44, %v2837_v51  ;;  %v2750_v56 = vpop.f32.mrf.mxu0  ;;  %v2839_v32 = vpop.f32.mrf.mxu1 }
 0x3f9   : > { %v2751_v63 = vadd.f32 %v2750_v56, %v11896_v11  ;;  %v9082_v56 = vor.u32 %v10393_v8, %v9079_v25  ;;  %v10357_v8 = vld [vmem:[#allocation3 + $0x12c] sm:$0xf] }
 0x3fa   : > { %v3015_v59 = vadd.f32 %v3014_v42, %v2926_v60  ;;  %v8823_v42 = vld [vmem:[#allocation3 + $0x58] sm:$0xf0]  ;;  %v10425_v60 = vld [vmem:[#allocation3 + $0x34c] sm:$0xf] }
 0x3fb   : > { %v2840_v9 = vadd.f32 %v2839_v32, %v2751_v63  ;;  %2789 = vmatmul.bf16.gmra.mxu0 %v13740_v4  ;;  %2878 = vmatmul.bf16.gmra.mxu1 %v13741_v39  ;;  %v9207_v32 = vld [vmem:[#allocation3 + $0x358] sm:$0xf0]  ;;  %v8826_v50 = vor.u32 %v10329_v53, %v8823_v42 }
 0x3fc   : > { %v3466_v57 = vmax.f32 %v3015_v59, 0.0  ;;  %2967 = vmatmul.bf16.gmra.mxu2 %v13742_v27  ;;  %3056 = vmatmul.bf16.gmra.mxu3 %v13743_v37  ;;  %v9210_v59 = vor.u32 %v10425_v60, %v9207_v32  ;;  %v8951_v27 = vld [vmem:[#allocation3 + $0x158] sm:$0xf0]  ;;  %v10421_v60 = vld [vmem:[#allocation3 + $0x32c] sm:$0xf] }
 0x3fd   : > { %3255 = vmatpush.bf16.msra.mxu2 %v9082_v56  ;;  %3077 = vmatpush.bf16.msra.mxu0 %v8826_v50  ;;  %v9191_v32 = vld [vmem:[#allocation3 + $0x338] sm:$0xf0] }
 0x3fe   : > { %v11943_v2 = vpack.c.bf16 %v3466_v57, %v3462_v14  ;;  %v8954_v14 = vor.u32 %v10361_v31, %v8951_v27  ;;  %3344 = vmatpush.bf16.msra.mxu3 %v9210_v59  ;;  %v9194_v58 = vor.u32 %v10421_v60, %v9191_v32  ;;  %v10321_v31 = vld [vmem:[#allocation3 + $0xc] sm:$0xf]  ;;  %v8791_v27 = vld [vmem:[#allocation3 + $0x18] sm:$0xf0] }
 0x3ff   : > { %v2928_v51 = vpop.f32.mrf.mxu2  ;;  %v3017_v44 = vpop.f32.mrf.mxu3 }
 0x400   : > { %13744 = vst [vmem:[#allocation77_spill] sm:$0xff] %v11943_v2  ;;  %v2929_v63 = vadd.f32 %v2928_v51, %v2840_v9  ;;  %v2752_v4 = vpop.f32.mrf.mxu0  ;;  %v2841_v39 = vpop.f32.mrf.mxu1  ;;  %v10325_v2 = vld [vmem:[#allocation3 + $0x2c] sm:$0xf]  ;;  %3166 = vmatpush.bf16.msra.mxu1 %v8954_v14  ;;  %v8935_v9 = vld [vmem:[#allocation3 + $0x138] sm:$0xf0] }
 0x401   : > { %v2753_v37 = vadd.f32 %v2752_v4, %v11896_v11  ;;  %v8810_v40 = vor.u32 %v10325_v2, %v8807_v38  ;;  %v10389_v51 = vld [vmem:[#allocation3 + $0x22c] sm:$0xf]  ;;  %v8938_v53 = vor.u32 %v10357_v8, %v8935_v9  ;;  %v9047_v2 = vld [vmem:[#allocation3 + $0x218] sm:$0xf0] }
 0x402   : > { %v3018_v57 = vadd.f32 %v3017_v44, %v2929_v63  ;;  %v9066_v42 = vor.u32 %v10389_v51, %v9063_v49  ;;  %v10353_v4 = vld [vmem:[#allocation3 + $0x10c] sm:$0xf]  ;;  %3345 = vmatpush.bf16.msra.mxu3 %v9194_v58  ;;  %v9175_v8 = vld [vmem:[#allocation3 + $0x318] sm:$0xf0] }
 0x403   : > { %v2842_v25 = vadd.f32 %v2841_v39, %v2753_v37  ;;  %3078 = vmatpush.bf16.msra.mxu0 %v8810_v40  ;;  %v8794_v39 = vor.u32 %v10321_v31, %v8791_v27  ;;  %v8919_v37 = vld [vmem:[#allocation3 + $0x118] sm:$0xf0]  ;;  %v10385_v38 = vld [vmem:[#allocation3 + $0x20c] sm:$0xf] }
 0x404   : > { %3256 = vmatpush.bf16.msra.mxu2 %v9066_v42  ;;  %3167 = vmatpush.bf16.msra.mxu1 %v8938_v53  ;;  %v9050_v49 = vor.u32 %v10385_v38, %v9047_v2  ;;  %v10417_v14 = vld [vmem:[#allocation3 + $0x30c] sm:$0xf]  ;;  %v8922_v9 = vor.u32 %v10353_v4, %v8919_v37  ;;  %v3470_v58 = vmax.f32 %v3018_v57, 0.0 }
 0x405   : > { %v9178_v51 = vor.u32 %v10417_v14, %v9175_v8 }
 0x407   : > { %v2930_v44 = vpop.f32.mrf.mxu2  ;;  %v3019_v56 = vpop.f32.mrf.mxu3  ;;  %3079 = vmatpush.bf16.msra.mxu0 %v8794_v39  ;;  %3346 = vmatpush.bf16.msra.mxu3 %v9178_v51 }
 0x408   : > { %v2931_v63 = vadd.f32 %v2930_v44, %v2842_v25  ;;  %v2755_v50 = vpop.f32.mrf.mxu0  ;;  %v2844_v59 = vpop.f32.mrf.mxu1  ;;  %3257 = vmatpush.bf16.msra.mxu2 %v9050_v49  ;;  %3168 = vmatpush.bf16.msra.mxu1 %v8922_v9 }
 0x409   : > { %v2756_v40 = vadd.f32 %v2755_v50, %v11896_v11 }
 0x40a   : > { %v3020_v42 = vadd.f32 %v3019_v56, %v2931_v63 }
 0x40b   : > { %v2845_v60 = vadd.f32 %v2844_v59, %v2756_v40  ;;  %2794 = vmatmul.bf16.gmra.mxu0 %v11596_v47  ;;  %2883 = vmatmul.bf16.gmra.mxu1 %v11598_v29 }
 0x40c   : > { %v3474_v53 = vmax.f32 %v3020_v42, 0.0  ;;  %2972 = vmatmul.bf16.gmra.mxu2 %v11606_v13  ;;  %3061 = vmatmul.bf16.gmra.mxu3 %v11608_v35 }
 0x40e   : > { %v11951_v25 = vpack.c.bf16 %v3474_v53, %v3470_v58 }
 0x40f   : > { %v2933_v32 = vpop.f32.mrf.mxu2  ;;  %v3022_v31 = vpop.f32.mrf.mxu3 }
 0x410   : > { %v2934_v27 = vadd.f32 %v2933_v32, %v2845_v60  ;;  %v2757_v4 = vpop.f32.mrf.mxu0  ;;  %v2846_v44 = vpop.f32.mrf.mxu1 }
 0x411   : > { %v2758_v56 = vadd.f32 %v2757_v4, %v11896_v11 }
 0x412   : > { %v3023_v39 = vadd.f32 %v3022_v31, %v2934_v27 }
 0x413   : > { %v2847_v37 = vadd.f32 %v2846_v44, %v2758_v56 }
 0x414   : > { %v3478_v8 = vmax.f32 %v3023_v39, 0.0 }
 0x417   : > { %v2935_v38 = vpop.f32.mrf.mxu2  ;;  %v3024_v57 = vpop.f32.mrf.mxu3 }
 0x418   : > { %v2936_v2 = vadd.f32 %v2935_v38, %v2847_v37  ;;  %v2760_v63 = vpop.f32.mrf.mxu0  ;;  %v2849_v50 = vpop.f32.mrf.mxu1 }
 0x419   : > { %v2761_v59 = vadd.f32 %v2760_v63, %v11896_v11 }
 0x41a   : > { %v3025_v49 = vadd.f32 %v3024_v57, %v2936_v2 }
 0x41b   : > { %v2850_v14 = vadd.f32 %v2849_v50, %v2761_v59  ;;  %2799 = vmatmul.bf16.gmra.mxu0 %v11621_v28  ;;  %2888 = vmatmul.bf16.gmra.mxu1 %v11623_v26 }
 0x41c   : > { %v3482_v40 = vmax.f32 %v3025_v49, 0.0  ;;  %2977 = vmatmul.bf16.gmra.mxu2 %v11632_v34  ;;  %3066 = vmatmul.bf16.gmra.mxu3 %v11634_v1 }
 0x41e   : > { %v11959_v9 = vpack.c.bf16 %v3482_v40, %v3478_v8 }
 0x41f   : > { %v2938_v51 = vpop.f32.mrf.mxu2  ;;  %v3027_v42 = vpop.f32.mrf.mxu3 }
 0x420   : > { %v2939_v60 = vadd.f32 %v2938_v51, %v2850_v14  ;;  %v2762_v58 = vpop.f32.mrf.mxu0  ;;  %v2851_v53 = vpop.f32.mrf.mxu1 }
 0x421   : > { %v2763_v32 = vadd.f32 %v2762_v58, %v11896_v11 }
 0x422   : > { %v3028_v31 = vadd.f32 %v3027_v42, %v2939_v60 }
 0x423   : > { %v2852_v27 = vadd.f32 %v2851_v53, %v2763_v32 }
 0x424   : > { %v3486_v63 = vmax.f32 %v3028_v31, 0.0 }
 0x427   : > { %v2940_v4 = vpop.f32.mrf.mxu2  ;;  %v3029_v44 = vpop.f32.mrf.mxu3 }
 0x428   : > { %v2941_v56 = vadd.f32 %v2940_v4, %v2852_v27  ;;  %v2765_v39 = vpop.f32.mrf.mxu0  ;;  %v2854_v37 = vpop.f32.mrf.mxu1 }
 0x429   : > { %v2766_v38 = vadd.f32 %v2765_v39, %v11896_v11 }
 0x42a   : > { %v3030_v57 = vadd.f32 %v3029_v44, %v2941_v56 }
 0x42b   : > { %v2855_v2 = vadd.f32 %v2854_v37, %v2766_v38  ;;  %3080 = vmatmul.bf16.vlgmr.msra.gmra.mxu0 %v11424_v12  ;;  %3169 = vmatmul.bf16.vlgmr.msra.gmra.mxu1 %v11426_v15 }
 0x42c   : > { %v3490_v50 = vmax.f32 %v3030_v57, 0.0  ;;  %3258 = vmatmul.bf16.vlgmr.msra.gmra.mxu2 %v11235_v16  ;;  %3347 = vmatmul.bf16.vlgmr.msra.gmra.mxu3 %v11237_v17 }
 0x42e   : > { %v11967_v59 = vpack.c.bf16 %v3490_v50, %v3486_v63 }
 0x42f   : > { %v2943_v49 = vpop.f32.mrf.mxu2  ;;  %v3032_v14 = vpop.f32.mrf.mxu3 }
 0x430   : > { %13745 = vst [vmem:[#allocation78_spill] sm:$0xff] %v11967_v59  ;;  %v2944_v8 = vadd.f32 %v2943_v49, %v2855_v2  ;;  %v2767_v40 = vpop.f32.mrf.mxu0  ;;  %v2856_v51 = vpop.f32.mrf.mxu1 }
 0x431   : > { %v2768_v42 = vadd.f32 %v2767_v40, %v11896_v11 }
 0x432   : > { %v3033_v60 = vadd.f32 %v3032_v14, %v2944_v8 }
 0x433   : > { %v2857_v58 = vadd.f32 %v2856_v51, %v2768_v42 }
 0x434   : > { %v3494_v4 = vmax.f32 %v3033_v60, 0.0 }
 0x437   : > { %v2945_v12 = vpop.f32.mrf.mxu2  ;;  %v3034_v53 = vpop.f32.mrf.mxu3 }
 0x438   : > { %v2946_v15 = vadd.f32 %v2945_v12, %v2857_v58  ;;  %v2770_v32 = vpop.f32.mrf.mxu0  ;;  %v2859_v31 = vpop.f32.mrf.mxu1 }
 0x439   : > { %v2771_v16 = vadd.f32 %v2770_v32, %v11896_v11 }
 0x43a   : > { %v3035_v27 = vadd.f32 %v3034_v53, %v2946_v15 }
 0x43b   : > { %v2860_v17 = vadd.f32 %v2859_v31, %v2771_v16  ;;  %3085 = vmatmul.bf16.gmra.mxu0 %v11456_v61  ;;  %3174 = vmatmul.bf16.gmra.mxu1 %v11458_v62 }
 0x43c   : > { %v3498_v44 = vmax.f32 %v3035_v27, 0.0  ;;  %3263 = vmatmul.bf16.gmra.mxu2 %v11261_v48  ;;  %3352 = vmatmul.bf16.gmra.mxu3 %v13662_v20 }
 0x43e   : > { %v11975_v56 = vpack.c.bf16 %v3498_v44, %v3494_v4 }
 0x43f   : > { %v2948_v39 = vpop.f32.mrf.mxu2  ;;  %v3037_v37 = vpop.f32.mrf.mxu3 }
 0x440   : > { %13746 = vst [vmem:[#allocation79_spill] sm:$0xff] %v11975_v56  ;;  %v2949_v38 = vadd.f32 %v2948_v39, %v2860_v17  ;;  %v2772_v57 = vpop.f32.mrf.mxu0  ;;  %v2861_v2 = vpop.f32.mrf.mxu1 }
 0x441   : > { %v2773_v63 = vadd.f32 %v2772_v57, %v11896_v11 }
 0x442   : > { %v3038_v50 = vadd.f32 %v3037_v37, %v2949_v38 }
 0x443   : > { %v2862_v49 = vadd.f32 %v2861_v2, %v2773_v63  ;;  %v13748_v2 = vld [vmem:[#allocation19_spill] sm:$0xff] }
 0x444   : > { %v3502_v42 = vmax.f32 %v3038_v50, 0.0  ;;  %v9661_v50 = vld [vmem:[#allocation6 + $0x2e0] sm:$0xf] }
 0x447   : > { %v2950_v61 = vpop.f32.mrf.mxu2  ;;  %v3039_v14 = vpop.f32.mrf.mxu3 }
 0x448   : > { %v2951_v62 = vadd.f32 %v2950_v61, %v2862_v49  ;;  %v2775_v8 = vpop.f32.mrf.mxu0  ;;  %v2864_v40 = vpop.f32.mrf.mxu1  ;;  %v10542_v49 = vld [vmem:[#allocation6 + $0x2ec] sm:$0xf0] }
 0x449   : > { %v2776_v48 = vadd.f32 %v2775_v8, %v11896_v11 }
 0x44a   : > { %v3040_v51 = vadd.f32 %v3039_v14, %v2951_v62  ;;  %v9662_v62 = vor.u32 %v10542_v49, %v9661_v50 }
 0x44b   : > { %v2865_v20 = vadd.f32 %v2864_v40, %v2776_v48  ;;  %3090 = vmatmul.bf16.gmra.mxu0 %v11488_v24  ;;  %3179 = vmatmul.bf16.gmra.mxu1 %v11490_v19 }
 0x44c   : > { %v3506_v60 = vmax.f32 %v3040_v51, 0.0  ;;  %3268 = vmatmul.bf16.gmra.mxu2 %v13664_v46  ;;  %3357 = vmatmul.bf16.gmra.mxu3 %v13665_v21 }
 0x44d   : > { %4576 = vmatpush.bf16.msrb.mxu2 %v9662_v62 }
 0x44e   : > { %v11983_v58 = vpack.c.bf16 %v3506_v60, %v3502_v42  ;;  %v10478_v42 = vld [vmem:[#allocation6 + $0xec] sm:$0xf0]  ;;  %v9789_v60 = vld [vmem:[#allocation6 + $0x3e0] sm:$0xf] }
 0x44f   : > { %v2953_v12 = vpop.f32.mrf.mxu2  ;;  %v3042_v53 = vpop.f32.mrf.mxu3 }
 0x450   : > { %13747 = vst [vmem:[#allocation80_spill] sm:$0xff] %v11983_v58  ;;  %v2954_v15 = vadd.f32 %v2953_v12, %v2865_v20  ;;  %v2777_v32 = vpop.f32.mrf.mxu0  ;;  %v2866_v31 = vpop.f32.mrf.mxu1  ;;  %v9405_v20 = vld [vmem:[#allocation6 + $0xe0] sm:$0xf]  ;;  %v10574_v12 = vld [vmem:[#allocation6 + $0x3ec] sm:$0xf0] }
 0x451   : > { %v2778_v16 = vadd.f32 %v2777_v32, %v11896_v11  ;;  %v10510_v32 = vld [vmem:[#allocation6 + $0x1ec] sm:$0xf0] }
 0x452   : > { %v3043_v27 = vadd.f32 %v3042_v53, %v2954_v15  ;;  %v9533_v53 = vld [vmem:[#allocation6 + $0x1e0] sm:$0xf]  ;;  %v9790_v15 = vor.u32 %v10574_v12, %v9789_v60 }
 0x453   : > { %v2867_v17 = vadd.f32 %v2866_v31, %v2778_v16 }
 0x454   : > { %v3510_v38 = vmax.f32 %v3043_v27, 0.0  ;;  %v9534_v27 = vor.u32 %v10510_v32, %v9533_v53  ;;  %4665 = vmatpush.bf16.msrb.mxu3 %v9790_v15  ;;  %v13755_v15 = vld [vmem:[#allocation24_spill] sm:$0xff]  ;;  %v13756_v32 = vld [vmem:[#allocation25_spill] sm:$0xff] }
 0x456   : > { %4487 = vmatpush.bf16.msrb.mxu1 %v9534_v27  ;;  %v13757_v27 = vld [vmem:[#allocation26_spill] sm:$0xff] }
 0x457   : > { %v2955_v24 = vpop.f32.mrf.mxu2  ;;  %v3044_v4 = vpop.f32.mrf.mxu3 }
 0x458   : > { %v2956_v19 = vadd.f32 %v2955_v24, %v2867_v17  ;;  %v2780_v44 = vpop.f32.mrf.mxu0  ;;  %v2869_v39 = vpop.f32.mrf.mxu1 }
 0x459   : > { %v2781_v46 = vadd.f32 %v2780_v44, %v11896_v11 }
 0x45a   : > { %v3045_v37 = vadd.f32 %v3044_v4, %v2956_v19 }
 0x45b   : > { %v2870_v21 = vadd.f32 %v2869_v39, %v2781_v46  ;;  %3095 = vmatmul.bf16.gmra.mxu0 %v13707_v54  ;;  %3184 = vmatmul.bf16.gmra.mxu1 %v13708_v36  ;;  %v13750_v46 = vld [vmem:[#allocation20_spill] sm:$0xff] }
 0x45c   : > { %v3514_v57 = vmax.f32 %v3045_v37, 0.0  ;;  %3273 = vmatmul.bf16.gmra.mxu2 %v13709_v6  ;;  %3362 = vmatmul.bf16.gmra.mxu3 %v13748_v2  ;;  %v9406_v6 = vor.u32 %v10478_v42, %v9405_v20  ;;  %v13751_v37 = vld [vmem:[#allocation21_spill] sm:$0xff]  ;;  %v13753_v2 = vld [vmem:[#allocation23_spill] sm:$0xff] }
 0x45e   : > { %v11991_v63 = vpack.c.bf16 %v3514_v57, %v3510_v38  ;;  %4398 = vmatpush.bf16.msrb.mxu0 %v9406_v6  ;;  %v13752_v57 = vld [vmem:[#allocation22_spill] sm:$0xff] }
 0x45f   : > { %v2958_v61 = vpop.f32.mrf.mxu2  ;;  %v3047_v14 = vpop.f32.mrf.mxu3 }
 0x460   : > { %13749 = vst [vmem:[#allocation19_spill] sm:$0xff] %v11991_v63  ;;  %v2959_v8 = vadd.f32 %v2958_v61, %v2870_v21  ;;  %v2782_v40 = vpop.f32.mrf.mxu0  ;;  %v2871_v48 = vpop.f32.mrf.mxu1 }
 0x461   : > { %v2783_v54 = vadd.f32 %v2782_v40, %v11896_v11 }
 0x462   : > { %v3048_v36 = vadd.f32 %v3047_v14, %v2959_v8 }
 0x463   : > { %v2872_v51 = vadd.f32 %v2871_v48, %v2783_v54 }
 0x464   : > { %v3518_v21 = vmax.f32 %v3048_v36, 0.0 }
 0x467   : > { %v2960_v31 = vpop.f32.mrf.mxu2  ;;  %v3049_v16 = vpop.f32.mrf.mxu3 }
 0x468   : > { %v2961_v17 = vadd.f32 %v2960_v31, %v2872_v51  ;;  %v2785_v24 = vpop.f32.mrf.mxu0  ;;  %v2874_v4 = vpop.f32.mrf.mxu1 }
 0x469   : > { %v2786_v19 = vadd.f32 %v2785_v24, %v11896_v11 }
 0x46a   : > { %v3050_v44 = vadd.f32 %v3049_v16, %v2961_v17  ;;  %v13758_v17 = vld [vmem:[#allocation27_spill] sm:$0xff] }
 0x46b   : > { %v2875_v39 = vadd.f32 %v2874_v4, %v2786_v19  ;;  %3100 = vmatmul.bf16.gmra.mxu0 %v13750_v46  ;;  %3189 = vmatmul.bf16.gmra.mxu1 %v13751_v37  ;;  %v9645_v4 = vld [vmem:[#allocation6 + $0x2c0] sm:$0xf]  ;;  %v10538_v19 = vld [vmem:[#allocation6 + $0x2cc] sm:$0xf0] }
 0x46c   : > { %v3522_v38 = vmax.f32 %v3050_v44, 0.0  ;;  %3278 = vmatmul.bf16.gmra.mxu2 %v13752_v57  ;;  %3367 = vmatmul.bf16.gmra.mxu3 %v13753_v2  ;;  %v9646_v46 = vor.u32 %v10538_v19, %v9645_v4 }
 0x46e   : > { %v11999_v50 = vpack.c.bf16 %v3522_v38, %v3518_v21  ;;  %4577 = vmatpush.bf16.msrb.mxu2 %v9646_v46 }
 0x46f   : > { %v2963_v49 = vpop.f32.mrf.mxu2  ;;  %v3052_v61 = vpop.f32.mrf.mxu3 }
 0x470   : > { %13754 = vst [vmem:[#allocation20_spill] sm:$0xff] %v11999_v50  ;;  %v2964_v14 = vadd.f32 %v2963_v49, %v2875_v39  ;;  %v2787_v62 = vpop.f32.mrf.mxu0  ;;  %v2876_v8 = vpop.f32.mrf.mxu1 }
 0x471   : > { %v2788_v40 = vadd.f32 %v2787_v62, %v11896_v11 }
 0x472   : > { %v3053_v48 = vadd.f32 %v3052_v61, %v2964_v14  ;;  %v9389_v61 = vld [vmem:[#allocation6 + $0xc0] sm:$0xf]  ;;  %v10474_v14 = vld [vmem:[#allocation6 + $0xcc] sm:$0xf0] }
 0x473   : > { %v2877_v54 = vadd.f32 %v2876_v8, %v2788_v40  ;;  %v9390_v62 = vor.u32 %v10474_v14, %v9389_v61  ;;  %v9773_v8 = vld [vmem:[#allocation6 + $0x3c0] sm:$0xf]  ;;  %v10570_v40 = vld [vmem:[#allocation6 + $0x3cc] sm:$0xf0] }
 0x474   : > { %v3526_v31 = vmax.f32 %v3053_v48, 0.0  ;;  %v9517_v48 = vld [vmem:[#allocation6 + $0x1c0] sm:$0xf] }
 0x475   : > { %4399 = vmatpush.bf16.msrb.mxu0 %v9390_v62  ;;  %v13762_v62 = vld [vmem:[#allocation32_spill] sm:$0xff] }
 0x477   : > { %v2965_v51 = vpop.f32.mrf.mxu2  ;;  %v3054_v20 = vpop.f32.mrf.mxu3 }
 0x478   : > { %v2966_v42 = vadd.f32 %v2965_v51, %v2877_v54  ;;  %v2790_v36 = vpop.f32.mrf.mxu0  ;;  %v2879_v6 = vpop.f32.mrf.mxu1  ;;  %v9774_v54 = vor.u32 %v10570_v40, %v9773_v8  ;;  %v10506_v51 = vld [vmem:[#allocation6 + $0x1cc] sm:$0xf0] }
 0x479   : > { %v2791_v60 = vadd.f32 %v2790_v36, %v11896_v11  ;;  %v9518_v36 = vor.u32 %v10506_v51, %v9517_v48  ;;  %v13763_v8 = vld [vmem:[#allocation33_spill] sm:$0xff]  ;;  %v13765_v51 = vld [vmem:[#allocation35_spill] sm:$0xff] }
 0x47a   : > { %v3055_v12 = vadd.f32 %v3054_v20, %v2966_v42  ;;  %4666 = vmatpush.bf16.msrb.mxu3 %v9774_v54  ;;  %v13764_v54 = vld [vmem:[#allocation34_spill] sm:$0xff] }
 0x47b   : > { %v2880_v53 = vadd.f32 %v2879_v6, %v2791_v60  ;;  %3105 = vmatmul.bf16.gmra.mxu0 %v13755_v15  ;;  %3194 = vmatmul.bf16.gmra.mxu1 %v13756_v32 }
 0x47c   : > { %v3530_v16 = vmax.f32 %v3055_v12, 0.0  ;;  %3283 = vmatmul.bf16.gmra.mxu2 %v13757_v27  ;;  %3372 = vmatmul.bf16.gmra.mxu3 %v13758_v17  ;;  %v13760_v27 = vld [vmem:[#allocation31_spill] sm:$0xff] }
 0x47d   : > { %4488 = vmatpush.bf16.msrb.mxu1 %v9518_v36  ;;  %v10534_v36 = vld [vmem:[#allocation6 + $0x2ac] sm:$0xf0] }
 0x47e   : > { %v12007_v24 = vpack.c.bf16 %v3530_v16, %v3526_v31 }
 0x47f   : > { %v2968_v44 = vpop.f32.mrf.mxu2  ;;  %v3057_v39 = vpop.f32.mrf.mxu3 }
 0x480   : > { %13759 = vst [vmem:[#allocation21_spill] sm:$0xff] %v12007_v24  ;;  %v2969_v37 = vadd.f32 %v2968_v44, %v2880_v53  ;;  %v2792_v21 = vpop.f32.mrf.mxu0  ;;  %v2881_v38 = vpop.f32.mrf.mxu1 }
 0x481   : > { %v2793_v57 = vadd.f32 %v2792_v21, %v11896_v11 }
 0x482   : > { %v3058_v2 = vadd.f32 %v3057_v39, %v2969_v37 }
 0x483   : > { %v2882_v49 = vadd.f32 %v2881_v38, %v2793_v57 }
 0x484   : > { %v3534_v31 = vmax.f32 %v3058_v2, 0.0 }
 0x487   : > { %v2970_v20 = vpop.f32.mrf.mxu2  ;;  %v3059_v42 = vpop.f32.mrf.mxu3 }
 0x488   : > { %v2971_v6 = vadd.f32 %v2970_v20, %v2882_v49  ;;  %v2795_v60 = vpop.f32.mrf.mxu0  ;;  %v2884_v12 = vpop.f32.mrf.mxu1 }
 0x489   : > { %v2796_v53 = vadd.f32 %v2795_v60, %v11896_v11 }
 0x48a   : > { %v3060_v15 = vadd.f32 %v3059_v42, %v2971_v6  ;;  %v9629_v42 = vld [vmem:[#allocation6 + $0x2a0] sm:$0xf] }
 0x48b   : > { %v2885_v32 = vadd.f32 %v2884_v12, %v2796_v53  ;;  %3110 = vmatmul.bf16.gmra.mxu0 %v13682_v0  ;;  %3199 = vmatmul.bf16.gmra.mxu1 %v13683_v43  ;;  %v9630_v12 = vor.u32 %v10534_v36, %v9629_v42 }
 0x48c   : > { %v3538_v16 = vmax.f32 %v3060_v15, 0.0  ;;  %3288 = vmatmul.bf16.gmra.mxu2 %v13722_v5  ;;  %3377 = vmatmul.bf16.gmra.mxu3 %v13760_v27 }
 0x48d   : > { %4578 = vmatpush.bf16.msrb.mxu2 %v9630_v12 }
 0x48e   : > { %v12015_v17 = vpack.c.bf16 %v3538_v16, %v3534_v31 }
 0x48f   : > { %v2973_v4 = vpop.f32.mrf.mxu2  ;;  %v3062_v19 = vpop.f32.mrf.mxu3 }
 0x490   : > { %13761 = vst [vmem:[#allocation22_spill] sm:$0xff] %v12015_v17  ;;  %v2974_v44 = vadd.f32 %v2973_v4, %v2885_v32  ;;  %v2797_v39 = vpop.f32.mrf.mxu0  ;;  %v2886_v46 = vpop.f32.mrf.mxu1  ;;  %v10778_v4 = vld [vmem:[%s13352_s4] sm:$0xf] }
 0x491   : > { %v2798_v37 = vadd.f32 %v2797_v39, %v11896_v11  ;;  %v10470_v39 = vld [vmem:[#allocation6 + $0xac] sm:$0xf0] }
 0x492   : > { %v3063_v21 = vadd.f32 %v3062_v19, %v2974_v44  ;;  %v12029_v19 = vperm.slane %v10778_v4, 3  ;;  %v9373_v44 = vld [vmem:[#allocation6 + $0xa0] sm:$0xf]  ;;  %v13766_v4 = vld [vmem:[#allocation37_spill] sm:$0xff] }
 0x493   : > { %v2887_v38 = vadd.f32 %v2886_v46, %v2798_v37  ;;  %v9374_v46 = vor.u32 %v10470_v39, %v9373_v44  ;;  %v9757_v37 = vld [vmem:[#allocation6 + $0x3a0] sm:$0xf] }
 0x494   : > { %v3542_v40 = vmax.f32 %v3063_v21, 0.0  ;;  %v10566_v21 = vld [vmem:[#allocation6 + $0x3ac] sm:$0xf0] }
 0x495   : > { %4400 = vmatpush.bf16.msrb.mxu0 %v9374_v46  ;;  %v13767_v46 = vld [vmem:[#allocation38_spill] sm:$0xff] }
 0x497   : > { %v2975_v0 = vpop.f32.mrf.mxu2  ;;  %v3064_v57 = vpop.f32.mrf.mxu3 }
 0x498   : > { %v2976_v43 = vadd.f32 %v2975_v0, %v2887_v38  ;;  %v2800_v2 = vpop.f32.mrf.mxu0  ;;  %v2889_v49 = vpop.f32.mrf.mxu1  ;;  %v9501_v38 = vld [vmem:[#allocation6 + $0x1a0] sm:$0xf]  ;;  %v9758_v0 = vor.u32 %v10566_v21, %v9757_v37 }
 0x499   : > { %v2801_v5 = vadd.f32 %v2800_v2, %v11896_v11  ;;  %v13768_v37 = vld [vmem:[#allocation39_spill] sm:$0xff] }
 0x49a   : > { %v3065_v61 = vadd.f32 %v3064_v57, %v2976_v43  ;;  %v10502_v57 = vld [vmem:[#allocation6 + $0x1ac] sm:$0xf0]  ;;  %4667 = vmatpush.bf16.msrb.mxu3 %v9758_v0 }
 0x49b   : > { %v2890_v14 = vadd.f32 %v2889_v49, %v2801_v5  ;;  %3115 = vmatmul.bf16.gmra.mxu0 %v13762_v62  ;;  %3204 = vmatmul.bf16.gmra.mxu1 %v13763_v8  ;;  %v10530_v0 = vld [vmem:[#allocation6 + $0x28c] sm:$0xf0] }
 0x49c   : > { %v3546_v48 = vmax.f32 %v3065_v61, 0.0  ;;  %3293 = vmatmul.bf16.gmra.mxu2 %v13764_v54  ;;  %3382 = vmatmul.bf16.gmra.mxu3 %v13765_v51 }
 0x49e   : > { %v12023_v20 = vpack.c.bf16 %v3546_v48, %v3542_v40 }
 0x49f   : > { %v2978_v6 = vpop.f32.mrf.mxu2  ;;  %v3067_v60 = vpop.f32.mrf.mxu3 }
 0x4a0   : > { %v2979_v53 = vadd.f32 %v2978_v6, %v2890_v14  ;;  %v2802_v15 = vpop.f32.mrf.mxu0  ;;  %v2891_v32 = vpop.f32.mrf.mxu1 }
 0x4a1   : > { %v2803_v31 = vadd.f32 %v2802_v15, %v11896_v11  ;;  %v9502_v11 = vor.u32 %v10502_v57, %v9501_v38  ;;  %v9613_v38 = vld [vmem:[#allocation6 + $0x280] sm:$0xf] }
 0x4a2   : > { %v3068_v16 = vadd.f32 %v3067_v60, %v2979_v53 }
 0x4a3   : > { %v2892_v27 = vadd.f32 %v2891_v32, %v2803_v31  ;;  %4489 = vmatpush.bf16.msrb.mxu1 %v9502_v11 }
 0x4a4   : > { %v3550_v40 = vmax.f32 %v3068_v16, 0.0 }
 0x4a7   : > { %v2980_v43 = vpop.f32.mrf.mxu2  ;;  %v3069_v2 = vpop.f32.mrf.mxu3 }
 0x4a8   : > { %v2981_v49 = vadd.f32 %v2980_v43, %v2892_v27  ;;  %v3081_v5 = vpop.f32.mrf.mxu0  ;;  %v3170_v61 = vpop.f32.mrf.mxu1 }
 0x4a9   : > { %v3082_v14 = vadd.f32 %v3081_v5, %v12029_v19 }
 0x4aa   : > { %v3070_v62 = vadd.f32 %v3069_v2, %v2981_v49  ;;  %v9614_v2 = vor.u32 %v10530_v0, %v9613_v38 }
 0x4ab   : > { %v3171_v8 = vadd.f32 %v3170_v61, %v3082_v14  ;;  %3120 = vmatmul.bf16.gmra.mxu0 %v11448_v23  ;;  %3209 = vmatmul.bf16.gmra.mxu1 %v11450_v18 }
 0x4ac   : > { %v3554_v48 = vmax.f32 %v3070_v62, 0.0  ;;  %3298 = vmatmul.bf16.gmra.mxu2 %v11462_v7  ;;  %3387 = vmatmul.bf16.gmra.mxu3 %v13730_v30  ;;  %v9357_v62 = vld [vmem:[#allocation6 + $0x80] sm:$0xf] }
 0x4ad   : > { %4579 = vmatpush.bf16.msrb.mxu2 %v9614_v2 }
 0x4ae   : > { %v12036_v54 = vpack.c.bf16 %v3554_v48, %v3550_v40  ;;  %v9741_v48 = vld [vmem:[#allocation6 + $0x380] sm:$0xf] }
 0x4af   : > { %v3259_v51 = vpop.f32.mrf.mxu2  ;;  %v3348_v42 = vpop.f32.mrf.mxu3 }
 0x4b0   : > { %v3260_v36 = vadd.f32 %v3259_v51, %v3171_v8  ;;  %v3083_v6 = vpop.f32.mrf.mxu0  ;;  %v3172_v60 = vpop.f32.mrf.mxu1  ;;  %v10466_v8 = vld [vmem:[#allocation6 + $0x8c] sm:$0xf0] }
 0x4b1   : > { %v3084_v12 = vadd.f32 %v3083_v6, %v12029_v19  ;;  %v9358_v40 = vor.u32 %v10466_v8, %v9357_v62  ;;  %v10562_v51 = vld [vmem:[#allocation6 + $0x38c] sm:$0xf0]  ;;  %v9597_v62 = vld [vmem:[#allocation6 + $0x260] sm:$0xf] }
 0x4b2   : > { %v3349_v53 = vadd.f32 %v3348_v42, %v3260_v36  ;;  %v9485_v42 = vld [vmem:[#allocation6 + $0x180] sm:$0xf]  ;;  %v9742_v36 = vor.u32 %v10562_v51, %v9741_v48  ;;  %v10498_v6 = vld [vmem:[#allocation6 + $0x18c] sm:$0xf0] }
 0x4b3   : > { %v3173_v15 = vadd.f32 %v3172_v60, %v3084_v12  ;;  %4401 = vmatpush.bf16.msrb.mxu0 %v9358_v40  ;;  %v10526_v8 = vld [vmem:[#allocation6 + $0x26c] sm:$0xf0] }
 0x4b4   : > { %v3431_v44 = vmax.f32 %v3349_v53, 0.0  ;;  %v9486_v53 = vor.u32 %v10498_v6, %v9485_v42  ;;  %4668 = vmatpush.bf16.msrb.mxu3 %v9742_v36  ;;  %v9598_v51 = vor.u32 %v10526_v8, %v9597_v62 }
 0x4b6   : > { %4490 = vmatpush.bf16.msrb.mxu1 %v9486_v53  ;;  %4580 = vmatpush.bf16.msrb.mxu2 %v9598_v51  ;;  %v10462_v53 = vld [vmem:[#allocation6 + $0x6c] sm:$0xf0] }
 0x4b7   : > { %v3261_v23 = vpop.f32.mrf.mxu2  ;;  %v3350_v32 = vpop.f32.mrf.mxu3 }
 0x4b8   : > { %v3262_v18 = vadd.f32 %v3261_v23, %v3173_v15  ;;  %v3086_v31 = vpop.f32.mrf.mxu0  ;;  %v3175_v16 = vpop.f32.mrf.mxu1 }
 0x4b9   : > { %v3087_v7 = vadd.f32 %v3086_v31, %v12029_v19 }
 0x4ba   : > { %v3351_v27 = vadd.f32 %v3350_v32, %v3262_v18 }
 0x4bb   : > { %v3176_v30 = vadd.f32 %v3175_v16, %v3087_v7  ;;  %3125 = vmatmul.bf16.gmra.mxu0 %v11480_v52  ;;  %3214 = vmatmul.bf16.gmra.mxu1 %v13766_v4 }
 0x4bc   : > { %v3435_v39 = vmax.f32 %v3351_v27, 0.0  ;;  %3303 = vmatmul.bf16.gmra.mxu2 %v13767_v46  ;;  %3392 = vmatmul.bf16.gmra.mxu3 %v13768_v37 }
 0x4be   : > { %v12044_v21 = vpack.c.bf16 %v3435_v39, %v3431_v44 }
 0x4bf   : > { %v3264_v57 = vpop.f32.mrf.mxu2  ;;  %v3353_v43 = vpop.f32.mrf.mxu3 }
 0x4c0   : > { %v3265_v11 = vadd.f32 %v3264_v57, %v3176_v30  ;;  %v3088_v49 = vpop.f32.mrf.mxu0  ;;  %v3177_v5 = vpop.f32.mrf.mxu1 }
 0x4c1   : > { %v3089_v52 = vadd.f32 %v3088_v49, %v12029_v19 }
 0x4c2   : > { %v3354_v61 = vadd.f32 %v3353_v43, %v3265_v11 }
 0x4c3   : > { %v3178_v14 = vadd.f32 %v3177_v5, %v3089_v52 }
 0x4c4   : > { %v3439_v7 = vmax.f32 %v3354_v61, 0.0  ;;  %v13769_v61 = vld [vmem:[#allocation42_spill] sm:$0xff] }
 0x4c7   : > { %v3266_v60 = vpop.f32.mrf.mxu2  ;;  %v3355_v12 = vpop.f32.mrf.mxu3 }
 0x4c8   : > { %v3267_v15 = vadd.f32 %v3266_v60, %v3178_v14  ;;  %v3091_v23 = vpop.f32.mrf.mxu0  ;;  %v3180_v32 = vpop.f32.mrf.mxu1 }
 0x4c9   : > { %v3092_v18 = vadd.f32 %v3091_v23, %v12029_v19  ;;  %v10558_v23 = vld [vmem:[#allocation6 + $0x36c] sm:$0xf0] }
 0x4ca   : > { %v3356_v31 = vadd.f32 %v3355_v12, %v3267_v15  ;;  %v9341_v12 = vld [vmem:[#allocation6 + $0x60] sm:$0xf] }
 0x4cb   : > { %v3181_v16 = vadd.f32 %v3180_v32, %v3092_v18  ;;  %3130 = vmatmul.bf16.gmra.mxu0 %v11512_v22  ;;  %3219 = vmatmul.bf16.gmra.mxu1 %v11514_v45  ;;  %v9725_v15 = vld [vmem:[#allocation6 + $0x360] sm:$0xf] }
 0x4cc   : > { %v3443_v27 = vmax.f32 %v3356_v31, 0.0  ;;  %3308 = vmatmul.bf16.gmra.mxu2 %v11526_v33  ;;  %3397 = vmatmul.bf16.gmra.mxu3 %v11528_v41  ;;  %v9469_v32 = vld [vmem:[#allocation6 + $0x160] sm:$0xf]  ;;  %v9726_v18 = vor.u32 %v10558_v23, %v9725_v15  ;;  %v10494_v31 = vld [vmem:[#allocation6 + $0x16c] sm:$0xf0]  ;;  %v13778_v23 = vld [vmem:[#allocation50_spill] sm:$0xff] }
 0x4cd   : > { %v13777_v15 = vld [vmem:[#allocation49_spill] sm:$0xff] }
 0x4ce   : > { %v12052_v30 = vpack.c.bf16 %v3443_v27, %v3439_v7  ;;  %v9470_v27 = vor.u32 %v10494_v31, %v9469_v32  ;;  %4669 = vmatpush.bf16.msrb.mxu3 %v9726_v18  ;;  %v9581_v18 = vld [vmem:[#allocation6 + $0x240] sm:$0xf]  ;;  %v10522_v31 = vld [vmem:[#allocation6 + $0x24c] sm:$0xf0] }
 0x4cf   : > { %v3269_v4 = vpop.f32.mrf.mxu2  ;;  %v3358_v44 = vpop.f32.mrf.mxu3 }
 0x4d0   : > { %v3270_v39 = vadd.f32 %v3269_v4, %v3181_v16  ;;  %v3093_v46 = vpop.f32.mrf.mxu0  ;;  %v3182_v37 = vpop.f32.mrf.mxu1  ;;  %4491 = vmatpush.bf16.msrb.mxu1 %v9470_v27 }
 0x4d1   : > { %v3094_v38 = vadd.f32 %v3093_v46, %v12029_v19 }
 0x4d2   : > { %v3359_v0 = vadd.f32 %v3358_v44, %v3270_v39 }
 0x4d3   : > { %v3183_v57 = vadd.f32 %v3182_v37, %v3094_v38 }
 0x4d4   : > { %v3447_v5 = vmax.f32 %v3359_v0, 0.0  ;;  %v13770_v0 = vld [vmem:[#allocation43_spill] sm:$0xff] }
 0x4d7   : > { %v3271_v22 = vpop.f32.mrf.mxu2  ;;  %v3360_v43 = vpop.f32.mrf.mxu3 }
 0x4d8   : > { %v3272_v45 = vadd.f32 %v3271_v22, %v3183_v57  ;;  %v3096_v2 = vpop.f32.mrf.mxu0  ;;  %v3185_v11 = vpop.f32.mrf.mxu1  ;;  %v13771_v57 = vld [vmem:[#allocation44_spill] sm:$0xff] }
 0x4d9   : > { %v3097_v33 = vadd.f32 %v3096_v2, %v12029_v19  ;;  %v13773_v2 = vld [vmem:[#allocation46_spill] sm:$0xff] }
 0x4da   : > { %v3361_v49 = vadd.f32 %v3360_v43, %v3272_v45  ;;  %v13772_v45 = vld [vmem:[#allocation45_spill] sm:$0xff] }
 0x4db   : > { %v3186_v41 = vadd.f32 %v3185_v11, %v3097_v33  ;;  %3135 = vmatmul.bf16.gmra.mxu0 %v11536_v3  ;;  %3224 = vmatmul.bf16.gmra.mxu1 %v11538_v55 }
 0x4dc   : > { %v3451_v52 = vmax.f32 %v3361_v49, 0.0  ;;  %3313 = vmatmul.bf16.gmra.mxu2 %v11546_v10  ;;  %3402 = vmatmul.bf16.gmra.mxu3 %v13769_v61  ;;  %v9342_v10 = vor.u32 %v10462_v53, %v9341_v12  ;;  %v13776_v12 = vld [vmem:[#allocation48_spill] sm:$0xff] }
 0x4de   : > { %v12060_v14 = vpack.c.bf16 %v3451_v52, %v3447_v5  ;;  %4402 = vmatpush.bf16.msrb.mxu0 %v9342_v10 }
 0x4df   : > { %v3274_v40 = vpop.f32.mrf.mxu2  ;;  %v3363_v48 = vpop.f32.mrf.mxu3 }
 0x4e0   : > { %v3275_v42 = vadd.f32 %v3274_v40, %v3186_v41  ;;  %v3098_v36 = vpop.f32.mrf.mxu0  ;;  %v3187_v6 = vpop.f32.mrf.mxu1 }
 0x4e1   : > { %v3099_v3 = vadd.f32 %v3098_v36, %v12029_v19 }
 0x4e2   : > { %v3364_v55 = vadd.f32 %v3363_v48, %v3275_v42 }
 0x4e3   : > { %v3188_v60 = vadd.f32 %v3187_v6, %v3099_v3 }
 0x4e4   : > { %v3455_v22 = vmax.f32 %v3364_v55, 0.0 }
 0x4e7   : > { %v3276_v16 = vpop.f32.mrf.mxu2  ;;  %v3365_v7 = vpop.f32.mrf.mxu3 }
 0x4e8   : > { %v3277_v4 = vadd.f32 %v3276_v16, %v3188_v60  ;;  %v3101_v44 = vpop.f32.mrf.mxu0  ;;  %v3190_v39 = vpop.f32.mrf.mxu1  ;;  %v13775_v60 = vld [vmem:[#allocation47_spill] sm:$0xff] }
 0x4e9   : > { %v3102_v46 = vadd.f32 %v3101_v44, %v12029_v19  ;;  %v9325_v16 = vld [vmem:[#allocation6 + $0x40] sm:$0xf]  ;;  %v10458_v44 = vld [vmem:[#allocation6 + $0x4c] sm:$0xf0] }
 0x4ea   : > { %v3366_v37 = vadd.f32 %v3365_v7, %v3277_v4  ;;  %v9582_v4 = vor.u32 %v10522_v31, %v9581_v18  ;;  %v9549_v18 = vld [vmem:[#allocation6 + $0x200] sm:$0xf]  ;;  %v10514_v31 = vld [vmem:[#allocation6 + $0x20c] sm:$0xf0] }
 0x4eb   : > { %v3191_v38 = vadd.f32 %v3190_v39, %v3102_v46  ;;  %3140 = vmatmul.bf16.gmra.mxu0 %v13770_v0  ;;  %3229 = vmatmul.bf16.gmra.mxu1 %v13771_v57  ;;  %v9709_v39 = vld [vmem:[#allocation6 + $0x340] sm:$0xf]  ;;  %v10554_v46 = vld [vmem:[#allocation6 + $0x34c] sm:$0xf0]  ;;  %v9326_v57 = vor.u32 %v10458_v44, %v9325_v16 }
 0x4ec   : > { %v3459_v43 = vmax.f32 %v3366_v37, 0.0  ;;  %3318 = vmatmul.bf16.gmra.mxu2 %v13772_v45  ;;  %3407 = vmatmul.bf16.gmra.mxu3 %v13773_v2  ;;  %v10490_v45 = vld [vmem:[#allocation6 + $0x14c] sm:$0xf0]  ;;  %v9677_v44 = vld [vmem:[#allocation6 + $0x300] sm:$0xf] }
 0x4ed   : > { %4581 = vmatpush.bf16.msrb.mxu2 %v9582_v4  ;;  %4403 = vmatpush.bf16.msrb.mxu0 %v9326_v57  ;;  %v9550_v4 = vor.u32 %v10514_v31, %v9549_v18 }
 0x4ee   : > { %v12068_v11 = vpack.c.bf16 %v3459_v43, %v3455_v22  ;;  %v9710_v22 = vor.u32 %v10554_v46, %v9709_v39  ;;  %v9453_v43 = vld [vmem:[#allocation6 + $0x140] sm:$0xf]  ;;  %v10546_v39 = vld [vmem:[#allocation6 + $0x30c] sm:$0xf0] }
 0x4ef   : > { %v3279_v33 = vpop.f32.mrf.mxu2  ;;  %v3368_v49 = vpop.f32.mrf.mxu3 }
 0x4f0   : > { %13774 = vst [vmem:[#allocation23_spill] sm:$0xff] %v12068_v11  ;;  %v3280_v41 = vadd.f32 %v3279_v33, %v3191_v38  ;;  %v3103_v5 = vpop.f32.mrf.mxu0  ;;  %v3192_v52 = vpop.f32.mrf.mxu1  ;;  %v9454_v33 = vor.u32 %v10490_v45, %v9453_v43  ;;  %4670 = vmatpush.bf16.msrb.mxu3 %v9710_v22 }
 0x4f1   : > { %v3104_v61 = vadd.f32 %v3103_v5, %v12029_v19  ;;  %v10454_v5 = vld [vmem:[#allocation6 + $0x2c] sm:$0xf0] }
 0x4f2   : > { %v3369_v62 = vadd.f32 %v3368_v49, %v3280_v41  ;;  %v9309_v41 = vld [vmem:[#allocation6 + $0x20] sm:$0xf]  ;;  %4492 = vmatpush.bf16.msrb.mxu1 %v9454_v33 }
 0x4f3   : > { %v3193_v8 = vadd.f32 %v3192_v52, %v3104_v61  ;;  %v9437_v52 = vld [vmem:[#allocation6 + $0x120] sm:$0xf] }
 0x4f4   : > { %v3463_v53 = vmax.f32 %v3369_v62, 0.0  ;;  %v9310_v62 = vor.u32 %v10454_v5, %v9309_v41 }
 0x4f6   : > { %4404 = vmatpush.bf16.msrb.mxu0 %v9310_v62 }
 0x4f7   : > { %v3281_v40 = vpop.f32.mrf.mxu2  ;;  %v3370_v48 = vpop.f32.mrf.mxu3 }
 0x4f8   : > { %v3282_v51 = vadd.f32 %v3281_v40, %v3193_v8  ;;  %v3106_v42 = vpop.f32.mrf.mxu0  ;;  %v3195_v36 = vpop.f32.mrf.mxu1  ;;  %v10486_v8 = vld [vmem:[#allocation6 + $0x12c] sm:$0xf0]  ;;  %v9565_v40 = vld [vmem:[#allocation6 + $0x220] sm:$0xf] }
 0x4f9   : > { %v3107_v6 = vadd.f32 %v3106_v42, %v12029_v19 }
 0x4fa   : > { %v3371_v3 = vadd.f32 %v3370_v48, %v3282_v51  ;;  %v10518_v48 = vld [vmem:[#allocation6 + $0x22c] sm:$0xf0]  ;;  %v9438_v51 = vor.u32 %v10486_v8, %v9437_v52 }
 0x4fb   : > { %v3196_v55 = vadd.f32 %v3195_v36, %v3107_v6  ;;  %3145 = vmatmul.bf16.gmra.mxu0 %v13775_v60  ;;  %3234 = vmatmul.bf16.gmra.mxu1 %v13776_v12  ;;  %v9566_v42 = vor.u32 %v10518_v48, %v9565_v40  ;;  %v9693_v36 = vld [vmem:[#allocation6 + $0x320] sm:$0xf]  ;;  %v10550_v6 = vld [vmem:[#allocation6 + $0x32c] sm:$0xf0] }
 0x4fc   : > { %v3467_v10 = vmax.f32 %v3371_v3, 0.0  ;;  %3323 = vmatmul.bf16.gmra.mxu2 %v13777_v15  ;;  %3412 = vmatmul.bf16.gmra.mxu3 %v13778_v23  ;;  %v9694_v3 = vor.u32 %v10550_v6, %v9693_v36  ;;  %v10450_v60 = vld [vmem:[#allocation6 + $0xc] sm:$0xf0]  ;;  %v9421_v12 = vld [vmem:[#allocation6 + $0x100] sm:$0xf] }
 0x4fd   : > { %4582 = vmatpush.bf16.msrb.mxu2 %v9566_v42  ;;  %4493 = vmatpush.bf16.msrb.mxu1 %v9438_v51  ;;  %v10482_v23 = vld [vmem:[#allocation6 + $0x10c] sm:$0xf0] }
 0x4fe   : > { %v12076_v32 = vpack.c.bf16 %v3467_v10, %v3463_v53  ;;  %4671 = vmatpush.bf16.msrb.mxu3 %v9694_v3 }
 0x4ff   : > { %v3284_v7 = vpop.f32.mrf.mxu2  ;;  %v3373_v27 = vpop.f32.mrf.mxu3 }
 0x500   : > { %v3285_v37 = vadd.f32 %v3284_v7, %v3196_v55  ;;  %v3108_v38 = vpop.f32.mrf.mxu0  ;;  %v3197_v0 = vpop.f32.mrf.mxu1  ;;  %v9293_v55 = vld [vmem:[#allocation6] sm:$0xf] }
 0x501   : > { %v3109_v2 = vadd.f32 %v3108_v38, %v12029_v19  ;;  %v9294_v15 = vor.u32 %v10450_v60, %v9293_v55  ;;  %v9678_v38 = vor.u32 %v10546_v39, %v9677_v44  ;;  %4583 = vmatpush.bf16.msrb.mxu2 %v9550_v4  ;;  %v13781_v4 = vld [vmem:[#allocation63_spill] sm:$0xff] }
 0x502   : > { %v3374_v49 = vadd.f32 %v3373_v27, %v3285_v37  ;;  %v9422_v37 = vor.u32 %v10482_v23, %v9421_v12 }
 0x503   : > { %v3198_v61 = vadd.f32 %v3197_v0, %v3109_v2  ;;  %4405 = vmatpush.bf16.msrb.mxu0 %v9294_v15  ;;  %4672 = vmatpush.bf16.msrb.mxu3 %v9678_v38 }
 0x504   : > { %v3471_v22 = vmax.f32 %v3374_v49, 0.0  ;;  %4494 = vmatpush.bf16.msrb.mxu1 %v9422_v37 }
 0x507   : > { %v3286_v53 = vpop.f32.mrf.mxu2  ;;  %v3375_v10 = vpop.f32.mrf.mxu3 }
 0x508   : > { %v3287_v16 = vadd.f32 %v3286_v53, %v3198_v61  ;;  %v3111_v7 = vpop.f32.mrf.mxu0  ;;  %v3200_v27 = vpop.f32.mrf.mxu1 }
 0x509   : > { %v3112_v46 = vadd.f32 %v3111_v7, %v12029_v19 }
 0x50a   : > { %v3376_v0 = vadd.f32 %v3375_v10, %v3287_v16 }
 0x50b   : > { %v3201_v57 = vadd.f32 %v3200_v27, %v3112_v46  ;;  %3150 = vmatmul.bf16.gmra.mxu0 %v11596_v47  ;;  %3239 = vmatmul.bf16.gmra.mxu1 %v11598_v29  ;;  %v13780_v27 = vld [vmem:[#allocation51_spill] sm:$0xff]  ;;  %v13782_v46 = vld [vmem:[#allocation36_spill] sm:$0xff] }
 0x50c   : > { %v3475_v43 = vmax.f32 %v3376_v0, 0.0  ;;  %3328 = vmatmul.bf16.gmra.mxu2 %v11606_v13  ;;  %3417 = vmatmul.bf16.gmra.mxu3 %v11608_v35 }
 0x50e   : > { %v12084_v45 = vpack.c.bf16 %v3475_v43, %v3471_v22 }
 0x50f   : > { %v3289_v2 = vpop.f32.mrf.mxu2  ;;  %v3378_v33 = vpop.f32.mrf.mxu3 }
 0x510   : > { %v3290_v41 = vadd.f32 %v3289_v2, %v3201_v57  ;;  %v3113_v5 = vpop.f32.mrf.mxu0  ;;  %v3202_v52 = vpop.f32.mrf.mxu1 }
 0x511   : > { %v3114_v61 = vadd.f32 %v3113_v5, %v12029_v19 }
 0x512   : > { %v3379_v47 = vadd.f32 %v3378_v33, %v3290_v41 }
 0x513   : > { %v3203_v62 = vadd.f32 %v3202_v52, %v3114_v61 }
 0x514   : > { %v3479_v42 = vmax.f32 %v3379_v47, 0.0 }
 0x517   : > { %v3291_v29 = vpop.f32.mrf.mxu2  ;;  %v3380_v49 = vpop.f32.mrf.mxu3 }
 0x518   : > { %v3292_v8 = vadd.f32 %v3291_v29, %v3203_v62  ;;  %v3116_v40 = vpop.f32.mrf.mxu0  ;;  %v3205_v13 = vpop.f32.mrf.mxu1 }
 0x519   : > { %v3117_v35 = vadd.f32 %v3116_v40, %v12029_v19  ;;  %v13784_v40 = vld [vmem:[#allocation52_spill] sm:$0xff] }
 0x51a   : > { %v3381_v48 = vadd.f32 %v3380_v49, %v3292_v8 }
 0x51b   : > { %v3206_v51 = vadd.f32 %v3205_v13, %v3117_v35  ;;  %3155 = vmatmul.bf16.gmra.mxu0 %v11621_v28  ;;  %3244 = vmatmul.bf16.gmra.mxu1 %v11623_v26  ;;  %v13785_v13 = vld [vmem:[#allocation64_spill] sm:$0xff] }
 0x51c   : > { %v3483_v36 = vmax.f32 %v3381_v48, 0.0  ;;  %3333 = vmatmul.bf16.gmra.mxu2 %v11632_v34  ;;  %3422 = vmatmul.bf16.gmra.mxu3 %v11634_v1 }
 0x51e   : > { %v12092_v6 = vpack.c.bf16 %v3483_v36, %v3479_v42 }
 0x51f   : > { %v3294_v3 = vpop.f32.mrf.mxu2  ;;  %v3383_v55 = vpop.f32.mrf.mxu3 }
 0x520   : > { %13779 = vst [vmem:[#allocation24_spill] sm:$0xff] %v12092_v6  ;;  %v3295_v60 = vadd.f32 %v3294_v3, %v3206_v51  ;;  %v3118_v12 = vpop.f32.mrf.mxu0  ;;  %v3207_v53 = vpop.f32.mrf.mxu1  ;;  %v13786_v51 = vld [vmem:[#allocation74_spill] sm:$0xff] }
 0x521   : > { %v3119_v10 = vadd.f32 %v3118_v12, %v12029_v19 }
 0x522   : > { %v3384_v15 = vadd.f32 %v3383_v55, %v3295_v60 }
 0x523   : > { %v3208_v23 = vadd.f32 %v3207_v53, %v3119_v10 }
 0x524   : > { %v3487_v44 = vmax.f32 %v3384_v15, 0.0 }
 0x527   : > { %v3296_v28 = vpop.f32.mrf.mxu2  ;;  %v3385_v18 = vpop.f32.mrf.mxu3 }
 0x528   : > { %v3297_v26 = vadd.f32 %v3296_v28, %v3208_v23  ;;  %v3121_v31 = vpop.f32.mrf.mxu0  ;;  %v3210_v16 = vpop.f32.mrf.mxu1 }
 0x529   : > { %v3122_v34 = vadd.f32 %v3121_v31, %v12029_v19 }
 0x52a   : > { %v3386_v7 = vadd.f32 %v3385_v18, %v3297_v26 }
 0x52b   : > { %v3211_v1 = vadd.f32 %v3210_v16, %v3122_v34  ;;  %4406 = vmatmul.bf16.vlgmr.msrb.gmra.mxu0 %v13780_v27  ;;  %4495 = vmatmul.bf16.vlgmr.msrb.gmra.mxu1 %v13781_v4 }
 0x52c   : > { %v3491_v39 = vmax.f32 %v3386_v7, 0.0  ;;  %4584 = vmatmul.bf16.vlgmr.msrb.gmra.mxu2 %v13782_v46  ;;  %4673 = vmatmul.bf16.vlgmr.msrb.gmra.mxu3 %v12044_v21 }
 0x52e   : > { %v12100_v37 = vpack.c.bf16 %v3491_v39, %v3487_v44  ;;  %v13789_v44 = vld [vmem:[#allocation65_spill] sm:$0xff] }
 0x52f   : > { %v3299_v38 = vpop.f32.mrf.mxu2  ;;  %v3388_v0 = vpop.f32.mrf.mxu3 }
 0x530   : > { %13783 = vst [vmem:[#allocation25_spill] sm:$0xff] %v12100_v37  ;;  %v3300_v57 = vadd.f32 %v3299_v38, %v3211_v1  ;;  %v3123_v22 = vpop.f32.mrf.mxu0  ;;  %v3212_v43 = vpop.f32.mrf.mxu1  ;;  %v13788_v1 = vld [vmem:[#allocation53_spill] sm:$0xff] }
 0x531   : > { %v3124_v2 = vadd.f32 %v3123_v22, %v12029_v19 }
 0x532   : > { %v3389_v33 = vadd.f32 %v3388_v0, %v3300_v57  ;;  %v13790_v0 = vld [vmem:[#allocation75_spill] sm:$0xff] }
 0x533   : > { %v3213_v41 = vadd.f32 %v3212_v43, %v3124_v2 }
 0x534   : > { %v3495_v35 = vmax.f32 %v3389_v33, 0.0 }
 0x537   : > { %v3301_v5 = vpop.f32.mrf.mxu2  ;;  %v3390_v52 = vpop.f32.mrf.mxu3 }
 0x538   : > { %v3302_v61 = vadd.f32 %v3301_v5, %v3213_v41  ;;  %v3126_v47 = vpop.f32.mrf.mxu0  ;;  %v3215_v62 = vpop.f32.mrf.mxu1 }
 0x539   : > { %v3127_v29 = vadd.f32 %v3126_v47, %v12029_v19 }
 0x53a   : > { %v3391_v49 = vadd.f32 %v3390_v52, %v3302_v61 }
 0x53b   : > { %v3216_v8 = vadd.f32 %v3215_v62, %v3127_v29  ;;  %4411 = vmatmul.bf16.gmra.mxu0 %v13784_v40  ;;  %4500 = vmatmul.bf16.gmra.mxu1 %v13785_v13 }
 0x53c   : > { %v3499_v48 = vmax.f32 %v3391_v49, 0.0  ;;  %4589 = vmatmul.bf16.gmra.mxu2 %v13786_v51  ;;  %4678 = vmatmul.bf16.gmra.mxu3 %v12052_v30 }
 0x53e   : > { %v12108_v42 = vpack.c.bf16 %v3499_v48, %v3495_v35 }
 0x53f   : > { %v3304_v36 = vpop.f32.mrf.mxu2  ;;  %v3393_v3 = vpop.f32.mrf.mxu3 }
 0x540   : > { %13787 = vst [vmem:[#allocation26_spill] sm:$0xff] %v12108_v42  ;;  %v3305_v55 = vadd.f32 %v3304_v36, %v3216_v8  ;;  %v3128_v60 = vpop.f32.mrf.mxu0  ;;  %v3217_v12 = vpop.f32.mrf.mxu1 }
 0x541   : > { %v3129_v53 = vadd.f32 %v3128_v60, %v12029_v19 }
 0x542   : > { %v3394_v10 = vadd.f32 %v3393_v3, %v3305_v55  ;;  %v13792_v3 = vld [vmem:[#allocation54_spill] sm:$0xff] }
 0x543   : > { %v3218_v15 = vadd.f32 %v3217_v12, %v3129_v53  ;;  %v13793_v55 = vld [vmem:[#allocation66_spill] sm:$0xff]  ;;  %v13794_v53 = vld [vmem:[#allocation76_spill] sm:$0xff] }
 0x544   : > { %v3503_v39 = vmax.f32 %v3394_v10, 0.0 }
 0x547   : > { %v3306_v23 = vpop.f32.mrf.mxu2  ;;  %v3395_v28 = vpop.f32.mrf.mxu3 }
 0x548   : > { %v3307_v18 = vadd.f32 %v3306_v23, %v3218_v15  ;;  %v3131_v26 = vpop.f32.mrf.mxu0  ;;  %v3220_v31 = vpop.f32.mrf.mxu1  ;;  %v10540_v15 = vld [vmem:[#allocation6 + $0x2e4] sm:$0xf]  ;;  %v9663_v23 = vld [vmem:[#allocation6 + $0x2f0] sm:$0xf0] }
 0x549   : > { %v3132_v16 = vadd.f32 %v3131_v26, %v12029_v19  ;;  %v9666_v26 = vor.u32 %v10540_v15, %v9663_v23  ;;  %v13797_v15 = vld [vmem:[#allocation67_spill] sm:$0xff] }
 0x54a   : > { %v3396_v34 = vadd.f32 %v3395_v28, %v3307_v18 }
 0x54b   : > { %v3221_v7 = vadd.f32 %v3220_v31, %v3132_v16  ;;  %4416 = vmatmul.bf16.gmra.mxu0 %v13788_v1  ;;  %4505 = vmatmul.bf16.gmra.mxu1 %v13789_v44 }
 0x54c   : > { %v3507_v38 = vmax.f32 %v3396_v34, 0.0  ;;  %4594 = vmatmul.bf16.gmra.mxu2 %v13790_v0  ;;  %4683 = vmatmul.bf16.gmra.mxu3 %v12060_v14 }
 0x54d   : > { %4932 = vmatpush.bf16.msra.mxu2 %v9666_v26 }
 0x54e   : > { %v12116_v57 = vpack.c.bf16 %v3507_v38, %v3503_v39 }
 0x54f   : > { %v3309_v22 = vpop.f32.mrf.mxu2  ;;  %v3398_v43 = vpop.f32.mrf.mxu3 }
 0x550   : > { %13791 = vst [vmem:[#allocation27_spill] sm:$0xff] %v12116_v57  ;;  %v3310_v2 = vadd.f32 %v3309_v22, %v3221_v7  ;;  %v3133_v33 = vpop.f32.mrf.mxu0  ;;  %v3222_v41 = vpop.f32.mrf.mxu1  ;;  %v10476_v22 = vld [vmem:[#allocation6 + $0xe4] sm:$0xf] }
 0x551   : > { %v3134_v5 = vadd.f32 %v3133_v33, %v12029_v19  ;;  %v10572_v33 = vld [vmem:[#allocation6 + $0x3e4] sm:$0xf] }
 0x552   : > { %v3399_v52 = vadd.f32 %v3398_v43, %v3310_v2  ;;  %v9407_v43 = vld [vmem:[#allocation6 + $0xf0] sm:$0xf0] }
 0x553   : > { %v3223_v61 = vadd.f32 %v3222_v41, %v3134_v5  ;;  %v9410_v2 = vor.u32 %v10476_v22, %v9407_v43  ;;  %v9791_v41 = vld [vmem:[#allocation6 + $0x3f0] sm:$0xf0]  ;;  %v10508_v5 = vld [vmem:[#allocation6 + $0x1e4] sm:$0xf] }
 0x554   : > { %v3511_v60 = vmax.f32 %v3399_v52, 0.0  ;;  %v9794_v52 = vor.u32 %v10572_v33, %v9791_v41 }
 0x555   : > { %4754 = vmatpush.bf16.msra.mxu0 %v9410_v2 }
 0x556   : > { %5021 = vmatpush.bf16.msra.mxu3 %v9794_v52 }
 0x557   : > { %v3311_v47 = vpop.f32.mrf.mxu2  ;;  %v3400_v62 = vpop.f32.mrf.mxu3 }
 0x558   : > { %v3312_v29 = vadd.f32 %v3311_v47, %v3223_v61  ;;  %v3136_v49 = vpop.f32.mrf.mxu0  ;;  %v3225_v8 = vpop.f32.mrf.mxu1  ;;  %v9535_v61 = vld [vmem:[#allocation6 + $0x1f0] sm:$0xf0] }
 0x559   : > { %v3137_v35 = vadd.f32 %v3136_v49, %v12029_v19 }
 0x55a   : > { %v3401_v48 = vadd.f32 %v3400_v62, %v3312_v29  ;;  %v9538_v29 = vor.u32 %v10508_v5, %v9535_v61 }
 0x55b   : > { %v3226_v36 = vadd.f32 %v3225_v8, %v3137_v35  ;;  %4421 = vmatmul.bf16.gmra.mxu0 %v13792_v3  ;;  %4510 = vmatmul.bf16.gmra.mxu1 %v13793_v55 }
 0x55c   : > { %v3515_v12 = vmax.f32 %v3401_v48, 0.0  ;;  %4599 = vmatmul.bf16.gmra.mxu2 %v13794_v53  ;;  %4688 = vmatmul.bf16.gmra.mxu3 %v12068_v11 }
 0x55d   : > { %4843 = vmatpush.bf16.msra.mxu1 %v9538_v29  ;;  %v13800_v29 = vld [vmem:[#allocation56_spill] sm:$0xff] }
 0x55e   : > { %v12124_v10 = vpack.c.bf16 %v3515_v12, %v3511_v60  ;;  %v13796_v12 = vld [vmem:[#allocation55_spill] sm:$0xff] }
 0x55f   : > { %v3314_v28 = vpop.f32.mrf.mxu2  ;;  %v3403_v18 = vpop.f32.mrf.mxu3 }
 0x560   : > { %13795 = vst [vmem:[#allocation31_spill] sm:$0xff] %v12124_v10  ;;  %v3315_v31 = vadd.f32 %v3314_v28, %v3226_v36  ;;  %v3138_v16 = vpop.f32.mrf.mxu0  ;;  %v3227_v34 = vpop.f32.mrf.mxu1 }
 0x561   : > { %v3139_v7 = vadd.f32 %v3138_v16, %v12029_v19 }
 0x562   : > { %v3404_v39 = vadd.f32 %v3403_v18, %v3315_v31  ;;  %v13798_v18 = vld [vmem:[#allocation77_spill] sm:$0xff] }
 0x563   : > { %v3228_v38 = vadd.f32 %v3227_v34, %v3139_v7 }
 0x564   : > { %v3519_v23 = vmax.f32 %v3404_v39, 0.0 }
 0x567   : > { %v3316_v47 = vpop.f32.mrf.mxu2  ;;  %v3405_v62 = vpop.f32.mrf.mxu3 }
 0x568   : > { %v3317_v49 = vadd.f32 %v3316_v47, %v3228_v38  ;;  %v3141_v8 = vpop.f32.mrf.mxu0  ;;  %v3230_v35 = vpop.f32.mrf.mxu1 }
 0x569   : > { %v3142_v48 = vadd.f32 %v3141_v8, %v12029_v19 }
 0x56a   : > { %v3406_v36 = vadd.f32 %v3405_v62, %v3317_v49  ;;  %v13801_v49 = vld [vmem:[#allocation68_spill] sm:$0xff] }
 0x56b   : > { %v3231_v60 = vadd.f32 %v3230_v35, %v3142_v48  ;;  %4426 = vmatmul.bf16.gmra.mxu0 %v13796_v12  ;;  %4515 = vmatmul.bf16.gmra.mxu1 %v13797_v15 }
 0x56c   : > { %v3523_v28 = vmax.f32 %v3406_v36, 0.0  ;;  %4604 = vmatmul.bf16.gmra.mxu2 %v13798_v18  ;;  %4693 = vmatmul.bf16.gmra.mxu3 %v12076_v32  ;;  %v10536_v36 = vld [vmem:[#allocation6 + $0x2c4] sm:$0xf] }
 0x56e   : > { %v12132_v26 = vpack.c.bf16 %v3523_v28, %v3519_v23 }
 0x56f   : > { %v3319_v31 = vpop.f32.mrf.mxu2  ;;  %v3408_v16 = vpop.f32.mrf.mxu3 }
 0x570   : > { %13799 = vst [vmem:[#allocation32_spill] sm:$0xff] %v12132_v26  ;;  %v3320_v34 = vadd.f32 %v3319_v31, %v3231_v60  ;;  %v3143_v7 = vpop.f32.mrf.mxu0  ;;  %v3232_v38 = vpop.f32.mrf.mxu1  ;;  %v9647_v60 = vld [vmem:[#allocation6 + $0x2d0] sm:$0xf0] }
 0x571   : > { %v3144_v22 = vadd.f32 %v3143_v7, %v12029_v19  ;;  %v9650_v31 = vor.u32 %v10536_v36, %v9647_v60 }
 0x572   : > { %v3409_v43 = vadd.f32 %v3408_v16, %v3320_v34 }
 0x573   : > { %v3233_v2 = vadd.f32 %v3232_v38, %v3144_v22  ;;  %4933 = vmatpush.bf16.msra.mxu2 %v9650_v31 }
 0x574   : > { %v3527_v8 = vmax.f32 %v3409_v43, 0.0 }
 0x577   : > { %v3321_v33 = vpop.f32.mrf.mxu2  ;;  %v3410_v41 = vpop.f32.mrf.mxu3 }
 0x578   : > { %v3322_v5 = vadd.f32 %v3321_v33, %v3233_v2  ;;  %v3146_v39 = vpop.f32.mrf.mxu0  ;;  %v3235_v52 = vpop.f32.mrf.mxu1  ;;  %v10472_v2 = vld [vmem:[#allocation6 + $0xc4] sm:$0xf]  ;;  %v9391_v33 = vld [vmem:[#allocation6 + $0xd0] sm:$0xf0] }
 0x579   : > { %v3147_v61 = vadd.f32 %v3146_v39, %v12029_v19  ;;  %v9775_v39 = vld [vmem:[#allocation6 + $0x3d0] sm:$0xf0] }
 0x57a   : > { %v3411_v47 = vadd.f32 %v3410_v41, %v3322_v5  ;;  %v9394_v41 = vor.u32 %v10472_v2, %v9391_v33  ;;  %v10568_v5 = vld [vmem:[#allocation6 + $0x3c4] sm:$0xf] }
 0x57b   : > { %v3236_v62 = vadd.f32 %v3235_v52, %v3147_v61  ;;  %4431 = vmatmul.bf16.gmra.mxu0 %v13800_v29  ;;  %4520 = vmatmul.bf16.gmra.mxu1 %v13801_v49  ;;  %v10504_v52 = vld [vmem:[#allocation6 + $0x1c4] sm:$0xf]  ;;  %v9778_v61 = vor.u32 %v10568_v5, %v9775_v39 }
 0x57c   : > { %v3531_v35 = vmax.f32 %v3411_v47, 0.0  ;;  %4609 = vmatmul.bf16.gmra.mxu2 %v11951_v25  ;;  %4698 = vmatmul.bf16.gmra.mxu3 %v12084_v45  ;;  %v9519_v47 = vld [vmem:[#allocation6 + $0x1d0] sm:$0xf0] }
 0x57d   : > { %4755 = vmatpush.bf16.msra.mxu0 %v9394_v41  ;;  %v9522_v36 = vor.u32 %v10504_v52, %v9519_v47  ;;  %5022 = vmatpush.bf16.msra.mxu3 %v9778_v61 }
 0x57e   : > { %v12140_v48 = vpack.c.bf16 %v3531_v35, %v3527_v8 }
 0x57f   : > { %v3324_v23 = vpop.f32.mrf.mxu2  ;;  %v3413_v28 = vpop.f32.mrf.mxu3  ;;  %4844 = vmatpush.bf16.msra.mxu1 %v9522_v36 }
 0x580   : > { %13802 = vst [vmem:[#allocation33_spill] sm:$0xff] %v12140_v48  ;;  %v3325_v16 = vadd.f32 %v3324_v23, %v3236_v62  ;;  %v3148_v34 = vpop.f32.mrf.mxu0  ;;  %v3237_v7 = vpop.f32.mrf.mxu1 }
 0x581   : > { %v3149_v38 = vadd.f32 %v3148_v34, %v12029_v19  ;;  %v13803_v34 = vld [vmem:[#allocation57_spill] sm:$0xff] }
 0x582   : > { %v3414_v22 = vadd.f32 %v3413_v28, %v3325_v16 }
 0x583   : > { %v3238_v43 = vadd.f32 %v3237_v7, %v3149_v38  ;;  %v13804_v7 = vld [vmem:[#allocation69_spill] sm:$0xff] }
 0x584   : > { %v3535_v38 = vmax.f32 %v3414_v22, 0.0 }
 0x587   : > { %v3326_v8 = vpop.f32.mrf.mxu2  ;;  %v3415_v35 = vpop.f32.mrf.mxu3 }
 0x588   : > { %v3327_v62 = vadd.f32 %v3326_v8, %v3238_v43  ;;  %v3151_v60 = vpop.f32.mrf.mxu0  ;;  %v3240_v23 = vpop.f32.mrf.mxu1 }
 0x589   : > { %v3152_v31 = vadd.f32 %v3151_v60, %v12029_v19 }
 0x58a   : > { %v3416_v28 = vadd.f32 %v3415_v35, %v3327_v62 }
 0x58b   : > { %v3241_v16 = vadd.f32 %v3240_v23, %v3152_v31  ;;  %4436 = vmatmul.bf16.gmra.mxu0 %v13803_v34  ;;  %4525 = vmatmul.bf16.gmra.mxu1 %v13804_v7 }
 0x58c   : > { %v3539_v2 = vmax.f32 %v3416_v28, 0.0  ;;  %4614 = vmatmul.bf16.gmra.mxu2 %v11959_v9  ;;  %4703 = vmatmul.bf16.gmra.mxu3 %v12092_v6 }
 0x58e   : > { %v12148_v33 = vpack.c.bf16 %v3539_v2, %v3535_v38  ;;  %v13806_v38 = vld [vmem:[#allocation58_spill] sm:$0xff] }
 0x58f   : > { %v3329_v43 = vpop.f32.mrf.mxu2  ;;  %v3418_v41 = vpop.f32.mrf.mxu3  ;;  %v13807_v2 = vld [vmem:[#allocation70_spill] sm:$0xff] }
 0x590   : > { %13805 = vst [vmem:[#allocation34_spill] sm:$0xff] %v12148_v33  ;;  %v3330_v5 = vadd.f32 %v3329_v43, %v3241_v16  ;;  %v3153_v39 = vpop.f32.mrf.mxu0  ;;  %v3242_v52 = vpop.f32.mrf.mxu1 }
 0x591   : > { %v3154_v61 = vadd.f32 %v3153_v39, %v12029_v19  ;;  %v9631_v39 = vld [vmem:[#allocation6 + $0x2b0] sm:$0xf0] }
 0x592   : > { %v3419_v47 = vadd.f32 %v3418_v41, %v3330_v5  ;;  %v10532_v5 = vld [vmem:[#allocation6 + $0x2a4] sm:$0xf] }
 0x593   : > { %v3243_v8 = vadd.f32 %v3242_v52, %v3154_v61 }
 0x594   : > { %v3543_v16 = vmax.f32 %v3419_v47, 0.0  ;;  %v12162_v47 = vld [vmem:[%s13354_s6] sm:$0xf] }
 0x597   : > { %v3331_v35 = vpop.f32.mrf.mxu2  ;;  %v3420_v36 = vpop.f32.mrf.mxu3 }
 0x598   : > { %v3332_v62 = vadd.f32 %v3331_v35, %v3243_v8  ;;  %v3156_v22 = vpop.f32.mrf.mxu0  ;;  %v3245_v60 = vpop.f32.mrf.mxu1  ;;  %v9634_v8 = vor.u32 %v10532_v5, %v9631_v39  ;;  %v10564_v5 = vld [vmem:[#allocation6 + $0x3a4] sm:$0xf] }
 0x599   : > { %v3157_v23 = vadd.f32 %v3156_v22, %v12029_v19  ;;  %v10500_v39 = vld [vmem:[#allocation6 + $0x1a4] sm:$0xf] }
 0x59a   : > { %v3421_v31 = vadd.f32 %v3420_v36, %v3332_v62  ;;  %4934 = vmatpush.bf16.msra.mxu2 %v9634_v8 }
 0x59b   : > { %v3246_v28 = vadd.f32 %v3245_v60, %v3157_v23  ;;  %4441 = vmatmul.bf16.gmra.mxu0 %v13806_v38  ;;  %4530 = vmatmul.bf16.gmra.mxu1 %v13807_v2 }
 0x59c   : > { %v3547_v43 = vmax.f32 %v3421_v31, 0.0  ;;  %4619 = vmatmul.bf16.gmra.mxu2 %v11967_v59  ;;  %4708 = vmatmul.bf16.gmra.mxu3 %v12100_v37  ;;  %v12165_v31 = vperm.slane %v12162_v47, 0  ;;  %v9503_v59 = vld [vmem:[#allocation6 + $0x1b0] sm:$0xf0] }
 0x59d   : > { %v9506_v2 = vor.u32 %v10500_v39, %v9503_v59 }
 0x59e   : > { %v12156_v41 = vpack.c.bf16 %v3547_v43, %v3543_v16  ;;  %v10468_v16 = vld [vmem:[#allocation6 + $0xa4] sm:$0xf]  ;;  %v9375_v43 = vld [vmem:[#allocation6 + $0xb0] sm:$0xf0] }
 0x59f   : > { %v3334_v52 = vpop.f32.mrf.mxu2  ;;  %v3423_v61 = vpop.f32.mrf.mxu3  ;;  %v9378_v37 = vor.u32 %v10468_v16, %v9375_v43  ;;  %4845 = vmatpush.bf16.msra.mxu1 %v9506_v2  ;;  %v13809_v16 = vld [vmem:[#allocation71_spill] sm:$0xff] }
 0x5a0   : > { %v3335_v35 = vadd.f32 %v3334_v52, %v3246_v28  ;;  %v3158_v36 = vpop.f32.mrf.mxu0  ;;  %v3247_v62 = vpop.f32.mrf.mxu1  ;;  %v9759_v28 = vld [vmem:[#allocation6 + $0x3b0] sm:$0xf0] }
 0x5a1   : > { %v3159_v22 = vadd.f32 %v3158_v36, %v12029_v19  ;;  %v9762_v52 = vor.u32 %v10564_v5, %v9759_v28  ;;  %4756 = vmatpush.bf16.msra.mxu0 %v9378_v37 }
 0x5a2   : > { %v3424_v60 = vadd.f32 %v3423_v61, %v3335_v35 }
 0x5a3   : > { %v3248_v23 = vadd.f32 %v3247_v62, %v3159_v22  ;;  %5023 = vmatpush.bf16.msra.mxu3 %v9762_v52  ;;  %v13808_v22 = vld [vmem:[#allocation15_spill] sm:$0xff] }
 0x5a4   : > { %v3551_v43 = vmax.f32 %v3424_v60, 0.0 }
 0x5a7   : > { %v3336_v19 = vpop.f32.mrf.mxu2  ;;  %v3425_v36 = vpop.f32.mrf.mxu3 }
 0x5a8   : > { %v3337_v38 = vadd.f32 %v3336_v19, %v3248_v23  ;;  %v4407_v6 = vpop.f32.mrf.mxu0  ;;  %v4496_v8 = vpop.f32.mrf.mxu1 }
 0x5a9   : > { %v4408_v61 = vadd.f32 %v4407_v6, %v12165_v31 }
 0x5aa   : > { %v3426_v35 = vadd.f32 %v3425_v36, %v3337_v38 }
 0x5ab   : > { %v4497_v62 = vadd.f32 %v4496_v8, %v4408_v61  ;;  %4446 = vmatmul.bf16.gmra.mxu0 %v13808_v22  ;;  %4535 = vmatmul.bf16.gmra.mxu1 %v13809_v16 }
 0x5ac   : > { %v3555_v5 = vmax.f32 %v3426_v35, 0.0  ;;  %4624 = vmatmul.bf16.gmra.mxu2 %v11975_v56  ;;  %4713 = vmatmul.bf16.gmra.mxu3 %v12108_v42 }
 0x5ae   : > { %v12172_v59 = vpack.c.bf16 %v3555_v5, %v3551_v43  ;;  %v13810_v43 = vld [vmem:[#allocation16_spill] sm:$0xff] }
 0x5af   : > { %v4585_v37 = vpop.f32.mrf.mxu2  ;;  %v4674_v23 = vpop.f32.mrf.mxu3  ;;  %v13811_v5 = vld [vmem:[#allocation72_spill] sm:$0xff] }
 0x5b0   : > { %v4586_v28 = vadd.f32 %v4585_v37, %v4497_v62  ;;  %v4409_v39 = vpop.f32.mrf.mxu0  ;;  %v4498_v6 = vpop.f32.mrf.mxu1 }
 0x5b1   : > { %v4410_v38 = vadd.f32 %v4409_v39, %v12165_v31  ;;  %v9615_v39 = vld [vmem:[#allocation6 + $0x290] sm:$0xf0] }
 0x5b2   : > { %v4675_v2 = vadd.f32 %v4674_v23, %v4586_v28  ;;  %v10528_v28 = vld [vmem:[#allocation6 + $0x284] sm:$0xf] }
 0x5b3   : > { %v4499_v52 = vadd.f32 %v4498_v6, %v4410_v38 }
 0x5b4   : > { %v5822_v62 = vmax.f32 %v4675_v2, 0.0 }
 0x5b7   : > { %v4587_v19 = vpop.f32.mrf.mxu2  ;;  %v4676_v36 = vpop.f32.mrf.mxu3 }
 0x5b8   : > { %v4588_v8 = vadd.f32 %v4587_v19, %v4499_v52  ;;  %v4412_v60 = vpop.f32.mrf.mxu0  ;;  %v4501_v61 = vpop.f32.mrf.mxu1  ;;  %v9618_v52 = vor.u32 %v10528_v28, %v9615_v39 }
 0x5b9   : > { %v4413_v35 = vadd.f32 %v4412_v60, %v12165_v31 }
 0x5ba   : > { %v4677_v56 = vadd.f32 %v4676_v36, %v4588_v8  ;;  %4935 = vmatpush.bf16.msra.mxu2 %v9618_v52 }
 0x5bb   : > { %v4502_v42 = vadd.f32 %v4501_v61, %v4413_v35  ;;  %4451 = vmatmul.bf16.gmra.mxu0 %v13810_v43  ;;  %4540 = vmatmul.bf16.gmra.mxu1 %v13811_v5  ;;  %v9359_v35 = vld [vmem:[#allocation6 + $0x90] sm:$0xf0]  ;;  %v10560_v5 = vld [vmem:[#allocation6 + $0x384] sm:$0xf] }
 0x5bc   : > { %v5826_v37 = vmax.f32 %v4677_v56, 0.0  ;;  %4629 = vmatmul.bf16.gmra.mxu2 %v11983_v58  ;;  %4718 = vmatmul.bf16.gmra.mxu3 %v12116_v57  ;;  %v10464_v56 = vld [vmem:[#allocation6 + $0x84] sm:$0xf]  ;;  %v9743_v57 = vld [vmem:[#allocation6 + $0x390] sm:$0xf0] }
 0x5bd   : > { %v9362_v58 = vor.u32 %v10464_v56, %v9359_v35 }
 0x5be   : > { %v12180_v23 = vpack.c.bf16 %v5826_v37, %v5822_v62  ;;  %v10496_v62 = vld [vmem:[#allocation6 + $0x184] sm:$0xf]  ;;  %v9746_v37 = vor.u32 %v10560_v5, %v9743_v57 }
 0x5bf   : > { %v4590_v6 = vpop.f32.mrf.mxu2  ;;  %v4679_v38 = vpop.f32.mrf.mxu3  ;;  %4757 = vmatpush.bf16.msra.mxu0 %v9362_v58 }
 0x5c0   : > { %13812 = vst [vmem:[#allocation35_spill] sm:$0xff] %v12180_v23  ;;  %v4591_v19 = vadd.f32 %v4590_v6, %v4502_v42  ;;  %v4414_v36 = vpop.f32.mrf.mxu0  ;;  %v4503_v8 = vpop.f32.mrf.mxu1  ;;  %v9487_v23 = vld [vmem:[#allocation6 + $0x190] sm:$0xf0]  ;;  %5024 = vmatpush.bf16.msra.mxu3 %v9746_v37 }
 0x5c1   : > { %v4415_v60 = vadd.f32 %v4414_v36, %v12165_v31  ;;  %v9490_v28 = vor.u32 %v10496_v62, %v9487_v23  ;;  %v13813_v36 = vld [vmem:[#allocation17_spill] sm:$0xff] }
 0x5c2   : > { %v4680_v61 = vadd.f32 %v4679_v38, %v4591_v19 }
 0x5c3   : > { %v4504_v2 = vadd.f32 %v4503_v8, %v4415_v60  ;;  %4846 = vmatpush.bf16.msra.mxu1 %v9490_v28  ;;  %v13814_v8 = vld [vmem:[#allocation40_spill] sm:$0xff] }
 0x5c4   : > { %v5830_v60 = vmax.f32 %v4680_v61, 0.0 }
 0x5c7   : > { %v4592_v43 = vpop.f32.mrf.mxu2  ;;  %v4681_v16 = vpop.f32.mrf.mxu3 }
 0x5c8   : > { %v4593_v42 = vadd.f32 %v4592_v43, %v4504_v2  ;;  %v4417_v39 = vpop.f32.mrf.mxu0  ;;  %v4506_v6 = vpop.f32.mrf.mxu1 }
 0x5c9   : > { %v4418_v52 = vadd.f32 %v4417_v39, %v12165_v31 }
 0x5ca   : > { %v4682_v38 = vadd.f32 %v4681_v16, %v4593_v42 }
 0x5cb   : > { %v4507_v19 = vadd.f32 %v4506_v6, %v4418_v52  ;;  %4456 = vmatmul.bf16.gmra.mxu0 %v13813_v36  ;;  %4545 = vmatmul.bf16.gmra.mxu1 %v13814_v8 }
 0x5cc   : > { %v5834_v57 = vmax.f32 %v4682_v38, 0.0  ;;  %4634 = vmatmul.bf16.gmra.mxu2 %v11991_v63  ;;  %4723 = vmatmul.bf16.gmra.mxu3 %v12124_v10 }
 0x5ce   : > { %v12188_v58 = vpack.c.bf16 %v5834_v57, %v5830_v60  ;;  %v13816_v60 = vld [vmem:[#allocation59_spill] sm:$0xff]  ;;  %v13817_v57 = vld [vmem:[#allocation41_spill] sm:$0xff] }
 0x5cf   : > { %v4595_v43 = vpop.f32.mrf.mxu2  ;;  %v4684_v5 = vpop.f32.mrf.mxu3 }
 0x5d0   : > { %13815 = vst [vmem:[#allocation37_spill] sm:$0xff] %v12188_v58  ;;  %v4596_v23 = vadd.f32 %v4595_v43, %v4507_v19  ;;  %v4419_v2 = vpop.f32.mrf.mxu0  ;;  %v4508_v56 = vpop.f32.mrf.mxu1 }
 0x5d1   : > { %v4420_v16 = vadd.f32 %v4419_v2, %v12165_v31  ;;  %v9599_v2 = vld [vmem:[#allocation6 + $0x270] sm:$0xf0] }
 0x5d2   : > { %v4685_v35 = vadd.f32 %v4684_v5, %v4596_v23  ;;  %v10524_v23 = vld [vmem:[#allocation6 + $0x264] sm:$0xf] }
 0x5d3   : > { %v4509_v62 = vadd.f32 %v4508_v56, %v4420_v16 }
 0x5d4   : > { %v5838_v19 = vmax.f32 %v4685_v35, 0.0 }
 0x5d7   : > { %v4597_v37 = vpop.f32.mrf.mxu2  ;;  %v4686_v28 = vpop.f32.mrf.mxu3 }
 0x5d8   : > { %v4598_v42 = vadd.f32 %v4597_v37, %v4509_v62  ;;  %v4422_v61 = vpop.f32.mrf.mxu0  ;;  %v4511_v39 = vpop.f32.mrf.mxu1  ;;  %v9602_v62 = vor.u32 %v10524_v23, %v9599_v2 }
 0x5d9   : > { %v4423_v6 = vadd.f32 %v4422_v61, %v12165_v31 }
 0x5da   : > { %v4687_v52 = vadd.f32 %v4686_v28, %v4598_v42  ;;  %4936 = vmatpush.bf16.msra.mxu2 %v9602_v62 }
 0x5db   : > { %v4512_v38 = vadd.f32 %v4511_v39, %v4423_v6  ;;  %4461 = vmatmul.bf16.gmra.mxu0 %v13816_v60  ;;  %4550 = vmatmul.bf16.gmra.mxu1 %v13817_v57  ;;  %v10460_v6 = vld [vmem:[#allocation6 + $0x64] sm:$0xf] }
 0x5dc   : > { %v5842_v43 = vmax.f32 %v4687_v52, 0.0  ;;  %4639 = vmatmul.bf16.gmra.mxu2 %v11999_v50  ;;  %4728 = vmatmul.bf16.gmra.mxu3 %v12132_v26  ;;  %v9343_v52 = vld [vmem:[#allocation6 + $0x70] sm:$0xf0]  ;;  %v10556_v50 = vld [vmem:[#allocation6 + $0x364] sm:$0xf] }
 0x5dd   : > { %v9346_v58 = vor.u32 %v10460_v6, %v9343_v52  ;;  %v9727_v26 = vld [vmem:[#allocation6 + $0x370] sm:$0xf0] }
 0x5de   : > { %v12196_v5 = vpack.c.bf16 %v5842_v43, %v5838_v19  ;;  %v10492_v19 = vld [vmem:[#allocation6 + $0x164] sm:$0xf]  ;;  %v9730_v43 = vor.u32 %v10556_v50, %v9727_v26 }
 0x5df   : > { %v4600_v56 = vpop.f32.mrf.mxu2  ;;  %v4689_v16 = vpop.f32.mrf.mxu3  ;;  %4758 = vmatpush.bf16.msra.mxu0 %v9346_v58 }
 0x5e0   : > { %13818 = vst [vmem:[#allocation38_spill] sm:$0xff] %v12196_v5  ;;  %v4601_v37 = vadd.f32 %v4600_v56, %v4512_v38  ;;  %v4424_v28 = vpop.f32.mrf.mxu0  ;;  %v4513_v42 = vpop.f32.mrf.mxu1  ;;  %v9471_v5 = vld [vmem:[#allocation6 + $0x170] sm:$0xf0]  ;;  %5025 = vmatpush.bf16.msra.mxu3 %v9730_v43 }
 0x5e1   : > { %v4425_v61 = vadd.f32 %v4424_v28, %v12165_v31  ;;  %v9474_v23 = vor.u32 %v10492_v19, %v9471_v5  ;;  %v13819_v28 = vld [vmem:[#allocation60_spill] sm:$0xff] }
 0x5e2   : > { %v4690_v39 = vadd.f32 %v4689_v16, %v4601_v37 }
 0x5e3   : > { %v4514_v35 = vadd.f32 %v4513_v42, %v4425_v61  ;;  %4847 = vmatpush.bf16.msra.mxu1 %v9474_v23  ;;  %v13820_v42 = vld [vmem:[#allocation18_spill] sm:$0xff] }
 0x5e4   : > { %v5846_v61 = vmax.f32 %v4690_v39, 0.0 }
 0x5e7   : > { %v4602_v57 = vpop.f32.mrf.mxu2  ;;  %v4691_v60 = vpop.f32.mrf.mxu3 }
 0x5e8   : > { %v4603_v38 = vadd.f32 %v4602_v57, %v4514_v35  ;;  %v4427_v2 = vpop.f32.mrf.mxu0  ;;  %v4516_v56 = vpop.f32.mrf.mxu1 }
 0x5e9   : > { %v4428_v62 = vadd.f32 %v4427_v2, %v12165_v31 }
 0x5ea   : > { %v4692_v16 = vadd.f32 %v4691_v60, %v4603_v38 }
 0x5eb   : > { %v4517_v37 = vadd.f32 %v4516_v56, %v4428_v62  ;;  %4466 = vmatmul.bf16.gmra.mxu0 %v13819_v28  ;;  %4555 = vmatmul.bf16.gmra.mxu1 %v13820_v42 }
 0x5ec   : > { %v5850_v50 = vmax.f32 %v4692_v16, 0.0  ;;  %4644 = vmatmul.bf16.gmra.mxu2 %v12007_v24  ;;  %4733 = vmatmul.bf16.gmra.mxu3 %v12140_v48  ;;  %v9567_v24 = vld [vmem:[#allocation6 + $0x230] sm:$0xf0] }
 0x5ee   : > { %v12204_v26 = vpack.c.bf16 %v5850_v50, %v5846_v61  ;;  %v13822_v61 = vld [vmem:[#allocation28_spill] sm:$0xff]  ;;  %v13823_v50 = vld [vmem:[#allocation30_spill] sm:$0xff] }
 0x5ef   : > { %v4605_v58 = vpop.f32.mrf.mxu2  ;;  %v4694_v57 = vpop.f32.mrf.mxu3 }
 0x5f0   : > { %13821 = vst [vmem:[#allocation39_spill] sm:$0xff] %v12204_v26  ;;  %v4606_v5 = vadd.f32 %v4605_v58, %v4517_v37  ;;  %v4429_v35 = vpop.f32.mrf.mxu0  ;;  %v4518_v6 = vpop.f32.mrf.mxu1 }
 0x5f1   : > { %v4430_v60 = vadd.f32 %v4429_v35, %v12165_v31  ;;  %v9583_v35 = vld [vmem:[#allocation6 + $0x250] sm:$0xf0] }
 0x5f2   : > { %v4695_v52 = vadd.f32 %v4694_v57, %v4606_v5  ;;  %v10520_v5 = vld [vmem:[#allocation6 + $0x244] sm:$0xf] }
 0x5f3   : > { %v4519_v19 = vadd.f32 %v4518_v6, %v4430_v60  ;;  %v10456_v6 = vld [vmem:[#allocation6 + $0x44] sm:$0xf] }
 0x5f4   : > { %v5854_v37 = vmax.f32 %v4695_v52, 0.0 }
 0x5f7   : > { %v4607_v43 = vpop.f32.mrf.mxu2  ;;  %v4696_v23 = vpop.f32.mrf.mxu3 }
 0x5f8   : > { %v4608_v38 = vadd.f32 %v4607_v43, %v4519_v19  ;;  %v4432_v39 = vpop.f32.mrf.mxu0  ;;  %v4521_v2 = vpop.f32.mrf.mxu1  ;;  %v9586_v43 = vor.u32 %v10520_v5, %v9583_v35  ;;  %v10484_v5 = vld [vmem:[#allocation6 + $0x124] sm:$0xf] }
 0x5f9   : > { %v4433_v56 = vadd.f32 %v4432_v39, %v12165_v31  ;;  %v9711_v39 = vld [vmem:[#allocation6 + $0x350] sm:$0xf0] }
 0x5fa   : > { %v4697_v62 = vadd.f32 %v4696_v23, %v4608_v38  ;;  %v9327_v23 = vld [vmem:[#allocation6 + $0x50] sm:$0xf0]  ;;  %v10552_v38 = vld [vmem:[#allocation6 + $0x344] sm:$0xf]  ;;  %4937 = vmatpush.bf16.msra.mxu2 %v9586_v43 }
 0x5fb   : > { %v4522_v16 = vadd.f32 %v4521_v2, %v4433_v56  ;;  %4471 = vmatmul.bf16.gmra.mxu0 %v13822_v61  ;;  %4560 = vmatmul.bf16.gmra.mxu1 %v13823_v50  ;;  %v9330_v52 = vor.u32 %v10456_v6, %v9327_v23  ;;  %v10488_v50 = vld [vmem:[#allocation6 + $0x144] sm:$0xf]  ;;  %v9311_v61 = vld [vmem:[#allocation6 + $0x30] sm:$0xf0] }
 0x5fc   : > { %v5858_v58 = vmax.f32 %v4697_v62, 0.0  ;;  %4649 = vmatmul.bf16.gmra.mxu2 %v12015_v17  ;;  %4738 = vmatmul.bf16.gmra.mxu3 %v12148_v33  ;;  %v9714_v62 = vor.u32 %v10552_v38, %v9711_v39  ;;  %v9455_v17 = vld [vmem:[#allocation6 + $0x150] sm:$0xf0]  ;;  %v10548_v38 = vld [vmem:[#allocation6 + $0x324] sm:$0xf] }
 0x5fd   : > { %4759 = vmatpush.bf16.msra.mxu0 %v9330_v52  ;;  %v9695_v39 = vld [vmem:[#allocation6 + $0x330] sm:$0xf0] }
 0x5fe   : > { %v12212_v57 = vpack.c.bf16 %v5858_v58, %v5854_v37  ;;  %v9458_v37 = vor.u32 %v10488_v50, %v9455_v17  ;;  %5026 = vmatpush.bf16.msra.mxu3 %v9714_v62  ;;  %v9698_v42 = vor.u32 %v10548_v38, %v9695_v39  ;;  %v10448_v17 = vld [vmem:[#allocation6 + $0x4] sm:$0xf]  ;;  %v9295_v50 = vld [vmem:[#allocation6 + $0x10] sm:$0xf0] }
 0x5ff   : > { %v4610_v60 = vpop.f32.mrf.mxu2  ;;  %v4699_v19 = vpop.f32.mrf.mxu3 }
 0x600   : > { %13824 = vst [vmem:[#allocation42_spill] sm:$0xff] %v12212_v57  ;;  %v4611_v2 = vadd.f32 %v4610_v60, %v4522_v16  ;;  %v4434_v56 = vpop.f32.mrf.mxu0  ;;  %v4523_v26 = vpop.f32.mrf.mxu1  ;;  %v10452_v57 = vld [vmem:[#allocation6 + $0x24] sm:$0xf]  ;;  %4848 = vmatpush.bf16.msra.mxu1 %v9458_v37  ;;  %v9439_v16 = vld [vmem:[#allocation6 + $0x130] sm:$0xf0] }
 0x601   : > { %v4435_v33 = vadd.f32 %v4434_v56, %v12165_v31  ;;  %v9314_v48 = vor.u32 %v10452_v57, %v9311_v61  ;;  %v10516_v60 = vld [vmem:[#allocation6 + $0x224] sm:$0xf]  ;;  %v9442_v6 = vor.u32 %v10484_v5, %v9439_v16  ;;  %v9551_v57 = vld [vmem:[#allocation6 + $0x210] sm:$0xf0] }
 0x602   : > { %v4700_v58 = vadd.f32 %v4699_v19, %v4611_v2  ;;  %v9570_v23 = vor.u32 %v10516_v60, %v9567_v24  ;;  %v10480_v19 = vld [vmem:[#allocation6 + $0x104] sm:$0xf]  ;;  %5027 = vmatpush.bf16.msra.mxu3 %v9698_v42  ;;  %v9679_v5 = vld [vmem:[#allocation6 + $0x310] sm:$0xf0] }
 0x603   : > { %v4524_v35 = vadd.f32 %v4523_v26, %v4435_v33  ;;  %4760 = vmatpush.bf16.msra.mxu0 %v9314_v48  ;;  %v9298_v33 = vor.u32 %v10448_v17, %v9295_v50  ;;  %v9423_v26 = vld [vmem:[#allocation6 + $0x110] sm:$0xf0]  ;;  %v10512_v61 = vld [vmem:[#allocation6 + $0x204] sm:$0xf] }
 0x604   : > { %4938 = vmatpush.bf16.msra.mxu2 %v9570_v23  ;;  %4849 = vmatpush.bf16.msra.mxu1 %v9442_v6  ;;  %v9554_v24 = vor.u32 %v10512_v61, %v9551_v57  ;;  %v10544_v37 = vld [vmem:[#allocation6 + $0x304] sm:$0xf]  ;;  %v9426_v16 = vor.u32 %v10480_v19, %v9423_v26  ;;  %v13825_v6 = vld [vmem:[#allocation29_spill] sm:$0xff]  ;;  %v5862_v39 = vmax.f32 %v4700_v58, 0.0 }
 0x605   : > { %v9682_v60 = vor.u32 %v10544_v37, %v9679_v5  ;;  %v13826_v42 = vld [vmem:[#allocation73_spill] sm:$0xff] }
 0x607   : > { %v4612_v43 = vpop.f32.mrf.mxu2  ;;  %v4701_v2 = vpop.f32.mrf.mxu3  ;;  %4761 = vmatpush.bf16.msra.mxu0 %v9298_v33  ;;  %5028 = vmatpush.bf16.msra.mxu3 %v9682_v60  ;;  %v13829_v60 = vld [vmem:[#allocation61_spill] sm:$0xff] }
 0x608   : > { %v4613_v56 = vadd.f32 %v4612_v43, %v4524_v35  ;;  %v4437_v52 = vpop.f32.mrf.mxu0  ;;  %v4526_v62 = vpop.f32.mrf.mxu1  ;;  %4939 = vmatpush.bf16.msra.mxu2 %v9554_v24  ;;  %4850 = vmatpush.bf16.msra.mxu1 %v9426_v16  ;;  %v13828_v16 = vld [vmem:[#allocation62_spill] sm:$0xff] }
 0x609   : > { %v4438_v48 = vadd.f32 %v4437_v52, %v12165_v31 }
 0x60a   : > { %v4702_v23 = vadd.f32 %v4701_v2, %v4613_v56 }
 0x60b   : > { %v4527_v38 = vadd.f32 %v4526_v62, %v4438_v48  ;;  %4476 = vmatmul.bf16.gmra.mxu0 %v13825_v6  ;;  %4565 = vmatmul.bf16.gmra.mxu1 %v13826_v42 }
 0x60c   : > { %v5866_v17 = vmax.f32 %v4702_v23, 0.0  ;;  %4654 = vmatmul.bf16.gmra.mxu2 %v12023_v20  ;;  %4743 = vmatmul.bf16.gmra.mxu3 %v12156_v41 }
 0x60e   : > { %v12220_v35 = vpack.c.bf16 %v5866_v17, %v5862_v39 }
 0x60f   : > { %v4615_v50 = vpop.f32.mrf.mxu2  ;;  %v4704_v19 = vpop.f32.mrf.mxu3 }
 0x610   : > { %13827 = vst [vmem:[#allocation43_spill] sm:$0xff] %v12220_v35  ;;  %v4616_v43 = vadd.f32 %v4615_v50, %v4527_v38  ;;  %v4439_v2 = vpop.f32.mrf.mxu0  ;;  %v4528_v33 = vpop.f32.mrf.mxu1 }
 0x611   : > { %v4440_v26 = vadd.f32 %v4439_v2, %v12165_v31 }
 0x612   : > { %v4705_v61 = vadd.f32 %v4704_v19, %v4616_v43 }
 0x613   : > { %v4529_v57 = vadd.f32 %v4528_v33, %v4440_v26 }
 0x614   : > { %v5870_v23 = vmax.f32 %v4705_v61, 0.0 }
 0x617   : > { %v4617_v56 = vpop.f32.mrf.mxu2  ;;  %v4706_v58 = vpop.f32.mrf.mxu3 }
 0x618   : > { %v4618_v52 = vadd.f32 %v4617_v56, %v4529_v57  ;;  %v4442_v62 = vpop.f32.mrf.mxu0  ;;  %v4531_v24 = vpop.f32.mrf.mxu1 }
 0x619   : > { %v4443_v37 = vadd.f32 %v4442_v62, %v12165_v31 }
 0x61a   : > { %v4707_v5 = vadd.f32 %v4706_v58, %v4618_v52 }
 0x61b   : > { %v4532_v48 = vadd.f32 %v4531_v24, %v4443_v37  ;;  %4481 = vmatmul.bf16.gmra.mxu0 %v13828_v16  ;;  %4570 = vmatmul.bf16.gmra.mxu1 %v13829_v60 }
 0x61c   : > { %v5874_v38 = vmax.f32 %v4707_v5, 0.0  ;;  %4659 = vmatmul.bf16.gmra.mxu2 %v12036_v54  ;;  %4748 = vmatmul.bf16.gmra.mxu3 %v12172_v59 }
 0x61e   : > { %v12228_v39 = vpack.c.bf16 %v5874_v38, %v5870_v23 }
 0x61f   : > { %v4620_v17 = vpop.f32.mrf.mxu2  ;;  %v4709_v50 = vpop.f32.mrf.mxu3 }
 0x620   : > { %13830 = vst [vmem:[#allocation44_spill] sm:$0xff] %v12228_v39  ;;  %v4621_v19 = vadd.f32 %v4620_v17, %v4532_v48  ;;  %v4444_v43 = vpop.f32.mrf.mxu0  ;;  %v4533_v2 = vpop.f32.mrf.mxu1 }
 0x621   : > { %v4445_v33 = vadd.f32 %v4444_v43, %v12165_v31 }
 0x622   : > { %v4710_v26 = vadd.f32 %v4709_v50, %v4621_v19 }
 0x623   : > { %v4534_v57 = vadd.f32 %v4533_v2, %v4445_v33 }
 0x624   : > { %v5878_v48 = vmax.f32 %v4710_v26, 0.0 }
 0x627   : > { %v4622_v56 = vpop.f32.mrf.mxu2  ;;  %v4711_v58 = vpop.f32.mrf.mxu3 }
 0x628   : > { %v4623_v52 = vadd.f32 %v4622_v56, %v4534_v57  ;;  %v4447_v61 = vpop.f32.mrf.mxu0  ;;  %v4536_v62 = vpop.f32.mrf.mxu1 }
 0x629   : > { %v4448_v24 = vadd.f32 %v4447_v61, %v12165_v31 }
 0x62a   : > { %v4712_v37 = vadd.f32 %v4711_v58, %v4623_v52 }
 0x62b   : > { %v4537_v5 = vadd.f32 %v4536_v62, %v4448_v24  ;;  %4762 = vmatmul.bf16.vlgmr.msra.gmra.mxu0 %v13780_v27  ;;  %4851 = vmatmul.bf16.vlgmr.msra.gmra.mxu1 %v13781_v4 }
 0x62c   : > { %v5882_v23 = vmax.f32 %v4712_v37, 0.0  ;;  %4940 = vmatmul.bf16.vlgmr.msra.gmra.mxu2 %v13782_v46  ;;  %5029 = vmatmul.bf16.vlgmr.msra.gmra.mxu3 %v12044_v21 }
 0x62e   : > { %v12236_v38 = vpack.c.bf16 %v5882_v23, %v5878_v48 }
 0x62f   : > { %v4625_v17 = vpop.f32.mrf.mxu2  ;;  %v4714_v50 = vpop.f32.mrf.mxu3 }
 0x630   : > { %13831 = vst [vmem:[#allocation45_spill] sm:$0xff] %v12236_v38  ;;  %v4626_v19 = vadd.f32 %v4625_v17, %v4537_v5  ;;  %v4449_v43 = vpop.f32.mrf.mxu0  ;;  %v4538_v2 = vpop.f32.mrf.mxu1 }
 0x631   : > { %v4450_v33 = vadd.f32 %v4449_v43, %v12165_v31 }
 0x632   : > { %v4715_v57 = vadd.f32 %v4714_v50, %v4626_v19 }
 0x633   : > { %v4539_v56 = vadd.f32 %v4538_v2, %v4450_v33 }
 0x634   : > { %v5886_v5 = vmax.f32 %v4715_v57, 0.0 }
 0x637   : > { %v4627_v58 = vpop.f32.mrf.mxu2  ;;  %v4716_v52 = vpop.f32.mrf.mxu3 }
 0x638   : > { %v4628_v61 = vadd.f32 %v4627_v58, %v4539_v56  ;;  %v4452_v26 = vpop.f32.mrf.mxu0  ;;  %v4541_v62 = vpop.f32.mrf.mxu1 }
 0x639   : > { %v4453_v24 = vadd.f32 %v4452_v26, %v12165_v31 }
 0x63a   : > { %v4717_v37 = vadd.f32 %v4716_v52, %v4628_v61 }
 0x63b   : > { %v4542_v39 = vadd.f32 %v4541_v62, %v4453_v24  ;;  %4767 = vmatmul.bf16.gmra.mxu0 %v13784_v40  ;;  %4856 = vmatmul.bf16.gmra.mxu1 %v13785_v13 }
 0x63c   : > { %v5890_v48 = vmax.f32 %v4717_v37, 0.0  ;;  %4945 = vmatmul.bf16.gmra.mxu2 %v13786_v51  ;;  %5034 = vmatmul.bf16.gmra.mxu3 %v12052_v30 }
 0x63e   : > { %v12244_v23 = vpack.c.bf16 %v5890_v48, %v5886_v5 }
 0x63f   : > { %v4630_v17 = vpop.f32.mrf.mxu2  ;;  %v4719_v50 = vpop.f32.mrf.mxu3 }
 0x640   : > { %13832 = vst [vmem:[#allocation46_spill] sm:$0xff] %v12244_v23  ;;  %v4631_v19 = vadd.f32 %v4630_v17, %v4542_v39  ;;  %v4454_v43 = vpop.f32.mrf.mxu0  ;;  %v4543_v2 = vpop.f32.mrf.mxu1 }
 0x641   : > { %v4455_v33 = vadd.f32 %v4454_v43, %v12165_v31 }
 0x642   : > { %v4720_v56 = vadd.f32 %v4719_v50, %v4631_v19 }
 0x643   : > { %v4544_v58 = vadd.f32 %v4543_v2, %v4455_v33 }
 0x644   : > { %v5894_v39 = vmax.f32 %v4720_v56, 0.0 }
 0x647   : > { %v4632_v52 = vpop.f32.mrf.mxu2  ;;  %v4721_v61 = vpop.f32.mrf.mxu3 }
 0x648   : > { %v4633_v26 = vadd.f32 %v4632_v52, %v4544_v58  ;;  %v4457_v57 = vpop.f32.mrf.mxu0  ;;  %v4546_v62 = vpop.f32.mrf.mxu1 }
 0x649   : > { %v4458_v24 = vadd.f32 %v4457_v57, %v12165_v31 }
 0x64a   : > { %v4722_v37 = vadd.f32 %v4721_v61, %v4633_v26 }
 0x64b   : > { %v4547_v38 = vadd.f32 %v4546_v62, %v4458_v24  ;;  %4772 = vmatmul.bf16.gmra.mxu0 %v13788_v1  ;;  %4861 = vmatmul.bf16.gmra.mxu1 %v13789_v44 }
 0x64c   : > { %v5898_v5 = vmax.f32 %v4722_v37, 0.0  ;;  %4950 = vmatmul.bf16.gmra.mxu2 %v13790_v0  ;;  %5039 = vmatmul.bf16.gmra.mxu3 %v12060_v14 }
 0x64e   : > { %v12252_v48 = vpack.c.bf16 %v5898_v5, %v5894_v39 }
 0x64f   : > { %v4635_v17 = vpop.f32.mrf.mxu2  ;;  %v4724_v50 = vpop.f32.mrf.mxu3 }
 0x650   : > { %13833 = vst [vmem:[#allocation47_spill] sm:$0xff] %v12252_v48  ;;  %v4636_v19 = vadd.f32 %v4635_v17, %v4547_v38  ;;  %v4459_v43 = vpop.f32.mrf.mxu0  ;;  %v4548_v2 = vpop.f32.mrf.mxu1  ;;  %v9669_v17 = vld [vmem:[#allocation6 + $0x2e8] sm:$0xf]  ;;  %v10575_v48 = vld [vmem:[#allocation6 + $0x3f4] sm:$0xf0] }
 0x651   : > { %v4460_v33 = vadd.f32 %v4459_v43, %v12165_v31 }
 0x652   : > { %v4725_v58 = vadd.f32 %v4724_v50, %v4636_v19  ;;  %v10543_v50 = vld [vmem:[#allocation6 + $0x2f4] sm:$0xf0] }
 0x653   : > { %v4549_v52 = vadd.f32 %v4548_v2, %v4460_v33  ;;  %v9670_v2 = vor.u32 %v10543_v50, %v9669_v17 }
 0x654   : > { %v5902_v38 = vmax.f32 %v4725_v58, 0.0 }
 0x655   : > { %5288 = vmatpush.bf16.msrb.mxu2 %v9670_v2 }
 0x657   : > { %v4637_v61 = vpop.f32.mrf.mxu2  ;;  %v4726_v26 = vpop.f32.mrf.mxu3 }
 0x658   : > { %v4638_v57 = vadd.f32 %v4637_v61, %v4549_v52  ;;  %v4462_v56 = vpop.f32.mrf.mxu0  ;;  %v4551_v62 = vpop.f32.mrf.mxu1 }
 0x659   : > { %v4463_v24 = vadd.f32 %v4462_v56, %v12165_v31  ;;  %v9413_v56 = vld [vmem:[#allocation6 + $0xe8] sm:$0xf] }
 0x65a   : > { %v4727_v37 = vadd.f32 %v4726_v26, %v4638_v57 }
 0x65b   : > { %v4552_v23 = vadd.f32 %v4551_v62, %v4463_v24  ;;  %4777 = vmatmul.bf16.gmra.mxu0 %v13792_v3  ;;  %4866 = vmatmul.bf16.gmra.mxu1 %v13793_v55  ;;  %v10479_v62 = vld [vmem:[#allocation6 + $0xf4] sm:$0xf0] }
 0x65c   : > { %v5906_v39 = vmax.f32 %v4727_v37, 0.0  ;;  %4955 = vmatmul.bf16.gmra.mxu2 %v13794_v53  ;;  %5044 = vmatmul.bf16.gmra.mxu3 %v12068_v11  ;;  %v9414_v24 = vor.u32 %v10479_v62, %v9413_v56  ;;  %v9797_v37 = vld [vmem:[#allocation6 + $0x3e8] sm:$0xf] }
 0x65e   : > { %v12260_v5 = vpack.c.bf16 %v5906_v39, %v5902_v38  ;;  %v9541_v38 = vld [vmem:[#allocation6 + $0x1e8] sm:$0xf]  ;;  %v9798_v39 = vor.u32 %v10575_v48, %v9797_v37  ;;  %5110 = vmatpush.bf16.msrb.mxu0 %v9414_v24 }
 0x65f   : > { %v4640_v19 = vpop.f32.mrf.mxu2  ;;  %v4729_v43 = vpop.f32.mrf.mxu3 }
 0x660   : > { %13834 = vst [vmem:[#allocation48_spill] sm:$0xff] %v12260_v5  ;;  %v4641_v33 = vadd.f32 %v4640_v19, %v4552_v23  ;;  %v4464_v52 = vpop.f32.mrf.mxu0  ;;  %v4553_v61 = vpop.f32.mrf.mxu1  ;;  %v10511_v5 = vld [vmem:[#allocation6 + $0x1f4] sm:$0xf0]  ;;  %5377 = vmatpush.bf16.msrb.mxu3 %v9798_v39 }
 0x661   : > { %v4465_v26 = vadd.f32 %v4464_v52, %v12165_v31  ;;  %v9542_v17 = vor.u32 %v10511_v5, %v9541_v38 }
 0x662   : > { %v4730_v57 = vadd.f32 %v4729_v43, %v4641_v33 }
 0x663   : > { %v4554_v58 = vadd.f32 %v4553_v61, %v4465_v26  ;;  %5199 = vmatpush.bf16.msrb.mxu1 %v9542_v17 }
 0x664   : > { %v5910_v52 = vmax.f32 %v4730_v57, 0.0 }
 0x667   : > { %v4642_v35 = vpop.f32.mrf.mxu2  ;;  %v4731_v11 = vpop.f32.mrf.mxu3 }
 0x668   : > { %v4643_v23 = vadd.f32 %v4642_v35, %v4554_v58  ;;  %v4467_v50 = vpop.f32.mrf.mxu0  ;;  %v4556_v19 = vpop.f32.mrf.mxu1 }
 0x669   : > { %v4468_v2 = vadd.f32 %v4467_v50, %v12165_v31 }
 0x66a   : > { %v4732_v43 = vadd.f32 %v4731_v11, %v4643_v23 }
 0x66b   : > { %v4557_v33 = vadd.f32 %v4556_v19, %v4468_v2  ;;  %4782 = vmatmul.bf16.gmra.mxu0 %v13796_v12  ;;  %4871 = vmatmul.bf16.gmra.mxu1 %v13797_v15 }
 0x66c   : > { %v5914_v48 = vmax.f32 %v4732_v43, 0.0  ;;  %4960 = vmatmul.bf16.gmra.mxu2 %v13798_v18  ;;  %5049 = vmatmul.bf16.gmra.mxu3 %v12076_v32 }
 0x66e   : > { %v12268_v5 = vpack.c.bf16 %v5914_v48, %v5910_v52  ;;  %v9653_v52 = vld [vmem:[#allocation6 + $0x2c8] sm:$0xf]  ;;  %v10539_v48 = vld [vmem:[#allocation6 + $0x2d4] sm:$0xf0] }
 0x66f   : > { %v4645_v35 = vpop.f32.mrf.mxu2  ;;  %v4734_v61 = vpop.f32.mrf.mxu3 }
 0x670   : > { %13835 = vst [vmem:[#allocation49_spill] sm:$0xff] %v12268_v5  ;;  %v4646_v26 = vadd.f32 %v4645_v35, %v4557_v33  ;;  %v4469_v58 = vpop.f32.mrf.mxu0  ;;  %v4558_v56 = vpop.f32.mrf.mxu1 }
 0x671   : > { %v4470_v11 = vadd.f32 %v4469_v58, %v12165_v31 }
 0x672   : > { %v4735_v62 = vadd.f32 %v4734_v61, %v4646_v26  ;;  %v9654_v26 = vor.u32 %v10539_v48, %v9653_v52 }
 0x673   : > { %v4559_v24 = vadd.f32 %v4558_v56, %v4470_v11 }
 0x674   : > { %v5918_v2 = vmax.f32 %v4735_v62, 0.0  ;;  %5289 = vmatpush.bf16.msrb.mxu2 %v9654_v26 }
 0x677   : > { %v4647_v37 = vpop.f32.mrf.mxu2  ;;  %v4736_v38 = vpop.f32.mrf.mxu3 }
 0x678   : > { %v4648_v39 = vadd.f32 %v4647_v37, %v4559_v24  ;;  %v4472_v57 = vpop.f32.mrf.mxu0  ;;  %v4561_v17 = vpop.f32.mrf.mxu1 }
 0x679   : > { %v4473_v23 = vadd.f32 %v4472_v57, %v12165_v31 }
 0x67a   : > { %v4737_v50 = vadd.f32 %v4736_v38, %v4648_v39  ;;  %v9397_v38 = vld [vmem:[#allocation6 + $0xc8] sm:$0xf]  ;;  %v10475_v39 = vld [vmem:[#allocation6 + $0xd4] sm:$0xf0] }
 0x67b   : > { %v4562_v19 = vadd.f32 %v4561_v17, %v4473_v23  ;;  %4787 = vmatmul.bf16.gmra.mxu0 %v13800_v29  ;;  %4876 = vmatmul.bf16.gmra.mxu1 %v13801_v49  ;;  %v9398_v57 = vor.u32 %v10475_v39, %v9397_v38  ;;  %v9781_v17 = vld [vmem:[#allocation6 + $0x3c8] sm:$0xf]  ;;  %v10571_v23 = vld [vmem:[#allocation6 + $0x3d4] sm:$0xf0] }
 0x67c   : > { %v5922_v43 = vmax.f32 %v4737_v50, 0.0  ;;  %4965 = vmatmul.bf16.gmra.mxu2 %v11951_v25  ;;  %5054 = vmatmul.bf16.gmra.mxu3 %v12084_v45  ;;  %v9525_v50 = vld [vmem:[#allocation6 + $0x1c8] sm:$0xf] }
 0x67d   : > { %5111 = vmatpush.bf16.msrb.mxu0 %v9398_v57 }
 0x67e   : > { %v12276_v33 = vpack.c.bf16 %v5922_v43, %v5918_v2  ;;  %v9782_v2 = vor.u32 %v10571_v23, %v9781_v17  ;;  %v10507_v43 = vld [vmem:[#allocation6 + $0x1d4] sm:$0xf0] }
 0x67f   : > { %v4650_v35 = vpop.f32.mrf.mxu2  ;;  %v4739_v61 = vpop.f32.mrf.mxu3  ;;  %v9526_v52 = vor.u32 %v10507_v43, %v9525_v50 }
 0x680   : > { %13836 = vst [vmem:[#allocation50_spill] sm:$0xff] %v12276_v33  ;;  %v4651_v58 = vadd.f32 %v4650_v35, %v4562_v19  ;;  %v4474_v56 = vpop.f32.mrf.mxu0  ;;  %v4563_v11 = vpop.f32.mrf.mxu1  ;;  %5378 = vmatpush.bf16.msrb.mxu3 %v9782_v2 }
 0x681   : > { %v4475_v24 = vadd.f32 %v4474_v56, %v12165_v31  ;;  %5200 = vmatpush.bf16.msrb.mxu1 %v9526_v52 }
 0x682   : > { %v4740_v37 = vadd.f32 %v4739_v61, %v4651_v58 }
 0x683   : > { %v4564_v62 = vadd.f32 %v4563_v11, %v4475_v24  ;;  %v13837_v24 = vld [vmem:[#allocation24_spill] sm:$0xff] }
 0x684   : > { %v5926_v56 = vmax.f32 %v4740_v37, 0.0 }
 0x687   : > { %v4652_v33 = vpop.f32.mrf.mxu2  ;;  %v4741_v5 = vpop.f32.mrf.mxu3 }
 0x688   : > { %v4653_v19 = vadd.f32 %v4652_v33, %v4564_v62  ;;  %v4477_v48 = vpop.f32.mrf.mxu0  ;;  %v4566_v35 = vpop.f32.mrf.mxu1 }
 0x689   : > { %v4478_v26 = vadd.f32 %v4477_v48, %v12165_v31 }
 0x68a   : > { %v4742_v61 = vadd.f32 %v4741_v5, %v4653_v19 }
 0x68b   : > { %v4567_v58 = vadd.f32 %v4566_v35, %v4478_v26  ;;  %4792 = vmatmul.bf16.gmra.mxu0 %v13803_v34  ;;  %4881 = vmatmul.bf16.gmra.mxu1 %v13804_v7 }
 0x68c   : > { %v5930_v11 = vmax.f32 %v4742_v61, 0.0  ;;  %4970 = vmatmul.bf16.gmra.mxu2 %v11959_v9  ;;  %5059 = vmatmul.bf16.gmra.mxu3 %v13837_v24  ;;  %v13839_v61 = vld [vmem:[#allocation58_spill] sm:$0xff] }
 0x68e   : > { %v12284_v38 = vpack.c.bf16 %v5930_v11, %v5926_v56  ;;  %v13840_v56 = vld [vmem:[#allocation70_spill] sm:$0xff] }
 0x68f   : > { %v4655_v33 = vpop.f32.mrf.mxu2  ;;  %v4744_v62 = vpop.f32.mrf.mxu3 }
 0x690   : > { %13838 = vst [vmem:[#allocation51_spill] sm:$0xff] %v12284_v38  ;;  %v4656_v39 = vadd.f32 %v4655_v33, %v4567_v58  ;;  %v4479_v57 = vpop.f32.mrf.mxu0  ;;  %v4568_v17 = vpop.f32.mrf.mxu1  ;;  %v13841_v33 = vld [vmem:[#allocation78_spill] sm:$0xff]  ;;  %v9381_v38 = vld [vmem:[#allocation6 + $0xa8] sm:$0xf] }
 0x691   : > { %v4480_v5 = vadd.f32 %v4479_v57, %v12165_v31  ;;  %v13842_v57 = vld [vmem:[#allocation25_spill] sm:$0xff] }
 0x692   : > { %v4745_v23 = vadd.f32 %v4744_v62, %v4656_v39  ;;  %v9637_v39 = vld [vmem:[#allocation6 + $0x2a8] sm:$0xf] }
 0x693   : > { %v4569_v50 = vadd.f32 %v4568_v17, %v4480_v5  ;;  %v10535_v17 = vld [vmem:[#allocation6 + $0x2b4] sm:$0xf0] }
 0x694   : > { %v5934_v58 = vmax.f32 %v4745_v23, 0.0 }
 0x697   : > { %v4657_v2 = vpop.f32.mrf.mxu2  ;;  %v4746_v43 = vpop.f32.mrf.mxu3 }
 0x698   : > { %v4658_v52 = vadd.f32 %v4657_v2, %v4569_v50  ;;  %v4482_v37 = vpop.f32.mrf.mxu0  ;;  %v4571_v19 = vpop.f32.mrf.mxu1  ;;  %v9638_v2 = vor.u32 %v10535_v17, %v9637_v39 }
 0x699   : > { %v4483_v48 = vadd.f32 %v4482_v37, %v12165_v31 }
 0x69a   : > { %v4747_v35 = vadd.f32 %v4746_v43, %v4658_v52  ;;  %5290 = vmatpush.bf16.msrb.mxu2 %v9638_v2 }
 0x69b   : > { %v4572_v26 = vadd.f32 %v4571_v19, %v4483_v48  ;;  %4797 = vmatmul.bf16.gmra.mxu0 %v13839_v61  ;;  %4886 = vmatmul.bf16.gmra.mxu1 %v13840_v56  ;;  %v10503_v61 = vld [vmem:[#allocation6 + $0x1b4] sm:$0xf0] }
 0x69c   : > { %v5938_v11 = vmax.f32 %v4747_v35, 0.0  ;;  %4975 = vmatmul.bf16.gmra.mxu2 %v13841_v33  ;;  %5064 = vmatmul.bf16.gmra.mxu3 %v13842_v57  ;;  %v12296_v35 = vperm.slane %v12162_v47, 1  ;;  %v10471_v57 = vld [vmem:[#allocation6 + $0xb4] sm:$0xf0]  ;;  %v9509_v33 = vld [vmem:[#allocation6 + $0x1a8] sm:$0xf] }
 0x69d   : > { %v9510_v17 = vor.u32 %v10503_v61, %v9509_v33 }
 0x69e   : > { %v12292_v62 = vpack.c.bf16 %v5938_v11, %v5934_v58  ;;  %v9382_v58 = vor.u32 %v10471_v57, %v9381_v38  ;;  %v9765_v11 = vld [vmem:[#allocation6 + $0x3a8] sm:$0xf]  ;;  %v13844_v38 = vld [vmem:[#allocation71_spill] sm:$0xff] }
 0x69f   : > { %v4660_v5 = vpop.f32.mrf.mxu2  ;;  %v4749_v50 = vpop.f32.mrf.mxu3  ;;  %5201 = vmatpush.bf16.msrb.mxu1 %v9510_v17 }
 0x6a0   : > { %13843 = vst [vmem:[#allocation63_spill] sm:$0xff] %v12292_v62  ;;  %v4661_v37 = vadd.f32 %v4660_v5, %v4572_v26  ;;  %v4484_v43 = vpop.f32.mrf.mxu0  ;;  %v4573_v52 = vpop.f32.mrf.mxu1  ;;  %v10567_v62 = vld [vmem:[#allocation6 + $0x3b4] sm:$0xf0]  ;;  %5112 = vmatpush.bf16.msrb.mxu0 %v9382_v58 }
 0x6a1   : > { %v4485_v19 = vadd.f32 %v4484_v43, %v12165_v31  ;;  %v9766_v56 = vor.u32 %v10567_v62, %v9765_v11  ;;  %v13845_v43 = vld [vmem:[#allocation79_spill] sm:$0xff] }
 0x6a2   : > { %v4750_v48 = vadd.f32 %v4749_v50, %v4661_v37 }
 0x6a3   : > { %v4574_v23 = vadd.f32 %v4573_v52, %v4485_v19  ;;  %5379 = vmatpush.bf16.msrb.mxu3 %v9766_v56  ;;  %v13846_v52 = vld [vmem:[#allocation26_spill] sm:$0xff] }
 0x6a4   : > { %v5942_v57 = vmax.f32 %v4750_v48, 0.0 }
 0x6a7   : > { %v4662_v39 = vpop.f32.mrf.mxu2  ;;  %v4751_v26 = vpop.f32.mrf.mxu3 }
 0x6a8   : > { %v4663_v5 = vadd.f32 %v4662_v39, %v4574_v23  ;;  %v4763_v31 = vpop.f32.mrf.mxu0  ;;  %v4852_v2 = vpop.f32.mrf.mxu1 }
 0x6a9   : > { %v4764_v50 = vadd.f32 %v4763_v31, %v12296_v35 }
 0x6aa   : > { %v4752_v47 = vadd.f32 %v4751_v26, %v4663_v5 }
 0x6ab   : > { %v4853_v37 = vadd.f32 %v4852_v2, %v4764_v50  ;;  %4802 = vmatmul.bf16.gmra.mxu0 %v13808_v22  ;;  %4891 = vmatmul.bf16.gmra.mxu1 %v13844_v38 }
 0x6ac   : > { %v5946_v62 = vmax.f32 %v4752_v47, 0.0  ;;  %4980 = vmatmul.bf16.gmra.mxu2 %v13845_v43  ;;  %5069 = vmatmul.bf16.gmra.mxu3 %v13846_v52 }
 0x6ae   : > { %v12303_v61 = vpack.c.bf16 %v5946_v62, %v5942_v57  ;;  %v13848_v57 = vld [vmem:[#allocation16_spill] sm:$0xff] }
 0x6af   : > { %v4941_v33 = vpop.f32.mrf.mxu2  ;;  %v5030_v19 = vpop.f32.mrf.mxu3  ;;  %v13849_v62 = vld [vmem:[#allocation72_spill] sm:$0xff] }
 0x6b0   : > { %13847 = vst [vmem:[#allocation36_spill] sm:$0xff] %v12303_v61  ;;  %v4942_v56 = vadd.f32 %v4941_v33, %v4853_v37  ;;  %v4765_v23 = vpop.f32.mrf.mxu0  ;;  %v4854_v58 = vpop.f32.mrf.mxu1  ;;  %v13850_v61 = vld [vmem:[#allocation80_spill] sm:$0xff] }
 0x6b1   : > { %v4766_v11 = vadd.f32 %v4765_v23, %v12296_v35  ;;  %v13851_v23 = vld [vmem:[#allocation27_spill] sm:$0xff] }
 0x6b2   : > { %v5031_v39 = vadd.f32 %v5030_v19, %v4942_v56  ;;  %v9621_v56 = vld [vmem:[#allocation6 + $0x288] sm:$0xf] }
 0x6b3   : > { %v4855_v26 = vadd.f32 %v4854_v58, %v4766_v11  ;;  %v10531_v58 = vld [vmem:[#allocation6 + $0x294] sm:$0xf0] }
 0x6b4   : > { %v5823_v37 = vmax.f32 %v5031_v39, 0.0 }
 0x6b7   : > { %v4943_v17 = vpop.f32.mrf.mxu2  ;;  %v5032_v5 = vpop.f32.mrf.mxu3 }
 0x6b8   : > { %v4944_v31 = vadd.f32 %v4943_v17, %v4855_v26  ;;  %v4768_v48 = vpop.f32.mrf.mxu0  ;;  %v4857_v2 = vpop.f32.mrf.mxu1  ;;  %v9622_v17 = vor.u32 %v10531_v58, %v9621_v56 }
 0x6b9   : > { %v4769_v50 = vadd.f32 %v4768_v48, %v12296_v35 }
 0x6ba   : > { %v5033_v47 = vadd.f32 %v5032_v5, %v4944_v31  ;;  %5291 = vmatpush.bf16.msrb.mxu2 %v9622_v17 }
 0x6bb   : > { %v4858_v52 = vadd.f32 %v4857_v2, %v4769_v50  ;;  %4807 = vmatmul.bf16.gmra.mxu0 %v13848_v57  ;;  %4896 = vmatmul.bf16.gmra.mxu1 %v13849_v62  ;;  %v10467_v62 = vld [vmem:[#allocation6 + $0x94] sm:$0xf0]  ;;  %v9749_v57 = vld [vmem:[#allocation6 + $0x388] sm:$0xf] }
 0x6bc   : > { %v5827_v33 = vmax.f32 %v5033_v47, 0.0  ;;  %4985 = vmatmul.bf16.gmra.mxu2 %v13850_v61  ;;  %5074 = vmatmul.bf16.gmra.mxu3 %v13851_v23  ;;  %v9365_v47 = vld [vmem:[#allocation6 + $0x88] sm:$0xf]  ;;  %v10563_v23 = vld [vmem:[#allocation6 + $0x394] sm:$0xf0] }
 0x6bd   : > { %v9366_v61 = vor.u32 %v10467_v62, %v9365_v47 }
 0x6be   : > { %v12311_v19 = vpack.c.bf16 %v5827_v33, %v5823_v37  ;;  %v9493_v37 = vld [vmem:[#allocation6 + $0x188] sm:$0xf]  ;;  %v9750_v33 = vor.u32 %v10563_v23, %v9749_v57 }
 0x6bf   : > { %v4946_v11 = vpop.f32.mrf.mxu2  ;;  %v5035_v26 = vpop.f32.mrf.mxu3  ;;  %5113 = vmatpush.bf16.msrb.mxu0 %v9366_v61 }
 0x6c0   : > { %13852 = vst [vmem:[#allocation52_spill] sm:$0xff] %v12311_v19  ;;  %v4947_v48 = vadd.f32 %v4946_v11, %v4858_v52  ;;  %v4770_v5 = vpop.f32.mrf.mxu0  ;;  %v4859_v31 = vpop.f32.mrf.mxu1  ;;  %v10499_v19 = vld [vmem:[#allocation6 + $0x194] sm:$0xf0]  ;;  %5380 = vmatpush.bf16.msrb.mxu3 %v9750_v33 }
 0x6c1   : > { %v4771_v2 = vadd.f32 %v4770_v5, %v12296_v35  ;;  %v9494_v56 = vor.u32 %v10499_v19, %v9493_v37 }
 0x6c2   : > { %v5036_v50 = vadd.f32 %v5035_v26, %v4947_v48 }
 0x6c3   : > { %v4860_v39 = vadd.f32 %v4859_v31, %v4771_v2  ;;  %5202 = vmatpush.bf16.msrb.mxu1 %v9494_v56 }
 0x6c4   : > { %v5831_v62 = vmax.f32 %v5036_v50, 0.0 }
 0x6c7   : > { %v4948_v43 = vpop.f32.mrf.mxu2  ;;  %v5037_v38 = vpop.f32.mrf.mxu3 }
 0x6c8   : > { %v4949_v52 = vadd.f32 %v4948_v43, %v4860_v39  ;;  %v4773_v58 = vpop.f32.mrf.mxu0  ;;  %v4862_v11 = vpop.f32.mrf.mxu1 }
 0x6c9   : > { %v4774_v17 = vadd.f32 %v4773_v58, %v12296_v35 }
 0x6ca   : > { %v5038_v26 = vadd.f32 %v5037_v38, %v4949_v52 }
 0x6cb   : > { %v4863_v48 = vadd.f32 %v4862_v11, %v4774_v17  ;;  %4812 = vmatmul.bf16.gmra.mxu0 %v13813_v36  ;;  %4901 = vmatmul.bf16.gmra.mxu1 %v13814_v8  ;;  %v13854_v17 = vld [vmem:[#allocation59_spill] sm:$0xff] }
 0x6cc   : > { %v5835_v57 = vmax.f32 %v5038_v26, 0.0  ;;  %4990 = vmatmul.bf16.gmra.mxu2 %v11991_v63  ;;  %5079 = vmatmul.bf16.gmra.mxu3 %v12124_v10  ;;  %v13855_v26 = vld [vmem:[#allocation41_spill] sm:$0xff]  ;;  %v10519_v10 = vld [vmem:[#allocation6 + $0x234] sm:$0xf0] }
 0x6ce   : > { %v12319_v61 = vpack.c.bf16 %v5835_v57, %v5831_v62  ;;  %v13856_v57 = vld [vmem:[#allocation20_spill] sm:$0xff] }
 0x6cf   : > { %v4951_v43 = vpop.f32.mrf.mxu2  ;;  %v5040_v23 = vpop.f32.mrf.mxu3 }
 0x6d0   : > { %13853 = vst [vmem:[#allocation64_spill] sm:$0xff] %v12319_v61  ;;  %v4952_v19 = vadd.f32 %v4951_v43, %v4863_v48  ;;  %v4775_v5 = vpop.f32.mrf.mxu0  ;;  %v4864_v31 = vpop.f32.mrf.mxu1  ;;  %v13857_v43 = vld [vmem:[#allocation32_spill] sm:$0xff] }
 0x6d1   : > { %v4776_v38 = vadd.f32 %v4775_v5, %v12296_v35  ;;  %v10527_v5 = vld [vmem:[#allocation6 + $0x274] sm:$0xf0] }
 0x6d2   : > { %v5041_v2 = vadd.f32 %v5040_v23, %v4952_v19  ;;  %v9605_v19 = vld [vmem:[#allocation6 + $0x268] sm:$0xf] }
 0x6d3   : > { %v4865_v39 = vadd.f32 %v4864_v31, %v4776_v38 }
 0x6d4   : > { %v5839_v48 = vmax.f32 %v5041_v2, 0.0 }
 0x6d7   : > { %v4953_v47 = vpop.f32.mrf.mxu2  ;;  %v5042_v37 = vpop.f32.mrf.mxu3 }
 0x6d8   : > { %v4954_v33 = vadd.f32 %v4953_v47, %v4865_v39  ;;  %v4778_v50 = vpop.f32.mrf.mxu0  ;;  %v4867_v56 = vpop.f32.mrf.mxu1  ;;  %v9606_v39 = vor.u32 %v10527_v5, %v9605_v19 }
 0x6d9   : > { %v4779_v52 = vadd.f32 %v4778_v50, %v12296_v35 }
 0x6da   : > { %v5043_v58 = vadd.f32 %v5042_v37, %v4954_v33  ;;  %5292 = vmatpush.bf16.msrb.mxu2 %v9606_v39 }
 0x6db   : > { %v4868_v11 = vadd.f32 %v4867_v56, %v4779_v52  ;;  %4817 = vmatmul.bf16.gmra.mxu0 %v13854_v17  ;;  %4906 = vmatmul.bf16.gmra.mxu1 %v13855_v26  ;;  %v9349_v52 = vld [vmem:[#allocation6 + $0x68] sm:$0xf] }
 0x6dc   : > { %v5843_v62 = vmax.f32 %v5043_v58, 0.0  ;;  %4995 = vmatmul.bf16.gmra.mxu2 %v13856_v57  ;;  %5084 = vmatmul.bf16.gmra.mxu3 %v13857_v43  ;;  %v10463_v58 = vld [vmem:[#allocation6 + $0x74] sm:$0xf0]  ;;  %v9733_v57 = vld [vmem:[#allocation6 + $0x368] sm:$0xf] }
 0x6dd   : > { %v9350_v61 = vor.u32 %v10463_v58, %v9349_v52  ;;  %v10559_v43 = vld [vmem:[#allocation6 + $0x374] sm:$0xf0] }
 0x6de   : > { %v12327_v23 = vpack.c.bf16 %v5843_v62, %v5839_v48  ;;  %v9477_v48 = vld [vmem:[#allocation6 + $0x168] sm:$0xf]  ;;  %v9734_v62 = vor.u32 %v10559_v43, %v9733_v57  ;;  %v13860_v43 = vld [vmem:[#allocation21_spill] sm:$0xff] }
 0x6df   : > { %v4956_v31 = vpop.f32.mrf.mxu2  ;;  %v5045_v38 = vpop.f32.mrf.mxu3  ;;  %5114 = vmatpush.bf16.msrb.mxu0 %v9350_v61 }
 0x6e0   : > { %13858 = vst [vmem:[#allocation74_spill] sm:$0xff] %v12327_v23  ;;  %v4957_v47 = vadd.f32 %v4956_v31, %v4868_v11  ;;  %v4780_v37 = vpop.f32.mrf.mxu0  ;;  %v4869_v33 = vpop.f32.mrf.mxu1  ;;  %v10495_v23 = vld [vmem:[#allocation6 + $0x174] sm:$0xf0]  ;;  %5381 = vmatpush.bf16.msrb.mxu3 %v9734_v62 }
 0x6e1   : > { %v4781_v50 = vadd.f32 %v4780_v37, %v12296_v35  ;;  %v9478_v19 = vor.u32 %v10495_v23, %v9477_v48  ;;  %v13859_v37 = vld [vmem:[#allocation18_spill] sm:$0xff] }
 0x6e2   : > { %v5046_v56 = vadd.f32 %v5045_v38, %v4957_v47 }
 0x6e3   : > { %v4870_v2 = vadd.f32 %v4869_v33, %v4781_v50  ;;  %5203 = vmatpush.bf16.msrb.mxu1 %v9478_v19  ;;  %v13861_v50 = vld [vmem:[#allocation33_spill] sm:$0xff] }
 0x6e4   : > { %v5847_v33 = vmax.f32 %v5046_v56, 0.0 }
 0x6e7   : > { %v4958_v26 = vpop.f32.mrf.mxu2  ;;  %v5047_v17 = vpop.f32.mrf.mxu3 }
 0x6e8   : > { %v4959_v11 = vadd.f32 %v4958_v26, %v4870_v2  ;;  %v4783_v5 = vpop.f32.mrf.mxu0  ;;  %v4872_v31 = vpop.f32.mrf.mxu1 }
 0x6e9   : > { %v4784_v39 = vadd.f32 %v4783_v5, %v12296_v35 }
 0x6ea   : > { %v5048_v38 = vadd.f32 %v5047_v17, %v4959_v11 }
 0x6eb   : > { %v4873_v47 = vadd.f32 %v4872_v31, %v4784_v39  ;;  %4822 = vmatmul.bf16.gmra.mxu0 %v13819_v28  ;;  %4911 = vmatmul.bf16.gmra.mxu1 %v13859_v37  ;;  %v10455_v37 = vld [vmem:[#allocation6 + $0x34] sm:$0xf0] }
 0x6ec   : > { %v5851_v57 = vmax.f32 %v5048_v38, 0.0  ;;  %5000 = vmatmul.bf16.gmra.mxu2 %v13860_v43  ;;  %5089 = vmatmul.bf16.gmra.mxu3 %v13861_v50  ;;  %v9461_v43 = vld [vmem:[#allocation6 + $0x148] sm:$0xf] }
 0x6ee   : > { %v12335_v61 = vpack.c.bf16 %v5851_v57, %v5847_v33  ;;  %v13863_v33 = vld [vmem:[#allocation28_spill] sm:$0xff]  ;;  %v13864_v57 = vld [vmem:[#allocation30_spill] sm:$0xff] }
 0x6ef   : > { %v4961_v26 = vpop.f32.mrf.mxu2  ;;  %v5050_v23 = vpop.f32.mrf.mxu3 }
 0x6f0   : > { %13862 = vst [vmem:[#allocation53_spill] sm:$0xff] %v12335_v61  ;;  %v4962_v2 = vadd.f32 %v4961_v26, %v4873_v47  ;;  %v4785_v52 = vpop.f32.mrf.mxu0  ;;  %v4874_v58 = vpop.f32.mrf.mxu1  ;;  %v13865_v61 = vld [vmem:[#allocation22_spill] sm:$0xff] }
 0x6f1   : > { %v4786_v17 = vadd.f32 %v4785_v52, %v12296_v35  ;;  %v13866_v52 = vld [vmem:[#allocation34_spill] sm:$0xff] }
 0x6f2   : > { %v5051_v48 = vadd.f32 %v5050_v23, %v4962_v2  ;;  %v9589_v2 = vld [vmem:[#allocation6 + $0x248] sm:$0xf] }
 0x6f3   : > { %v4875_v62 = vadd.f32 %v4874_v58, %v4786_v17  ;;  %v10523_v58 = vld [vmem:[#allocation6 + $0x254] sm:$0xf0]  ;;  %v9333_v17 = vld [vmem:[#allocation6 + $0x48] sm:$0xf] }
 0x6f4   : > { %v5855_v47 = vmax.f32 %v5051_v48, 0.0 }
 0x6f7   : > { %v4963_v19 = vpop.f32.mrf.mxu2  ;;  %v5052_v11 = vpop.f32.mrf.mxu3 }
 0x6f8   : > { %v4964_v5 = vadd.f32 %v4963_v19, %v4875_v62  ;;  %v4788_v56 = vpop.f32.mrf.mxu0  ;;  %v4877_v31 = vpop.f32.mrf.mxu1 }
 0x6f9   : > { %v4789_v39 = vadd.f32 %v4788_v56, %v12296_v35  ;;  %v9590_v56 = vor.u32 %v10523_v58, %v9589_v2  ;;  %v9445_v2 = vld [vmem:[#allocation6 + $0x128] sm:$0xf] }
 0x6fa   : > { %v5053_v38 = vadd.f32 %v5052_v11, %v4964_v5  ;;  %v10459_v11 = vld [vmem:[#allocation6 + $0x54] sm:$0xf0]  ;;  %v9717_v5 = vld [vmem:[#allocation6 + $0x348] sm:$0xf] }
 0x6fb   : > { %v4878_v50 = vadd.f32 %v4877_v31, %v4789_v39  ;;  %4827 = vmatmul.bf16.gmra.mxu0 %v13863_v33  ;;  %4916 = vmatmul.bf16.gmra.mxu1 %v13864_v57  ;;  %v10555_v31 = vld [vmem:[#allocation6 + $0x354] sm:$0xf0]  ;;  %v9334_v48 = vor.u32 %v10459_v11, %v9333_v17 }
 0x6fc   : > { %v5859_v26 = vmax.f32 %v5053_v38, 0.0  ;;  %5005 = vmatmul.bf16.gmra.mxu2 %v13865_v61  ;;  %5094 = vmatmul.bf16.gmra.mxu3 %v13866_v52  ;;  %v9718_v38 = vor.u32 %v10555_v31, %v9717_v5  ;;  %v10491_v61 = vld [vmem:[#allocation6 + $0x154] sm:$0xf0]  ;;  %v9701_v5 = vld [vmem:[#allocation6 + $0x328] sm:$0xf] }
 0x6fd   : > { %5293 = vmatpush.bf16.msrb.mxu2 %v9590_v56  ;;  %5115 = vmatpush.bf16.msrb.mxu0 %v9334_v48  ;;  %v10551_v31 = vld [vmem:[#allocation6 + $0x334] sm:$0xf0] }
 0x6fe   : > { %v12343_v23 = vpack.c.bf16 %v5859_v26, %v5855_v47  ;;  %v9462_v47 = vor.u32 %v10491_v61, %v9461_v43  ;;  %5382 = vmatpush.bf16.msrb.mxu3 %v9718_v38  ;;  %v9702_v63 = vor.u32 %v10551_v31, %v9701_v5  ;;  %v9301_v43 = vld [vmem:[#allocation6 + $0x8] sm:$0xf]  ;;  %v10451_v61 = vld [vmem:[#allocation6 + $0x14] sm:$0xf0] }
 0x6ff   : > { %v4966_v62 = vpop.f32.mrf.mxu2  ;;  %v5055_v19 = vpop.f32.mrf.mxu3 }
 0x700   : > { %13867 = vst [vmem:[#allocation65_spill] sm:$0xff] %v12343_v23  ;;  %v4967_v39 = vadd.f32 %v4966_v62, %v4878_v50  ;;  %v4790_v33 = vpop.f32.mrf.mxu0  ;;  %v4879_v57 = vpop.f32.mrf.mxu1  ;;  %v9317_v23 = vld [vmem:[#allocation6 + $0x28] sm:$0xf]  ;;  %5204 = vmatpush.bf16.msrb.mxu1 %v9462_v47  ;;  %v10487_v50 = vld [vmem:[#allocation6 + $0x134] sm:$0xf0] }
 0x701   : > { %v4791_v52 = vadd.f32 %v4790_v33, %v12296_v35  ;;  %v9318_v28 = vor.u32 %v10455_v37, %v9317_v23  ;;  %v9573_v62 = vld [vmem:[#allocation6 + $0x228] sm:$0xf]  ;;  %v9446_v17 = vor.u32 %v10487_v50, %v9445_v2  ;;  %v10515_v23 = vld [vmem:[#allocation6 + $0x214] sm:$0xf0] }
 0x702   : > { %v5056_v26 = vadd.f32 %v5055_v19, %v4967_v39  ;;  %v9574_v11 = vor.u32 %v10519_v10, %v9573_v62  ;;  %v9429_v33 = vld [vmem:[#allocation6 + $0x108] sm:$0xf]  ;;  %5383 = vmatpush.bf16.msrb.mxu3 %v9702_v63  ;;  %v10547_v2 = vld [vmem:[#allocation6 + $0x314] sm:$0xf0] }
 0x703   : > { %v4880_v58 = vadd.f32 %v4879_v57, %v4791_v52  ;;  %5116 = vmatpush.bf16.msrb.mxu0 %v9318_v28  ;;  %v9302_v57 = vor.u32 %v10451_v61, %v9301_v43  ;;  %v10483_v52 = vld [vmem:[#allocation6 + $0x114] sm:$0xf0]  ;;  %v9557_v37 = vld [vmem:[#allocation6 + $0x208] sm:$0xf] }
 0x704   : > { %5294 = vmatpush.bf16.msrb.mxu2 %v9574_v11  ;;  %5205 = vmatpush.bf16.msrb.mxu1 %v9446_v17  ;;  %v9558_v10 = vor.u32 %v10515_v23, %v9557_v37  ;;  %v9685_v47 = vld [vmem:[#allocation6 + $0x308] sm:$0xf]  ;;  %v9430_v50 = vor.u32 %v10483_v52, %v9429_v33  ;;  %v5863_v63 = vmax.f32 %v5056_v26, 0.0 }
 0x705   : > { %v9686_v62 = vor.u32 %v10547_v2, %v9685_v47 }
 0x707   : > { %v4968_v19 = vpop.f32.mrf.mxu2  ;;  %v5057_v56 = vpop.f32.mrf.mxu3  ;;  %5117 = vmatpush.bf16.msrb.mxu0 %v9302_v57  ;;  %5384 = vmatpush.bf16.msrb.mxu3 %v9686_v62 }
 0x708   : > { %v4969_v39 = vadd.f32 %v4968_v19, %v4880_v58  ;;  %v4793_v48 = vpop.f32.mrf.mxu0  ;;  %v4882_v38 = vpop.f32.mrf.mxu1  ;;  %5295 = vmatpush.bf16.msrb.mxu2 %v9558_v10  ;;  %5206 = vmatpush.bf16.msrb.mxu1 %v9430_v50 }
 0x709   : > { %v4794_v28 = vadd.f32 %v4793_v48, %v12296_v35 }
 0x70a   : > { %v5058_v11 = vadd.f32 %v5057_v56, %v4969_v39 }
 0x70b   : > { %v4883_v5 = vadd.f32 %v4882_v38, %v4794_v28  ;;  %4832 = vmatmul.bf16.gmra.mxu0 %v13825_v6  ;;  %4921 = vmatmul.bf16.gmra.mxu1 %v13826_v42 }
 0x70c   : > { %v5867_v17 = vmax.f32 %v5058_v11, 0.0  ;;  %5010 = vmatmul.bf16.gmra.mxu2 %v12023_v20  ;;  %5099 = vmatmul.bf16.gmra.mxu3 %v12156_v41 }
 0x70e   : > { %v12351_v58 = vpack.c.bf16 %v5867_v17, %v5863_v63 }
 0x70f   : > { %v4971_v31 = vpop.f32.mrf.mxu2  ;;  %v5060_v43 = vpop.f32.mrf.mxu3 }
 0x710   : > { %13868 = vst [vmem:[#allocation75_spill] sm:$0xff] %v12351_v58  ;;  %v4972_v61 = vadd.f32 %v4971_v31, %v4883_v5  ;;  %v4795_v33 = vpop.f32.mrf.mxu0  ;;  %v4884_v19 = vpop.f32.mrf.mxu1 }
 0x711   : > { %v4796_v56 = vadd.f32 %v4795_v33, %v12296_v35 }
 0x712   : > { %v5061_v57 = vadd.f32 %v5060_v43, %v4972_v61 }
 0x713   : > { %v4885_v52 = vadd.f32 %v4884_v19, %v4796_v56 }
 0x714   : > { %v5871_v2 = vmax.f32 %v5061_v57, 0.0 }
 0x717   : > { %v4973_v37 = vpop.f32.mrf.mxu2  ;;  %v5062_v26 = vpop.f32.mrf.mxu3 }
 0x718   : > { %v4974_v23 = vadd.f32 %v4973_v37, %v4885_v52  ;;  %v4798_v39 = vpop.f32.mrf.mxu0  ;;  %v4887_v48 = vpop.f32.mrf.mxu1 }
 0x719   : > { %v4799_v38 = vadd.f32 %v4798_v39, %v12296_v35 }
 0x71a   : > { %v5063_v10 = vadd.f32 %v5062_v26, %v4974_v23 }
 0x71b   : > { %v4888_v47 = vadd.f32 %v4887_v48, %v4799_v38  ;;  %4837 = vmatmul.bf16.gmra.mxu0 %v13828_v16  ;;  %4926 = vmatmul.bf16.gmra.mxu1 %v13829_v60 }
 0x71c   : > { %v5875_v28 = vmax.f32 %v5063_v10, 0.0  ;;  %5015 = vmatmul.bf16.gmra.mxu2 %v12036_v54  ;;  %5104 = vmatmul.bf16.gmra.mxu3 %v12172_v59 }
 0x71e   : > { %v12359_v50 = vpack.c.bf16 %v5875_v28, %v5871_v2 }
 0x71f   : > { %v4976_v62 = vpop.f32.mrf.mxu2  ;;  %v5065_v11 = vpop.f32.mrf.mxu3 }
 0x720   : > { %13869 = vst [vmem:[#allocation54_spill] sm:$0xff] %v12359_v50  ;;  %v4977_v5 = vadd.f32 %v4976_v62, %v4888_v47  ;;  %v4800_v63 = vpop.f32.mrf.mxu0  ;;  %v4889_v17 = vpop.f32.mrf.mxu1 }
 0x721   : > { %v4801_v31 = vadd.f32 %v4800_v63, %v12296_v35 }
 0x722   : > { %v5066_v43 = vadd.f32 %v5065_v11, %v4977_v5 }
 0x723   : > { %v4890_v61 = vadd.f32 %v4889_v17, %v4801_v31 }
 0x724   : > { %v5879_v39 = vmax.f32 %v5066_v43, 0.0 }
 0x727   : > { %v4978_v33 = vpop.f32.mrf.mxu2  ;;  %v5067_v19 = vpop.f32.mrf.mxu3 }
 0x728   : > { %v4979_v56 = vadd.f32 %v4978_v33, %v4890_v61  ;;  %v4803_v57 = vpop.f32.mrf.mxu0  ;;  %v4892_v52 = vpop.f32.mrf.mxu1 }
 0x729   : > { %v4804_v37 = vadd.f32 %v4803_v57, %v12296_v35 }
 0x72a   : > { %v5068_v26 = vadd.f32 %v5067_v19, %v4979_v56 }
 0x72b   : > { %v4893_v23 = vadd.f32 %v4892_v52, %v4804_v37  ;;  %5118 = vmatmul.bf16.vlgmr.msrb.gmra.mxu0 %v13780_v27  ;;  %5207 = vmatmul.bf16.vlgmr.msrb.gmra.mxu1 %v13781_v4 }
 0x72c   : > { %v5883_v48 = vmax.f32 %v5068_v26, 0.0  ;;  %5296 = vmatmul.bf16.vlgmr.msrb.gmra.mxu2 %v13782_v46  ;;  %5385 = vmatmul.bf16.vlgmr.msrb.gmra.mxu3 %v12044_v21 }
 0x72e   : > { %v12367_v38 = vpack.c.bf16 %v5883_v48, %v5879_v39 }
 0x72f   : > { %v4981_v10 = vpop.f32.mrf.mxu2  ;;  %v5070_v47 = vpop.f32.mrf.mxu3 }
 0x730   : > { %13870 = vst [vmem:[#allocation66_spill] sm:$0xff] %v12367_v38  ;;  %v4982_v2 = vadd.f32 %v4981_v10, %v4893_v23  ;;  %v4805_v28 = vpop.f32.mrf.mxu0  ;;  %v4894_v62 = vpop.f32.mrf.mxu1 }
 0x731   : > { %v4806_v11 = vadd.f32 %v4805_v28, %v12296_v35 }
 0x732   : > { %v5071_v5 = vadd.f32 %v5070_v47, %v4982_v2 }
 0x733   : > { %v4895_v63 = vadd.f32 %v4894_v62, %v4806_v11 }
 0x734   : > { %v5887_v52 = vmax.f32 %v5071_v5, 0.0 }
 0x737   : > { %v4983_v17 = vpop.f32.mrf.mxu2  ;;  %v5072_v31 = vpop.f32.mrf.mxu3 }
 0x738   : > { %v4984_v61 = vadd.f32 %v4983_v17, %v4895_v63  ;;  %v4808_v43 = vpop.f32.mrf.mxu0  ;;  %v4897_v33 = vpop.f32.mrf.mxu1 }
 0x739   : > { %v4809_v19 = vadd.f32 %v4808_v43, %v12296_v35 }
 0x73a   : > { %v5073_v56 = vadd.f32 %v5072_v31, %v4984_v61 }
 0x73b   : > { %v4898_v57 = vadd.f32 %v4897_v33, %v4809_v19  ;;  %5123 = vmatmul.bf16.gmra.mxu0 %v13784_v40  ;;  %5212 = vmatmul.bf16.gmra.mxu1 %v13785_v13 }
 0x73c   : > { %v5891_v37 = vmax.f32 %v5073_v56, 0.0  ;;  %5301 = vmatmul.bf16.gmra.mxu2 %v13786_v51  ;;  %5390 = vmatmul.bf16.gmra.mxu3 %v12052_v30 }
 0x73e   : > { %v12375_v26 = vpack.c.bf16 %v5891_v37, %v5887_v52 }
 0x73f   : > { %v4986_v23 = vpop.f32.mrf.mxu2  ;;  %v5075_v39 = vpop.f32.mrf.mxu3 }
 0x740   : > { %13871 = vst [vmem:[#allocation76_spill] sm:$0xff] %v12375_v26  ;;  %v4987_v48 = vadd.f32 %v4986_v23, %v4898_v57  ;;  %v4810_v10 = vpop.f32.mrf.mxu0  ;;  %v4899_v47 = vpop.f32.mrf.mxu1 }
 0x741   : > { %v4811_v2 = vadd.f32 %v4810_v10, %v12296_v35 }
 0x742   : > { %v5076_v28 = vadd.f32 %v5075_v39, %v4987_v48 }
 0x743   : > { %v4900_v62 = vadd.f32 %v4899_v47, %v4811_v2 }
 0x744   : > { %v5895_v19 = vmax.f32 %v5076_v28, 0.0 }
 0x747   : > { %v4988_v11 = vpop.f32.mrf.mxu2  ;;  %v5077_v63 = vpop.f32.mrf.mxu3 }
 0x748   : > { %v4989_v17 = vadd.f32 %v4988_v11, %v4900_v62  ;;  %v4813_v5 = vpop.f32.mrf.mxu0  ;;  %v4902_v31 = vpop.f32.mrf.mxu1 }
 0x749   : > { %v4814_v61 = vadd.f32 %v4813_v5, %v12296_v35 }
 0x74a   : > { %v5078_v43 = vadd.f32 %v5077_v63, %v4989_v17 }
 0x74b   : > { %v4903_v33 = vadd.f32 %v4902_v31, %v4814_v61  ;;  %5128 = vmatmul.bf16.gmra.mxu0 %v13788_v1  ;;  %5217 = vmatmul.bf16.gmra.mxu1 %v13789_v44 }
 0x74c   : > { %v5899_v56 = vmax.f32 %v5078_v43, 0.0  ;;  %5306 = vmatmul.bf16.gmra.mxu2 %v13790_v0  ;;  %5395 = vmatmul.bf16.gmra.mxu3 %v12060_v14 }
 0x74e   : > { %v12383_v57 = vpack.c.bf16 %v5899_v56, %v5895_v19  ;;  %v13873_v19 = vld [vmem:[#allocation23_spill] sm:$0xff] }
 0x74f   : > { %v4991_v52 = vpop.f32.mrf.mxu2  ;;  %v5080_v37 = vpop.f32.mrf.mxu3 }
 0x750   : > { %13872 = vst [vmem:[#allocation55_spill] sm:$0xff] %v12383_v57  ;;  %v4992_v23 = vadd.f32 %v4991_v52, %v4903_v33  ;;  %v4815_v39 = vpop.f32.mrf.mxu0  ;;  %v4904_v48 = vpop.f32.mrf.mxu1  ;;  %v10541_v52 = vld [vmem:[#allocation6 + $0x2ec] sm:$0xf]  ;;  %v9799_v57 = vld [vmem:[#allocation6 + $0x3f8] sm:$0xf0] }
 0x751   : > { %v4816_v10 = vadd.f32 %v4815_v39, %v12296_v35 }
 0x752   : > { %v5081_v47 = vadd.f32 %v5080_v37, %v4992_v23  ;;  %v9671_v37 = vld [vmem:[#allocation6 + $0x2f8] sm:$0xf0] }
 0x753   : > { %v4905_v2 = vadd.f32 %v4904_v48, %v4816_v10  ;;  %v9674_v48 = vor.u32 %v10541_v52, %v9671_v37 }
 0x754   : > { %v5903_v43 = vmax.f32 %v5081_v47, 0.0 }
 0x755   : > { %5644 = vmatpush.bf16.msra.mxu2 %v9674_v48 }
 0x757   : > { %v4993_v62 = vpop.f32.mrf.mxu2  ;;  %v5082_v11 = vpop.f32.mrf.mxu3 }
 0x758   : > { %v4994_v63 = vadd.f32 %v4993_v62, %v4905_v2  ;;  %v4818_v28 = vpop.f32.mrf.mxu0  ;;  %v4907_v17 = vpop.f32.mrf.mxu1 }
 0x759   : > { %v4819_v5 = vadd.f32 %v4818_v28, %v12296_v35  ;;  %v10477_v28 = vld [vmem:[#allocation6 + $0xec] sm:$0xf] }
 0x75a   : > { %v5083_v31 = vadd.f32 %v5082_v11, %v4994_v63 }
 0x75b   : > { %v4908_v61 = vadd.f32 %v4907_v17, %v4819_v5  ;;  %5133 = vmatmul.bf16.gmra.mxu0 %v13792_v3  ;;  %5222 = vmatmul.bf16.gmra.mxu1 %v13793_v55  ;;  %v9415_v17 = vld [vmem:[#allocation6 + $0xf8] sm:$0xf0] }
 0x75c   : > { %v5907_v33 = vmax.f32 %v5083_v31, 0.0  ;;  %5311 = vmatmul.bf16.gmra.mxu2 %v13794_v53  ;;  %5400 = vmatmul.bf16.gmra.mxu3 %v13873_v19  ;;  %v9418_v5 = vor.u32 %v10477_v28, %v9415_v17  ;;  %v10573_v31 = vld [vmem:[#allocation6 + $0x3ec] sm:$0xf] }
 0x75e   : > { %v12391_v56 = vpack.c.bf16 %v5907_v33, %v5903_v43  ;;  %v10509_v43 = vld [vmem:[#allocation6 + $0x1ec] sm:$0xf]  ;;  %v9802_v33 = vor.u32 %v10573_v31, %v9799_v57  ;;  %5466 = vmatpush.bf16.msra.mxu0 %v9418_v5 }
 0x75f   : > { %v4996_v23 = vpop.f32.mrf.mxu2  ;;  %v5085_v39 = vpop.f32.mrf.mxu3 }
 0x760   : > { %13874 = vst [vmem:[#allocation67_spill] sm:$0xff] %v12391_v56  ;;  %v4997_v10 = vadd.f32 %v4996_v23, %v4908_v61  ;;  %v4820_v2 = vpop.f32.mrf.mxu0  ;;  %v4909_v62 = vpop.f32.mrf.mxu1  ;;  %v9543_v56 = vld [vmem:[#allocation6 + $0x1f8] sm:$0xf0]  ;;  %5733 = vmatpush.bf16.msra.mxu3 %v9802_v33 }
 0x761   : > { %v4821_v11 = vadd.f32 %v4820_v2, %v12296_v35  ;;  %v9546_v52 = vor.u32 %v10509_v43, %v9543_v56 }
 0x762   : > { %v5086_v63 = vadd.f32 %v5085_v39, %v4997_v10 }
 0x763   : > { %v4910_v47 = vadd.f32 %v4909_v62, %v4821_v11  ;;  %5555 = vmatpush.bf16.msra.mxu1 %v9546_v52 }
 0x764   : > { %v5911_v2 = vmax.f32 %v5086_v63, 0.0 }
 0x767   : > { %v4998_v26 = vpop.f32.mrf.mxu2  ;;  %v5087_v38 = vpop.f32.mrf.mxu3 }
 0x768   : > { %v4999_v61 = vadd.f32 %v4998_v26, %v4910_v47  ;;  %v4823_v37 = vpop.f32.mrf.mxu0  ;;  %v4912_v23 = vpop.f32.mrf.mxu1 }
 0x769   : > { %v4824_v48 = vadd.f32 %v4823_v37, %v12296_v35 }
 0x76a   : > { %v5088_v39 = vadd.f32 %v5087_v38, %v4999_v61 }
 0x76b   : > { %v4913_v10 = vadd.f32 %v4912_v23, %v4824_v48  ;;  %5138 = vmatmul.bf16.gmra.mxu0 %v13796_v12  ;;  %5227 = vmatmul.bf16.gmra.mxu1 %v13797_v15 }
 0x76c   : > { %v5915_v57 = vmax.f32 %v5088_v39, 0.0  ;;  %5316 = vmatmul.bf16.gmra.mxu2 %v13798_v18  ;;  %5405 = vmatmul.bf16.gmra.mxu3 %v12076_v32 }
 0x76e   : > { %v12399_v56 = vpack.c.bf16 %v5915_v57, %v5911_v2  ;;  %v10537_v2 = vld [vmem:[#allocation6 + $0x2cc] sm:$0xf]  ;;  %v9655_v57 = vld [vmem:[#allocation6 + $0x2d8] sm:$0xf0] }
 0x76f   : > { %v5001_v26 = vpop.f32.mrf.mxu2  ;;  %v5090_v62 = vpop.f32.mrf.mxu3 }
 0x770   : > { %13875 = vst [vmem:[#allocation77_spill] sm:$0xff] %v12399_v56  ;;  %v5002_v11 = vadd.f32 %v5001_v26, %v4913_v10  ;;  %v4825_v47 = vpop.f32.mrf.mxu0  ;;  %v4914_v28 = vpop.f32.mrf.mxu1 }
 0x771   : > { %v4826_v38 = vadd.f32 %v4825_v47, %v12296_v35 }
 0x772   : > { %v5091_v17 = vadd.f32 %v5090_v62, %v5002_v11  ;;  %v9658_v11 = vor.u32 %v10537_v2, %v9655_v57 }
 0x773   : > { %v4915_v5 = vadd.f32 %v4914_v28, %v4826_v38 }
 0x774   : > { %v5919_v48 = vmax.f32 %v5091_v17, 0.0  ;;  %5645 = vmatpush.bf16.msra.mxu2 %v9658_v11 }
 0x777   : > { %v5003_v31 = vpop.f32.mrf.mxu2  ;;  %v5092_v43 = vpop.f32.mrf.mxu3 }
 0x778   : > { %v5004_v33 = vadd.f32 %v5003_v31, %v4915_v5  ;;  %v4828_v63 = vpop.f32.mrf.mxu0  ;;  %v4917_v52 = vpop.f32.mrf.mxu1 }
 0x779   : > { %v4829_v61 = vadd.f32 %v4828_v63, %v12296_v35 }
 0x77a   : > { %v5093_v37 = vadd.f32 %v5092_v43, %v5004_v33  ;;  %v10473_v43 = vld [vmem:[#allocation6 + $0xcc] sm:$0xf]  ;;  %v9399_v33 = vld [vmem:[#allocation6 + $0xd8] sm:$0xf0] }
 0x77b   : > { %v4918_v23 = vadd.f32 %v4917_v52, %v4829_v61  ;;  %5143 = vmatmul.bf16.gmra.mxu0 %v13800_v29  ;;  %5232 = vmatmul.bf16.gmra.mxu1 %v13801_v49  ;;  %v9402_v63 = vor.u32 %v10473_v43, %v9399_v33  ;;  %v10569_v52 = vld [vmem:[#allocation6 + $0x3cc] sm:$0xf]  ;;  %v9783_v61 = vld [vmem:[#allocation6 + $0x3d8] sm:$0xf0] }
 0x77c   : > { %v5923_v39 = vmax.f32 %v5093_v37, 0.0  ;;  %5321 = vmatmul.bf16.gmra.mxu2 %v11951_v25  ;;  %5410 = vmatmul.bf16.gmra.mxu3 %v12084_v45  ;;  %v10505_v37 = vld [vmem:[#allocation6 + $0x1cc] sm:$0xf] }
 0x77d   : > { %5467 = vmatpush.bf16.msra.mxu0 %v9402_v63 }
 0x77e   : > { %v12407_v10 = vpack.c.bf16 %v5923_v39, %v5919_v48  ;;  %v9786_v48 = vor.u32 %v10569_v52, %v9783_v61  ;;  %v9527_v39 = vld [vmem:[#allocation6 + $0x1d8] sm:$0xf0] }
 0x77f   : > { %v5006_v26 = vpop.f32.mrf.mxu2  ;;  %v5095_v62 = vpop.f32.mrf.mxu3  ;;  %v9530_v2 = vor.u32 %v10505_v37, %v9527_v39 }
 0x780   : > { %13876 = vst [vmem:[#allocation56_spill] sm:$0xff] %v12407_v10  ;;  %v5007_v47 = vadd.f32 %v5006_v26, %v4918_v23  ;;  %v4830_v28 = vpop.f32.mrf.mxu0  ;;  %v4919_v38 = vpop.f32.mrf.mxu1  ;;  %5734 = vmatpush.bf16.msra.mxu3 %v9786_v48 }
 0x781   : > { %v4831_v5 = vadd.f32 %v4830_v28, %v12296_v35  ;;  %5556 = vmatpush.bf16.msra.mxu1 %v9530_v2 }
 0x782   : > { %v5096_v31 = vadd.f32 %v5095_v62, %v5007_v47 }
 0x783   : > { %v4920_v17 = vadd.f32 %v4919_v38, %v4831_v5 }
 0x784   : > { %v5927_v28 = vmax.f32 %v5096_v31, 0.0 }
 0x787   : > { %v5008_v10 = vpop.f32.mrf.mxu2  ;;  %v5097_v56 = vpop.f32.mrf.mxu3 }
 0x788   : > { %v5009_v23 = vadd.f32 %v5008_v10, %v4920_v17  ;;  %v4833_v57 = vpop.f32.mrf.mxu0  ;;  %v4922_v26 = vpop.f32.mrf.mxu1 }
 0x789   : > { %v4834_v11 = vadd.f32 %v4833_v57, %v12296_v35 }
 0x78a   : > { %v5098_v62 = vadd.f32 %v5097_v56, %v5009_v23 }
 0x78b   : > { %v4923_v47 = vadd.f32 %v4922_v26, %v4834_v11  ;;  %5148 = vmatmul.bf16.gmra.mxu0 %v13803_v34  ;;  %5237 = vmatmul.bf16.gmra.mxu1 %v13804_v7  ;;  %v13878_v11 = vld [vmem:[#allocation58_spill] sm:$0xff] }
 0x78c   : > { %v5931_v38 = vmax.f32 %v5098_v62, 0.0  ;;  %5326 = vmatmul.bf16.gmra.mxu2 %v11959_v9  ;;  %5415 = vmatmul.bf16.gmra.mxu3 %v13837_v24  ;;  %v13879_v62 = vld [vmem:[#allocation70_spill] sm:$0xff] }
 0x78e   : > { %v12415_v5 = vpack.c.bf16 %v5931_v38, %v5927_v28  ;;  %v13880_v38 = vld [vmem:[#allocation78_spill] sm:$0xff] }
 0x78f   : > { %v5011_v10 = vpop.f32.mrf.mxu2  ;;  %v5100_v17 = vpop.f32.mrf.mxu3 }
 0x790   : > { %13877 = vst [vmem:[#allocation68_spill] sm:$0xff] %v12415_v5  ;;  %v5012_v43 = vadd.f32 %v5011_v10, %v4923_v47  ;;  %v4835_v33 = vpop.f32.mrf.mxu0  ;;  %v4924_v63 = vpop.f32.mrf.mxu1  ;;  %v13881_v10 = vld [vmem:[#allocation25_spill] sm:$0xff]  ;;  %v9511_v5 = vld [vmem:[#allocation6 + $0x1b8] sm:$0xf0] }
 0x791   : > { %v4836_v56 = vadd.f32 %v4835_v33, %v12296_v35  ;;  %v9639_v33 = vld [vmem:[#allocation6 + $0x2b8] sm:$0xf0] }
 0x792   : > { %v5101_v52 = vadd.f32 %v5100_v17, %v5012_v43  ;;  %v10533_v43 = vld [vmem:[#allocation6 + $0x2ac] sm:$0xf] }
 0x793   : > { %v4925_v61 = vadd.f32 %v4924_v63, %v4836_v56 }
 0x794   : > { %v5935_v47 = vmax.f32 %v5101_v52, 0.0 }
 0x797   : > { %v5013_v37 = vpop.f32.mrf.mxu2  ;;  %v5102_v48 = vpop.f32.mrf.mxu3 }
 0x798   : > { %v5014_v39 = vadd.f32 %v5013_v37, %v4925_v61  ;;  %v4838_v31 = vpop.f32.mrf.mxu0  ;;  %v4927_v2 = vpop.f32.mrf.mxu1  ;;  %v9642_v61 = vor.u32 %v10533_v43, %v9639_v33  ;;  %v10565_v43 = vld [vmem:[#allocation6 + $0x3ac] sm:$0xf] }
 0x799   : > { %v4839_v23 = vadd.f32 %v4838_v31, %v12296_v35  ;;  %v10501_v33 = vld [vmem:[#allocation6 + $0x1ac] sm:$0xf] }
 0x79a   : > { %v5103_v57 = vadd.f32 %v5102_v48, %v5014_v39  ;;  %5646 = vmatpush.bf16.msra.mxu2 %v9642_v61 }
 0x79b   : > { %v4928_v26 = vadd.f32 %v4927_v2, %v4839_v23  ;;  %5153 = vmatmul.bf16.gmra.mxu0 %v13878_v11  ;;  %5242 = vmatmul.bf16.gmra.mxu1 %v13879_v62  ;;  %v12429_v23 = vld [vmem:[%s13354_s6] sm:$0xf] }
 0x79c   : > { %v5939_v28 = vmax.f32 %v5103_v57, 0.0  ;;  %5331 = vmatmul.bf16.gmra.mxu2 %v13880_v38  ;;  %5420 = vmatmul.bf16.gmra.mxu3 %v13881_v10  ;;  %13883 = vst [vmem:[#allocation69_spill] sm:$0xff] %v12429_v23  ;;  %v12432_v57 = vperm.slane %v12429_v23, 2  ;;  %v13886_v23 = vld [vmem:[#allocation26_spill] sm:$0xff] }
 0x79e   : > { %v12423_v17 = vpack.c.bf16 %v5939_v28, %v5935_v47  ;;  %v10469_v47 = vld [vmem:[#allocation6 + $0xac] sm:$0xf]  ;;  %v9383_v28 = vld [vmem:[#allocation6 + $0xb8] sm:$0xf0] }
 0x79f   : > { %v5016_v63 = vpop.f32.mrf.mxu2  ;;  %v5105_v56 = vpop.f32.mrf.mxu3 }
 0x7a0   : > { %13882 = vst [vmem:[#allocation57_spill] sm:$0xff] %v12423_v17  ;;  %v5017_v37 = vadd.f32 %v5016_v63, %v4928_v26  ;;  %v4840_v48 = vpop.f32.mrf.mxu0  ;;  %v4929_v39 = vpop.f32.mrf.mxu1  ;;  %v9386_v17 = vor.u32 %v10469_v47, %v9383_v28  ;;  %v9767_v26 = vld [vmem:[#allocation6 + $0x3b8] sm:$0xf0]  ;;  %v13884_v47 = vld [vmem:[#allocation71_spill] sm:$0xff] }
 0x7a1   : > { %v4841_v31 = vadd.f32 %v4840_v48, %v12296_v35  ;;  %v9770_v63 = vor.u32 %v10565_v43, %v9767_v26  ;;  %v13885_v26 = vld [vmem:[#allocation79_spill] sm:$0xff] }
 0x7a2   : > { %v5106_v2 = vadd.f32 %v5105_v56, %v5017_v37  ;;  %5468 = vmatpush.bf16.msra.mxu0 %v9386_v17  ;;  %v9514_v56 = vor.u32 %v10501_v33, %v9511_v5 }
 0x7a3   : > { %v4930_v52 = vadd.f32 %v4929_v39, %v4841_v31  ;;  %5735 = vmatpush.bf16.msra.mxu3 %v9770_v63 }
 0x7a4   : > { %5557 = vmatpush.bf16.msra.mxu1 %v9514_v56  ;;  %v5943_v28 = vmax.f32 %v5106_v2, 0.0 }
 0x7a7   : > { %v5018_v35 = vpop.f32.mrf.mxu2  ;;  %v5107_v61 = vpop.f32.mrf.mxu3 }
 0x7a8   : > { %v5019_v37 = vadd.f32 %v5018_v35, %v4930_v52  ;;  %v5119_v48 = vpop.f32.mrf.mxu0  ;;  %v5208_v39 = vpop.f32.mrf.mxu1 }
 0x7a9   : > { %v5120_v31 = vadd.f32 %v5119_v48, %v12432_v57 }
 0x7aa   : > { %v5108_v50 = vadd.f32 %v5107_v61, %v5019_v37 }
 0x7ab   : > { %v5209_v58 = vadd.f32 %v5208_v39, %v5120_v31  ;;  %5158 = vmatmul.bf16.gmra.mxu0 %v13808_v22  ;;  %5247 = vmatmul.bf16.gmra.mxu1 %v13884_v47 }
 0x7ac   : > { %v5947_v43 = vmax.f32 %v5108_v50, 0.0  ;;  %5336 = vmatmul.bf16.gmra.mxu2 %v13885_v26  ;;  %5425 = vmatmul.bf16.gmra.mxu3 %v13886_v23 }
 0x7ae   : > { %v12439_v5 = vpack.c.bf16 %v5947_v43, %v5943_v28  ;;  %v13888_v28 = vld [vmem:[#allocation16_spill] sm:$0xff] }
 0x7af   : > { %v5297_v17 = vpop.f32.mrf.mxu2  ;;  %v5386_v52 = vpop.f32.mrf.mxu3  ;;  %v13889_v43 = vld [vmem:[#allocation72_spill] sm:$0xff] }
 0x7b0   : > { %13887 = vst [vmem:[#allocation29_spill] sm:$0xff] %v12439_v5  ;;  %v5298_v33 = vadd.f32 %v5297_v17, %v5209_v58  ;;  %v5121_v63 = vpop.f32.mrf.mxu0  ;;  %v5210_v35 = vpop.f32.mrf.mxu1  ;;  %v13890_v5 = vld [vmem:[#allocation80_spill] sm:$0xff] }
 0x7b1   : > { %v5122_v61 = vadd.f32 %v5121_v63, %v12432_v57  ;;  %v13891_v63 = vld [vmem:[#allocation27_spill] sm:$0xff] }
 0x7b2   : > { %v5387_v56 = vadd.f32 %v5386_v52, %v5298_v33  ;;  %v10529_v33 = vld [vmem:[#allocation6 + $0x28c] sm:$0xf] }
 0x7b3   : > { %v5211_v37 = vadd.f32 %v5210_v35, %v5122_v61  ;;  %v9623_v35 = vld [vmem:[#allocation6 + $0x298] sm:$0xf0] }
 0x7b4   : > { %v5824_v58 = vmax.f32 %v5387_v56, 0.0 }
 0x7b7   : > { %v5299_v48 = vpop.f32.mrf.mxu2  ;;  %v5388_v39 = vpop.f32.mrf.mxu3 }
 0x7b8   : > { %v5300_v31 = vadd.f32 %v5299_v48, %v5211_v37  ;;  %v5124_v2 = vpop.f32.mrf.mxu0  ;;  %v5213_v50 = vpop.f32.mrf.mxu1  ;;  %v9626_v48 = vor.u32 %v10529_v33, %v9623_v35 }
 0x7b9   : > { %v5125_v26 = vadd.f32 %v5124_v2, %v12432_v57 }
 0x7ba   : > { %v5389_v47 = vadd.f32 %v5388_v39, %v5300_v31  ;;  %5647 = vmatpush.bf16.msra.mxu2 %v9626_v48 }
 0x7bb   : > { %v5214_v23 = vadd.f32 %v5213_v50, %v5125_v26  ;;  %5163 = vmatmul.bf16.gmra.mxu0 %v13888_v28  ;;  %5252 = vmatmul.bf16.gmra.mxu1 %v13889_v43  ;;  %v9367_v43 = vld [vmem:[#allocation6 + $0x98] sm:$0xf0]  ;;  %v10561_v28 = vld [vmem:[#allocation6 + $0x38c] sm:$0xf] }
 0x7bc   : > { %v5828_v17 = vmax.f32 %v5389_v47, 0.0  ;;  %5341 = vmatmul.bf16.gmra.mxu2 %v13890_v5  ;;  %5430 = vmatmul.bf16.gmra.mxu3 %v13891_v63  ;;  %v10465_v47 = vld [vmem:[#allocation6 + $0x8c] sm:$0xf]  ;;  %v9751_v63 = vld [vmem:[#allocation6 + $0x398] sm:$0xf0] }
 0x7bd   : > { %v9370_v5 = vor.u32 %v10465_v47, %v9367_v43 }
 0x7be   : > { %v12447_v52 = vpack.c.bf16 %v5828_v17, %v5824_v58  ;;  %v10497_v58 = vld [vmem:[#allocation6 + $0x18c] sm:$0xf]  ;;  %v9754_v17 = vor.u32 %v10561_v28, %v9751_v63  ;;  %v13893_v63 = vld [vmem:[#allocation19_spill] sm:$0xff] }
 0x7bf   : > { %v5302_v61 = vpop.f32.mrf.mxu2  ;;  %v5391_v37 = vpop.f32.mrf.mxu3  ;;  %5469 = vmatpush.bf16.msra.mxu0 %v9370_v5 }
 0x7c0   : > { %13892 = vst [vmem:[#allocation73_spill] sm:$0xff] %v12447_v52  ;;  %v5303_v2 = vadd.f32 %v5302_v61, %v5214_v23  ;;  %v5126_v39 = vpop.f32.mrf.mxu0  ;;  %v5215_v26 = vpop.f32.mrf.mxu1  ;;  %v9495_v52 = vld [vmem:[#allocation6 + $0x198] sm:$0xf0]  ;;  %5736 = vmatpush.bf16.msra.mxu3 %v9754_v17 }
 0x7c1   : > { %v5127_v31 = vadd.f32 %v5126_v39, %v12432_v57  ;;  %v9498_v33 = vor.u32 %v10497_v58, %v9495_v52  ;;  %v13894_v39 = vld [vmem:[#allocation31_spill] sm:$0xff] }
 0x7c2   : > { %v5392_v50 = vadd.f32 %v5391_v37, %v5303_v2 }
 0x7c3   : > { %v5216_v56 = vadd.f32 %v5215_v26, %v5127_v31  ;;  %5558 = vmatpush.bf16.msra.mxu1 %v9498_v33 }
 0x7c4   : > { %v5832_v43 = vmax.f32 %v5392_v50, 0.0 }
 0x7c7   : > { %v5304_v22 = vpop.f32.mrf.mxu2  ;;  %v5393_v10 = vpop.f32.mrf.mxu3 }
 0x7c8   : > { %v5305_v23 = vadd.f32 %v5304_v22, %v5216_v56  ;;  %v5129_v35 = vpop.f32.mrf.mxu0  ;;  %v5218_v61 = vpop.f32.mrf.mxu1 }
 0x7c9   : > { %v5130_v48 = vadd.f32 %v5129_v35, %v12432_v57 }
 0x7ca   : > { %v5394_v37 = vadd.f32 %v5393_v10, %v5305_v23 }
 0x7cb   : > { %v5219_v2 = vadd.f32 %v5218_v61, %v5130_v48  ;;  %5168 = vmatmul.bf16.gmra.mxu0 %v13813_v36  ;;  %5257 = vmatmul.bf16.gmra.mxu1 %v13814_v8  ;;  %v9575_v36 = vld [vmem:[#allocation6 + $0x238] sm:$0xf0] }
 0x7cc   : > { %v5836_v28 = vmax.f32 %v5394_v37, 0.0  ;;  %5346 = vmatmul.bf16.gmra.mxu2 %v13893_v63  ;;  %5435 = vmatmul.bf16.gmra.mxu3 %v13894_v39 }
 0x7ce   : > { %v12455_v5 = vpack.c.bf16 %v5836_v28, %v5832_v43  ;;  %v13896_v43 = vld [vmem:[#allocation59_spill] sm:$0xff]  ;;  %v13897_v28 = vld [vmem:[#allocation41_spill] sm:$0xff] }
 0x7cf   : > { %v5307_v22 = vpop.f32.mrf.mxu2  ;;  %v5396_v52 = vpop.f32.mrf.mxu3 }
 0x7d0   : > { %13895 = vst [vmem:[#allocation62_spill] sm:$0xff] %v12455_v5  ;;  %v5308_v26 = vadd.f32 %v5307_v22, %v5219_v2  ;;  %v5131_v31 = vpop.f32.mrf.mxu0  ;;  %v5220_v56 = vpop.f32.mrf.mxu1  ;;  %v13898_v5 = vld [vmem:[#allocation20_spill] sm:$0xff] }
 0x7d1   : > { %v5132_v10 = vadd.f32 %v5131_v31, %v12432_v57  ;;  %v13899_v31 = vld [vmem:[#allocation32_spill] sm:$0xff] }
 0x7d2   : > { %v5397_v47 = vadd.f32 %v5396_v52, %v5308_v26  ;;  %v10525_v26 = vld [vmem:[#allocation6 + $0x26c] sm:$0xf] }
 0x7d3   : > { %v5221_v58 = vadd.f32 %v5220_v56, %v5132_v10  ;;  %v9607_v56 = vld [vmem:[#allocation6 + $0x278] sm:$0xf0] }
 0x7d4   : > { %v5840_v2 = vmax.f32 %v5397_v47, 0.0 }
 0x7d7   : > { %v5309_v17 = vpop.f32.mrf.mxu2  ;;  %v5398_v33 = vpop.f32.mrf.mxu3 }
 0x7d8   : > { %v5310_v23 = vadd.f32 %v5309_v17, %v5221_v58  ;;  %v5134_v50 = vpop.f32.mrf.mxu0  ;;  %v5223_v35 = vpop.f32.mrf.mxu1  ;;  %v9610_v17 = vor.u32 %v10525_v26, %v9607_v56 }
 0x7d9   : > { %v5135_v61 = vadd.f32 %v5134_v50, %v12432_v57 }
 0x7da   : > { %v5399_v48 = vadd.f32 %v5398_v33, %v5310_v23  ;;  %5648 = vmatpush.bf16.msra.mxu2 %v9610_v17 }
 0x7db   : > { %v5224_v37 = vadd.f32 %v5223_v35, %v5135_v61  ;;  %5173 = vmatmul.bf16.gmra.mxu0 %v13896_v43  ;;  %5262 = vmatmul.bf16.gmra.mxu1 %v13897_v28  ;;  %v9351_v28 = vld [vmem:[#allocation6 + $0x78] sm:$0xf0]  ;;  %v10557_v43 = vld [vmem:[#allocation6 + $0x36c] sm:$0xf] }
 0x7dc   : > { %v5844_v22 = vmax.f32 %v5399_v48, 0.0  ;;  %5351 = vmatmul.bf16.gmra.mxu2 %v13898_v5  ;;  %5440 = vmatmul.bf16.gmra.mxu3 %v13899_v31  ;;  %v10461_v48 = vld [vmem:[#allocation6 + $0x6c] sm:$0xf]  ;;  %v9735_v31 = vld [vmem:[#allocation6 + $0x378] sm:$0xf0] }
 0x7dd   : > { %v9354_v5 = vor.u32 %v10461_v48, %v9351_v28  ;;  %v13902_v28 = vld [vmem:[#allocation18_spill] sm:$0xff] }
 0x7de   : > { %v12463_v52 = vpack.c.bf16 %v5844_v22, %v5840_v2  ;;  %v10493_v2 = vld [vmem:[#allocation6 + $0x16c] sm:$0xf]  ;;  %v9738_v22 = vor.u32 %v10557_v43, %v9735_v31  ;;  %v13903_v31 = vld [vmem:[#allocation21_spill] sm:$0xff] }
 0x7df   : > { %v5312_v10 = vpop.f32.mrf.mxu2  ;;  %v5401_v58 = vpop.f32.mrf.mxu3  ;;  %5470 = vmatpush.bf16.msra.mxu0 %v9354_v5 }
 0x7e0   : > { %13900 = vst [vmem:[#allocation61_spill] sm:$0xff] %v12463_v52  ;;  %v5313_v50 = vadd.f32 %v5312_v10, %v5224_v37  ;;  %v5136_v33 = vpop.f32.mrf.mxu0  ;;  %v5225_v23 = vpop.f32.mrf.mxu1  ;;  %v9479_v52 = vld [vmem:[#allocation6 + $0x178] sm:$0xf0]  ;;  %5737 = vmatpush.bf16.msra.mxu3 %v9738_v22 }
 0x7e1   : > { %v5137_v35 = vadd.f32 %v5136_v33, %v12432_v57  ;;  %v9482_v26 = vor.u32 %v10493_v2, %v9479_v52  ;;  %v13901_v33 = vld [vmem:[#allocation60_spill] sm:$0xff] }
 0x7e2   : > { %v5402_v61 = vadd.f32 %v5401_v58, %v5313_v50 }
 0x7e3   : > { %v5226_v47 = vadd.f32 %v5225_v23, %v5137_v35  ;;  %5559 = vmatpush.bf16.msra.mxu1 %v9482_v26  ;;  %v13904_v35 = vld [vmem:[#allocation33_spill] sm:$0xff] }
 0x7e4   : > { %v5848_v23 = vmax.f32 %v5402_v61, 0.0 }
 0x7e7   : > { %v5314_v39 = vpop.f32.mrf.mxu2  ;;  %v5403_v63 = vpop.f32.mrf.mxu3 }
 0x7e8   : > { %v5315_v37 = vadd.f32 %v5314_v39, %v5226_v47  ;;  %v5139_v56 = vpop.f32.mrf.mxu0  ;;  %v5228_v10 = vpop.f32.mrf.mxu1 }
 0x7e9   : > { %v5140_v17 = vadd.f32 %v5139_v56, %v12432_v57 }
 0x7ea   : > { %v5404_v58 = vadd.f32 %v5403_v63, %v5315_v37 }
 0x7eb   : > { %v5229_v50 = vadd.f32 %v5228_v10, %v5140_v17  ;;  %5178 = vmatmul.bf16.gmra.mxu0 %v13901_v33  ;;  %5267 = vmatmul.bf16.gmra.mxu1 %v13902_v28  ;;  %v10489_v28 = vld [vmem:[#allocation6 + $0x14c] sm:$0xf]  ;;  %v9319_v33 = vld [vmem:[#allocation6 + $0x38] sm:$0xf0] }
 0x7ec   : > { %v5852_v43 = vmax.f32 %v5404_v58, 0.0  ;;  %5356 = vmatmul.bf16.gmra.mxu2 %v13903_v31  ;;  %5445 = vmatmul.bf16.gmra.mxu3 %v13904_v35 }
 0x7ee   : > { %v12471_v5 = vpack.c.bf16 %v5852_v43, %v5848_v23  ;;  %v13906_v23 = vld [vmem:[#allocation28_spill] sm:$0xff]  ;;  %v13907_v43 = vld [vmem:[#allocation30_spill] sm:$0xff] }
 0x7ef   : > { %v5317_v39 = vpop.f32.mrf.mxu2  ;;  %v5406_v52 = vpop.f32.mrf.mxu3 }
 0x7f0   : > { %13905 = vst [vmem:[#allocation24_spill] sm:$0xff] %v12471_v5  ;;  %v5318_v47 = vadd.f32 %v5317_v39, %v5229_v50  ;;  %v5141_v48 = vpop.f32.mrf.mxu0  ;;  %v5230_v2 = vpop.f32.mrf.mxu1  ;;  %v13908_v5 = vld [vmem:[#allocation22_spill] sm:$0xff] }
 0x7f1   : > { %v5142_v63 = vadd.f32 %v5141_v48, %v12432_v57  ;;  %v13909_v48 = vld [vmem:[#allocation34_spill] sm:$0xff] }
 0x7f2   : > { %v5407_v22 = vadd.f32 %v5406_v52, %v5318_v47  ;;  %v10521_v47 = vld [vmem:[#allocation6 + $0x24c] sm:$0xf] }
 0x7f3   : > { %v5231_v26 = vadd.f32 %v5230_v2, %v5142_v63  ;;  %v9591_v2 = vld [vmem:[#allocation6 + $0x258] sm:$0xf0]  ;;  %v10457_v63 = vld [vmem:[#allocation6 + $0x4c] sm:$0xf] }
 0x7f4   : > { %v5856_v50 = vmax.f32 %v5407_v22, 0.0 }
 0x7f7   : > { %v5319_v37 = vpop.f32.mrf.mxu2  ;;  %v5408_v56 = vpop.f32.mrf.mxu3 }
 0x7f8   : > { %v5320_v10 = vadd.f32 %v5319_v37, %v5231_v26  ;;  %v5144_v61 = vpop.f32.mrf.mxu0  ;;  %v5233_v17 = vpop.f32.mrf.mxu1 }
 0x7f9   : > { %v5145_v58 = vadd.f32 %v5144_v61, %v12432_v57  ;;  %v9594_v61 = vor.u32 %v10521_v47, %v9591_v2  ;;  %v10485_v47 = vld [vmem:[#allocation6 + $0x12c] sm:$0xf] }
 0x7fa   : > { %v5409_v31 = vadd.f32 %v5408_v56, %v5320_v10  ;;  %v9335_v56 = vld [vmem:[#allocation6 + $0x58] sm:$0xf0]  ;;  %v10553_v10 = vld [vmem:[#allocation6 + $0x34c] sm:$0xf] }
 0x7fb   : > { %v5234_v35 = vadd.f32 %v5233_v17, %v5145_v58  ;;  %5183 = vmatmul.bf16.gmra.mxu0 %v13906_v23  ;;  %5272 = vmatmul.bf16.gmra.mxu1 %v13907_v43  ;;  %v9719_v17 = vld [vmem:[#allocation6 + $0x358] sm:$0xf0]  ;;  %v9338_v22 = vor.u32 %v10457_v63, %v9335_v56 }
 0x7fc   : > { %v5860_v39 = vmax.f32 %v5409_v31, 0.0  ;;  %5361 = vmatmul.bf16.gmra.mxu2 %v13908_v5  ;;  %5450 = vmatmul.bf16.gmra.mxu3 %v13909_v48  ;;  %v9722_v31 = vor.u32 %v10553_v10, %v9719_v17  ;;  %v9463_v5 = vld [vmem:[#allocation6 + $0x158] sm:$0xf0]  ;;  %v10549_v10 = vld [vmem:[#allocation6 + $0x32c] sm:$0xf] }
 0x7fd   : > { %5649 = vmatpush.bf16.msra.mxu2 %v9594_v61  ;;  %5471 = vmatpush.bf16.msra.mxu0 %v9338_v22  ;;  %v9703_v17 = vld [vmem:[#allocation6 + $0x338] sm:$0xf0] }
 0x7fe   : > { %v12479_v52 = vpack.c.bf16 %v5860_v39, %v5856_v50  ;;  %v9466_v50 = vor.u32 %v10489_v28, %v9463_v5  ;;  %5738 = vmatpush.bf16.msra.mxu3 %v9722_v31  ;;  %v9706_v38 = vor.u32 %v10549_v10, %v9703_v17  ;;  %v10449_v28 = vld [vmem:[#allocation6 + $0xc] sm:$0xf]  ;;  %v9303_v5 = vld [vmem:[#allocation6 + $0x18] sm:$0xf0] }
 0x7ff   : > { %v5322_v26 = vpop.f32.mrf.mxu2  ;;  %v5411_v37 = vpop.f32.mrf.mxu3 }
 0x800   : > { %13910 = vst [vmem:[#allocation23_spill] sm:$0xff] %v12479_v52  ;;  %v5323_v58 = vadd.f32 %v5322_v26, %v5234_v35  ;;  %v5146_v23 = vpop.f32.mrf.mxu0  ;;  %v5235_v43 = vpop.f32.mrf.mxu1  ;;  %v10453_v52 = vld [vmem:[#allocation6 + $0x2c] sm:$0xf]  ;;  %5560 = vmatpush.bf16.msra.mxu1 %v9466_v50  ;;  %v9447_v35 = vld [vmem:[#allocation6 + $0x138] sm:$0xf0] }
 0x801   : > { %v5147_v48 = vadd.f32 %v5146_v23, %v12432_v57  ;;  %v9322_v8 = vor.u32 %v10453_v52, %v9319_v33  ;;  %v10517_v26 = vld [vmem:[#allocation6 + $0x22c] sm:$0xf]  ;;  %v9450_v63 = vor.u32 %v10485_v47, %v9447_v35  ;;  %v9559_v52 = vld [vmem:[#allocation6 + $0x218] sm:$0xf0] }
 0x802   : > { %v5412_v39 = vadd.f32 %v5411_v37, %v5323_v58  ;;  %v9578_v56 = vor.u32 %v10517_v26, %v9575_v36  ;;  %v10481_v23 = vld [vmem:[#allocation6 + $0x10c] sm:$0xf]  ;;  %5739 = vmatpush.bf16.msra.mxu3 %v9706_v38  ;;  %v9687_v47 = vld [vmem:[#allocation6 + $0x318] sm:$0xf0] }
 0x803   : > { %v5236_v2 = vadd.f32 %v5235_v43, %v5147_v48  ;;  %5472 = vmatpush.bf16.msra.mxu0 %v9322_v8  ;;  %v9306_v43 = vor.u32 %v10449_v28, %v9303_v5  ;;  %v9431_v48 = vld [vmem:[#allocation6 + $0x118] sm:$0xf0]  ;;  %v10513_v33 = vld [vmem:[#allocation6 + $0x20c] sm:$0xf] }
 0x804   : > { %5650 = vmatpush.bf16.msra.mxu2 %v9578_v56  ;;  %5561 = vmatpush.bf16.msra.mxu1 %v9450_v63  ;;  %v9562_v36 = vor.u32 %v10513_v33, %v9559_v52  ;;  %v10545_v50 = vld [vmem:[#allocation6 + $0x30c] sm:$0xf]  ;;  %v9434_v35 = vor.u32 %v10481_v23, %v9431_v48  ;;  %v5864_v38 = vmax.f32 %v5412_v39, 0.0 }
 0x805   : > { %v9690_v26 = vor.u32 %v10545_v50, %v9687_v47 }
 0x807   : > { %v5324_v37 = vpop.f32.mrf.mxu2  ;;  %v5413_v61 = vpop.f32.mrf.mxu3  ;;  %5473 = vmatpush.bf16.msra.mxu0 %v9306_v43  ;;  %5740 = vmatpush.bf16.msra.mxu3 %v9690_v26 }
 0x808   : > { %v5325_v58 = vadd.f32 %v5324_v37, %v5236_v2  ;;  %v5149_v22 = vpop.f32.mrf.mxu0  ;;  %v5238_v31 = vpop.f32.mrf.mxu1  ;;  %5651 = vmatpush.bf16.msra.mxu2 %v9562_v36  ;;  %5562 = vmatpush.bf16.msra.mxu1 %v9434_v35 }
 0x809   : > { %v5150_v8 = vadd.f32 %v5149_v22, %v12432_v57 }
 0x80a   : > { %v5414_v56 = vadd.f32 %v5413_v61, %v5325_v58 }
 0x80b   : > { %v5239_v10 = vadd.f32 %v5238_v31, %v5150_v8  ;;  %5188 = vmatmul.bf16.gmra.mxu0 %v13825_v6  ;;  %5277 = vmatmul.bf16.gmra.mxu1 %v13826_v42 }
 0x80c   : > { %v5868_v63 = vmax.f32 %v5414_v56, 0.0  ;;  %5366 = vmatmul.bf16.gmra.mxu2 %v12023_v20  ;;  %5455 = vmatmul.bf16.gmra.mxu3 %v12156_v41 }
 0x80e   : > { %v12487_v2 = vpack.c.bf16 %v5868_v63, %v5864_v38 }
 0x80f   : > { %v5327_v17 = vpop.f32.mrf.mxu2  ;;  %v5416_v28 = vpop.f32.mrf.mxu3 }
 0x810   : > { %13911 = vst [vmem:[#allocation58_spill] sm:$0xff] %v12487_v2  ;;  %v5328_v5 = vadd.f32 %v5327_v17, %v5239_v10  ;;  %v5151_v23 = vpop.f32.mrf.mxu0  ;;  %v5240_v37 = vpop.f32.mrf.mxu1 }
 0x811   : > { %v5152_v61 = vadd.f32 %v5151_v23, %v12432_v57 }
 0x812   : > { %v5417_v43 = vadd.f32 %v5416_v28, %v5328_v5 }
 0x813   : > { %v5241_v48 = vadd.f32 %v5240_v37, %v5152_v61 }
 0x814   : > { %v5872_v47 = vmax.f32 %v5417_v43, 0.0 }
 0x817   : > { %v5329_v33 = vpop.f32.mrf.mxu2  ;;  %v5418_v39 = vpop.f32.mrf.mxu3 }
 0x818   : > { %v5330_v52 = vadd.f32 %v5329_v33, %v5241_v48  ;;  %v5154_v58 = vpop.f32.mrf.mxu0  ;;  %v5243_v22 = vpop.f32.mrf.mxu1 }
 0x819   : > { %v5155_v31 = vadd.f32 %v5154_v58, %v12432_v57 }
 0x81a   : > { %v5419_v36 = vadd.f32 %v5418_v39, %v5330_v52 }
 0x81b   : > { %v5244_v50 = vadd.f32 %v5243_v22, %v5155_v31  ;;  %5193 = vmatmul.bf16.gmra.mxu0 %v13828_v16  ;;  %5282 = vmatmul.bf16.gmra.mxu1 %v13829_v60 }
 0x81c   : > { %v5876_v8 = vmax.f32 %v5419_v36, 0.0  ;;  %5371 = vmatmul.bf16.gmra.mxu2 %v12036_v54  ;;  %5460 = vmatmul.bf16.gmra.mxu3 %v12172_v59 }
 0x81e   : > { %v12495_v35 = vpack.c.bf16 %v5876_v8, %v5872_v47 }
 0x81f   : > { %v5332_v26 = vpop.f32.mrf.mxu2  ;;  %v5421_v56 = vpop.f32.mrf.mxu3 }
 0x820   : > { %13912 = vst [vmem:[#allocation70_spill] sm:$0xff] %v12495_v35  ;;  %v5333_v10 = vadd.f32 %v5332_v26, %v5244_v50  ;;  %v5156_v38 = vpop.f32.mrf.mxu0  ;;  %v5245_v63 = vpop.f32.mrf.mxu1 }
 0x821   : > { %v5157_v17 = vadd.f32 %v5156_v38, %v12432_v57 }
 0x822   : > { %v5422_v28 = vadd.f32 %v5421_v56, %v5333_v10 }
 0x823   : > { %v5246_v5 = vadd.f32 %v5245_v63, %v5157_v17 }
 0x824   : > { %v5880_v58 = vmax.f32 %v5422_v28, 0.0 }
 0x827   : > { %v5334_v23 = vpop.f32.mrf.mxu2  ;;  %v5423_v37 = vpop.f32.mrf.mxu3 }
 0x828   : > { %v5335_v61 = vadd.f32 %v5334_v23, %v5246_v5  ;;  %v5159_v43 = vpop.f32.mrf.mxu0  ;;  %v5248_v48 = vpop.f32.mrf.mxu1 }
 0x829   : > { %v5160_v33 = vadd.f32 %v5159_v43, %v12432_v57 }
 0x82a   : > { %v5424_v39 = vadd.f32 %v5423_v37, %v5335_v61 }
 0x82b   : > { %v5249_v52 = vadd.f32 %v5248_v48, %v5160_v33  ;;  %5474 = vmatmul.bf16.vlgmr.msra.gmra.mxu0 %v13780_v27  ;;  %5563 = vmatmul.bf16.vlgmr.msra.gmra.mxu1 %v13781_v4 }
 0x82c   : > { %v5884_v22 = vmax.f32 %v5424_v39, 0.0  ;;  %5652 = vmatmul.bf16.vlgmr.msra.gmra.mxu2 %v13782_v46  ;;  %5741 = vmatmul.bf16.vlgmr.msra.gmra.mxu3 %v12044_v21 }
 0x82e   : > { %v12503_v31 = vpack.c.bf16 %v5884_v22, %v5880_v58 }
 0x82f   : > { %v5337_v36 = vpop.f32.mrf.mxu2  ;;  %v5426_v50 = vpop.f32.mrf.mxu3 }
 0x830   : > { %13913 = vst [vmem:[#allocation81_spill] sm:$0xff] %v12503_v31  ;;  %v5338_v47 = vadd.f32 %v5337_v36, %v5249_v52  ;;  %v5161_v8 = vpop.f32.mrf.mxu0  ;;  %v5250_v26 = vpop.f32.mrf.mxu1 }
 0x831   : > { %v5162_v56 = vadd.f32 %v5161_v8, %v12432_v57 }
 0x832   : > { %v5427_v10 = vadd.f32 %v5426_v50, %v5338_v47 }
 0x833   : > { %v5251_v38 = vadd.f32 %v5250_v26, %v5162_v56 }
 0x834   : > { %v5888_v23 = vmax.f32 %v5427_v10, 0.0 }
 0x837   : > { %v5339_v27 = vpop.f32.mrf.mxu2  ;;  %v5428_v63 = vpop.f32.mrf.mxu3 }
 0x838   : > { %v5340_v4 = vadd.f32 %v5339_v27, %v5251_v38  ;;  %v5164_v17 = vpop.f32.mrf.mxu0  ;;  %v5253_v28 = vpop.f32.mrf.mxu1 }
 0x839   : > { %v5165_v46 = vadd.f32 %v5164_v17, %v12432_v57 }
 0x83a   : > { %v5429_v5 = vadd.f32 %v5428_v63, %v5340_v4 }
 0x83b   : > { %v5254_v21 = vadd.f32 %v5253_v28, %v5165_v46  ;;  %5479 = vmatmul.bf16.gmra.mxu0 %v13784_v40  ;;  %5568 = vmatmul.bf16.gmra.mxu1 %v13785_v13 }
 0x83c   : > { %v5892_v37 = vmax.f32 %v5429_v5, 0.0  ;;  %5657 = vmatmul.bf16.gmra.mxu2 %v13786_v51  ;;  %5746 = vmatmul.bf16.gmra.mxu3 %v12052_v30 }
 0x83e   : > { %v12511_v61 = vpack.c.bf16 %v5892_v37, %v5888_v23 }
 0x83f   : > { %v5342_v43 = vpop.f32.mrf.mxu2  ;;  %v5431_v48 = vpop.f32.mrf.mxu3 }
 0x840   : > { %13914 = vst [vmem:[#allocation82_spill] sm:$0xff] %v12511_v61  ;;  %v5343_v33 = vadd.f32 %v5342_v43, %v5254_v21  ;;  %v5166_v39 = vpop.f32.mrf.mxu0  ;;  %v5255_v52 = vpop.f32.mrf.mxu1 }
 0x841   : > { %v5167_v58 = vadd.f32 %v5166_v39, %v12432_v57 }
 0x842   : > { %v5432_v22 = vadd.f32 %v5431_v48, %v5343_v33 }
 0x843   : > { %v5256_v36 = vadd.f32 %v5255_v52, %v5167_v58  ;;  %v10173_v58 = vld [vmem:[#allocation8 + $0x2e0] sm:$0xf] }
 0x844   : > { %v5896_v56 = vmax.f32 %v5432_v22, 0.0  ;;  %v10670_v22 = vld [vmem:[#allocation8 + $0x2ec] sm:$0xf0] }
 0x847   : > { %v5344_v40 = vpop.f32.mrf.mxu2  ;;  %v5433_v50 = vpop.f32.mrf.mxu3 }
 0x848   : > { %v5345_v13 = vadd.f32 %v5344_v40, %v5256_v36  ;;  %v5169_v47 = vpop.f32.mrf.mxu0  ;;  %v5258_v8 = vpop.f32.mrf.mxu1 }
 0x849   : > { %v5170_v51 = vadd.f32 %v5169_v47, %v12432_v57 }
 0x84a   : > { %v5434_v26 = vadd.f32 %v5433_v50, %v5345_v13  ;;  %v10174_v50 = vor.u32 %v10670_v22, %v10173_v58 }
 0x84b   : > { %v5259_v30 = vadd.f32 %v5258_v8, %v5170_v51  ;;  %5484 = vmatmul.bf16.gmra.mxu0 %v13788_v1  ;;  %5573 = vmatmul.bf16.gmra.mxu1 %v13789_v44 }
 0x84c   : > { %v5900_v10 = vmax.f32 %v5434_v26, 0.0  ;;  %5662 = vmatmul.bf16.gmra.mxu2 %v13790_v0  ;;  %5751 = vmatmul.bf16.gmra.mxu3 %v12060_v14  ;;  %v9917_v26 = vld [vmem:[#allocation8 + $0xe0] sm:$0xf] }
 0x84d   : > { %6970 = vmatpush.bf16.msrb.mxu2 %v10174_v50 }
 0x84e   : > { %v12519_v38 = vpack.c.bf16 %v5900_v10, %v5896_v56  ;;  %v10301_v56 = vld [vmem:[#allocation8 + $0x3e0] sm:$0xf] }
 0x84f   : > { %v5347_v27 = vpop.f32.mrf.mxu2  ;;  %v5436_v63 = vpop.f32.mrf.mxu3  ;;  %v10045_v10 = vld [vmem:[#allocation8 + $0x1e0] sm:$0xf] }
 0x850   : > { %13915 = vst [vmem:[#allocation83_spill] sm:$0xff] %v12519_v38  ;;  %v5348_v4 = vadd.f32 %v5347_v27, %v5259_v30  ;;  %v5171_v17 = vpop.f32.mrf.mxu0  ;;  %v5260_v28 = vpop.f32.mrf.mxu1  ;;  %v10606_v30 = vld [vmem:[#allocation8 + $0xec] sm:$0xf0] }
 0x851   : > { %v5172_v46 = vadd.f32 %v5171_v17, %v12432_v57 }
 0x852   : > { %v5437_v5 = vadd.f32 %v5436_v63, %v5348_v4  ;;  %v10638_v63 = vld [vmem:[#allocation8 + $0x1ec] sm:$0xf0] }
 0x853   : > { %v5261_v21 = vadd.f32 %v5260_v28, %v5172_v46  ;;  %v10046_v28 = vor.u32 %v10638_v63, %v10045_v10 }
 0x854   : > { %v5904_v33 = vmax.f32 %v5437_v5, 0.0 }
 0x855   : > { %6881 = vmatpush.bf16.msrb.mxu1 %v10046_v28  ;;  %v10602_v28 = vld [vmem:[#allocation8 + $0xcc] sm:$0xf0] }
 0x857   : > { %v5349_v1 = vpop.f32.mrf.mxu2  ;;  %v5438_v23 = vpop.f32.mrf.mxu3 }
 0x858   : > { %v5350_v44 = vadd.f32 %v5349_v1, %v5261_v21  ;;  %v5174_v37 = vpop.f32.mrf.mxu0  ;;  %v5263_v43 = vpop.f32.mrf.mxu1 }
 0x859   : > { %v5175_v0 = vadd.f32 %v5174_v37, %v12432_v57 }
 0x85a   : > { %v5439_v48 = vadd.f32 %v5438_v23, %v5350_v44 }
 0x85b   : > { %v5264_v14 = vadd.f32 %v5263_v43, %v5175_v0  ;;  %5489 = vmatmul.bf16.gmra.mxu0 %v13792_v3  ;;  %5578 = vmatmul.bf16.gmra.mxu1 %v13793_v55 }
 0x85c   : > { %v5908_v39 = vmax.f32 %v5439_v48, 0.0  ;;  %5667 = vmatmul.bf16.gmra.mxu2 %v13794_v53  ;;  %5756 = vmatmul.bf16.gmra.mxu3 %v13873_v19  ;;  %v9918_v53 = vor.u32 %v10606_v30, %v9917_v26  ;;  %v10702_v19 = vld [vmem:[#allocation8 + $0x3ec] sm:$0xf0]  ;;  %v10157_v26 = vld [vmem:[#allocation8 + $0x2c0] sm:$0xf] }
 0x85d   : > { %v10302_v27 = vor.u32 %v10702_v19, %v10301_v56  ;;  %v10666_v30 = vld [vmem:[#allocation8 + $0x2cc] sm:$0xf0] }
 0x85e   : > { %v12527_v52 = vpack.c.bf16 %v5908_v39, %v5904_v33  ;;  %6792 = vmatpush.bf16.msrb.mxu0 %v9918_v53  ;;  %v10158_v19 = vor.u32 %v10666_v30, %v10157_v26 }
 0x85f   : > { %v5352_v36 = vpop.f32.mrf.mxu2  ;;  %v5441_v40 = vpop.f32.mrf.mxu3  ;;  %7059 = vmatpush.bf16.msrb.mxu3 %v10302_v27 }
 0x860   : > { %13916 = vst [vmem:[#allocation84_spill] sm:$0xff] %v12527_v52  ;;  %v5353_v13 = vadd.f32 %v5352_v36, %v5264_v14  ;;  %v5176_v47 = vpop.f32.mrf.mxu0  ;;  %v5265_v8 = vpop.f32.mrf.mxu1  ;;  %6971 = vmatpush.bf16.msrb.mxu2 %v10158_v19  ;;  %v13920_v19 = vld [vmem:[#allocation78_spill] sm:$0xff] }
 0x861   : > { %v5177_v3 = vadd.f32 %v5176_v47, %v12432_v57 }
 0x862   : > { %v5442_v55 = vadd.f32 %v5441_v40, %v5353_v13 }
 0x863   : > { %v5266_v51 = vadd.f32 %v5265_v8, %v5177_v3 }
 0x864   : > { %v5912_v37 = vmax.f32 %v5442_v55, 0.0 }
 0x867   : > { %v5354_v4 = vpop.f32.mrf.mxu2  ;;  %v5443_v17 = vpop.f32.mrf.mxu3 }
 0x868   : > { %v5355_v46 = vadd.f32 %v5354_v4, %v5266_v51  ;;  %v5179_v5 = vpop.f32.mrf.mxu0  ;;  %v5268_v21 = vpop.f32.mrf.mxu1 }
 0x869   : > { %v5180_v1 = vadd.f32 %v5179_v5, %v12432_v57  ;;  %v10029_v5 = vld [vmem:[#allocation8 + $0x1c0] sm:$0xf] }
 0x86a   : > { %v5444_v23 = vadd.f32 %v5443_v17, %v5355_v46  ;;  %v9901_v17 = vld [vmem:[#allocation8 + $0xc0] sm:$0xf] }
 0x86b   : > { %v5269_v44 = vadd.f32 %v5268_v21, %v5180_v1  ;;  %5494 = vmatmul.bf16.gmra.mxu0 %v13796_v12  ;;  %5583 = vmatmul.bf16.gmra.mxu1 %v13797_v15  ;;  %v10285_v46 = vld [vmem:[#allocation8 + $0x3c0] sm:$0xf]  ;;  %v10634_v1 = vld [vmem:[#allocation8 + $0x1cc] sm:$0xf0] }
 0x86c   : > { %v5916_v43 = vmax.f32 %v5444_v23, 0.0  ;;  %5672 = vmatmul.bf16.gmra.mxu2 %v13798_v18  ;;  %5761 = vmatmul.bf16.gmra.mxu3 %v12076_v32 }
 0x86e   : > { %v12535_v0 = vpack.c.bf16 %v5916_v43, %v5912_v37  ;;  %v10030_v37 = vor.u32 %v10634_v1, %v10029_v5  ;;  %v13923_v5 = vld [vmem:[#allocation69_spill] sm:$0xff]  ;;  %v9885_v1 = vld [vmem:[#allocation8 + $0xa0] sm:$0xf] }
 0x86f   : > { %v5357_v48 = vpop.f32.mrf.mxu2  ;;  %v5446_v14 = vpop.f32.mrf.mxu3 }
 0x870   : > { %13917 = vst [vmem:[#allocation85_spill] sm:$0xff] %v12535_v0  ;;  %v5358_v33 = vadd.f32 %v5357_v48, %v5269_v44  ;;  %v5181_v39 = vpop.f32.mrf.mxu0  ;;  %v5270_v58 = vpop.f32.mrf.mxu1  ;;  %6882 = vmatpush.bf16.msrb.mxu1 %v10030_v37  ;;  %v10269_v37 = vld [vmem:[#allocation8 + $0x3a0] sm:$0xf] }
 0x871   : > { %v5182_v22 = vadd.f32 %v5181_v39, %v12432_v57 }
 0x872   : > { %v5447_v36 = vadd.f32 %v5446_v14, %v5358_v33 }
 0x873   : > { %v5271_v40 = vadd.f32 %v5270_v58, %v5182_v22 }
 0x874   : > { %v5920_v3 = vmax.f32 %v5447_v36, 0.0 }
 0x877   : > { %v5359_v12 = vpop.f32.mrf.mxu2  ;;  %v5448_v50 = vpop.f32.mrf.mxu3 }
 0x878   : > { %v5360_v15 = vadd.f32 %v5359_v12, %v5271_v40  ;;  %v5184_v13 = vpop.f32.mrf.mxu0  ;;  %v5273_v47 = vpop.f32.mrf.mxu1 }
 0x879   : > { %v5185_v18 = vadd.f32 %v5184_v13, %v12432_v57 }
 0x87a   : > { %v5449_v8 = vadd.f32 %v5448_v50, %v5360_v15 }
 0x87b   : > { %v5274_v32 = vadd.f32 %v5273_v47, %v5185_v18  ;;  %5499 = vmatmul.bf16.gmra.mxu0 %v13800_v29  ;;  %5588 = vmatmul.bf16.gmra.mxu1 %v13801_v49 }
 0x87c   : > { %v5924_v55 = vmax.f32 %v5449_v8, 0.0  ;;  %5677 = vmatmul.bf16.gmra.mxu2 %v11951_v25  ;;  %5766 = vmatmul.bf16.gmra.mxu3 %v12084_v45  ;;  %v9902_v25 = vor.u32 %v10602_v28, %v9901_v17  ;;  %v10698_v45 = vld [vmem:[#allocation8 + $0x3cc] sm:$0xf0] }
 0x87d   : > { %v10286_v21 = vor.u32 %v10698_v45, %v10285_v46 }
 0x87e   : > { %v12543_v51 = vpack.c.bf16 %v5924_v55, %v5920_v3  ;;  %6793 = vmatpush.bf16.msrb.mxu0 %v9902_v25 }
 0x87f   : > { %v5362_v53 = vpop.f32.mrf.mxu2  ;;  %v5451_v56 = vpop.f32.mrf.mxu3  ;;  %7060 = vmatpush.bf16.msrb.mxu3 %v10286_v21  ;;  %v12563_v21 = vperm.slane %v13923_v5, 3  ;;  %v13931_v5 = vld [vmem:[#allocation80_spill] sm:$0xff] }
 0x880   : > { %13918 = vst [vmem:[#allocation86_spill] sm:$0xff] %v12543_v51  ;;  %v5363_v10 = vadd.f32 %v5362_v53, %v5274_v32  ;;  %v5186_v27 = vpop.f32.mrf.mxu0  ;;  %v5275_v63 = vpop.f32.mrf.mxu1 }
 0x881   : > { %v5187_v29 = vadd.f32 %v5186_v27, %v12432_v57 }
 0x882   : > { %v5452_v49 = vadd.f32 %v5451_v56, %v5363_v10  ;;  %v13921_v10 = vld [vmem:[#allocation25_spill] sm:$0xff] }
 0x883   : > { %v5276_v4 = vadd.f32 %v5275_v63, %v5187_v29  ;;  %v10141_v63 = vld [vmem:[#allocation8 + $0x2a0] sm:$0xf]  ;;  %v10662_v29 = vld [vmem:[#allocation8 + $0x2ac] sm:$0xf0] }
 0x884   : > { %v5928_v22 = vmax.f32 %v5452_v49, 0.0  ;;  %v10142_v17 = vor.u32 %v10662_v29, %v10141_v63 }
 0x886   : > { %6972 = vmatpush.bf16.msrb.mxu2 %v10142_v17 }
 0x887   : > { %v5364_v23 = vpop.f32.mrf.mxu2  ;;  %v5453_v44 = vpop.f32.mrf.mxu3 }
 0x888   : > { %v5365_v43 = vadd.f32 %v5364_v23, %v5276_v4  ;;  %v5189_v48 = vpop.f32.mrf.mxu0  ;;  %v5278_v14 = vpop.f32.mrf.mxu1  ;;  %v10598_v23 = vld [vmem:[#allocation8 + $0xac] sm:$0xf0] }
 0x889   : > { %v5190_v33 = vadd.f32 %v5189_v48, %v12432_v57  ;;  %v10013_v48 = vld [vmem:[#allocation8 + $0x1a0] sm:$0xf] }
 0x88a   : > { %v5454_v39 = vadd.f32 %v5453_v44, %v5365_v43  ;;  %v9886_v44 = vor.u32 %v10598_v23, %v9885_v1  ;;  %v10694_v43 = vld [vmem:[#allocation8 + $0x3ac] sm:$0xf0]  ;;  %v13932_v1 = vld [vmem:[#allocation27_spill] sm:$0xff] }
 0x88b   : > { %v5279_v58 = vadd.f32 %v5278_v14, %v5190_v33  ;;  %5504 = vmatmul.bf16.gmra.mxu0 %v13803_v34  ;;  %5593 = vmatmul.bf16.gmra.mxu1 %v13804_v7  ;;  %v10270_v14 = vor.u32 %v10694_v43, %v10269_v37  ;;  %v10630_v33 = vld [vmem:[#allocation8 + $0x1ac] sm:$0xf0] }
 0x88c   : > { %v5932_v36 = vmax.f32 %v5454_v39, 0.0  ;;  %5682 = vmatmul.bf16.gmra.mxu2 %v11959_v9  ;;  %5771 = vmatmul.bf16.gmra.mxu3 %v13837_v24  ;;  %v10658_v37 = vld [vmem:[#allocation8 + $0x28c] sm:$0xf0] }
 0x88d   : > { %6794 = vmatpush.bf16.msrb.mxu0 %v9886_v44  ;;  %7061 = vmatpush.bf16.msrb.mxu3 %v10270_v14  ;;  %v10125_v44 = vld [vmem:[#allocation8 + $0x280] sm:$0xf] }
 0x88e   : > { %v12551_v40 = vpack.c.bf16 %v5932_v36, %v5928_v22  ;;  %v10014_v22 = vor.u32 %v10630_v33, %v10013_v48  ;;  %v10126_v14 = vor.u32 %v10658_v37, %v10125_v44 }
 0x88f   : > { %v5367_v12 = vpop.f32.mrf.mxu2  ;;  %v5456_v50 = vpop.f32.mrf.mxu3 }
 0x890   : > { %13919 = vst [vmem:[#allocation87_spill] sm:$0xff] %v12551_v40  ;;  %v5368_v15 = vadd.f32 %v5367_v12, %v5279_v58  ;;  %v5191_v13 = vpop.f32.mrf.mxu0  ;;  %v5280_v47 = vpop.f32.mrf.mxu1  ;;  %6883 = vmatpush.bf16.msrb.mxu1 %v10014_v22  ;;  %6973 = vmatpush.bf16.msrb.mxu2 %v10126_v14 }
 0x891   : > { %v5192_v18 = vadd.f32 %v5191_v13, %v12432_v57 }
 0x892   : > { %v5457_v8 = vadd.f32 %v5456_v50, %v5368_v15 }
 0x893   : > { %v5281_v32 = vadd.f32 %v5280_v47, %v5192_v18  ;;  %v13924_v47 = vld [vmem:[#allocation15_spill] sm:$0xff] }
 0x894   : > { %v5936_v53 = vmax.f32 %v5457_v8, 0.0  ;;  %v13925_v18 = vld [vmem:[#allocation71_spill] sm:$0xff] }
 0x897   : > { %v5369_v34 = vpop.f32.mrf.mxu2  ;;  %v5458_v3 = vpop.f32.mrf.mxu3 }
 0x898   : > { %v5370_v7 = vadd.f32 %v5369_v34, %v5281_v32  ;;  %v5194_v55 = vpop.f32.mrf.mxu0  ;;  %v5283_v26 = vpop.f32.mrf.mxu1  ;;  %v13926_v34 = vld [vmem:[#allocation79_spill] sm:$0xff] }
 0x899   : > { %v5195_v9 = vadd.f32 %v5194_v55, %v12432_v57 }
 0x89a   : > { %v5459_v30 = vadd.f32 %v5458_v3, %v5370_v7  ;;  %v13927_v3 = vld [vmem:[#allocation26_spill] sm:$0xff] }
 0x89b   : > { %v5284_v24 = vadd.f32 %v5283_v26, %v5195_v9  ;;  %5509 = vmatmul.bf16.gmra.mxu0 %v13878_v11  ;;  %5598 = vmatmul.bf16.gmra.mxu1 %v13879_v62 }
 0x89c   : > { %v5940_v56 = vmax.f32 %v5459_v30, 0.0  ;;  %5687 = vmatmul.bf16.gmra.mxu2 %v13920_v19  ;;  %5776 = vmatmul.bf16.gmra.mxu3 %v13921_v10 }
 0x89e   : > { %v12559_v27 = vpack.c.bf16 %v5940_v56, %v5936_v53 }
 0x89f   : > { %v5372_v49 = vpop.f32.mrf.mxu2  ;;  %v5461_v4 = vpop.f32.mrf.mxu3 }
 0x8a0   : > { %13922 = vst [vmem:[#allocation78_spill] sm:$0xff] %v12559_v27  ;;  %v5373_v28 = vadd.f32 %v5372_v49, %v5284_v24  ;;  %v5196_v25 = vpop.f32.mrf.mxu0  ;;  %v5285_v46 = vpop.f32.mrf.mxu1 }
 0x8a1   : > { %v5197_v11 = vadd.f32 %v5196_v25, %v12432_v57 }
 0x8a2   : > { %v5462_v62 = vadd.f32 %v5461_v4, %v5373_v28 }
 0x8a3   : > { %v5286_v45 = vadd.f32 %v5285_v46, %v5197_v11  ;;  %v13929_v46 = vld [vmem:[#allocation16_spill] sm:$0xff] }
 0x8a4   : > { %v5944_v8 = vmax.f32 %v5462_v62, 0.0  ;;  %v13930_v11 = vld [vmem:[#allocation72_spill] sm:$0xff] }
 0x8a7   : > { %v5374_v39 = vpop.f32.mrf.mxu2  ;;  %v5463_v58 = vpop.f32.mrf.mxu3 }
 0x8a8   : > { %v5375_v36 = vadd.f32 %v5374_v39, %v5286_v45  ;;  %v5475_v57 = vpop.f32.mrf.mxu0  ;;  %v5564_v12 = vpop.f32.mrf.mxu1 }
 0x8a9   : > { %v5476_v50 = vadd.f32 %v5475_v57, %v12563_v21 }
 0x8aa   : > { %v5464_v15 = vadd.f32 %v5463_v58, %v5375_v36 }
 0x8ab   : > { %v5565_v13 = vadd.f32 %v5564_v12, %v5476_v50  ;;  %5514 = vmatmul.bf16.gmra.mxu0 %v13924_v47  ;;  %5603 = vmatmul.bf16.gmra.mxu1 %v13925_v18  ;;  %v9869_v12 = vld [vmem:[#allocation8 + $0x80] sm:$0xf]  ;;  %v10594_v50 = vld [vmem:[#allocation8 + $0x8c] sm:$0xf0] }
 0x8ac   : > { %v5948_v32 = vmax.f32 %v5464_v15, 0.0  ;;  %5692 = vmatmul.bf16.gmra.mxu2 %v13926_v34  ;;  %5781 = vmatmul.bf16.gmra.mxu3 %v13927_v3  ;;  %v9870_v15 = vor.u32 %v10594_v50, %v9869_v12  ;;  %v10690_v47 = vld [vmem:[#allocation8 + $0x38c] sm:$0xf0]  ;;  %v9997_v18 = vld [vmem:[#allocation8 + $0x180] sm:$0xf]  ;;  %v13940_v50 = vld [vmem:[#allocation20_spill] sm:$0xff] }
 0x8ae   : > { %v12570_v7 = vpack.c.bf16 %v5948_v32, %v5944_v8  ;;  %v10626_v32 = vld [vmem:[#allocation8 + $0x18c] sm:$0xf0]  ;;  %6795 = vmatpush.bf16.msrb.mxu0 %v9870_v15  ;;  %v13941_v15 = vld [vmem:[#allocation32_spill] sm:$0xff] }
 0x8af   : > { %v5653_v55 = vpop.f32.mrf.mxu2  ;;  %v5742_v26 = vpop.f32.mrf.mxu3 }
 0x8b0   : > { %13928 = vst [vmem:[#allocation25_spill] sm:$0xff] %v12570_v7  ;;  %v5654_v9 = vadd.f32 %v5653_v55, %v5565_v13  ;;  %v5477_v30 = vpop.f32.mrf.mxu0  ;;  %v5566_v24 = vpop.f32.mrf.mxu1  ;;  %v10253_v13 = vld [vmem:[#allocation8 + $0x380] sm:$0xf]  ;;  %v9998_v55 = vor.u32 %v10626_v32, %v9997_v18  ;;  %v10654_v18 = vld [vmem:[#allocation8 + $0x26c] sm:$0xf0] }
 0x8b1   : > { %v5478_v53 = vadd.f32 %v5477_v30, %v12563_v21  ;;  %v10254_v8 = vor.u32 %v10690_v47, %v10253_v13  ;;  %v10109_v47 = vld [vmem:[#allocation8 + $0x260] sm:$0xf] }
 0x8b2   : > { %v5743_v56 = vadd.f32 %v5742_v26, %v5654_v9  ;;  %6884 = vmatpush.bf16.msrb.mxu1 %v9998_v55 }
 0x8b3   : > { %v5567_v19 = vadd.f32 %v5566_v24, %v5478_v53  ;;  %7062 = vmatpush.bf16.msrb.mxu3 %v10254_v8 }
 0x8b4   : > { %v5825_v62 = vmax.f32 %v5743_v56, 0.0 }
 0x8b7   : > { %v5655_v10 = vpop.f32.mrf.mxu2  ;;  %v5744_v63 = vpop.f32.mrf.mxu3 }
 0x8b8   : > { %v5656_v29 = vadd.f32 %v5655_v10, %v5567_v19  ;;  %v5480_v49 = vpop.f32.mrf.mxu0  ;;  %v5569_v4 = vpop.f32.mrf.mxu1  ;;  %v13933_v19 = vld [vmem:[#allocation17_spill] sm:$0xff]  ;;  %v13934_v10 = vld [vmem:[#allocation40_spill] sm:$0xff] }
 0x8b9   : > { %v5481_v17 = vadd.f32 %v5480_v49, %v12563_v21  ;;  %v13935_v49 = vld [vmem:[#allocation19_spill] sm:$0xff] }
 0x8ba   : > { %v5745_v28 = vadd.f32 %v5744_v63, %v5656_v29 }
 0x8bb   : > { %v5570_v25 = vadd.f32 %v5569_v4, %v5481_v17  ;;  %5519 = vmatmul.bf16.gmra.mxu0 %v13929_v46  ;;  %5608 = vmatmul.bf16.gmra.mxu1 %v13930_v11  ;;  %v13936_v4 = vld [vmem:[#allocation31_spill] sm:$0xff] }
 0x8bc   : > { %v5829_v45 = vmax.f32 %v5745_v28, 0.0  ;;  %5697 = vmatmul.bf16.gmra.mxu2 %v13931_v5  ;;  %5786 = vmatmul.bf16.gmra.mxu3 %v13932_v1 }
 0x8be   : > { %v12578_v23 = vpack.c.bf16 %v5829_v45, %v5825_v62 }
 0x8bf   : > { %v5658_v43 = vpop.f32.mrf.mxu2  ;;  %v5747_v48 = vpop.f32.mrf.mxu3 }
 0x8c0   : > { %v5659_v33 = vadd.f32 %v5658_v43, %v5570_v25  ;;  %v5482_v39 = vpop.f32.mrf.mxu0  ;;  %v5571_v58 = vpop.f32.mrf.mxu1 }
 0x8c1   : > { %v5483_v22 = vadd.f32 %v5482_v39, %v12563_v21 }
 0x8c2   : > { %v5748_v36 = vadd.f32 %v5747_v48, %v5659_v33 }
 0x8c3   : > { %v5572_v57 = vadd.f32 %v5571_v58, %v5483_v22  ;;  %v13938_v22 = vld [vmem:[#allocation59_spill] sm:$0xff] }
 0x8c4   : > { %v5833_v63 = vmax.f32 %v5748_v36, 0.0  ;;  %v13939_v36 = vld [vmem:[#allocation41_spill] sm:$0xff] }
 0x8c7   : > { %v5660_v34 = vpop.f32.mrf.mxu2  ;;  %v5749_v3 = vpop.f32.mrf.mxu3 }
 0x8c8   : > { %v5661_v26 = vadd.f32 %v5660_v34, %v5572_v57  ;;  %v5485_v9 = vpop.f32.mrf.mxu0  ;;  %v5574_v30 = vpop.f32.mrf.mxu1  ;;  %v10110_v34 = vor.u32 %v10654_v18, %v10109_v47 }
 0x8c9   : > { %v5486_v24 = vadd.f32 %v5485_v9, %v12563_v21 }
 0x8ca   : > { %v5750_v53 = vadd.f32 %v5749_v3, %v5661_v26  ;;  %6974 = vmatpush.bf16.msrb.mxu2 %v10110_v34 }
 0x8cb   : > { %v5575_v56 = vadd.f32 %v5574_v30, %v5486_v24  ;;  %5524 = vmatmul.bf16.gmra.mxu0 %v13933_v19  ;;  %5613 = vmatmul.bf16.gmra.mxu1 %v13934_v10  ;;  %v10237_v10 = vld [vmem:[#allocation8 + $0x360] sm:$0xf] }
 0x8cc   : > { %v5837_v29 = vmax.f32 %v5750_v53, 0.0  ;;  %5702 = vmatmul.bf16.gmra.mxu2 %v13935_v49  ;;  %5791 = vmatmul.bf16.gmra.mxu3 %v13936_v4  ;;  %v9853_v53 = vld [vmem:[#allocation8 + $0x60] sm:$0xf]  ;;  %v10622_v4 = vld [vmem:[#allocation8 + $0x16c] sm:$0xf0] }
 0x8ce   : > { %v12586_v17 = vpack.c.bf16 %v5837_v29, %v5833_v63  ;;  %v10686_v63 = vld [vmem:[#allocation8 + $0x36c] sm:$0xf0]  ;;  %v9981_v29 = vld [vmem:[#allocation8 + $0x160] sm:$0xf] }
 0x8cf   : > { %v5663_v28 = vpop.f32.mrf.mxu2  ;;  %v5752_v25 = vpop.f32.mrf.mxu3  ;;  %v10238_v49 = vor.u32 %v10686_v63, %v10237_v10  ;;  %v13949_v10 = vld [vmem:[#allocation22_spill] sm:$0xff] }
 0x8d0   : > { %13937 = vst [vmem:[#allocation69_spill] sm:$0xff] %v12586_v17  ;;  %v5664_v46 = vadd.f32 %v5663_v28, %v5575_v56  ;;  %v5487_v11 = vpop.f32.mrf.mxu0  ;;  %v5576_v62 = vpop.f32.mrf.mxu1  ;;  %v10590_v56 = vld [vmem:[#allocation8 + $0x6c] sm:$0xf0]  ;;  %v13950_v63 = vld [vmem:[#allocation34_spill] sm:$0xff] }
 0x8d1   : > { %v5488_v45 = vadd.f32 %v5487_v11, %v12563_v21  ;;  %v9854_v19 = vor.u32 %v10590_v56, %v9853_v53  ;;  %7063 = vmatpush.bf16.msrb.mxu3 %v10238_v49  ;;  %v13948_v53 = vld [vmem:[#allocation30_spill] sm:$0xff]  ;;  %v10093_v49 = vld [vmem:[#allocation8 + $0x240] sm:$0xf] }
 0x8d2   : > { %v5753_v5 = vadd.f32 %v5752_v25, %v5664_v46  ;;  %v9982_v46 = vor.u32 %v10622_v4, %v9981_v29  ;;  %v10650_v4 = vld [vmem:[#allocation8 + $0x24c] sm:$0xf0] }
 0x8d3   : > { %v5577_v1 = vadd.f32 %v5576_v62, %v5488_v45  ;;  %6796 = vmatpush.bf16.msrb.mxu0 %v9854_v19 }
 0x8d4   : > { %v5841_v57 = vmax.f32 %v5753_v5, 0.0  ;;  %6885 = vmatpush.bf16.msrb.mxu1 %v9982_v46 }
 0x8d7   : > { %v5665_v44 = vpop.f32.mrf.mxu2  ;;  %v5754_v37 = vpop.f32.mrf.mxu3 }
 0x8d8   : > { %v5666_v43 = vadd.f32 %v5665_v44, %v5577_v1  ;;  %v5490_v48 = vpop.f32.mrf.mxu0  ;;  %v5579_v14 = vpop.f32.mrf.mxu1 }
 0x8d9   : > { %v5491_v33 = vadd.f32 %v5490_v48, %v12563_v21 }
 0x8da   : > { %v5755_v39 = vadd.f32 %v5754_v37, %v5666_v43  ;;  %v13942_v37 = vld [vmem:[#allocation60_spill] sm:$0xff]  ;;  %v13943_v43 = vld [vmem:[#allocation18_spill] sm:$0xff] }
 0x8db   : > { %v5580_v58 = vadd.f32 %v5579_v14, %v5491_v33  ;;  %5529 = vmatmul.bf16.gmra.mxu0 %v13938_v22  ;;  %5618 = vmatmul.bf16.gmra.mxu1 %v13939_v36  ;;  %v13944_v33 = vld [vmem:[#allocation21_spill] sm:$0xff] }
 0x8dc   : > { %v5845_v12 = vmax.f32 %v5755_v39, 0.0  ;;  %5707 = vmatmul.bf16.gmra.mxu2 %v13940_v50  ;;  %5796 = vmatmul.bf16.gmra.mxu3 %v13941_v15  ;;  %v13945_v39 = vld [vmem:[#allocation33_spill] sm:$0xff] }
 0x8de   : > { %v12594_v13 = vpack.c.bf16 %v5845_v12, %v5841_v57 }
 0x8df   : > { %v5668_v8 = vpop.f32.mrf.mxu2  ;;  %v5757_v32 = vpop.f32.mrf.mxu3 }
 0x8e0   : > { %v5669_v3 = vadd.f32 %v5668_v8, %v5580_v58  ;;  %v5492_v55 = vpop.f32.mrf.mxu0  ;;  %v5581_v26 = vpop.f32.mrf.mxu1 }
 0x8e1   : > { %v5493_v9 = vadd.f32 %v5492_v55, %v12563_v21 }
 0x8e2   : > { %v5758_v30 = vadd.f32 %v5757_v32, %v5669_v3 }
 0x8e3   : > { %v5582_v24 = vadd.f32 %v5581_v26, %v5493_v9 }
 0x8e4   : > { %v5849_v48 = vmax.f32 %v5758_v30, 0.0 }
 0x8e7   : > { %v5670_v28 = vpop.f32.mrf.mxu2  ;;  %v5759_v25 = vpop.f32.mrf.mxu3 }
 0x8e8   : > { %v5671_v11 = vadd.f32 %v5670_v28, %v5582_v24  ;;  %v5495_v62 = vpop.f32.mrf.mxu0  ;;  %v5584_v45 = vpop.f32.mrf.mxu1  ;;  %v13947_v24 = vld [vmem:[#allocation28_spill] sm:$0xff]  ;;  %v9837_v28 = vld [vmem:[#allocation8 + $0x40] sm:$0xf] }
 0x8e9   : > { %v5496_v5 = vadd.f32 %v5495_v62, %v12563_v21  ;;  %v10586_v62 = vld [vmem:[#allocation8 + $0x4c] sm:$0xf0] }
 0x8ea   : > { %v5760_v1 = vadd.f32 %v5759_v25, %v5671_v11  ;;  %v10094_v11 = vor.u32 %v10650_v4, %v10093_v49  ;;  %v10061_v49 = vld [vmem:[#allocation8 + $0x200] sm:$0xf]  ;;  %v10642_v4 = vld [vmem:[#allocation8 + $0x20c] sm:$0xf0] }
 0x8eb   : > { %v5585_v44 = vadd.f32 %v5584_v45, %v5496_v5  ;;  %5534 = vmatmul.bf16.gmra.mxu0 %v13942_v37  ;;  %5623 = vmatmul.bf16.gmra.mxu1 %v13943_v43  ;;  %v10221_v45 = vld [vmem:[#allocation8 + $0x340] sm:$0xf]  ;;  %v10682_v5 = vld [vmem:[#allocation8 + $0x34c] sm:$0xf0]  ;;  %v9838_v43 = vor.u32 %v10586_v62, %v9837_v28 }
 0x8ec   : > { %v5853_v14 = vmax.f32 %v5760_v1, 0.0  ;;  %5712 = vmatmul.bf16.gmra.mxu2 %v13944_v33  ;;  %5801 = vmatmul.bf16.gmra.mxu3 %v13945_v39  ;;  %v10618_v33 = vld [vmem:[#allocation8 + $0x14c] sm:$0xf0]  ;;  %v10189_v62 = vld [vmem:[#allocation8 + $0x300] sm:$0xf] }
 0x8ed   : > { %6975 = vmatpush.bf16.msrb.mxu2 %v10094_v11  ;;  %6797 = vmatpush.bf16.msrb.mxu0 %v9838_v43  ;;  %v10062_v11 = vor.u32 %v10642_v4, %v10061_v49 }
 0x8ee   : > { %v12602_v58 = vpack.c.bf16 %v5853_v14, %v5849_v48  ;;  %v10222_v48 = vor.u32 %v10682_v5, %v10221_v45  ;;  %v9965_v14 = vld [vmem:[#allocation8 + $0x140] sm:$0xf]  ;;  %v10674_v45 = vld [vmem:[#allocation8 + $0x30c] sm:$0xf0] }
 0x8ef   : > { %v5673_v22 = vpop.f32.mrf.mxu2  ;;  %v5762_v36 = vpop.f32.mrf.mxu3 }
 0x8f0   : > { %13946 = vst [vmem:[#allocation15_spill] sm:$0xff] %v12602_v58  ;;  %v5674_v57 = vadd.f32 %v5673_v22, %v5585_v44  ;;  %v5497_v12 = vpop.f32.mrf.mxu0  ;;  %v5586_v50 = vpop.f32.mrf.mxu1  ;;  %v9966_v22 = vor.u32 %v10618_v33, %v9965_v14  ;;  %7064 = vmatpush.bf16.msrb.mxu3 %v10222_v48 }
 0x8f1   : > { %v5498_v15 = vadd.f32 %v5497_v12, %v12563_v21  ;;  %v10582_v12 = vld [vmem:[#allocation8 + $0x2c] sm:$0xf0] }
 0x8f2   : > { %v5763_v47 = vadd.f32 %v5762_v36, %v5674_v57  ;;  %v9821_v57 = vld [vmem:[#allocation8 + $0x20] sm:$0xf]  ;;  %6886 = vmatpush.bf16.msrb.mxu1 %v9966_v22 }
 0x8f3   : > { %v5587_v18 = vadd.f32 %v5586_v50, %v5498_v15  ;;  %v9949_v50 = vld [vmem:[#allocation8 + $0x120] sm:$0xf] }
 0x8f4   : > { %v5857_v56 = vmax.f32 %v5763_v47, 0.0  ;;  %v9822_v47 = vor.u32 %v10582_v12, %v9821_v57 }
 0x8f6   : > { %6798 = vmatpush.bf16.msrb.mxu0 %v9822_v47 }
 0x8f7   : > { %v5675_v8 = vpop.f32.mrf.mxu2  ;;  %v5764_v32 = vpop.f32.mrf.mxu3 }
 0x8f8   : > { %v5676_v34 = vadd.f32 %v5675_v8, %v5587_v18  ;;  %v5500_v3 = vpop.f32.mrf.mxu0  ;;  %v5589_v55 = vpop.f32.mrf.mxu1  ;;  %v10614_v18 = vld [vmem:[#allocation8 + $0x12c] sm:$0xf0]  ;;  %v10077_v8 = vld [vmem:[#allocation8 + $0x220] sm:$0xf] }
 0x8f9   : > { %v5501_v26 = vadd.f32 %v5500_v3, %v12563_v21 }
 0x8fa   : > { %v5765_v9 = vadd.f32 %v5764_v32, %v5676_v34  ;;  %v10646_v32 = vld [vmem:[#allocation8 + $0x22c] sm:$0xf0]  ;;  %v9950_v34 = vor.u32 %v10614_v18, %v9949_v50 }
 0x8fb   : > { %v5590_v30 = vadd.f32 %v5589_v55, %v5501_v26  ;;  %5539 = vmatmul.bf16.gmra.mxu0 %v13947_v24  ;;  %5628 = vmatmul.bf16.gmra.mxu1 %v13948_v53  ;;  %v10078_v3 = vor.u32 %v10646_v32, %v10077_v8  ;;  %v10205_v55 = vld [vmem:[#allocation8 + $0x320] sm:$0xf]  ;;  %v10678_v26 = vld [vmem:[#allocation8 + $0x32c] sm:$0xf0] }
 0x8fc   : > { %v5861_v19 = vmax.f32 %v5765_v9, 0.0  ;;  %5717 = vmatmul.bf16.gmra.mxu2 %v13949_v10  ;;  %5806 = vmatmul.bf16.gmra.mxu3 %v13950_v63  ;;  %v10206_v9 = vor.u32 %v10678_v26, %v10205_v55  ;;  %v10578_v24 = vld [vmem:[#allocation8 + $0xc] sm:$0xf0]  ;;  %v9933_v53 = vld [vmem:[#allocation8 + $0x100] sm:$0xf] }
 0x8fd   : > { %6976 = vmatpush.bf16.msrb.mxu2 %v10078_v3  ;;  %6887 = vmatpush.bf16.msrb.mxu1 %v9950_v34  ;;  %v10610_v63 = vld [vmem:[#allocation8 + $0x10c] sm:$0xf0] }
 0x8fe   : > { %v12610_v29 = vpack.c.bf16 %v5861_v19, %v5857_v56  ;;  %7065 = vmatpush.bf16.msrb.mxu3 %v10206_v9 }
 0x8ff   : > { %v5678_v25 = vpop.f32.mrf.mxu2  ;;  %v5767_v46 = vpop.f32.mrf.mxu3 }
 0x900   : > { %13951 = vst [vmem:[#allocation71_spill] sm:$0xff] %v12610_v29  ;;  %v5679_v1 = vadd.f32 %v5678_v25, %v5590_v30  ;;  %v5502_v44 = vpop.f32.mrf.mxu0  ;;  %v5591_v37 = vpop.f32.mrf.mxu1  ;;  %v9805_v30 = vld [vmem:[#allocation8] sm:$0xf] }
 0x901   : > { %v5503_v39 = vadd.f32 %v5502_v44, %v12563_v21  ;;  %v9806_v10 = vor.u32 %v10578_v24, %v9805_v30  ;;  %v10190_v44 = vor.u32 %v10674_v45, %v10189_v62  ;;  %6977 = vmatpush.bf16.msrb.mxu2 %v10062_v11  ;;  %v13955_v11 = vld [vmem:[#allocation52_spill] sm:$0xff] }
 0x902   : > { %v5768_v36 = vadd.f32 %v5767_v46, %v5679_v1  ;;  %v9934_v1 = vor.u32 %v10610_v63, %v9933_v53 }
 0x903   : > { %v5592_v15 = vadd.f32 %v5591_v37, %v5503_v39  ;;  %6799 = vmatpush.bf16.msrb.mxu0 %v9806_v10  ;;  %7066 = vmatpush.bf16.msrb.mxu3 %v10190_v44 }
 0x904   : > { %v5865_v48 = vmax.f32 %v5768_v36, 0.0  ;;  %6888 = vmatpush.bf16.msrb.mxu1 %v9934_v1 }
 0x907   : > { %v5680_v56 = vpop.f32.mrf.mxu2  ;;  %v5769_v19 = vpop.f32.mrf.mxu3 }
 0x908   : > { %v5681_v28 = vadd.f32 %v5680_v56, %v5592_v15  ;;  %v5505_v25 = vpop.f32.mrf.mxu0  ;;  %v5594_v46 = vpop.f32.mrf.mxu1 }
 0x909   : > { %v5506_v5 = vadd.f32 %v5505_v25, %v12563_v21 }
 0x90a   : > { %v5770_v37 = vadd.f32 %v5769_v19, %v5681_v28 }
 0x90b   : > { %v5595_v43 = vadd.f32 %v5594_v46, %v5506_v5  ;;  %5544 = vmatmul.bf16.gmra.mxu0 %v13825_v6  ;;  %5633 = vmatmul.bf16.gmra.mxu1 %v13826_v42  ;;  %v13954_v46 = vld [vmem:[#allocation35_spill] sm:$0xff]  ;;  %v13956_v5 = vld [vmem:[#allocation73_spill] sm:$0xff] }
 0x90c   : > { %v5869_v14 = vmax.f32 %v5770_v37, 0.0  ;;  %5722 = vmatmul.bf16.gmra.mxu2 %v12023_v20  ;;  %5811 = vmatmul.bf16.gmra.mxu3 %v12156_v41 }
 0x90e   : > { %v12618_v33 = vpack.c.bf16 %v5869_v14, %v5865_v48 }
 0x90f   : > { %v5683_v39 = vpop.f32.mrf.mxu2  ;;  %v5772_v22 = vpop.f32.mrf.mxu3 }
 0x910   : > { %13952 = vst [vmem:[#allocation79_spill] sm:$0xff] %v12618_v33  ;;  %v5684_v57 = vadd.f32 %v5683_v39, %v5595_v43  ;;  %v5507_v12 = vpop.f32.mrf.mxu0  ;;  %v5596_v50 = vpop.f32.mrf.mxu1 }
 0x911   : > { %v5508_v15 = vadd.f32 %v5507_v12, %v12563_v21 }
 0x912   : > { %v5773_v6 = vadd.f32 %v5772_v22, %v5684_v57 }
 0x913   : > { %v5597_v47 = vadd.f32 %v5596_v50, %v5508_v15 }
 0x914   : > { %v5873_v3 = vmax.f32 %v5773_v6, 0.0 }
 0x917   : > { %v5685_v42 = vpop.f32.mrf.mxu2  ;;  %v5774_v36 = vpop.f32.mrf.mxu3 }
 0x918   : > { %v5686_v18 = vadd.f32 %v5685_v42, %v5597_v47  ;;  %v5510_v8 = vpop.f32.mrf.mxu0  ;;  %v5599_v20 = vpop.f32.mrf.mxu1 }
 0x919   : > { %v5511_v41 = vadd.f32 %v5510_v8, %v12563_v21  ;;  %v13958_v8 = vld [vmem:[#allocation37_spill] sm:$0xff] }
 0x91a   : > { %v5775_v32 = vadd.f32 %v5774_v36, %v5686_v18 }
 0x91b   : > { %v5600_v34 = vadd.f32 %v5599_v20, %v5511_v41  ;;  %5549 = vmatmul.bf16.gmra.mxu0 %v13828_v16  ;;  %5638 = vmatmul.bf16.gmra.mxu1 %v13829_v60  ;;  %v13959_v20 = vld [vmem:[#allocation64_spill] sm:$0xff] }
 0x91c   : > { %v5877_v55 = vmax.f32 %v5775_v32, 0.0  ;;  %5727 = vmatmul.bf16.gmra.mxu2 %v12036_v54  ;;  %5816 = vmatmul.bf16.gmra.mxu3 %v12172_v59 }
 0x91e   : > { %v12626_v26 = vpack.c.bf16 %v5877_v55, %v5873_v3 }
 0x91f   : > { %v5688_v9 = vpop.f32.mrf.mxu2  ;;  %v5777_v30 = vpop.f32.mrf.mxu3 }
 0x920   : > { %13953 = vst [vmem:[#allocation26_spill] sm:$0xff] %v12626_v26  ;;  %v5689_v24 = vadd.f32 %v5688_v9, %v5600_v34  ;;  %v5512_v53 = vpop.f32.mrf.mxu0  ;;  %v5601_v56 = vpop.f32.mrf.mxu1  ;;  %v13960_v34 = vld [vmem:[#allocation62_spill] sm:$0xff] }
 0x921   : > { %v5513_v19 = vadd.f32 %v5512_v53, %v12563_v21 }
 0x922   : > { %v5778_v10 = vadd.f32 %v5777_v30, %v5689_v24 }
 0x923   : > { %v5602_v63 = vadd.f32 %v5601_v56, %v5513_v19 }
 0x924   : > { %v5881_v62 = vmax.f32 %v5778_v10, 0.0 }
 0x927   : > { %v5690_v16 = vpop.f32.mrf.mxu2  ;;  %v5779_v49 = vpop.f32.mrf.mxu3 }
 0x928   : > { %v5691_v60 = vadd.f32 %v5690_v16, %v5602_v63  ;;  %v5515_v4 = vpop.f32.mrf.mxu0  ;;  %v5604_v28 = vpop.f32.mrf.mxu1 }
 0x929   : > { %v5516_v54 = vadd.f32 %v5515_v4, %v12563_v21 }
 0x92a   : > { %v5780_v25 = vadd.f32 %v5779_v49, %v5691_v60 }
 0x92b   : > { %v5605_v59 = vadd.f32 %v5604_v28, %v5516_v54  ;;  %6800 = vmatmul.bf16.vlgmr.msrb.gmra.mxu0 %v13954_v46  ;;  %6889 = vmatmul.bf16.vlgmr.msrb.gmra.mxu1 %v13955_v11 }
 0x92c   : > { %v5885_v45 = vmax.f32 %v5780_v25, 0.0  ;;  %6978 = vmatmul.bf16.vlgmr.msrb.gmra.mxu2 %v13956_v5  ;;  %7067 = vmatmul.bf16.vlgmr.msrb.gmra.mxu3 %v12578_v23 }
 0x92e   : > { %v12634_v1 = vpack.c.bf16 %v5885_v45, %v5881_v62  ;;  %v13963_v62 = vld [vmem:[#allocation74_spill] sm:$0xff] }
 0x92f   : > { %v5693_v44 = vpop.f32.mrf.mxu2  ;;  %v5782_v37 = vpop.f32.mrf.mxu3 }
 0x930   : > { %13957 = vst [vmem:[#allocation16_spill] sm:$0xff] %v12634_v1  ;;  %v5694_v43 = vadd.f32 %v5693_v44, %v5605_v59  ;;  %v5517_v48 = vpop.f32.mrf.mxu0  ;;  %v5606_v14 = vpop.f32.mrf.mxu1  ;;  %v13962_v59 = vld [vmem:[#allocation38_spill] sm:$0xff] }
 0x931   : > { %v5518_v39 = vadd.f32 %v5517_v48, %v12563_v21 }
 0x932   : > { %v5783_v22 = vadd.f32 %v5782_v37, %v5694_v43  ;;  %v13964_v37 = vld [vmem:[#allocation61_spill] sm:$0xff] }
 0x933   : > { %v5607_v57 = vadd.f32 %v5606_v14, %v5518_v39 }
 0x934   : > { %v5889_v41 = vmax.f32 %v5783_v22, 0.0 }
 0x937   : > { %v5695_v12 = vpop.f32.mrf.mxu2  ;;  %v5784_v50 = vpop.f32.mrf.mxu3 }
 0x938   : > { %v5696_v15 = vadd.f32 %v5695_v12, %v5607_v57  ;;  %v5520_v6 = vpop.f32.mrf.mxu0  ;;  %v5609_v47 = vpop.f32.mrf.mxu1 }
 0x939   : > { %v5521_v42 = vadd.f32 %v5520_v6, %v12563_v21 }
 0x93a   : > { %v5785_v36 = vadd.f32 %v5784_v50, %v5696_v15 }
 0x93b   : > { %v5610_v18 = vadd.f32 %v5609_v47, %v5521_v42  ;;  %6805 = vmatmul.bf16.gmra.mxu0 %v13958_v8  ;;  %6894 = vmatmul.bf16.gmra.mxu1 %v13959_v20 }
 0x93c   : > { %v5893_v32 = vmax.f32 %v5785_v36, 0.0  ;;  %6983 = vmatmul.bf16.gmra.mxu2 %v13960_v34  ;;  %7072 = vmatmul.bf16.gmra.mxu3 %v12586_v17 }
 0x93e   : > { %v12642_v3 = vpack.c.bf16 %v5893_v32, %v5889_v41 }
 0x93f   : > { %v5698_v55 = vpop.f32.mrf.mxu2  ;;  %v5787_v9 = vpop.f32.mrf.mxu3 }
 0x940   : > { %13961 = vst [vmem:[#allocation72_spill] sm:$0xff] %v12642_v3  ;;  %v5699_v30 = vadd.f32 %v5698_v55, %v5610_v18  ;;  %v5522_v24 = vpop.f32.mrf.mxu0  ;;  %v5611_v53 = vpop.f32.mrf.mxu1 }
 0x941   : > { %v5523_v56 = vadd.f32 %v5522_v24, %v12563_v21 }
 0x942   : > { %v5788_v19 = vadd.f32 %v5787_v9, %v5699_v30  ;;  %v13966_v9 = vld [vmem:[#allocation39_spill] sm:$0xff]  ;;  %v13967_v30 = vld [vmem:[#allocation53_spill] sm:$0xff] }
 0x943   : > { %v5612_v10 = vadd.f32 %v5611_v53, %v5523_v56  ;;  %v13968_v56 = vld [vmem:[#allocation24_spill] sm:$0xff] }
 0x944   : > { %v5897_v45 = vmax.f32 %v5788_v19, 0.0 }
 0x947   : > { %v5700_v63 = vpop.f32.mrf.mxu2  ;;  %v5789_v16 = vpop.f32.mrf.mxu3 }
 0x948   : > { %v5701_v49 = vadd.f32 %v5700_v63, %v5612_v10  ;;  %v5525_v60 = vpop.f32.mrf.mxu0  ;;  %v5614_v4 = vpop.f32.mrf.mxu1  ;;  %v10668_v10 = vld [vmem:[#allocation8 + $0x2e4] sm:$0xf]  ;;  %v10175_v63 = vld [vmem:[#allocation8 + $0x2f0] sm:$0xf0] }
 0x949   : > { %v5526_v28 = vadd.f32 %v5525_v60, %v12563_v21  ;;  %v10178_v60 = vor.u32 %v10668_v10, %v10175_v63  ;;  %v13971_v10 = vld [vmem:[#allocation65_spill] sm:$0xff] }
 0x94a   : > { %v5790_v54 = vadd.f32 %v5789_v16, %v5701_v49 }
 0x94b   : > { %v5615_v25 = vadd.f32 %v5614_v4, %v5526_v28  ;;  %6810 = vmatmul.bf16.gmra.mxu0 %v13962_v59  ;;  %6899 = vmatmul.bf16.gmra.mxu1 %v13963_v62 }
 0x94c   : > { %v5901_v44 = vmax.f32 %v5790_v54, 0.0  ;;  %6988 = vmatmul.bf16.gmra.mxu2 %v13964_v37  ;;  %7077 = vmatmul.bf16.gmra.mxu3 %v12594_v13 }
 0x94d   : > { %7326 = vmatpush.bf16.msra.mxu2 %v10178_v60 }
 0x94e   : > { %v12650_v43 = vpack.c.bf16 %v5901_v44, %v5897_v45 }
 0x94f   : > { %v5703_v48 = vpop.f32.mrf.mxu2  ;;  %v5792_v14 = vpop.f32.mrf.mxu3 }
 0x950   : > { %13965 = vst [vmem:[#allocation80_spill] sm:$0xff] %v12650_v43  ;;  %v5704_v39 = vadd.f32 %v5703_v48, %v5615_v25  ;;  %v5527_v22 = vpop.f32.mrf.mxu0  ;;  %v5616_v57 = vpop.f32.mrf.mxu1  ;;  %v10604_v48 = vld [vmem:[#allocation8 + $0xe4] sm:$0xf] }
 0x951   : > { %v5528_v12 = vadd.f32 %v5527_v22, %v12563_v21  ;;  %v10700_v22 = vld [vmem:[#allocation8 + $0x3e4] sm:$0xf] }
 0x952   : > { %v5793_v50 = vadd.f32 %v5792_v14, %v5704_v39  ;;  %v9919_v14 = vld [vmem:[#allocation8 + $0xf0] sm:$0xf0] }
 0x953   : > { %v5617_v15 = vadd.f32 %v5616_v57, %v5528_v12  ;;  %v9922_v39 = vor.u32 %v10604_v48, %v9919_v14  ;;  %v10303_v57 = vld [vmem:[#allocation8 + $0x3f0] sm:$0xf0]  ;;  %v10636_v12 = vld [vmem:[#allocation8 + $0x1e4] sm:$0xf] }
 0x954   : > { %v5905_v24 = vmax.f32 %v5793_v50, 0.0  ;;  %v10306_v50 = vor.u32 %v10700_v22, %v10303_v57 }
 0x955   : > { %7148 = vmatpush.bf16.msra.mxu0 %v9922_v39 }
 0x956   : > { %7415 = vmatpush.bf16.msra.mxu3 %v10306_v50 }
 0x957   : > { %v5705_v6 = vpop.f32.mrf.mxu2  ;;  %v5794_v47 = vpop.f32.mrf.mxu3 }
 0x958   : > { %v5706_v42 = vadd.f32 %v5705_v6, %v5617_v15  ;;  %v5530_v36 = vpop.f32.mrf.mxu0  ;;  %v5619_v18 = vpop.f32.mrf.mxu1  ;;  %v10047_v15 = vld [vmem:[#allocation8 + $0x1f0] sm:$0xf0] }
 0x959   : > { %v5531_v41 = vadd.f32 %v5530_v36, %v12563_v21 }
 0x95a   : > { %v5795_v32 = vadd.f32 %v5794_v47, %v5706_v42  ;;  %v10050_v42 = vor.u32 %v10636_v12, %v10047_v15 }
 0x95b   : > { %v5620_v55 = vadd.f32 %v5619_v18, %v5531_v41  ;;  %6815 = vmatmul.bf16.gmra.mxu0 %v13966_v9  ;;  %6904 = vmatmul.bf16.gmra.mxu1 %v13967_v30 }
 0x95c   : > { %v5909_v53 = vmax.f32 %v5795_v32, 0.0  ;;  %6993 = vmatmul.bf16.gmra.mxu2 %v13968_v56  ;;  %7082 = vmatmul.bf16.gmra.mxu3 %v12602_v58 }
 0x95d   : > { %7237 = vmatpush.bf16.msra.mxu1 %v10050_v42  ;;  %v13974_v42 = vld [vmem:[#allocation43_spill] sm:$0xff] }
 0x95e   : > { %v12658_v19 = vpack.c.bf16 %v5909_v53, %v5905_v24  ;;  %v13970_v53 = vld [vmem:[#allocation42_spill] sm:$0xff] }
 0x95f   : > { %v5708_v16 = vpop.f32.mrf.mxu2  ;;  %v5797_v49 = vpop.f32.mrf.mxu3 }
 0x960   : > { %13969 = vst [vmem:[#allocation27_spill] sm:$0xff] %v12658_v19  ;;  %v5709_v4 = vadd.f32 %v5708_v16, %v5620_v55  ;;  %v5532_v28 = vpop.f32.mrf.mxu0  ;;  %v5621_v54 = vpop.f32.mrf.mxu1 }
 0x961   : > { %v5533_v25 = vadd.f32 %v5532_v28, %v12563_v21 }
 0x962   : > { %v5798_v45 = vadd.f32 %v5797_v49, %v5709_v4  ;;  %v13972_v49 = vld [vmem:[#allocation23_spill] sm:$0xff] }
 0x963   : > { %v5622_v44 = vadd.f32 %v5621_v54, %v5533_v25 }
 0x964   : > { %v5913_v63 = vmax.f32 %v5798_v45, 0.0 }
 0x967   : > { %v5710_v6 = vpop.f32.mrf.mxu2  ;;  %v5799_v47 = vpop.f32.mrf.mxu3 }
 0x968   : > { %v5711_v36 = vadd.f32 %v5710_v6, %v5622_v44  ;;  %v5535_v18 = vpop.f32.mrf.mxu0  ;;  %v5624_v41 = vpop.f32.mrf.mxu1 }
 0x969   : > { %v5536_v32 = vadd.f32 %v5535_v18, %v12563_v21 }
 0x96a   : > { %v5800_v55 = vadd.f32 %v5799_v47, %v5711_v36  ;;  %v13975_v36 = vld [vmem:[#allocation75_spill] sm:$0xff] }
 0x96b   : > { %v5625_v24 = vadd.f32 %v5624_v41, %v5536_v32  ;;  %6820 = vmatmul.bf16.gmra.mxu0 %v13970_v53  ;;  %6909 = vmatmul.bf16.gmra.mxu1 %v13971_v10 }
 0x96c   : > { %v5917_v16 = vmax.f32 %v5800_v55, 0.0  ;;  %6998 = vmatmul.bf16.gmra.mxu2 %v13972_v49  ;;  %7087 = vmatmul.bf16.gmra.mxu3 %v12610_v29  ;;  %v10664_v55 = vld [vmem:[#allocation8 + $0x2c4] sm:$0xf] }
 0x96e   : > { %v12666_v60 = vpack.c.bf16 %v5917_v16, %v5913_v63 }
 0x96f   : > { %v5713_v4 = vpop.f32.mrf.mxu2  ;;  %v5802_v28 = vpop.f32.mrf.mxu3 }
 0x970   : > { %13973 = vst [vmem:[#allocation17_spill] sm:$0xff] %v12666_v60  ;;  %v5714_v54 = vadd.f32 %v5713_v4, %v5625_v24  ;;  %v5537_v25 = vpop.f32.mrf.mxu0  ;;  %v5626_v44 = vpop.f32.mrf.mxu1  ;;  %v10159_v24 = vld [vmem:[#allocation8 + $0x2d0] sm:$0xf0] }
 0x971   : > { %v5538_v48 = vadd.f32 %v5537_v25, %v12563_v21  ;;  %v10162_v4 = vor.u32 %v10664_v55, %v10159_v24 }
 0x972   : > { %v5803_v14 = vadd.f32 %v5802_v28, %v5714_v54 }
 0x973   : > { %v5627_v39 = vadd.f32 %v5626_v44, %v5538_v48  ;;  %7327 = vmatpush.bf16.msra.mxu2 %v10162_v4 }
 0x974   : > { %v5921_v18 = vmax.f32 %v5803_v14, 0.0 }
 0x977   : > { %v5715_v22 = vpop.f32.mrf.mxu2  ;;  %v5804_v57 = vpop.f32.mrf.mxu3 }
 0x978   : > { %v5716_v12 = vadd.f32 %v5715_v22, %v5627_v39  ;;  %v5540_v45 = vpop.f32.mrf.mxu0  ;;  %v5629_v50 = vpop.f32.mrf.mxu1  ;;  %v10600_v39 = vld [vmem:[#allocation8 + $0xc4] sm:$0xf]  ;;  %v9903_v22 = vld [vmem:[#allocation8 + $0xd0] sm:$0xf0] }
 0x979   : > { %v5541_v15 = vadd.f32 %v5540_v45, %v12563_v21  ;;  %v10287_v45 = vld [vmem:[#allocation8 + $0x3d0] sm:$0xf0] }
 0x97a   : > { %v5805_v6 = vadd.f32 %v5804_v57, %v5716_v12  ;;  %v9906_v57 = vor.u32 %v10600_v39, %v9903_v22  ;;  %v10696_v12 = vld [vmem:[#allocation8 + $0x3c4] sm:$0xf] }
 0x97b   : > { %v5630_v47 = vadd.f32 %v5629_v50, %v5541_v15  ;;  %6825 = vmatmul.bf16.gmra.mxu0 %v13974_v42  ;;  %6914 = vmatmul.bf16.gmra.mxu1 %v13975_v36  ;;  %v10632_v50 = vld [vmem:[#allocation8 + $0x1c4] sm:$0xf]  ;;  %v10290_v15 = vor.u32 %v10696_v12, %v10287_v45 }
 0x97c   : > { %v5925_v41 = vmax.f32 %v5805_v6, 0.0  ;;  %7003 = vmatmul.bf16.gmra.mxu2 %v12487_v2  ;;  %7092 = vmatmul.bf16.gmra.mxu3 %v12618_v33  ;;  %v10031_v6 = vld [vmem:[#allocation8 + $0x1d0] sm:$0xf0] }
 0x97d   : > { %7149 = vmatpush.bf16.msra.mxu0 %v9906_v57  ;;  %v10034_v55 = vor.u32 %v10632_v50, %v10031_v6  ;;  %7416 = vmatpush.bf16.msra.mxu3 %v10290_v15 }
 0x97e   : > { %v12674_v32 = vpack.c.bf16 %v5925_v41, %v5921_v18 }
 0x97f   : > { %v5718_v63 = vpop.f32.mrf.mxu2  ;;  %v5807_v16 = vpop.f32.mrf.mxu3  ;;  %7238 = vmatpush.bf16.msra.mxu1 %v10034_v55 }
 0x980   : > { %13976 = vst [vmem:[#allocation40_spill] sm:$0xff] %v12674_v32  ;;  %v5719_v28 = vadd.f32 %v5718_v63, %v5630_v47  ;;  %v5542_v54 = vpop.f32.mrf.mxu0  ;;  %v5631_v25 = vpop.f32.mrf.mxu1 }
 0x981   : > { %v5543_v44 = vadd.f32 %v5542_v54, %v12563_v21  ;;  %v13977_v54 = vld [vmem:[#allocation44_spill] sm:$0xff] }
 0x982   : > { %v5808_v48 = vadd.f32 %v5807_v16, %v5719_v28 }
 0x983   : > { %v5632_v14 = vadd.f32 %v5631_v25, %v5543_v44  ;;  %v13978_v25 = vld [vmem:[#allocation54_spill] sm:$0xff] }
 0x984   : > { %v5929_v44 = vmax.f32 %v5808_v48, 0.0 }
 0x987   : > { %v5720_v18 = vpop.f32.mrf.mxu2  ;;  %v5809_v41 = vpop.f32.mrf.mxu3 }
 0x988   : > { %v5721_v47 = vadd.f32 %v5720_v18, %v5632_v14  ;;  %v5545_v24 = vpop.f32.mrf.mxu0  ;;  %v5634_v63 = vpop.f32.mrf.mxu1 }
 0x989   : > { %v5546_v4 = vadd.f32 %v5545_v24, %v12563_v21 }
 0x98a   : > { %v5810_v16 = vadd.f32 %v5809_v41, %v5721_v47 }
 0x98b   : > { %v5635_v28 = vadd.f32 %v5634_v63, %v5546_v4  ;;  %6830 = vmatmul.bf16.gmra.mxu0 %v13977_v54  ;;  %6919 = vmatmul.bf16.gmra.mxu1 %v13978_v25 }
 0x98c   : > { %v5933_v39 = vmax.f32 %v5810_v16, 0.0  ;;  %7008 = vmatmul.bf16.gmra.mxu2 %v12495_v35  ;;  %7097 = vmatmul.bf16.gmra.mxu3 %v12626_v26 }
 0x98e   : > { %v12682_v22 = vpack.c.bf16 %v5933_v39, %v5929_v44  ;;  %v13980_v44 = vld [vmem:[#allocation45_spill] sm:$0xff]  ;;  %v13981_v39 = vld [vmem:[#allocation66_spill] sm:$0xff] }
 0x98f   : > { %v5723_v14 = vpop.f32.mrf.mxu2  ;;  %v5812_v57 = vpop.f32.mrf.mxu3 }
 0x990   : > { %13979 = vst [vmem:[#allocation19_spill] sm:$0xff] %v12682_v22  ;;  %v5724_v12 = vadd.f32 %v5723_v14, %v5635_v28  ;;  %v5547_v45 = vpop.f32.mrf.mxu0  ;;  %v5636_v50 = vpop.f32.mrf.mxu1 }
 0x991   : > { %v5548_v15 = vadd.f32 %v5547_v45, %v12563_v21 }
 0x992   : > { %v5813_v6 = vadd.f32 %v5812_v57, %v5724_v12  ;;  %v10660_v57 = vld [vmem:[#allocation8 + $0x2a4] sm:$0xf]  ;;  %v10143_v12 = vld [vmem:[#allocation8 + $0x2b0] sm:$0xf0] }
 0x993   : > { %v5637_v18 = vadd.f32 %v5636_v50, %v5548_v15  ;;  %v10146_v45 = vor.u32 %v10660_v57, %v10143_v12  ;;  %v10692_v12 = vld [vmem:[#allocation8 + $0x3a4] sm:$0xf] }
 0x994   : > { %v5937_v28 = vmax.f32 %v5813_v6, 0.0  ;;  %v12696_v6 = vld [vmem:[%s13356_s8] sm:$0xf] }
 0x995   : > { %7328 = vmatpush.bf16.msra.mxu2 %v10146_v45  ;;  %v10271_v45 = vld [vmem:[#allocation8 + $0x3b0] sm:$0xf0] }
 0x997   : > { %v5725_v41 = vpop.f32.mrf.mxu2  ;;  %v5814_v55 = vpop.f32.mrf.mxu3 }
 0x998   : > { %v5726_v47 = vadd.f32 %v5725_v41, %v5637_v18  ;;  %v5550_v48 = vpop.f32.mrf.mxu0  ;;  %v5639_v24 = vpop.f32.mrf.mxu1 }
 0x999   : > { %v5551_v63 = vadd.f32 %v5550_v48, %v12563_v21 }
 0x99a   : > { %v5815_v4 = vadd.f32 %v5814_v55, %v5726_v47 }
 0x99b   : > { %v5640_v16 = vadd.f32 %v5639_v24, %v5551_v63  ;;  %6835 = vmatmul.bf16.gmra.mxu0 %v13980_v44  ;;  %6924 = vmatmul.bf16.gmra.mxu1 %v13981_v39 }
 0x99c   : > { %v5941_v14 = vmax.f32 %v5815_v4, 0.0  ;;  %7013 = vmatmul.bf16.gmra.mxu2 %v12503_v31  ;;  %7102 = vmatmul.bf16.gmra.mxu3 %v12634_v1  ;;  %v12699_v4 = vperm.slane %v12696_v6, 0  ;;  %v10015_v1 = vld [vmem:[#allocation8 + $0x1b0] sm:$0xf0] }
 0x99e   : > { %v12690_v50 = vpack.c.bf16 %v5941_v14, %v5937_v28  ;;  %v10596_v28 = vld [vmem:[#allocation8 + $0xa4] sm:$0xf]  ;;  %v9887_v14 = vld [vmem:[#allocation8 + $0xb0] sm:$0xf0] }
 0x99f   : > { %v5728_v15 = vpop.f32.mrf.mxu2  ;;  %v5817_v18 = vpop.f32.mrf.mxu3  ;;  %v9890_v57 = vor.u32 %v10596_v28, %v9887_v14  ;;  %v13984_v28 = vld [vmem:[#allocation76_spill] sm:$0xff] }
 0x9a0   : > { %13982 = vst [vmem:[#allocation31_spill] sm:$0xff] %v12690_v50  ;;  %v5729_v41 = vadd.f32 %v5728_v15, %v5640_v16  ;;  %v5552_v55 = vpop.f32.mrf.mxu0  ;;  %v5641_v47 = vpop.f32.mrf.mxu1  ;;  %v10628_v16 = vld [vmem:[#allocation8 + $0x1a4] sm:$0xf]  ;;  %v10274_v15 = vor.u32 %v10692_v12, %v10271_v45 }
 0x9a1   : > { %v5553_v48 = vadd.f32 %v5552_v55, %v12563_v21  ;;  %7150 = vmatpush.bf16.msra.mxu0 %v9890_v57  ;;  %v10018_v55 = vor.u32 %v10628_v16, %v10015_v1 }
 0x9a2   : > { %v5818_v24 = vadd.f32 %v5817_v18, %v5729_v41  ;;  %7417 = vmatpush.bf16.msra.mxu3 %v10274_v15 }
 0x9a3   : > { %v5642_v63 = vadd.f32 %v5641_v47, %v5553_v48  ;;  %7239 = vmatpush.bf16.msra.mxu1 %v10018_v55  ;;  %v13983_v48 = vld [vmem:[#allocation46_spill] sm:$0xff] }
 0x9a4   : > { %v5945_v14 = vmax.f32 %v5818_v24, 0.0 }
 0x9a7   : > { %v5730_v31 = vpop.f32.mrf.mxu2  ;;  %v5819_v21 = vpop.f32.mrf.mxu3 }
 0x9a8   : > { %v5731_v39 = vadd.f32 %v5730_v31, %v5642_v63  ;;  %v6801_v44 = vpop.f32.mrf.mxu0  ;;  %v6890_v26 = vpop.f32.mrf.mxu1 }
 0x9a9   : > { %v6802_v18 = vadd.f32 %v6801_v44, %v12699_v4 }
 0x9aa   : > { %v5820_v41 = vadd.f32 %v5819_v21, %v5731_v39 }
 0x9ab   : > { %v6891_v47 = vadd.f32 %v6890_v26, %v6802_v18  ;;  %6840 = vmatmul.bf16.gmra.mxu0 %v13983_v48  ;;  %6929 = vmatmul.bf16.gmra.mxu1 %v13984_v28 }
 0x9ac   : > { %v5949_v12 = vmax.f32 %v5820_v41, 0.0  ;;  %7018 = vmatmul.bf16.gmra.mxu2 %v12511_v61  ;;  %7107 = vmatmul.bf16.gmra.mxu3 %v12642_v3 }
 0x9ae   : > { %v12706_v1 = vpack.c.bf16 %v5949_v12, %v5945_v14  ;;  %v13986_v14 = vld [vmem:[#allocation47_spill] sm:$0xff] }
 0x9af   : > { %v6979_v31 = vpop.f32.mrf.mxu2  ;;  %v7068_v63 = vpop.f32.mrf.mxu3  ;;  %v13987_v12 = vld [vmem:[#allocation55_spill] sm:$0xff] }
 0x9b0   : > { %13985 = vst [vmem:[#allocation59_spill] sm:$0xff] %v12706_v1  ;;  %v6980_v57 = vadd.f32 %v6979_v31, %v6891_v47  ;;  %v6803_v45 = vpop.f32.mrf.mxu0  ;;  %v6892_v44 = vpop.f32.mrf.mxu1 }
 0x9b1   : > { %v6804_v39 = vadd.f32 %v6803_v45, %v12699_v4 }
 0x9b2   : > { %v7069_v26 = vadd.f32 %v7068_v63, %v6980_v57  ;;  %v10656_v63 = vld [vmem:[#allocation8 + $0x284] sm:$0xf]  ;;  %v10127_v57 = vld [vmem:[#allocation8 + $0x290] sm:$0xf0] }
 0x9b3   : > { %v6893_v16 = vadd.f32 %v6892_v44, %v6804_v39  ;;  %v10130_v45 = vor.u32 %v10656_v63, %v10127_v57  ;;  %v9999_v63 = vld [vmem:[#allocation8 + $0x190] sm:$0xf0] }
 0x9b4   : > { %v8216_v47 = vmax.f32 %v7069_v26, 0.0 }
 0x9b5   : > { %7329 = vmatpush.bf16.msra.mxu2 %v10130_v45 }
 0x9b7   : > { %v6981_v15 = vpop.f32.mrf.mxu2  ;;  %v7070_v21 = vpop.f32.mrf.mxu3 }
 0x9b8   : > { %v6982_v55 = vadd.f32 %v6981_v15, %v6893_v16  ;;  %v6806_v24 = vpop.f32.mrf.mxu0  ;;  %v6895_v18 = vpop.f32.mrf.mxu1 }
 0x9b9   : > { %v6807_v41 = vadd.f32 %v6806_v24, %v12699_v4 }
 0x9ba   : > { %v7071_v61 = vadd.f32 %v7070_v21, %v6982_v55 }
 0x9bb   : > { %v6896_v3 = vadd.f32 %v6895_v18, %v6807_v41  ;;  %6845 = vmatmul.bf16.gmra.mxu0 %v13986_v14  ;;  %6934 = vmatmul.bf16.gmra.mxu1 %v13987_v12  ;;  %v9871_v41 = vld [vmem:[#allocation8 + $0x90] sm:$0xf0]  ;;  %v10688_v12 = vld [vmem:[#allocation8 + $0x384] sm:$0xf] }
 0x9bc   : > { %v8220_v31 = vmax.f32 %v7071_v61, 0.0  ;;  %7023 = vmatmul.bf16.gmra.mxu2 %v12519_v38  ;;  %7112 = vmatmul.bf16.gmra.mxu3 %v12650_v43  ;;  %v10592_v61 = vld [vmem:[#allocation8 + $0x84] sm:$0xf]  ;;  %v10255_v43 = vld [vmem:[#allocation8 + $0x390] sm:$0xf0] }
 0x9bd   : > { %v9874_v38 = vor.u32 %v10592_v61, %v9871_v41  ;;  %v10624_v14 = vld [vmem:[#allocation8 + $0x184] sm:$0xf]  ;;  %v10258_v28 = vor.u32 %v10688_v12, %v10255_v43 }
 0x9be   : > { %v12714_v44 = vpack.c.bf16 %v8220_v31, %v8216_v47  ;;  %v10002_v57 = vor.u32 %v10624_v14, %v9999_v63 }
 0x9bf   : > { %v6984_v39 = vpop.f32.mrf.mxu2  ;;  %v7073_v16 = vpop.f32.mrf.mxu3  ;;  %7151 = vmatpush.bf16.msra.mxu0 %v9874_v38  ;;  %7418 = vmatpush.bf16.msra.mxu3 %v10258_v28 }
 0x9c0   : > { %13988 = vst [vmem:[#allocation41_spill] sm:$0xff] %v12714_v44  ;;  %v6985_v15 = vadd.f32 %v6984_v39, %v6896_v3  ;;  %v6808_v21 = vpop.f32.mrf.mxu0  ;;  %v6897_v55 = vpop.f32.mrf.mxu1  ;;  %7240 = vmatpush.bf16.msra.mxu1 %v10002_v57 }
 0x9c1   : > { %v6809_v24 = vadd.f32 %v6808_v21, %v12699_v4 }
 0x9c2   : > { %v7074_v18 = vadd.f32 %v7073_v16, %v6985_v15 }
 0x9c3   : > { %v6898_v26 = vadd.f32 %v6897_v55, %v6809_v24  ;;  %v13989_v55 = vld [vmem:[#allocation48_spill] sm:$0xff]  ;;  %v13990_v24 = vld [vmem:[#allocation67_spill] sm:$0xff] }
 0x9c4   : > { %v8224_v61 = vmax.f32 %v7074_v18, 0.0 }
 0x9c7   : > { %v6986_v47 = vpop.f32.mrf.mxu2  ;;  %v7075_v31 = vpop.f32.mrf.mxu3 }
 0x9c8   : > { %v6987_v45 = vadd.f32 %v6986_v47, %v6898_v26  ;;  %v6811_v3 = vpop.f32.mrf.mxu0  ;;  %v6900_v39 = vpop.f32.mrf.mxu1 }
 0x9c9   : > { %v6812_v21 = vadd.f32 %v6811_v3, %v12699_v4 }
 0x9ca   : > { %v7076_v16 = vadd.f32 %v7075_v31, %v6987_v45 }
 0x9cb   : > { %v6901_v15 = vadd.f32 %v6900_v39, %v6812_v21  ;;  %6850 = vmatmul.bf16.gmra.mxu0 %v13989_v55  ;;  %6939 = vmatmul.bf16.gmra.mxu1 %v13990_v24 }
 0x9cc   : > { %v8228_v43 = vmax.f32 %v7076_v16, 0.0  ;;  %7028 = vmatmul.bf16.gmra.mxu2 %v12527_v52  ;;  %7117 = vmatmul.bf16.gmra.mxu3 %v12658_v19 }
 0x9ce   : > { %v12722_v38 = vpack.c.bf16 %v8228_v43, %v8224_v61  ;;  %v13992_v61 = vld [vmem:[#allocation49_spill] sm:$0xff] }
 0x9cf   : > { %v6989_v14 = vpop.f32.mrf.mxu2  ;;  %v7078_v12 = vpop.f32.mrf.mxu3  ;;  %v13993_v43 = vld [vmem:[#allocation77_spill] sm:$0xff] }
 0x9d0   : > { %13991 = vst [vmem:[#allocation20_spill] sm:$0xff] %v12722_v38  ;;  %v6990_v28 = vadd.f32 %v6989_v14, %v6901_v15  ;;  %v6813_v26 = vpop.f32.mrf.mxu0  ;;  %v6902_v41 = vpop.f32.mrf.mxu1 }
 0x9d1   : > { %v6814_v63 = vadd.f32 %v6813_v26, %v12699_v4 }
 0x9d2   : > { %v7079_v47 = vadd.f32 %v7078_v12, %v6990_v28  ;;  %v10652_v12 = vld [vmem:[#allocation8 + $0x264] sm:$0xf]  ;;  %v10111_v28 = vld [vmem:[#allocation8 + $0x270] sm:$0xf0] }
 0x9d3   : > { %v6903_v31 = vadd.f32 %v6902_v41, %v6814_v63  ;;  %v10114_v26 = vor.u32 %v10652_v12, %v10111_v28  ;;  %v9983_v12 = vld [vmem:[#allocation8 + $0x170] sm:$0xf0] }
 0x9d4   : > { %v8232_v15 = vmax.f32 %v7079_v47, 0.0 }
 0x9d5   : > { %7330 = vmatpush.bf16.msra.mxu2 %v10114_v26 }
 0x9d7   : > { %v6991_v57 = vpop.f32.mrf.mxu2  ;;  %v7080_v45 = vpop.f32.mrf.mxu3 }
 0x9d8   : > { %v6992_v3 = vadd.f32 %v6991_v57, %v6903_v31  ;;  %v6816_v18 = vpop.f32.mrf.mxu0  ;;  %v6905_v39 = vpop.f32.mrf.mxu1 }
 0x9d9   : > { %v6817_v21 = vadd.f32 %v6816_v18, %v12699_v4 }
 0x9da   : > { %v7081_v16 = vadd.f32 %v7080_v45, %v6992_v3 }
 0x9db   : > { %v6906_v44 = vadd.f32 %v6905_v39, %v6817_v21  ;;  %6855 = vmatmul.bf16.gmra.mxu0 %v13992_v61  ;;  %6944 = vmatmul.bf16.gmra.mxu1 %v13993_v43  ;;  %v10588_v21 = vld [vmem:[#allocation8 + $0x64] sm:$0xf] }
 0x9dc   : > { %v8236_v14 = vmax.f32 %v7081_v16, 0.0  ;;  %7033 = vmatmul.bf16.gmra.mxu2 %v12535_v0  ;;  %7122 = vmatmul.bf16.gmra.mxu3 %v12666_v60  ;;  %v9855_v16 = vld [vmem:[#allocation8 + $0x70] sm:$0xf0]  ;;  %v10684_v0 = vld [vmem:[#allocation8 + $0x364] sm:$0xf] }
 0x9dd   : > { %v9858_v38 = vor.u32 %v10588_v21, %v9855_v16  ;;  %v10239_v60 = vld [vmem:[#allocation8 + $0x370] sm:$0xf0]  ;;  %v10620_v43 = vld [vmem:[#allocation8 + $0x164] sm:$0xf] }
 0x9de   : > { %v12730_v41 = vpack.c.bf16 %v8236_v14, %v8232_v15  ;;  %v10242_v61 = vor.u32 %v10684_v0, %v10239_v60  ;;  %v9986_v28 = vor.u32 %v10620_v43, %v9983_v12 }
 0x9df   : > { %v6994_v63 = vpop.f32.mrf.mxu2  ;;  %v7083_v31 = vpop.f32.mrf.mxu3  ;;  %7152 = vmatpush.bf16.msra.mxu0 %v9858_v38 }
 0x9e0   : > { %13994 = vst [vmem:[#allocation32_spill] sm:$0xff] %v12730_v41  ;;  %v6995_v57 = vadd.f32 %v6994_v63, %v6906_v44  ;;  %v6818_v45 = vpop.f32.mrf.mxu0  ;;  %v6907_v3 = vpop.f32.mrf.mxu1  ;;  %7419 = vmatpush.bf16.msra.mxu3 %v10242_v61  ;;  %7241 = vmatpush.bf16.msra.mxu1 %v9986_v28 }
 0x9e1   : > { %v6819_v18 = vadd.f32 %v6818_v45, %v12699_v4 }
 0x9e2   : > { %v7084_v39 = vadd.f32 %v7083_v31, %v6995_v57 }
 0x9e3   : > { %v6908_v47 = vadd.f32 %v6907_v3, %v6819_v18  ;;  %v13995_v3 = vld [vmem:[#allocation50_spill] sm:$0xff]  ;;  %v13996_v18 = vld [vmem:[#allocation56_spill] sm:$0xff] }
 0x9e4   : > { %v8240_v21 = vmax.f32 %v7084_v39, 0.0 }
 0x9e7   : > { %v6996_v15 = vpop.f32.mrf.mxu2  ;;  %v7085_v14 = vpop.f32.mrf.mxu3 }
 0x9e8   : > { %v6997_v26 = vadd.f32 %v6996_v15, %v6908_v47  ;;  %v6821_v44 = vpop.f32.mrf.mxu0  ;;  %v6910_v63 = vpop.f32.mrf.mxu1 }
 0x9e9   : > { %v6822_v45 = vadd.f32 %v6821_v44, %v12699_v4 }
 0x9ea   : > { %v7086_v31 = vadd.f32 %v7085_v14, %v6997_v26 }
 0x9eb   : > { %v6911_v57 = vadd.f32 %v6910_v63, %v6822_v45  ;;  %6860 = vmatmul.bf16.gmra.mxu0 %v13995_v3  ;;  %6949 = vmatmul.bf16.gmra.mxu1 %v13996_v18  ;;  %v10207_v18 = vld [vmem:[#allocation8 + $0x330] sm:$0xf0] }
 0x9ec   : > { %v8244_v0 = vmax.f32 %v7086_v31, 0.0  ;;  %7038 = vmatmul.bf16.gmra.mxu2 %v12543_v51  ;;  %7127 = vmatmul.bf16.gmra.mxu3 %v12674_v32  ;;  %v10079_v32 = vld [vmem:[#allocation8 + $0x230] sm:$0xf0] }
 0x9ee   : > { %v12738_v60 = vpack.c.bf16 %v8244_v0, %v8240_v21  ;;  %v13998_v21 = vld [vmem:[#allocation51_spill] sm:$0xff]  ;;  %v13999_v0 = vld [vmem:[#allocation68_spill] sm:$0xff] }
 0x9ef   : > { %v6999_v38 = vpop.f32.mrf.mxu2  ;;  %v7088_v43 = vpop.f32.mrf.mxu3 }
 0x9f0   : > { %13997 = vst [vmem:[#allocation60_spill] sm:$0xff] %v12738_v60  ;;  %v7000_v61 = vadd.f32 %v6999_v38, %v6911_v57  ;;  %v6823_v47 = vpop.f32.mrf.mxu0  ;;  %v6912_v16 = vpop.f32.mrf.mxu1 }
 0x9f1   : > { %v6824_v12 = vadd.f32 %v6823_v47, %v12699_v4 }
 0x9f2   : > { %v7089_v15 = vadd.f32 %v7088_v43, %v7000_v61  ;;  %v10648_v43 = vld [vmem:[#allocation8 + $0x244] sm:$0xf]  ;;  %v10095_v61 = vld [vmem:[#allocation8 + $0x250] sm:$0xf0] }
 0x9f3   : > { %v6913_v14 = vadd.f32 %v6912_v16, %v6824_v12  ;;  %v10098_v47 = vor.u32 %v10648_v43, %v10095_v61  ;;  %v10584_v16 = vld [vmem:[#allocation8 + $0x44] sm:$0xf]  ;;  %v9839_v12 = vld [vmem:[#allocation8 + $0x50] sm:$0xf0] }
 0x9f4   : > { %v8248_v57 = vmax.f32 %v7089_v15, 0.0  ;;  %v9967_v15 = vld [vmem:[#allocation8 + $0x150] sm:$0xf0]  ;;  %v10612_v61 = vld [vmem:[#allocation8 + $0x124] sm:$0xf] }
 0x9f5   : > { %7331 = vmatpush.bf16.msra.mxu2 %v10098_v47 }
 0x9f7   : > { %v7001_v28 = vpop.f32.mrf.mxu2  ;;  %v7090_v26 = vpop.f32.mrf.mxu3 }
 0x9f8   : > { %v7002_v44 = vadd.f32 %v7001_v28, %v6913_v14  ;;  %v6826_v39 = vpop.f32.mrf.mxu0  ;;  %v6915_v63 = vpop.f32.mrf.mxu1  ;;  %v10680_v14 = vld [vmem:[#allocation8 + $0x344] sm:$0xf] }
 0x9f9   : > { %v6827_v45 = vadd.f32 %v6826_v39, %v12699_v4  ;;  %v9842_v39 = vor.u32 %v10584_v16, %v9839_v12  ;;  %v9951_v16 = vld [vmem:[#allocation8 + $0x130] sm:$0xf0]  ;;  %v10644_v12 = vld [vmem:[#allocation8 + $0x224] sm:$0xf] }
 0x9fa   : > { %v7091_v31 = vadd.f32 %v7090_v26, %v7002_v44  ;;  %v9954_v51 = vor.u32 %v10612_v61, %v9951_v16  ;;  %v10672_v61 = vld [vmem:[#allocation8 + $0x304] sm:$0xf] }
 0x9fb   : > { %v6916_v41 = vadd.f32 %v6915_v63, %v6827_v45  ;;  %6865 = vmatmul.bf16.gmra.mxu0 %v13998_v21  ;;  %6954 = vmatmul.bf16.gmra.mxu1 %v13999_v0  ;;  %v10223_v63 = vld [vmem:[#allocation8 + $0x350] sm:$0xf0]  ;;  %v10616_v45 = vld [vmem:[#allocation8 + $0x144] sm:$0xf] }
 0x9fc   : > { %v8252_v38 = vmax.f32 %v7091_v31, 0.0  ;;  %7043 = vmatmul.bf16.gmra.mxu2 %v12551_v40  ;;  %7132 = vmatmul.bf16.gmra.mxu3 %v12682_v22  ;;  %v10226_v0 = vor.u32 %v10680_v14, %v10223_v63  ;;  %v9970_v22 = vor.u32 %v10616_v45, %v9967_v15  ;;  %v10063_v45 = vld [vmem:[#allocation8 + $0x210] sm:$0xf0] }
 0x9fd   : > { %7153 = vmatpush.bf16.msra.mxu0 %v9842_v39 }
 0x9fe   : > { %v12746_v28 = vpack.c.bf16 %v8252_v38, %v8248_v57  ;;  %7420 = vmatpush.bf16.msra.mxu3 %v10226_v0  ;;  %7242 = vmatpush.bf16.msra.mxu1 %v9970_v22  ;;  %v10580_v57 = vld [vmem:[#allocation8 + $0x24] sm:$0xf]  ;;  %v9823_v38 = vld [vmem:[#allocation8 + $0x30] sm:$0xf0] }
 0x9ff   : > { %v7004_v26 = vpop.f32.mrf.mxu2  ;;  %v7093_v44 = vpop.f32.mrf.mxu3  ;;  %v9826_v47 = vor.u32 %v10580_v57, %v9823_v38  ;;  %v10608_v0 = vld [vmem:[#allocation8 + $0x104] sm:$0xf] }
 0xa00   : > { %14000 = vst [vmem:[#allocation18_spill] sm:$0xff] %v12746_v28  ;;  %v7005_v31 = vadd.f32 %v7004_v26, %v6916_v41  ;;  %v6828_v60 = vpop.f32.mrf.mxu0  ;;  %v6917_v40 = vpop.f32.mrf.mxu1  ;;  %v10082_v41 = vor.u32 %v10644_v12, %v10079_v32  ;;  %v10676_v26 = vld [vmem:[#allocation8 + $0x324] sm:$0xf] }
 0xa01   : > { %v6829_v21 = vadd.f32 %v6828_v60, %v12699_v4  ;;  %7154 = vmatpush.bf16.msra.mxu0 %v9826_v47  ;;  %v10210_v14 = vor.u32 %v10676_v26, %v10207_v18  ;;  %v10576_v60 = vld [vmem:[#allocation8 + $0x4] sm:$0xf]  ;;  %v10191_v47 = vld [vmem:[#allocation8 + $0x310] sm:$0xf0] }
 0xa02   : > { %v7094_v43 = vadd.f32 %v7093_v44, %v7005_v31  ;;  %7243 = vmatpush.bf16.msra.mxu1 %v9954_v51  ;;  %7332 = vmatpush.bf16.msra.mxu2 %v10082_v41  ;;  %v9807_v44 = vld [vmem:[#allocation8 + $0x10] sm:$0xf0]  ;;  %v10194_v18 = vor.u32 %v10672_v61, %v10191_v47  ;;  %v14001_v41 = vld [vmem:[#allocation63_spill] sm:$0xff] }
 0xa03   : > { %v6918_v28 = vadd.f32 %v6917_v40, %v6829_v21  ;;  %7421 = vmatpush.bf16.msra.mxu3 %v10210_v14  ;;  %v9810_v63 = vor.u32 %v10576_v60, %v9807_v44  ;;  %v9935_v40 = vld [vmem:[#allocation8 + $0x110] sm:$0xf0]  ;;  %v10640_v21 = vld [vmem:[#allocation8 + $0x204] sm:$0xf] }
 0xa04   : > { %v9938_v32 = vor.u32 %v10608_v0, %v9935_v40  ;;  %v10066_v38 = vor.u32 %v10640_v21, %v10063_v45  ;;  %v14002_v26 = vld [vmem:[#allocation57_spill] sm:$0xff]  ;;  %v8256_v14 = vmax.f32 %v7094_v43, 0.0 }
 0xa05   : > { %7155 = vmatpush.bf16.msra.mxu0 %v9810_v63 }
 0xa06   : > { %7244 = vmatpush.bf16.msra.mxu1 %v9938_v32  ;;  %7333 = vmatpush.bf16.msra.mxu2 %v10066_v38 }
 0xa07   : > { %v7006_v22 = vpop.f32.mrf.mxu2  ;;  %v7095_v39 = vpop.f32.mrf.mxu3  ;;  %7422 = vmatpush.bf16.msra.mxu3 %v10194_v18  ;;  %v14005_v18 = vld [vmem:[#allocation29_spill] sm:$0xff] }
 0xa08   : > { %v7007_v15 = vadd.f32 %v7006_v22, %v6918_v28  ;;  %v6831_v31 = vpop.f32.mrf.mxu0  ;;  %v6920_v57 = vpop.f32.mrf.mxu1 }
 0xa09   : > { %v6832_v51 = vadd.f32 %v6831_v31, %v12699_v4 }
 0xa0a   : > { %v7096_v16 = vadd.f32 %v7095_v39, %v7007_v15 }
 0xa0b   : > { %v6921_v12 = vadd.f32 %v6920_v57, %v6832_v51  ;;  %6870 = vmatmul.bf16.gmra.mxu0 %v14001_v41  ;;  %6959 = vmatmul.bf16.gmra.mxu1 %v14002_v26  ;;  %v14004_v51 = vld [vmem:[#allocation36_spill] sm:$0xff] }
 0xa0c   : > { %v8260_v28 = vmax.f32 %v7096_v16, 0.0  ;;  %7048 = vmatmul.bf16.gmra.mxu2 %v12559_v27  ;;  %7137 = vmatmul.bf16.gmra.mxu3 %v12690_v50 }
 0xa0e   : > { %v12754_v60 = vpack.c.bf16 %v8260_v28, %v8256_v14 }
 0xa0f   : > { %v7009_v44 = vpop.f32.mrf.mxu2  ;;  %v7098_v0 = vpop.f32.mrf.mxu3 }
 0xa10   : > { %14003 = vst [vmem:[#allocation21_spill] sm:$0xff] %v12754_v60  ;;  %v7010_v22 = vadd.f32 %v7009_v44, %v6921_v12  ;;  %v6833_v39 = vpop.f32.mrf.mxu0  ;;  %v6922_v63 = vpop.f32.mrf.mxu1 }
 0xa11   : > { %v6834_v40 = vadd.f32 %v6833_v39, %v12699_v4 }
 0xa12   : > { %v7099_v21 = vadd.f32 %v7098_v0, %v7010_v22 }
 0xa13   : > { %v6923_v45 = vadd.f32 %v6922_v63, %v6834_v40 }
 0xa14   : > { %v8264_v16 = vmax.f32 %v7099_v21, 0.0 }
 0xa17   : > { %v7011_v15 = vpop.f32.mrf.mxu2  ;;  %v7100_v31 = vpop.f32.mrf.mxu3 }
 0xa18   : > { %v7012_v43 = vadd.f32 %v7011_v15, %v6923_v45  ;;  %v6836_v57 = vpop.f32.mrf.mxu0  ;;  %v6925_v32 = vpop.f32.mrf.mxu1 }
 0xa19   : > { %v6837_v38 = vadd.f32 %v6836_v57, %v12699_v4 }
 0xa1a   : > { %v7101_v61 = vadd.f32 %v7100_v31, %v7012_v43 }
 0xa1b   : > { %v6926_v47 = vadd.f32 %v6925_v32, %v6837_v38  ;;  %6875 = vmatmul.bf16.gmra.mxu0 %v14004_v51  ;;  %6964 = vmatmul.bf16.gmra.mxu1 %v14005_v18 }
 0xa1c   : > { %v8268_v12 = vmax.f32 %v7101_v61, 0.0  ;;  %7053 = vmatmul.bf16.gmra.mxu2 %v12570_v7  ;;  %7142 = vmatmul.bf16.gmra.mxu3 %v12706_v1 }
 0xa1e   : > { %v12762_v14 = vpack.c.bf16 %v8268_v12, %v8264_v16 }
 0xa1f   : > { %v7014_v28 = vpop.f32.mrf.mxu2  ;;  %v7103_v44 = vpop.f32.mrf.mxu3 }
 0xa20   : > { %v7015_v0 = vadd.f32 %v7014_v28, %v6926_v47  ;;  %v6838_v22 = vpop.f32.mrf.mxu0  ;;  %v6927_v39 = vpop.f32.mrf.mxu1 }
 0xa21   : > { %v6839_v63 = vadd.f32 %v6838_v22, %v12699_v4 }
 0xa22   : > { %v7104_v40 = vadd.f32 %v7103_v44, %v7015_v0 }
 0xa23   : > { %v6928_v45 = vadd.f32 %v6927_v39, %v6839_v63 }
 0xa24   : > { %v8272_v47 = vmax.f32 %v7104_v40, 0.0 }
 0xa27   : > { %v7016_v15 = vpop.f32.mrf.mxu2  ;;  %v7105_v31 = vpop.f32.mrf.mxu3 }
 0xa28   : > { %v7017_v43 = vadd.f32 %v7016_v15, %v6928_v45  ;;  %v6841_v21 = vpop.f32.mrf.mxu0  ;;  %v6930_v57 = vpop.f32.mrf.mxu1 }
 0xa29   : > { %v6842_v32 = vadd.f32 %v6841_v21, %v12699_v4 }
 0xa2a   : > { %v7106_v38 = vadd.f32 %v7105_v31, %v7017_v43 }
 0xa2b   : > { %v6931_v61 = vadd.f32 %v6930_v57, %v6842_v32  ;;  %7156 = vmatmul.bf16.vlgmr.msra.gmra.mxu0 %v13954_v46  ;;  %7245 = vmatmul.bf16.vlgmr.msra.gmra.mxu1 %v13955_v11 }
 0xa2c   : > { %v8276_v16 = vmax.f32 %v7106_v38, 0.0  ;;  %7334 = vmatmul.bf16.vlgmr.msra.gmra.mxu2 %v13956_v5  ;;  %7423 = vmatmul.bf16.vlgmr.msra.gmra.mxu3 %v12578_v23 }
 0xa2e   : > { %v12770_v12 = vpack.c.bf16 %v8276_v16, %v8272_v47 }
 0xa2f   : > { %v7019_v28 = vpop.f32.mrf.mxu2  ;;  %v7108_v44 = vpop.f32.mrf.mxu3 }
 0xa30   : > { %v7020_v0 = vadd.f32 %v7019_v28, %v6931_v61  ;;  %v6843_v22 = vpop.f32.mrf.mxu0  ;;  %v6932_v39 = vpop.f32.mrf.mxu1 }
 0xa31   : > { %v6844_v63 = vadd.f32 %v6843_v22, %v12699_v4 }
 0xa32   : > { %v7109_v45 = vadd.f32 %v7108_v44, %v7020_v0 }
 0xa33   : > { %v6933_v15 = vadd.f32 %v6932_v39, %v6844_v63 }
 0xa34   : > { %v8280_v61 = vmax.f32 %v7109_v45, 0.0 }
 0xa37   : > { %v7021_v31 = vpop.f32.mrf.mxu2  ;;  %v7110_v43 = vpop.f32.mrf.mxu3 }
 0xa38   : > { %v7022_v21 = vadd.f32 %v7021_v31, %v6933_v15  ;;  %v6846_v40 = vpop.f32.mrf.mxu0  ;;  %v6935_v57 = vpop.f32.mrf.mxu1 }
 0xa39   : > { %v6847_v32 = vadd.f32 %v6846_v40, %v12699_v4 }
 0xa3a   : > { %v7111_v38 = vadd.f32 %v7110_v43, %v7022_v21 }
 0xa3b   : > { %v6936_v60 = vadd.f32 %v6935_v57, %v6847_v32  ;;  %7161 = vmatmul.bf16.gmra.mxu0 %v13958_v8  ;;  %7250 = vmatmul.bf16.gmra.mxu1 %v13959_v20 }
 0xa3c   : > { %v8284_v47 = vmax.f32 %v7111_v38, 0.0  ;;  %7339 = vmatmul.bf16.gmra.mxu2 %v13960_v34  ;;  %7428 = vmatmul.bf16.gmra.mxu3 %v12586_v17 }
 0xa3e   : > { %v12778_v16 = vpack.c.bf16 %v8284_v47, %v8280_v61 }
 0xa3f   : > { %v7024_v28 = vpop.f32.mrf.mxu2  ;;  %v7113_v44 = vpop.f32.mrf.mxu3 }
 0xa40   : > { %14006 = vst [vmem:[#allocation33_spill] sm:$0xff] %v12778_v16  ;;  %v7025_v0 = vadd.f32 %v7024_v28, %v6936_v60  ;;  %v6848_v22 = vpop.f32.mrf.mxu0  ;;  %v6937_v39 = vpop.f32.mrf.mxu1 }
 0xa41   : > { %v6849_v63 = vadd.f32 %v6848_v22, %v12699_v4 }
 0xa42   : > { %v7114_v15 = vadd.f32 %v7113_v44, %v7025_v0 }
 0xa43   : > { %v6938_v31 = vadd.f32 %v6937_v39, %v6849_v63 }
 0xa44   : > { %v8288_v60 = vmax.f32 %v7114_v15, 0.0 }
 0xa47   : > { %v7026_v43 = vpop.f32.mrf.mxu2  ;;  %v7115_v21 = vpop.f32.mrf.mxu3 }
 0xa48   : > { %v7027_v40 = vadd.f32 %v7026_v43, %v6938_v31  ;;  %v6851_v45 = vpop.f32.mrf.mxu0  ;;  %v6940_v57 = vpop.f32.mrf.mxu1 }
 0xa49   : > { %v6852_v32 = vadd.f32 %v6851_v45, %v12699_v4 }
 0xa4a   : > { %v7116_v38 = vadd.f32 %v7115_v21, %v7027_v40 }
 0xa4b   : > { %v6941_v17 = vadd.f32 %v6940_v57, %v6852_v32  ;;  %7166 = vmatmul.bf16.gmra.mxu0 %v13962_v59  ;;  %7255 = vmatmul.bf16.gmra.mxu1 %v13963_v62 }
 0xa4c   : > { %v8292_v61 = vmax.f32 %v7116_v38, 0.0  ;;  %7344 = vmatmul.bf16.gmra.mxu2 %v13964_v37  ;;  %7433 = vmatmul.bf16.gmra.mxu3 %v12594_v13 }
 0xa4e   : > { %v12786_v47 = vpack.c.bf16 %v8292_v61, %v8288_v60  ;;  %v10181_v61 = vld [vmem:[#allocation8 + $0x2e8] sm:$0xf] }
 0xa4f   : > { %v7029_v28 = vpop.f32.mrf.mxu2  ;;  %v7118_v44 = vpop.f32.mrf.mxu3 }
 0xa50   : > { %14007 = vst [vmem:[#allocation28_spill] sm:$0xff] %v12786_v47  ;;  %v7030_v0 = vadd.f32 %v7029_v28, %v6941_v17  ;;  %v6853_v22 = vpop.f32.mrf.mxu0  ;;  %v6942_v39 = vpop.f32.mrf.mxu1  ;;  %v10671_v28 = vld [vmem:[#allocation8 + $0x2f4] sm:$0xf0] }
 0xa51   : > { %v6854_v63 = vadd.f32 %v6853_v22, %v12699_v4  ;;  %v10703_v47 = vld [vmem:[#allocation8 + $0x3f4] sm:$0xf0] }
 0xa52   : > { %v7119_v31 = vadd.f32 %v7118_v44, %v7030_v0  ;;  %v10182_v44 = vor.u32 %v10671_v28, %v10181_v61  ;;  %v10639_v61 = vld [vmem:[#allocation8 + $0x1f4] sm:$0xf0] }
 0xa53   : > { %v6943_v43 = vadd.f32 %v6942_v39, %v6854_v63 }
 0xa54   : > { %v8296_v17 = vmax.f32 %v7119_v31, 0.0  ;;  %7682 = vmatpush.bf16.msrb.mxu2 %v10182_v44 }
 0xa57   : > { %v7031_v21 = vpop.f32.mrf.mxu2  ;;  %v7120_v40 = vpop.f32.mrf.mxu3 }
 0xa58   : > { %v7032_v45 = vadd.f32 %v7031_v21, %v6943_v43  ;;  %v6856_v15 = vpop.f32.mrf.mxu0  ;;  %v6945_v57 = vpop.f32.mrf.mxu1 }
 0xa59   : > { %v6857_v32 = vadd.f32 %v6856_v15, %v12699_v4  ;;  %v9925_v15 = vld [vmem:[#allocation8 + $0xe8] sm:$0xf] }
 0xa5a   : > { %v7121_v38 = vadd.f32 %v7120_v40, %v7032_v45 }
 0xa5b   : > { %v6946_v16 = vadd.f32 %v6945_v57, %v6857_v32  ;;  %7171 = vmatmul.bf16.gmra.mxu0 %v13966_v9  ;;  %7260 = vmatmul.bf16.gmra.mxu1 %v13967_v30  ;;  %v10607_v57 = vld [vmem:[#allocation8 + $0xf4] sm:$0xf0] }
 0xa5c   : > { %v8300_v60 = vmax.f32 %v7121_v38, 0.0  ;;  %7349 = vmatmul.bf16.gmra.mxu2 %v13968_v56  ;;  %7438 = vmatmul.bf16.gmra.mxu3 %v12602_v58  ;;  %v9926_v32 = vor.u32 %v10607_v57, %v9925_v15  ;;  %v10309_v38 = vld [vmem:[#allocation8 + $0x3e8] sm:$0xf] }
 0xa5d   : > { %v10053_v58 = vld [vmem:[#allocation8 + $0x1e8] sm:$0xf]  ;;  %v10310_v56 = vor.u32 %v10703_v47, %v10309_v38 }
 0xa5e   : > { %v12794_v0 = vpack.c.bf16 %v8300_v60, %v8296_v17  ;;  %7504 = vmatpush.bf16.msrb.mxu0 %v9926_v32  ;;  %v10054_v28 = vor.u32 %v10639_v61, %v10053_v58 }
 0xa5f   : > { %v7034_v22 = vpop.f32.mrf.mxu2  ;;  %v7123_v39 = vpop.f32.mrf.mxu3  ;;  %7771 = vmatpush.bf16.msrb.mxu3 %v10310_v56 }
 0xa60   : > { %14008 = vst [vmem:[#allocation30_spill] sm:$0xff] %v12794_v0  ;;  %v7035_v63 = vadd.f32 %v7034_v22, %v6946_v16  ;;  %v6858_v43 = vpop.f32.mrf.mxu0  ;;  %v6947_v21 = vpop.f32.mrf.mxu1  ;;  %7593 = vmatpush.bf16.msrb.mxu1 %v10054_v28  ;;  %v10037_v0 = vld [vmem:[#allocation8 + $0x1c8] sm:$0xf] }
 0xa61   : > { %v6859_v40 = vadd.f32 %v6858_v43, %v12699_v4 }
 0xa62   : > { %v7124_v45 = vadd.f32 %v7123_v39, %v7035_v63 }
 0xa63   : > { %v6948_v31 = vadd.f32 %v6947_v21, %v6859_v40 }
 0xa64   : > { %v8304_v21 = vmax.f32 %v7124_v45, 0.0 }
 0xa67   : > { %v7036_v17 = vpop.f32.mrf.mxu2  ;;  %v7125_v60 = vpop.f32.mrf.mxu3 }
 0xa68   : > { %v7037_v44 = vadd.f32 %v7036_v17, %v6948_v31  ;;  %v6861_v16 = vpop.f32.mrf.mxu0  ;;  %v6950_v22 = vpop.f32.mrf.mxu1 }
 0xa69   : > { %v6862_v43 = vadd.f32 %v6861_v16, %v12699_v4 }
 0xa6a   : > { %v7126_v39 = vadd.f32 %v7125_v60, %v7037_v44 }
 0xa6b   : > { %v6951_v63 = vadd.f32 %v6950_v22, %v6862_v43  ;;  %7176 = vmatmul.bf16.gmra.mxu0 %v13970_v53  ;;  %7265 = vmatmul.bf16.gmra.mxu1 %v13971_v10 }
 0xa6c   : > { %v8308_v47 = vmax.f32 %v7126_v39, 0.0  ;;  %7354 = vmatmul.bf16.gmra.mxu2 %v13972_v49  ;;  %7443 = vmatmul.bf16.gmra.mxu3 %v12610_v29 }
 0xa6e   : > { %v12802_v58 = vpack.c.bf16 %v8308_v47, %v8304_v21  ;;  %v10165_v21 = vld [vmem:[#allocation8 + $0x2c8] sm:$0xf]  ;;  %v10667_v47 = vld [vmem:[#allocation8 + $0x2d4] sm:$0xf0] }
 0xa6f   : > { %v7039_v40 = vpop.f32.mrf.mxu2  ;;  %v7128_v31 = vpop.f32.mrf.mxu3 }
 0xa70   : > { %14009 = vst [vmem:[#allocation22_spill] sm:$0xff] %v12802_v58  ;;  %v7040_v56 = vadd.f32 %v7039_v40, %v6951_v63  ;;  %v6863_v15 = vpop.f32.mrf.mxu0  ;;  %v6952_v57 = vpop.f32.mrf.mxu1  ;;  %v10166_v40 = vor.u32 %v10667_v47, %v10165_v21  ;;  %v10635_v21 = vld [vmem:[#allocation8 + $0x1d4] sm:$0xf0] }
 0xa71   : > { %v6864_v32 = vadd.f32 %v6863_v15, %v12699_v4  ;;  %v10038_v47 = vor.u32 %v10635_v21, %v10037_v0 }
 0xa72   : > { %v7129_v38 = vadd.f32 %v7128_v31, %v7040_v56  ;;  %7683 = vmatpush.bf16.msrb.mxu2 %v10166_v40 }
 0xa73   : > { %v6953_v61 = vadd.f32 %v6952_v57, %v6864_v32  ;;  %7594 = vmatpush.bf16.msrb.mxu1 %v10038_v47 }
 0xa74   : > { %v8312_v39 = vmax.f32 %v7129_v38, 0.0 }
 0xa77   : > { %v7041_v17 = vpop.f32.mrf.mxu2  ;;  %v7130_v60 = vpop.f32.mrf.mxu3 }
 0xa78   : > { %v7042_v28 = vadd.f32 %v7041_v17, %v6953_v61  ;;  %v6866_v45 = vpop.f32.mrf.mxu0  ;;  %v6955_v44 = vpop.f32.mrf.mxu1 }
 0xa79   : > { %v6867_v16 = vadd.f32 %v6866_v45, %v12699_v4  ;;  %v10603_v45 = vld [vmem:[#allocation8 + $0xd4] sm:$0xf0] }
 0xa7a   : > { %v7131_v22 = vadd.f32 %v7130_v60, %v7042_v28  ;;  %v9909_v28 = vld [vmem:[#allocation8 + $0xc8] sm:$0xf] }
 0xa7b   : > { %v6956_v43 = vadd.f32 %v6955_v44, %v6867_v16  ;;  %7181 = vmatmul.bf16.gmra.mxu0 %v13974_v42  ;;  %7270 = vmatmul.bf16.gmra.mxu1 %v13975_v36  ;;  %v9910_v44 = vor.u32 %v10603_v45, %v9909_v28  ;;  %v10293_v16 = vld [vmem:[#allocation8 + $0x3c8] sm:$0xf]  ;;  %v14011_v28 = vld [vmem:[#allocation26_spill] sm:$0xff] }
 0xa7c   : > { %v8316_v63 = vmax.f32 %v7131_v22, 0.0  ;;  %7359 = vmatmul.bf16.gmra.mxu2 %v12487_v2  ;;  %7448 = vmatmul.bf16.gmra.mxu3 %v12618_v33  ;;  %v10699_v22 = vld [vmem:[#allocation8 + $0x3d4] sm:$0xf0] }
 0xa7d   : > { %v10294_v58 = vor.u32 %v10699_v22, %v10293_v16  ;;  %7505 = vmatpush.bf16.msrb.mxu0 %v9910_v44 }
 0xa7e   : > { %v12810_v31 = vpack.c.bf16 %v8316_v63, %v8312_v39 }
 0xa7f   : > { %v7044_v56 = vpop.f32.mrf.mxu2  ;;  %v7133_v15 = vpop.f32.mrf.mxu3  ;;  %7772 = vmatpush.bf16.msrb.mxu3 %v10294_v58 }
 0xa80   : > { %14010 = vst [vmem:[#allocation34_spill] sm:$0xff] %v12810_v31  ;;  %v7045_v57 = vadd.f32 %v7044_v56, %v6956_v43  ;;  %v6868_v32 = vpop.f32.mrf.mxu0  ;;  %v6957_v61 = vpop.f32.mrf.mxu1  ;;  %v14015_v31 = vld [vmem:[#allocation81_spill] sm:$0xff] }
 0xa81   : > { %v6869_v17 = vadd.f32 %v6868_v32, %v12699_v4 }
 0xa82   : > { %v7134_v60 = vadd.f32 %v7133_v15, %v7045_v57 }
 0xa83   : > { %v6958_v38 = vadd.f32 %v6957_v61, %v6869_v17 }
 0xa84   : > { %v8320_v61 = vmax.f32 %v7134_v60, 0.0 }
 0xa87   : > { %v7046_v39 = vpop.f32.mrf.mxu2  ;;  %v7135_v63 = vpop.f32.mrf.mxu3 }
 0xa88   : > { %v7047_v40 = vadd.f32 %v7046_v39, %v6958_v38  ;;  %v6871_v43 = vpop.f32.mrf.mxu0  ;;  %v6960_v56 = vpop.f32.mrf.mxu1 }
 0xa89   : > { %v6872_v32 = vadd.f32 %v6871_v43, %v12699_v4 }
 0xa8a   : > { %v7136_v15 = vadd.f32 %v7135_v63, %v7047_v40 }
 0xa8b   : > { %v6961_v57 = vadd.f32 %v6960_v56, %v6872_v32  ;;  %7186 = vmatmul.bf16.gmra.mxu0 %v13977_v54  ;;  %7275 = vmatmul.bf16.gmra.mxu1 %v13978_v25  ;;  %v10069_v54 = vld [vmem:[#allocation8 + $0x208] sm:$0xf] }
 0xa8c   : > { %v8324_v17 = vmax.f32 %v7136_v15, 0.0  ;;  %7364 = vmatmul.bf16.gmra.mxu2 %v12495_v35  ;;  %7453 = vmatmul.bf16.gmra.mxu3 %v14011_v28 }
 0xa8e   : > { %v12818_v0 = vpack.c.bf16 %v8324_v17, %v8320_v61  ;;  %v14013_v61 = vld [vmem:[#allocation45_spill] sm:$0xff]  ;;  %v14014_v17 = vld [vmem:[#allocation66_spill] sm:$0xff] }
 0xa8f   : > { %v7049_v38 = vpop.f32.mrf.mxu2  ;;  %v7138_v45 = vpop.f32.mrf.mxu3 }
 0xa90   : > { %14012 = vst [vmem:[#allocation35_spill] sm:$0xff] %v12818_v0  ;;  %v7050_v58 = vadd.f32 %v7049_v38, %v6961_v57  ;;  %v6873_v44 = vpop.f32.mrf.mxu0  ;;  %v6962_v16 = vpop.f32.mrf.mxu1  ;;  %v9893_v0 = vld [vmem:[#allocation8 + $0xa8] sm:$0xf] }
 0xa91   : > { %v6874_v22 = vadd.f32 %v6873_v44, %v12699_v4  ;;  %v14016_v44 = vld [vmem:[#allocation16_spill] sm:$0xff] }
 0xa92   : > { %v7139_v21 = vadd.f32 %v7138_v45, %v7050_v58  ;;  %v10149_v45 = vld [vmem:[#allocation8 + $0x2a8] sm:$0xf]  ;;  %v10663_v58 = vld [vmem:[#allocation8 + $0x2b4] sm:$0xf0] }
 0xa93   : > { %v6963_v39 = vadd.f32 %v6962_v16, %v6874_v22  ;;  %v10150_v16 = vor.u32 %v10663_v58, %v10149_v45  ;;  %v10695_v45 = vld [vmem:[#allocation8 + $0x3b4] sm:$0xf0] }
 0xa94   : > { %v8328_v57 = vmax.f32 %v7139_v21, 0.0  ;;  %v10631_v58 = vld [vmem:[#allocation8 + $0x1b4] sm:$0xf0] }
 0xa95   : > { %7684 = vmatpush.bf16.msrb.mxu2 %v10150_v16 }
 0xa97   : > { %v7051_v63 = vpop.f32.mrf.mxu2  ;;  %v7140_v47 = vpop.f32.mrf.mxu3 }
 0xa98   : > { %v7052_v40 = vadd.f32 %v7051_v63, %v6963_v39  ;;  %v6876_v60 = vpop.f32.mrf.mxu0  ;;  %v6965_v43 = vpop.f32.mrf.mxu1 }
 0xa99   : > { %v6877_v56 = vadd.f32 %v6876_v60, %v12699_v4 }
 0xa9a   : > { %v7141_v32 = vadd.f32 %v7140_v47, %v7052_v40 }
 0xa9b   : > { %v6966_v15 = vadd.f32 %v6965_v43, %v6877_v56  ;;  %7191 = vmatmul.bf16.gmra.mxu0 %v14013_v61  ;;  %7280 = vmatmul.bf16.gmra.mxu1 %v14014_v17  ;;  %v10277_v17 = vld [vmem:[#allocation8 + $0x3a8] sm:$0xf] }
 0xa9c   : > { %v8332_v38 = vmax.f32 %v7141_v32, 0.0  ;;  %7369 = vmatmul.bf16.gmra.mxu2 %v14015_v31  ;;  %7458 = vmatmul.bf16.gmra.mxu3 %v14016_v44  ;;  %v12830_v32 = vperm.slane %v12696_v6, 1  ;;  %v10599_v44 = vld [vmem:[#allocation8 + $0xb4] sm:$0xf0] }
 0xa9d   : > { %v9894_v31 = vor.u32 %v10599_v44, %v9893_v0  ;;  %v14018_v0 = vld [vmem:[#allocation76_spill] sm:$0xff] }
 0xa9e   : > { %v12826_v22 = vpack.c.bf16 %v8332_v38, %v8328_v57  ;;  %v10021_v57 = vld [vmem:[#allocation8 + $0x1a8] sm:$0xf]  ;;  %v10278_v38 = vor.u32 %v10695_v45, %v10277_v17 }
 0xa9f   : > { %v7054_v39 = vpop.f32.mrf.mxu2  ;;  %v7143_v63 = vpop.f32.mrf.mxu3  ;;  %7506 = vmatpush.bf16.msrb.mxu0 %v9894_v31 }
 0xaa0   : > { %14017 = vst [vmem:[#allocation52_spill] sm:$0xff] %v12826_v22  ;;  %v7055_v47 = vadd.f32 %v7054_v39, %v6966_v15  ;;  %v6878_v40 = vpop.f32.mrf.mxu0  ;;  %v6967_v60 = vpop.f32.mrf.mxu1  ;;  %v10022_v15 = vor.u32 %v10631_v58, %v10021_v57  ;;  %7773 = vmatpush.bf16.msrb.mxu3 %v10278_v38 }
 0xaa1   : > { %v6879_v43 = vadd.f32 %v6878_v40, %v12699_v4  ;;  %v14019_v40 = vld [vmem:[#allocation82_spill] sm:$0xff] }
 0xaa2   : > { %v7144_v56 = vadd.f32 %v7143_v63, %v7055_v47  ;;  %7595 = vmatpush.bf16.msrb.mxu1 %v10022_v15 }
 0xaa3   : > { %v6968_v21 = vadd.f32 %v6967_v60, %v6879_v43  ;;  %v14020_v60 = vld [vmem:[#allocation72_spill] sm:$0xff] }
 0xaa4   : > { %v8336_v44 = vmax.f32 %v7144_v56, 0.0 }
 0xaa7   : > { %v7056_v22 = vpop.f32.mrf.mxu2  ;;  %v7145_v16 = vpop.f32.mrf.mxu3 }
 0xaa8   : > { %v7057_v39 = vadd.f32 %v7056_v22, %v6968_v21  ;;  %v7157_v61 = vpop.f32.mrf.mxu0  ;;  %v7246_v4 = vpop.f32.mrf.mxu1 }
 0xaa9   : > { %v7158_v63 = vadd.f32 %v7157_v61, %v12830_v32 }
 0xaaa   : > { %v7146_v6 = vadd.f32 %v7145_v16, %v7057_v39 }
 0xaab   : > { %v7247_v47 = vadd.f32 %v7246_v4, %v7158_v63  ;;  %7196 = vmatmul.bf16.gmra.mxu0 %v13983_v48  ;;  %7285 = vmatmul.bf16.gmra.mxu1 %v14018_v0  ;;  %v10605_v48 = vld [vmem:[#allocation8 + $0xec] sm:$0xf] }
 0xaac   : > { %v8340_v17 = vmax.f32 %v7146_v6, 0.0  ;;  %7374 = vmatmul.bf16.gmra.mxu2 %v14019_v40  ;;  %7463 = vmatmul.bf16.gmra.mxu3 %v14020_v60  ;;  %v10005_v40 = vld [vmem:[#allocation8 + $0x188] sm:$0xf] }
 0xaae   : > { %v12837_v31 = vpack.c.bf16 %v8340_v17, %v8336_v44  ;;  %v14022_v44 = vld [vmem:[#allocation47_spill] sm:$0xff] }
 0xaaf   : > { %v7335_v22 = vpop.f32.mrf.mxu2  ;;  %v7424_v43 = vpop.f32.mrf.mxu3  ;;  %v14023_v17 = vld [vmem:[#allocation55_spill] sm:$0xff] }
 0xab0   : > { %14021 = vst [vmem:[#allocation73_spill] sm:$0xff] %v12837_v31  ;;  %v7336_v21 = vadd.f32 %v7335_v22, %v7247_v47  ;;  %v7159_v45 = vpop.f32.mrf.mxu0  ;;  %v7248_v61 = vpop.f32.mrf.mxu1  ;;  %v14024_v31 = vld [vmem:[#allocation83_spill] sm:$0xff] }
 0xab1   : > { %v7160_v57 = vadd.f32 %v7159_v45, %v12830_v32  ;;  %v14025_v45 = vld [vmem:[#allocation80_spill] sm:$0xff] }
 0xab2   : > { %v7425_v38 = vadd.f32 %v7424_v43, %v7336_v21  ;;  %v10133_v43 = vld [vmem:[#allocation8 + $0x288] sm:$0xf]  ;;  %v10659_v21 = vld [vmem:[#allocation8 + $0x294] sm:$0xf0] }
 0xab3   : > { %v7249_v58 = vadd.f32 %v7248_v61, %v7160_v57  ;;  %v10134_v61 = vor.u32 %v10659_v21, %v10133_v43  ;;  %v10627_v43 = vld [vmem:[#allocation8 + $0x194] sm:$0xf0] }
 0xab4   : > { %v8217_v47 = vmax.f32 %v7425_v38, 0.0  ;;  %v10006_v21 = vor.u32 %v10627_v43, %v10005_v40 }
 0xab5   : > { %7685 = vmatpush.bf16.msrb.mxu2 %v10134_v61 }
 0xab6   : > { %7596 = vmatpush.bf16.msrb.mxu1 %v10006_v21 }
 0xab7   : > { %v7337_v16 = vpop.f32.mrf.mxu2  ;;  %v7426_v15 = vpop.f32.mrf.mxu3 }
 0xab8   : > { %v7338_v39 = vadd.f32 %v7337_v16, %v7249_v58  ;;  %v7162_v56 = vpop.f32.mrf.mxu0  ;;  %v7251_v4 = vpop.f32.mrf.mxu1 }
 0xab9   : > { %v7163_v63 = vadd.f32 %v7162_v56, %v12830_v32 }
 0xaba   : > { %v7427_v6 = vadd.f32 %v7426_v15, %v7338_v39 }
 0xabb   : > { %v7252_v60 = vadd.f32 %v7251_v4, %v7163_v63  ;;  %7201 = vmatmul.bf16.gmra.mxu0 %v14022_v44  ;;  %7290 = vmatmul.bf16.gmra.mxu1 %v14023_v17  ;;  %v10595_v17 = vld [vmem:[#allocation8 + $0x94] sm:$0xf0]  ;;  %v10261_v44 = vld [vmem:[#allocation8 + $0x388] sm:$0xf] }
 0xabc   : > { %v8221_v22 = vmax.f32 %v7427_v6, 0.0  ;;  %7379 = vmatmul.bf16.gmra.mxu2 %v14024_v31  ;;  %7468 = vmatmul.bf16.gmra.mxu3 %v14025_v45  ;;  %v9877_v6 = vld [vmem:[#allocation8 + $0x88] sm:$0xf]  ;;  %v10691_v45 = vld [vmem:[#allocation8 + $0x394] sm:$0xf0] }
 0xabd   : > { %v9878_v31 = vor.u32 %v10595_v17, %v9877_v6  ;;  %v10262_v0 = vor.u32 %v10691_v45, %v10261_v44 }
 0xabe   : > { %v12845_v57 = vpack.c.bf16 %v8221_v22, %v8217_v47 }
 0xabf   : > { %v7340_v58 = vpop.f32.mrf.mxu2  ;;  %v7429_v16 = vpop.f32.mrf.mxu3  ;;  %7507 = vmatpush.bf16.msrb.mxu0 %v9878_v31  ;;  %7774 = vmatpush.bf16.msrb.mxu3 %v10262_v0 }
 0xac0   : > { %v7341_v15 = vadd.f32 %v7340_v58, %v7252_v60  ;;  %v7164_v39 = vpop.f32.mrf.mxu0  ;;  %v7253_v56 = vpop.f32.mrf.mxu1 }
 0xac1   : > { %v7165_v4 = vadd.f32 %v7164_v39, %v12830_v32 }
 0xac2   : > { %v7430_v63 = vadd.f32 %v7429_v16, %v7341_v15 }
 0xac3   : > { %v7254_v38 = vadd.f32 %v7253_v56, %v7165_v4 }
 0xac4   : > { %v8225_v17 = vmax.f32 %v7430_v63, 0.0 }
 0xac7   : > { %v7342_v47 = vpop.f32.mrf.mxu2  ;;  %v7431_v22 = vpop.f32.mrf.mxu3 }
 0xac8   : > { %v7343_v61 = vadd.f32 %v7342_v47, %v7254_v38  ;;  %v7167_v60 = vpop.f32.mrf.mxu0  ;;  %v7256_v58 = vpop.f32.mrf.mxu1 }
 0xac9   : > { %v7168_v39 = vadd.f32 %v7167_v60, %v12830_v32 }
 0xaca   : > { %v7432_v16 = vadd.f32 %v7431_v22, %v7343_v61 }
 0xacb   : > { %v7257_v15 = vadd.f32 %v7256_v58, %v7168_v39  ;;  %7206 = vmatmul.bf16.gmra.mxu0 %v13989_v55  ;;  %7295 = vmatmul.bf16.gmra.mxu1 %v13990_v24 }
 0xacc   : > { %v8229_v44 = vmax.f32 %v7432_v16, 0.0  ;;  %7384 = vmatmul.bf16.gmra.mxu2 %v12527_v52  ;;  %7473 = vmatmul.bf16.gmra.mxu3 %v12658_v19  ;;  %v14026_v16 = vld [vmem:[#allocation49_spill] sm:$0xff]  ;;  %v9845_v19 = vld [vmem:[#allocation8 + $0x48] sm:$0xf]  ;;  %v10587_v52 = vld [vmem:[#allocation8 + $0x54] sm:$0xf0] }
 0xace   : > { %v12853_v40 = vpack.c.bf16 %v8229_v44, %v8225_v17  ;;  %v14027_v17 = vld [vmem:[#allocation77_spill] sm:$0xff] }
 0xacf   : > { %v7345_v31 = vpop.f32.mrf.mxu2  ;;  %v7434_v45 = vpop.f32.mrf.mxu3 }
 0xad0   : > { %v7346_v0 = vadd.f32 %v7345_v31, %v7257_v15  ;;  %v7169_v56 = vpop.f32.mrf.mxu0  ;;  %v7258_v4 = vpop.f32.mrf.mxu1  ;;  %v14028_v31 = vld [vmem:[#allocation85_spill] sm:$0xff] }
 0xad1   : > { %v7170_v38 = vadd.f32 %v7169_v56, %v12830_v32  ;;  %v14029_v56 = vld [vmem:[#allocation17_spill] sm:$0xff] }
 0xad2   : > { %v7435_v6 = vadd.f32 %v7434_v45, %v7346_v0  ;;  %v10117_v45 = vld [vmem:[#allocation8 + $0x268] sm:$0xf]  ;;  %v10655_v0 = vld [vmem:[#allocation8 + $0x274] sm:$0xf0] }
 0xad3   : > { %v7259_v43 = vadd.f32 %v7258_v4, %v7170_v38  ;;  %v10118_v4 = vor.u32 %v10655_v0, %v10117_v45  ;;  %v10245_v45 = vld [vmem:[#allocation8 + $0x368] sm:$0xf] }
 0xad4   : > { %v8233_v15 = vmax.f32 %v7435_v6, 0.0 }
 0xad5   : > { %7686 = vmatpush.bf16.msrb.mxu2 %v10118_v4  ;;  %v9846_v4 = vor.u32 %v10587_v52, %v9845_v19  ;;  %v14030_v52 = vld [vmem:[#allocation56_spill] sm:$0xff] }
 0xad6   : > { %v9813_v19 = vld [vmem:[#allocation8 + $0x8] sm:$0xf] }
 0xad7   : > { %v7347_v47 = vpop.f32.mrf.mxu2  ;;  %v7436_v22 = vpop.f32.mrf.mxu3 }
 0xad8   : > { %v7348_v21 = vadd.f32 %v7347_v47, %v7259_v43  ;;  %v7172_v63 = vpop.f32.mrf.mxu0  ;;  %v7261_v61 = vpop.f32.mrf.mxu1 }
 0xad9   : > { %v7173_v60 = vadd.f32 %v7172_v63, %v12830_v32 }
 0xada   : > { %v7437_v58 = vadd.f32 %v7436_v22, %v7348_v21  ;;  %v9861_v22 = vld [vmem:[#allocation8 + $0x68] sm:$0xf]  ;;  %v10591_v21 = vld [vmem:[#allocation8 + $0x74] sm:$0xf0] }
 0xadb   : > { %v7262_v39 = vadd.f32 %v7261_v61, %v7173_v60  ;;  %7211 = vmatmul.bf16.gmra.mxu0 %v14026_v16  ;;  %7300 = vmatmul.bf16.gmra.mxu1 %v14027_v17  ;;  %v9862_v17 = vor.u32 %v10591_v21, %v9861_v22  ;;  %v10623_v16 = vld [vmem:[#allocation8 + $0x174] sm:$0xf0]  ;;  %v9973_v21 = vld [vmem:[#allocation8 + $0x148] sm:$0xf] }
 0xadc   : > { %v8237_v44 = vmax.f32 %v7437_v58, 0.0  ;;  %7389 = vmatmul.bf16.gmra.mxu2 %v14028_v31  ;;  %7478 = vmatmul.bf16.gmra.mxu3 %v14029_v56  ;;  %v9989_v56 = vld [vmem:[#allocation8 + $0x168] sm:$0xf]  ;;  %v10583_v22 = vld [vmem:[#allocation8 + $0x34] sm:$0xf0] }
 0xadd   : > { %7508 = vmatpush.bf16.msrb.mxu0 %v9862_v17 }
 0xade   : > { %v12861_v38 = vpack.c.bf16 %v8237_v44, %v8233_v15  ;;  %v10687_v15 = vld [vmem:[#allocation8 + $0x374] sm:$0xf0]  ;;  %v9990_v44 = vor.u32 %v10623_v16, %v9989_v56 }
 0xadf   : > { %v7350_v43 = vpop.f32.mrf.mxu2  ;;  %v7439_v47 = vpop.f32.mrf.mxu3  ;;  %v10246_v0 = vor.u32 %v10687_v15, %v10245_v45  ;;  %v10579_v45 = vld [vmem:[#allocation8 + $0x14] sm:$0xf0]  ;;  %v9957_v15 = vld [vmem:[#allocation8 + $0x128] sm:$0xf] }
 0xae0   : > { %v7351_v63 = vadd.f32 %v7350_v43, %v7262_v39  ;;  %v7174_v61 = vpop.f32.mrf.mxu0  ;;  %v7263_v60 = vpop.f32.mrf.mxu1  ;;  %7597 = vmatpush.bf16.msrb.mxu1 %v9990_v44  ;;  %v9829_v43 = vld [vmem:[#allocation8 + $0x28] sm:$0xf] }
 0xae1   : > { %v7175_v6 = vadd.f32 %v7174_v61, %v12830_v32  ;;  %7775 = vmatpush.bf16.msrb.mxu3 %v10246_v0  ;;  %7509 = vmatpush.bf16.msrb.mxu0 %v9846_v4  ;;  %v10615_v4 = vld [vmem:[#allocation8 + $0x134] sm:$0xf0] }
 0xae2   : > { %v7440_v58 = vadd.f32 %v7439_v47, %v7351_v63  ;;  %v10619_v63 = vld [vmem:[#allocation8 + $0x154] sm:$0xf0] }
 0xae3   : > { %v7264_v31 = vadd.f32 %v7263_v60, %v7175_v6  ;;  %v9830_v6 = vor.u32 %v10583_v22, %v9829_v43  ;;  %v9974_v55 = vor.u32 %v10619_v63, %v9973_v21  ;;  %v9814_v43 = vor.u32 %v10579_v45, %v9813_v19  ;;  %v9927_v22 = vld [vmem:[#allocation8 + $0xf8] sm:$0xf0]  ;;  %v9941_v63 = vld [vmem:[#allocation8 + $0x108] sm:$0xf] }
 0xae4   : > { %v8241_v44 = vmax.f32 %v7440_v58, 0.0  ;;  %v9930_v21 = vor.u32 %v10605_v48, %v9927_v22 }
 0xae5   : > { %7510 = vmatpush.bf16.msrb.mxu0 %v9830_v6  ;;  %7598 = vmatpush.bf16.msrb.mxu1 %v9974_v55  ;;  %v10055_v6 = vld [vmem:[#allocation8 + $0x1f8] sm:$0xf0] }
 0xae7   : > { %v7352_v24 = vpop.f32.mrf.mxu2  ;;  %v7441_v39 = vpop.f32.mrf.mxu3 }
 0xae8   : > { %v7353_v61 = vadd.f32 %v7352_v24, %v7264_v31  ;;  %v7177_v47 = vpop.f32.mrf.mxu0  ;;  %v7266_v17 = vpop.f32.mrf.mxu1  ;;  %v14031_v24 = vld [vmem:[#allocation86_spill] sm:$0xff]  ;;  %v14032_v31 = vld [vmem:[#allocation40_spill] sm:$0xff] }
 0xae9   : > { %v7178_v60 = vadd.f32 %v7177_v47, %v12830_v32  ;;  %7511 = vmatpush.bf16.msrb.mxu0 %v9814_v43 }
 0xaea   : > { %v7442_v16 = vadd.f32 %v7441_v39, %v7353_v61  ;;  %v9958_v39 = vor.u32 %v10615_v4, %v9957_v15  ;;  %v10039_v4 = vld [vmem:[#allocation8 + $0x1d8] sm:$0xf0] }
 0xaeb   : > { %v7267_v56 = vadd.f32 %v7266_v17, %v7178_v60  ;;  %7216 = vmatmul.bf16.gmra.mxu0 %v13995_v3  ;;  %7305 = vmatmul.bf16.gmra.mxu1 %v14030_v52  ;;  %v10611_v60 = vld [vmem:[#allocation8 + $0x114] sm:$0xf0]  ;;  %v9911_v3 = vld [vmem:[#allocation8 + $0xd8] sm:$0xf0] }
 0xaec   : > { %v8245_v0 = vmax.f32 %v7442_v16, 0.0  ;;  %7394 = vmatmul.bf16.gmra.mxu2 %v14031_v24  ;;  %7483 = vmatmul.bf16.gmra.mxu3 %v14032_v31  ;;  %v10601_v24 = vld [vmem:[#allocation8 + $0xcc] sm:$0xf]  ;;  %v9942_v55 = vor.u32 %v10611_v60, %v9941_v63  ;;  %v14033_v60 = vld [vmem:[#allocation51_spill] sm:$0xff] }
 0xaed   : > { %v10637_v31 = vld [vmem:[#allocation8 + $0x1ec] sm:$0xf]  ;;  %7599 = vmatpush.bf16.msrb.mxu1 %v9958_v39  ;;  %7860 = vmatpush.bf16.msra.mxu0 %v9930_v21  ;;  %v9914_v48 = vor.u32 %v10601_v24, %v9911_v3  ;;  %v9879_v3 = vld [vmem:[#allocation8 + $0x98] sm:$0xf0] }
 0xaee   : > { %v12869_v61 = vpack.c.bf16 %v8245_v0, %v8241_v44  ;;  %v10058_v45 = vor.u32 %v10637_v31, %v10055_v6  ;;  %v10597_v44 = vld [vmem:[#allocation8 + $0xac] sm:$0xf]  ;;  %v9895_v0 = vld [vmem:[#allocation8 + $0xb8] sm:$0xf0] }
 0xaef   : > { %v7355_v47 = vpop.f32.mrf.mxu2  ;;  %v7444_v17 = vpop.f32.mrf.mxu3  ;;  %v9898_v22 = vor.u32 %v10597_v44, %v9895_v0  ;;  %v10593_v21 = vld [vmem:[#allocation8 + $0x8c] sm:$0xf] }
 0xaf0   : > { %v7356_v58 = vadd.f32 %v7355_v47, %v7267_v56  ;;  %v7179_v16 = vpop.f32.mrf.mxu0  ;;  %v7268_v52 = vpop.f32.mrf.mxu1  ;;  %v10633_v56 = vld [vmem:[#allocation8 + $0x1cc] sm:$0xf]  ;;  %v9882_v31 = vor.u32 %v10593_v21, %v9879_v3 }
 0xaf1   : > { %v7180_v28 = vadd.f32 %v7179_v16, %v12830_v32  ;;  %7600 = vmatpush.bf16.msrb.mxu1 %v9942_v55  ;;  %7861 = vmatpush.bf16.msra.mxu0 %v9914_v48  ;;  %v10042_v47 = vor.u32 %v10633_v56, %v10039_v4  ;;  %v10629_v24 = vld [vmem:[#allocation8 + $0x1ac] sm:$0xf]  ;;  %v14036_v48 = vld [vmem:[#allocation19_spill] sm:$0xff]  ;;  %v9863_v56 = vld [vmem:[#allocation8 + $0x78] sm:$0xf0] }
 0xaf2   : > { %v7445_v19 = vadd.f32 %v7444_v17, %v7356_v58  ;;  %v14034_v58 = vld [vmem:[#allocation68_spill] sm:$0xff] }
 0xaf3   : > { %v7269_v15 = vadd.f32 %v7268_v52, %v7180_v28  ;;  %v10023_v28 = vld [vmem:[#allocation8 + $0x1b8] sm:$0xf0]  ;;  %v10589_v0 = vld [vmem:[#allocation8 + $0x6c] sm:$0xf] }
 0xaf4   : > { %v10026_v17 = vor.u32 %v10629_v24, %v10023_v28  ;;  %v8249_v55 = vmax.f32 %v7445_v19, 0.0  ;;  %v10625_v4 = vld [vmem:[#allocation8 + $0x18c] sm:$0xf] }
 0xaf5   : > { %7949 = vmatpush.bf16.msra.mxu1 %v10058_v45  ;;  %7862 = vmatpush.bf16.msra.mxu0 %v9898_v22  ;;  %v10101_v45 = vld [vmem:[#allocation8 + $0x248] sm:$0xf] }
 0xaf6   : > { %v10229_v22 = vld [vmem:[#allocation8 + $0x348] sm:$0xf] }
 0xaf7   : > { %v7357_v35 = vpop.f32.mrf.mxu2  ;;  %v7446_v16 = vpop.f32.mrf.mxu3 }
 0xaf8   : > { %v7358_v43 = vadd.f32 %v7357_v35, %v7269_v15  ;;  %v12872_v39 = vpop.f32.mrf.mxu0  ;;  %v12874_v63 = vpop.f32.mrf.mxu1  ;;  %v14035_v35 = vld [vmem:[#allocation87_spill] sm:$0xff]  ;;  %v10651_v15 = vld [vmem:[#allocation8 + $0x254] sm:$0xf0] }
 0xaf9   : > { %7950 = vmatpush.bf16.msra.mxu1 %v10042_v47  ;;  %v10102_v44 = vor.u32 %v10651_v15, %v10101_v45  ;;  %7863 = vmatpush.bf16.msra.mxu0 %v9882_v31  ;;  %v10683_v47 = vld [vmem:[#allocation8 + $0x354] sm:$0xf0]  ;;  %v10585_v15 = vld [vmem:[#allocation8 + $0x4c] sm:$0xf]  ;;  %v9847_v31 = vld [vmem:[#allocation8 + $0x58] sm:$0xf0] }
 0xafa   : > { %v7447_v52 = vadd.f32 %v7446_v16, %v7358_v43  ;;  %v9866_v16 = vor.u32 %v10589_v0, %v9863_v56  ;;  %v10007_v43 = vld [vmem:[#allocation8 + $0x198] sm:$0xf0]  ;;  %v10230_v24 = vor.u32 %v10683_v47, %v10229_v22  ;;  %v10085_v0 = vld [vmem:[#allocation8 + $0x228] sm:$0xf]  ;;  %v10647_v56 = vld [vmem:[#allocation8 + $0x234] sm:$0xf0] }
 0xafb   : > { %7221 = vmatmul.bf16.gmra.mxu0 %v14033_v60  ;;  %7310 = vmatmul.bf16.gmra.mxu1 %v14034_v58  ;;  %v10010_v28 = vor.u32 %v10625_v4, %v10007_v43  ;;  %v10086_v58 = vor.u32 %v10647_v56, %v10085_v0  ;;  %v10581_v4 = vld [vmem:[#allocation8 + $0x2c] sm:$0xf]  ;;  %v9831_v47 = vld [vmem:[#allocation8 + $0x38] sm:$0xf0] }
 0xafc   : > { %v8253_v6 = vmax.f32 %v7447_v52, 0.0  ;;  %7399 = vmatmul.bf16.gmra.mxu2 %v14035_v35  ;;  %7488 = vmatmul.bf16.gmra.mxu3 %v14036_v48  ;;  %v9991_v48 = vld [vmem:[#allocation8 + $0x178] sm:$0xf0]  ;;  %v10213_v35 = vld [vmem:[#allocation8 + $0x328] sm:$0xf]  ;;  %v9834_v25 = vor.u32 %v10581_v4, %v9831_v47 }
 0xafd   : > { %7951 = vmatpush.bf16.msra.mxu1 %v10026_v17  ;;  %7687 = vmatpush.bf16.msrb.mxu2 %v10102_v44  ;;  %v10621_v17 = vld [vmem:[#allocation8 + $0x16c] sm:$0xf]  ;;  %v10679_v44 = vld [vmem:[#allocation8 + $0x334] sm:$0xf0]  ;;  %v9975_v60 = vld [vmem:[#allocation8 + $0x158] sm:$0xf0] }
 0xafe   : > { %v12880_v21 = vpack.c.bf16 %v8253_v6, %v8249_v55  ;;  %7776 = vmatpush.bf16.msrb.mxu3 %v10230_v24  ;;  %7864 = vmatpush.bf16.msra.mxu0 %v9866_v16  ;;  %v9850_v55 = vor.u32 %v10585_v15, %v9847_v31  ;;  %v9994_v6 = vor.u32 %v10621_v17, %v9991_v48  ;;  %v10617_v43 = vld [vmem:[#allocation8 + $0x14c] sm:$0xf]  ;;  %v10643_v16 = vld [vmem:[#allocation8 + $0x214] sm:$0xf0] }
 0xaff   : > { %v12882_v19 = vpop.f32.mrf.mxu2  ;;  %v12884_v3 = vpop.f32.mrf.mxu3  ;;  %v10214_v22 = vor.u32 %v10679_v44, %v10213_v35  ;;  %v9978_v24 = vor.u32 %v10617_v43, %v9975_v60  ;;  %v10070_v31 = vor.u32 %v10643_v16, %v10069_v54  ;;  %v10675_v17 = vld [vmem:[#allocation8 + $0x314] sm:$0xf0]  ;;  %v10577_v56 = vld [vmem:[#allocation8 + $0xc] sm:$0xf] }
 0xb00   : > { %v12886_v52 = vpop.f32.mrf.mxu0  ;;  %v12888_v45 = vpop.f32.mrf.mxu1  ;;  %v10613_v44 = vld [vmem:[#allocation8 + $0x12c] sm:$0xf] }
 0xb01   : > { %7952 = vmatpush.bf16.msra.mxu1 %v10010_v28  ;;  %7688 = vmatpush.bf16.msrb.mxu2 %v10086_v58  ;;  %v10197_v28 = vld [vmem:[#allocation8 + $0x308] sm:$0xf]  ;;  %v9815_v58 = vld [vmem:[#allocation8 + $0x18] sm:$0xf0]  ;;  %v10609_v54 = vld [vmem:[#allocation8 + $0x10c] sm:$0xf] }
 0xb02   : > { %7865 = vmatpush.bf16.msra.mxu0 %v9850_v55  ;;  %7777 = vmatpush.bf16.msrb.mxu3 %v10214_v22  ;;  %v10198_v55 = vor.u32 %v10675_v17, %v10197_v28  ;;  %v9818_v60 = vor.u32 %v10577_v56, %v9815_v58  ;;  %v9943_v22 = vld [vmem:[#allocation8 + $0x118] sm:$0xf0] }
 0xb03   : > { %v9946_v47 = vor.u32 %v10609_v54, %v9943_v22 }
 0xb05   : > { %7953 = vmatpush.bf16.msra.mxu1 %v9994_v6  ;;  %7689 = vmatpush.bf16.msrb.mxu2 %v10070_v31  ;;  %v9959_v6 = vld [vmem:[#allocation8 + $0x138] sm:$0xf0] }
 0xb06   : > { %7866 = vmatpush.bf16.msra.mxu0 %v9834_v25  ;;  %v9962_v4 = vor.u32 %v10613_v44, %v9959_v6  ;;  %7778 = vmatpush.bf16.msrb.mxu3 %v10198_v55 }
 0xb07   : > { %v12890_v15 = vpop.f32.mrf.mxu2  ;;  %v12892_v48 = vpop.f32.mrf.mxu3 }
 0xb08   : > { %v7187_v35 = vpop.f32.mrf.mxu0  ;;  %v7276_v0 = vpop.f32.mrf.mxu1 }
 0xb09   : > { %7954 = vmatpush.bf16.msra.mxu1 %v9978_v24 }
 0xb0a   : > { %7867 = vmatpush.bf16.msra.mxu0 %v9818_v60 }
 0xb0b   : > { %7226 = vmatmul.bf16.gmra.mxu0 %v14001_v41  ;;  %7315 = vmatmul.bf16.gmra.mxu1 %v14002_v26 }
 0xb0c   : > { %7404 = vmatmul.bf16.gmra.mxu2 %v12559_v27  ;;  %7493 = vmatmul.bf16.gmra.mxu3 %v12690_v50 }
 0xb0d   : > { %7955 = vmatpush.bf16.msra.mxu1 %v9962_v4 }
 0xb0f   : > { %v7365_v43 = vpop.f32.mrf.mxu2  ;;  %v7454_v16 = vpop.f32.mrf.mxu3 }
 0xb10   : > { %v7189_v25 = vpop.f32.mrf.mxu0  ;;  %v7278_v24 = vpop.f32.mrf.mxu1 }
 0xb11   : > { %7956 = vmatpush.bf16.msra.mxu1 %v9946_v47  ;;  %v7190_v22 = vadd.f32 %v7189_v25, %v12830_v32 }
 0xb17   : > { %v7367_v28 = vpop.f32.mrf.mxu2  ;;  %v7456_v31 = vpop.f32.mrf.mxu3 }
 0xb18   : > { %v7192_v17 = vpop.f32.mrf.mxu0  ;;  %v7281_v56 = vpop.f32.mrf.mxu1 }
 0xb19   : > { %v7193_v58 = vadd.f32 %v7192_v17, %v12830_v32 }
 0xb1b   : > { %7231 = vmatmul.bf16.gmra.mxu0 %v14004_v51  ;;  %7320 = vmatmul.bf16.gmra.mxu1 %v14005_v18  ;;  %v7282_v4 = vadd.f32 %v7281_v56, %v7193_v58  ;;  %v7188_v51 = vadd.f32 %v7187_v35, %v12830_v32  ;;  %v7185_v35 = vadd.f32 %v12886_v52, %v12830_v32 }
 0xb1c   : > { %7409 = vmatmul.bf16.gmra.mxu2 %v12570_v7  ;;  %7498 = vmatmul.bf16.gmra.mxu3 %v12706_v1  ;;  %v7279_v7 = vadd.f32 %v7278_v24, %v7190_v22 }
 0xb1d   : > { %v7277_v2 = vadd.f32 %v7276_v0, %v7188_v51 }
 0xb1e   : > { %v7368_v36 = vadd.f32 %v7367_v28, %v7279_v7 }
 0xb1f   : > { %v7370_v44 = vpop.f32.mrf.mxu2  ;;  %v7459_v55 = vpop.f32.mrf.mxu3  ;;  %v7366_v25 = vadd.f32 %v7365_v43, %v7277_v2 }
 0xb20   : > { %v7194_v6 = vpop.f32.mrf.mxu0  ;;  %v7283_v60 = vpop.f32.mrf.mxu1  ;;  %v7371_v47 = vadd.f32 %v7370_v44, %v7282_v4  ;;  %v7457_v7 = vadd.f32 %v7456_v31, %v7368_v36 }
 0xb21   : > { %v7195_v54 = vadd.f32 %v7194_v6, %v12830_v32  ;;  %v7455_v51 = vadd.f32 %v7454_v16, %v7366_v25 }
 0xb22   : > { %v7460_v26 = vadd.f32 %v7459_v55, %v7371_v47  ;;  %v8269_v43 = vmax.f32 %v7457_v7, 0.0 }
 0xb23   : > { %v7284_v50 = vadd.f32 %v7283_v60, %v7195_v54  ;;  %v8265_v31 = vmax.f32 %v7455_v51, 0.0 }
 0xb24   : > { %v8273_v44 = vmax.f32 %v7460_v26, 0.0 }
 0xb25   : > { %v8371_v16 = vpack.c.bf16 %v8269_v43, %v8265_v31 }
 0xb27   : > { %v7372_v18 = vpop.f32.mrf.mxu2  ;;  %v7461_v27 = vpop.f32.mrf.mxu3 }
 0xb28   : > { %v7373_v1 = vadd.f32 %v7372_v18, %v7284_v50  ;;  %v7197_v41 = vpop.f32.mrf.mxu0  ;;  %v7286_v17 = vpop.f32.mrf.mxu1 }
 0xb29   : > { %v7198_v33 = vadd.f32 %v7197_v41, %v12830_v32  ;;  %v7274_v41 = vadd.f32 %v12888_v45, %v7185_v35 }
 0xb2a   : > { %v7462_v56 = vadd.f32 %v7461_v27, %v7373_v1  ;;  %v7183_v27 = vadd.f32 %v12872_v39, %v12830_v32 }
 0xb2b   : > { %v7287_v58 = vadd.f32 %v7286_v17, %v7198_v33  ;;  %7512 = vmatmul.bf16.vlgmr.msrb.gmra.mxu0 %v13954_v46  ;;  %7601 = vmatmul.bf16.vlgmr.msrb.gmra.mxu1 %v13955_v11 }
 0xb2c   : > { %v8277_v24 = vmax.f32 %v7462_v56, 0.0  ;;  %7690 = vmatmul.bf16.vlgmr.msrb.gmra.mxu2 %v13956_v5  ;;  %7779 = vmatmul.bf16.vlgmr.msrb.gmra.mxu3 %v12578_v23  ;;  %v7272_v0 = vadd.f32 %v12874_v63, %v7183_v27  ;;  %v14037_v56 = vld [vmem:[#allocation69_spill] sm:$0xff] }
 0xb2d   : > { %8425 = vmatpush.bf16.xpose.msrb.mxu0 %v12770_v12  ;;  %v7363_v12 = vadd.f32 %v12890_v15, %v7274_v41  ;;  %v14040_v41 = vld [vmem:[#allocation18_spill] sm:$0xff] }
 0xb2e   : > { %v8375_v33 = vpack.c.bf16 %v8277_v24, %v8273_v44  ;;  %v7361_v36 = vadd.f32 %v12882_v19, %v7272_v0 }
 0xb2f   : > { %v7375_v50 = vpop.f32.mrf.mxu2  ;;  %v7464_v1 = vpop.f32.mrf.mxu3  ;;  %v7452_v45 = vadd.f32 %v12892_v48, %v7363_v12 }
 0xb30   : > { %v7376_v18 = vadd.f32 %v7375_v50, %v7287_v58  ;;  %8438 = vmatpush.bf16.xpose.msrb.mxu1 %v8375_v33  ;;  %v7199_v2 = vpop.f32.mrf.mxu0  ;;  %v7288_v26 = vpop.f32.mrf.mxu1  ;;  %v7450_v60 = vadd.f32 %v12884_v3, %v7361_v36  ;;  %v14038_v3 = vld [vmem:[#allocation21_spill] sm:$0xff]  ;;  %v14041_v36 = vld [vmem:[#allocation60_spill] sm:$0xff] }
 0xb31   : > { %v7200_v52 = vadd.f32 %v7199_v2, %v12830_v32  ;;  %v8261_v22 = vmax.f32 %v7452_v45, 0.0 }
 0xb32   : > { %v7465_v28 = vadd.f32 %v7464_v1, %v7376_v18 }
 0xb33   : > { %v7289_v39 = vadd.f32 %v7288_v26, %v7200_v52 }
 0xb34   : > { %v8281_v19 = vmax.f32 %v7465_v28, 0.0 }
 0xb35   : > { %8426 = vmatpush.bf16.xpose.msrb.mxu0 %v12762_v14  ;;  %v8257_v14 = vmax.f32 %v7450_v60, 0.0 }
 0xb37   : > { %v7377_v55 = vpop.f32.mrf.mxu2  ;;  %v7466_v6 = vpop.f32.mrf.mxu3  ;;  %v8367_v58 = vpack.c.bf16 %v8261_v22, %v8257_v14 }
 0xb38   : > { %v7378_v4 = vadd.f32 %v7377_v55, %v7289_v39  ;;  %8439 = vmatpush.bf16.xpose.msrb.mxu1 %v8371_v16  ;;  %v7202_v63 = vpop.f32.mrf.mxu0  ;;  %v7291_v54 = vpop.f32.mrf.mxu1 }
 0xb39   : > { %v7203_v15 = vadd.f32 %v7202_v63, %v12830_v32 }
 0xb3a   : > { %v7467_v47 = vadd.f32 %v7466_v6, %v7378_v4 }
 0xb3b   : > { %v7292_v17 = vadd.f32 %v7291_v54, %v7203_v15  ;;  %7517 = vmatmul.bf16.gmra.mxu0 %v13958_v8  ;;  %7606 = vmatmul.bf16.gmra.mxu1 %v13959_v20  ;;  %v14043_v54 = vld [vmem:[#allocation32_spill] sm:$0xff] }
 0xb3c   : > { %v8285_v48 = vmax.f32 %v7467_v47, 0.0  ;;  %7695 = vmatmul.bf16.gmra.mxu2 %v13960_v34  ;;  %7784 = vmatmul.bf16.gmra.mxu3 %v14037_v56 }
 0xb3d   : > { %8427 = vmatpush.bf16.xpose.msrb.mxu0 %v14038_v3 }
 0xb3e   : > { %v12930_v35 = vpack.c.bf16 %v8285_v48, %v8281_v19 }
 0xb3f   : > { %v7380_v25 = vpop.f32.mrf.mxu2  ;;  %v7469_v44 = vpop.f32.mrf.mxu3 }
 0xb40   : > { %14039 = vst [vmem:[#allocation37_spill] sm:$0xff] %v12930_v35  ;;  %v7381_v24 = vadd.f32 %v7380_v25, %v7292_v17  ;;  %8440 = vmatpush.bf16.xpose.msrb.mxu1 %v8367_v58  ;;  %v7204_v27 = vpop.f32.mrf.mxu0  ;;  %v7293_v7 = vpop.f32.mrf.mxu1  ;;  %v14044_v25 = vld [vmem:[#allocation24_spill] sm:$0xff] }
 0xb41   : > { %v7205_v33 = vadd.f32 %v7204_v27, %v12830_v32  ;;  %v10183_v27 = vld [vmem:[#allocation8 + $0x2f8] sm:$0xf0] }
 0xb42   : > { %v7470_v50 = vadd.f32 %v7469_v44, %v7381_v24  ;;  %v14045_v44 = vld [vmem:[#allocation15_spill] sm:$0xff]  ;;  %v10669_v24 = vld [vmem:[#allocation8 + $0x2ec] sm:$0xf] }
 0xb43   : > { %v7294_v1 = vadd.f32 %v7293_v7, %v7205_v33  ;;  %v14046_v7 = vld [vmem:[#allocation20_spill] sm:$0xff] }
 0xb44   : > { %v8289_v28 = vmax.f32 %v7470_v50, 0.0 }
 0xb45   : > { %8428 = vmatpush.bf16.xpose.msrb.mxu0 %v14040_v41 }
 0xb47   : > { %v7382_v51 = vpop.f32.mrf.mxu2  ;;  %v7471_v18 = vpop.f32.mrf.mxu3 }
 0xb48   : > { %v7383_v2 = vadd.f32 %v7382_v51, %v7294_v1  ;;  %8441 = vmatpush.bf16.xpose.msrb.mxu1 %v12880_v21  ;;  %v7207_v26 = vpop.f32.mrf.mxu0  ;;  %v7296_v52 = vpop.f32.mrf.mxu1 }
 0xb49   : > { %v7208_v0 = vadd.f32 %v7207_v26, %v12830_v32 }
 0xb4a   : > { %v7472_v12 = vadd.f32 %v7471_v18, %v7383_v2 }
 0xb4b   : > { %v7297_v43 = vadd.f32 %v7296_v52, %v7208_v0  ;;  %7522 = vmatmul.bf16.gmra.mxu0 %v13962_v59  ;;  %7611 = vmatmul.bf16.gmra.mxu1 %v13963_v62  ;;  %v10701_v0 = vld [vmem:[#allocation8 + $0x3ec] sm:$0xf] }
 0xb4c   : > { %v8293_v39 = vmax.f32 %v7472_v12, 0.0  ;;  %7700 = vmatmul.bf16.gmra.mxu2 %v13964_v37  ;;  %7789 = vmatmul.bf16.gmra.mxu3 %v12594_v13  ;;  %v10311_v12 = vld [vmem:[#allocation8 + $0x3f8] sm:$0xf0] }
 0xb4d   : > { %8429 = vmatpush.bf16.xpose.msrb.mxu0 %v14041_v36 }
 0xb4e   : > { %v12941_v31 = vpack.c.bf16 %v8293_v39, %v8289_v28  ;;  %v10314_v28 = vor.u32 %v10701_v0, %v10311_v12 }
 0xb4f   : > { %v7385_v21 = vpop.f32.mrf.mxu2  ;;  %v7474_v45 = vpop.f32.mrf.mxu3 }
 0xb50   : > { %14042 = vst [vmem:[#allocation64_spill] sm:$0xff] %v12941_v31  ;;  %v7386_v16 = vadd.f32 %v7385_v21, %v7297_v43  ;;  %8442 = vmatpush.bf16.xpose.msrb.mxu1 %v12869_v61  ;;  %v7209_v55 = vpop.f32.mrf.mxu0  ;;  %v7298_v6 = vpop.f32.mrf.mxu1  ;;  %v14047_v43 = vld [vmem:[#allocation41_spill] sm:$0xff]  ;;  %8127 = vmatpush.bf16.msra.mxu3 %v10314_v28 }
 0xb51   : > { %v7210_v60 = vadd.f32 %v7209_v55, %v12830_v32 }
 0xb52   : > { %v7475_v4 = vadd.f32 %v7474_v45, %v7386_v16 }
 0xb53   : > { %v7299_v63 = vadd.f32 %v7298_v6, %v7210_v60 }
 0xb54   : > { %v8297_v61 = vmax.f32 %v7475_v4, 0.0 }
 0xb55   : > { %8430 = vmatpush.bf16.xpose.msrb.mxu0 %v14043_v54 }
 0xb57   : > { %v7387_v15 = vpop.f32.mrf.mxu2  ;;  %v7476_v22 = vpop.f32.mrf.mxu3 }
 0xb58   : > { %v7388_v47 = vadd.f32 %v7387_v15, %v7299_v63  ;;  %8443 = vmatpush.bf16.xpose.msrb.mxu1 %v12861_v38  ;;  %v7212_v17 = vpop.f32.mrf.mxu0  ;;  %v7301_v14 = vpop.f32.mrf.mxu1  ;;  %v10186_v38 = vor.u32 %v10669_v24, %v10183_v27 }
 0xb59   : > { %v7213_v19 = vadd.f32 %v7212_v17, %v12830_v32 }
 0xb5a   : > { %v7477_v48 = vadd.f32 %v7476_v22, %v7388_v47  ;;  %8038 = vmatpush.bf16.msra.mxu2 %v10186_v38 }
 0xb5b   : > { %v7302_v3 = vadd.f32 %v7301_v14, %v7213_v19  ;;  %7527 = vmatmul.bf16.gmra.mxu0 %v13966_v9  ;;  %7616 = vmatmul.bf16.gmra.mxu1 %v13967_v30 }
 0xb5c   : > { %v8301_v58 = vmax.f32 %v7477_v48, 0.0  ;;  %7705 = vmatmul.bf16.gmra.mxu2 %v14044_v25  ;;  %7794 = vmatmul.bf16.gmra.mxu3 %v14045_v44 }
 0xb5d   : > { %8431 = vmatpush.bf16.xpose.msrb.mxu0 %v14046_v7 }
 0xb5e   : > { %v12953_v33 = vpack.c.bf16 %v8301_v58, %v8297_v61 }
 0xb5f   : > { %v7390_v50 = vpop.f32.mrf.mxu2  ;;  %v7479_v1 = vpop.f32.mrf.mxu3 }
 0xb60   : > { %v7391_v41 = vadd.f32 %v7390_v50, %v7302_v3  ;;  %8444 = vmatpush.bf16.xpose.msrb.mxu1 %v12853_v40  ;;  %v7214_v51 = vpop.f32.mrf.mxu0  ;;  %v7303_v18 = vpop.f32.mrf.mxu1  ;;  %v14048_v50 = vld [vmem:[#allocation75_spill] sm:$0xff] }
 0xb61   : > { %v7215_v2 = vadd.f32 %v7214_v51, %v12830_v32  ;;  %v14049_v51 = vld [vmem:[#allocation58_spill] sm:$0xff] }
 0xb62   : > { %v7480_v26 = vadd.f32 %v7479_v1, %v7391_v41 }
 0xb63   : > { %v7304_v52 = vadd.f32 %v7303_v18, %v7215_v2  ;;  %v14050_v18 = vld [vmem:[#allocation79_spill] sm:$0xff]  ;;  %v10665_v2 = vld [vmem:[#allocation8 + $0x2cc] sm:$0xf] }
 0xb64   : > { %v8305_v60 = vmax.f32 %v7480_v26, 0.0  ;;  %v10167_v26 = vld [vmem:[#allocation8 + $0x2d8] sm:$0xf0] }
 0xb65   : > { %8432 = vmatpush.bf16.xpose.msrb.mxu0 %v14047_v43 }
 0xb67   : > { %v7392_v39 = vpop.f32.mrf.mxu2  ;;  %v7481_v36 = vpop.f32.mrf.mxu3 }
 0xb68   : > { %v7393_v21 = vadd.f32 %v7392_v39, %v7304_v52  ;;  %8445 = vmatpush.bf16.xpose.msrb.mxu1 %v12845_v57  ;;  %v7217_v45 = vpop.f32.mrf.mxu0  ;;  %v7306_v16 = vpop.f32.mrf.mxu1  ;;  %v10170_v52 = vor.u32 %v10665_v2, %v10167_v26 }
 0xb69   : > { %v7218_v40 = vadd.f32 %v7217_v45, %v12830_v32 }
 0xb6a   : > { %v7482_v55 = vadd.f32 %v7481_v36, %v7393_v21  ;;  %8039 = vmatpush.bf16.msra.mxu2 %v10170_v52 }
 0xb6b   : > { %v7307_v6 = vadd.f32 %v7306_v16, %v7218_v40  ;;  %7532 = vmatmul.bf16.gmra.mxu0 %v13970_v53  ;;  %7621 = vmatmul.bf16.gmra.mxu1 %v13971_v10  ;;  %v10697_v40 = vld [vmem:[#allocation8 + $0x3cc] sm:$0xf] }
 0xb6c   : > { %v8309_v4 = vmax.f32 %v7482_v55, 0.0  ;;  %7710 = vmatmul.bf16.gmra.mxu2 %v13972_v49  ;;  %7799 = vmatmul.bf16.gmra.mxu3 %v12610_v29  ;;  %v10295_v55 = vld [vmem:[#allocation8 + $0x3d8] sm:$0xf0] }
 0xb6e   : > { %v12964_v63 = vpack.c.bf16 %v8309_v4, %v8305_v60 }
 0xb6f   : > { %v7395_v54 = vpop.f32.mrf.mxu2  ;;  %v7484_v57 = vpop.f32.mrf.mxu3 }
 0xb70   : > { %v7396_v15 = vadd.f32 %v7395_v54, %v7307_v6  ;;  %v7219_v22 = vpop.f32.mrf.mxu0  ;;  %v7308_v47 = vpop.f32.mrf.mxu1  ;;  %v10298_v6 = vor.u32 %v10697_v40, %v10295_v55  ;;  %v14055_v40 = vld [vmem:[#allocation45_spill] sm:$0xff]  ;;  %v14056_v55 = vld [vmem:[#allocation66_spill] sm:$0xff] }
 0xb71   : > { %v7220_v17 = vadd.f32 %v7219_v22, %v12830_v32 }
 0xb72   : > { %v7485_v14 = vadd.f32 %v7484_v57, %v7396_v15  ;;  %8128 = vmatpush.bf16.msra.mxu3 %v10298_v6 }
 0xb73   : > { %v7309_v19 = vadd.f32 %v7308_v47, %v7220_v17 }
 0xb74   : > { %v8313_v1 = vmax.f32 %v7485_v14, 0.0  ;;  %v14051_v14 = vld [vmem:[#allocation44_spill] sm:$0xff] }
 0xb77   : > { %v7397_v48 = vpop.f32.mrf.mxu2  ;;  %v7486_v3 = vpop.f32.mrf.mxu3 }
 0xb78   : > { %v7398_v61 = vadd.f32 %v7397_v48, %v7309_v19  ;;  %v7222_v58 = vpop.f32.mrf.mxu0  ;;  %v7311_v24 = vpop.f32.mrf.mxu1  ;;  %v14052_v19 = vld [vmem:[#allocation54_spill] sm:$0xff] }
 0xb79   : > { %v7223_v27 = vadd.f32 %v7222_v58, %v12830_v32  ;;  %v14054_v58 = vld [vmem:[#allocation26_spill] sm:$0xff] }
 0xb7a   : > { %v7487_v7 = vadd.f32 %v7486_v3, %v7398_v61  ;;  %v14053_v61 = vld [vmem:[#allocation70_spill] sm:$0xff] }
 0xb7b   : > { %v7312_v38 = vadd.f32 %v7311_v24, %v7223_v27  ;;  %7537 = vmatmul.bf16.gmra.mxu0 %v13974_v42  ;;  %7626 = vmatmul.bf16.gmra.mxu1 %v14048_v50 }
 0xb7c   : > { %v8317_v41 = vmax.f32 %v7487_v7, 0.0  ;;  %7715 = vmatmul.bf16.gmra.mxu2 %v14049_v51  ;;  %7804 = vmatmul.bf16.gmra.mxu3 %v14050_v18 }
 0xb7e   : > { %v12972_v0 = vpack.c.bf16 %v8317_v41, %v8313_v1 }
 0xb7f   : > { %v7400_v12 = vpop.f32.mrf.mxu2  ;;  %v7489_v43 = vpop.f32.mrf.mxu3 }
 0xb80   : > { %v7401_v28 = vadd.f32 %v7400_v12, %v7312_v38  ;;  %v7224_v39 = vpop.f32.mrf.mxu0  ;;  %v7313_v36 = vpop.f32.mrf.mxu1 }
 0xb81   : > { %v7225_v21 = vadd.f32 %v7224_v39, %v12830_v32 }
 0xb82   : > { %v7490_v45 = vadd.f32 %v7489_v43, %v7401_v28 }
 0xb83   : > { %v7314_v16 = vadd.f32 %v7313_v36, %v7225_v21 }
 0xb84   : > { %v8321_v48 = vmax.f32 %v7490_v45, 0.0 }
 0xb87   : > { %v7402_v60 = vpop.f32.mrf.mxu2  ;;  %v7491_v4 = vpop.f32.mrf.mxu3 }
 0xb88   : > { %v7403_v54 = vadd.f32 %v7402_v60, %v7314_v16  ;;  %v7227_v57 = vpop.f32.mrf.mxu0  ;;  %v7316_v15 = vpop.f32.mrf.mxu1 }
 0xb89   : > { %v7228_v22 = vadd.f32 %v7227_v57, %v12830_v32  ;;  %v10661_v57 = vld [vmem:[#allocation8 + $0x2ac] sm:$0xf] }
 0xb8a   : > { %v7492_v47 = vadd.f32 %v7491_v4, %v7403_v54  ;;  %v14057_v4 = vld [vmem:[#allocation81_spill] sm:$0xff]  ;;  %v14058_v54 = vld [vmem:[#allocation16_spill] sm:$0xff] }
 0xb8b   : > { %v7317_v17 = vadd.f32 %v7316_v15, %v7228_v22  ;;  %7542 = vmatmul.bf16.gmra.mxu0 %v14051_v14  ;;  %7631 = vmatmul.bf16.gmra.mxu1 %v14052_v19  ;;  %v10151_v15 = vld [vmem:[#allocation8 + $0x2b8] sm:$0xf0] }
 0xb8c   : > { %v8325_v3 = vmax.f32 %v7492_v47, 0.0  ;;  %7720 = vmatmul.bf16.gmra.mxu2 %v14053_v61  ;;  %7809 = vmatmul.bf16.gmra.mxu3 %v14054_v58  ;;  %v10154_v22 = vor.u32 %v10661_v57, %v10151_v15  ;;  %v14061_v57 = vld [vmem:[#allocation76_spill] sm:$0xff] }
 0xb8e   : > { %v12980_v24 = vpack.c.bf16 %v8325_v3, %v8321_v48  ;;  %8040 = vmatpush.bf16.msra.mxu2 %v10154_v22 }
 0xb8f   : > { %v7405_v27 = vpop.f32.mrf.mxu2  ;;  %v7494_v7 = vpop.f32.mrf.mxu3 }
 0xb90   : > { %v7406_v38 = vadd.f32 %v7405_v27, %v7317_v17  ;;  %v7229_v1 = vpop.f32.mrf.mxu0  ;;  %v7318_v41 = vpop.f32.mrf.mxu1 }
 0xb91   : > { %v7230_v2 = vadd.f32 %v7229_v1, %v12830_v32 }
 0xb92   : > { %v7495_v26 = vadd.f32 %v7494_v7, %v7406_v38 }
 0xb93   : > { %v7319_v52 = vadd.f32 %v7318_v41, %v7230_v2  ;;  %v10693_v2 = vld [vmem:[#allocation8 + $0x3ac] sm:$0xf] }
 0xb94   : > { %v8329_v6 = vmax.f32 %v7495_v26, 0.0  ;;  %v10279_v26 = vld [vmem:[#allocation8 + $0x3b8] sm:$0xf0] }
 0xb97   : > { %v7407_v12 = vpop.f32.mrf.mxu2  ;;  %v7496_v43 = vpop.f32.mrf.mxu3 }
 0xb98   : > { %v7408_v28 = vadd.f32 %v7407_v12, %v7319_v52  ;;  %v7232_v39 = vpop.f32.mrf.mxu0  ;;  %v7321_v36 = vpop.f32.mrf.mxu1  ;;  %v12994_v52 = vld [vmem:[%s13356_s8] sm:$0xf] }
 0xb99   : > { %v7233_v21 = vadd.f32 %v7232_v39, %v12830_v32  ;;  %14059 = vst [vmem:[#allocation62_spill] sm:$0xff] %v12994_v52  ;;  %v12997_v12 = vperm.slane %v12994_v52, 2 }
 0xb9a   : > { %v7497_v45 = vadd.f32 %v7496_v43, %v7408_v28  ;;  %v10282_v43 = vor.u32 %v10693_v2, %v10279_v26 }
 0xb9b   : > { %v7322_v16 = vadd.f32 %v7321_v36, %v7233_v21  ;;  %7547 = vmatmul.bf16.gmra.mxu0 %v14055_v40  ;;  %7636 = vmatmul.bf16.gmra.mxu1 %v14056_v55 }
 0xb9c   : > { %v8333_v60 = vmax.f32 %v7497_v45, 0.0  ;;  %7725 = vmatmul.bf16.gmra.mxu2 %v14057_v4  ;;  %7814 = vmatmul.bf16.gmra.mxu3 %v14058_v54  ;;  %v10071_v54 = vld [vmem:[#allocation8 + $0x218] sm:$0xf0]  ;;  %v10673_v4 = vld [vmem:[#allocation8 + $0x30c] sm:$0xf] }
 0xb9d   : > { %8129 = vmatpush.bf16.msra.mxu3 %v10282_v43 }
 0xb9e   : > { %v12988_v47 = vpack.c.bf16 %v8333_v60, %v8329_v6  ;;  %v14060_v60 = vld [vmem:[#allocation46_spill] sm:$0xff] }
 0xb9f   : > { %v7410_v17 = vpop.f32.mrf.mxu2  ;;  %v7499_v48 = vpop.f32.mrf.mxu3 }
 0xba0   : > { %v7411_v3 = vadd.f32 %v7410_v17, %v7322_v16  ;;  %v7234_v27 = vpop.f32.mrf.mxu0  ;;  %v7323_v7 = vpop.f32.mrf.mxu1  ;;  %v14062_v17 = vld [vmem:[#allocation82_spill] sm:$0xff] }
 0xba1   : > { %v7235_v38 = vadd.f32 %v7234_v27, %v12830_v32 }
 0xba2   : > { %v7500_v1 = vadd.f32 %v7499_v48, %v7411_v3  ;;  %v14063_v48 = vld [vmem:[#allocation72_spill] sm:$0xff] }
 0xba3   : > { %v7324_v41 = vadd.f32 %v7323_v7, %v7235_v38 }
 0xba4   : > { %v8337_v15 = vmax.f32 %v7500_v1, 0.0 }
 0xba7   : > { %v7412_v28 = vpop.f32.mrf.mxu2  ;;  %v7501_v39 = vpop.f32.mrf.mxu3 }
 0xba8   : > { %v7413_v36 = vadd.f32 %v7412_v28, %v7324_v41  ;;  %v7513_v21 = vpop.f32.mrf.mxu0  ;;  %v7602_v45 = vpop.f32.mrf.mxu1 }
 0xba9   : > { %v7514_v32 = vadd.f32 %v7513_v21, %v12997_v12 }
 0xbaa   : > { %v7502_v16 = vadd.f32 %v7501_v39, %v7413_v36 }
 0xbab   : > { %v7603_v6 = vadd.f32 %v7602_v45, %v7514_v32  ;;  %7552 = vmatmul.bf16.gmra.mxu0 %v14060_v60  ;;  %7641 = vmatmul.bf16.gmra.mxu1 %v14061_v57  ;;  %v14076_v60 = vld [vmem:[#allocation85_spill] sm:$0xff] }
 0xbac   : > { %v8341_v22 = vmax.f32 %v7502_v16, 0.0  ;;  %7730 = vmatmul.bf16.gmra.mxu2 %v14062_v17  ;;  %7819 = vmatmul.bf16.gmra.mxu3 %v14063_v48  ;;  %v14066_v17 = vld [vmem:[#allocation83_spill] sm:$0xff] }
 0xbae   : > { %v13004_v3 = vpack.c.bf16 %v8341_v22, %v8337_v15  ;;  %v14064_v15 = vld [vmem:[#allocation47_spill] sm:$0xff] }
 0xbaf   : > { %v7691_v27 = vpop.f32.mrf.mxu2  ;;  %v7780_v7 = vpop.f32.mrf.mxu3  ;;  %v14065_v22 = vld [vmem:[#allocation55_spill] sm:$0xff] }
 0xbb0   : > { %v7692_v38 = vadd.f32 %v7691_v27, %v7603_v6  ;;  %v7515_v41 = vpop.f32.mrf.mxu0  ;;  %v7604_v2 = vpop.f32.mrf.mxu1 }
 0xbb1   : > { %v7516_v26 = vadd.f32 %v7515_v41, %v12997_v12  ;;  %v14067_v41 = vld [vmem:[#allocation80_spill] sm:$0xff] }
 0xbb2   : > { %v7781_v43 = vadd.f32 %v7780_v7, %v7692_v38  ;;  %v10657_v7 = vld [vmem:[#allocation8 + $0x28c] sm:$0xf]  ;;  %v10135_v38 = vld [vmem:[#allocation8 + $0x298] sm:$0xf0] }
 0xbb3   : > { %v7605_v28 = vadd.f32 %v7604_v2, %v7516_v26  ;;  %v10138_v2 = vor.u32 %v10657_v7, %v10135_v38 }
 0xbb4   : > { %v8218_v6 = vmax.f32 %v7781_v43, 0.0 }
 0xbb5   : > { %8041 = vmatpush.bf16.msra.mxu2 %v10138_v2 }
 0xbb7   : > { %v7693_v39 = vpop.f32.mrf.mxu2  ;;  %v7782_v36 = vpop.f32.mrf.mxu3 }
 0xbb8   : > { %v7694_v21 = vadd.f32 %v7693_v39, %v7605_v28  ;;  %v7518_v1 = vpop.f32.mrf.mxu0  ;;  %v7607_v45 = vpop.f32.mrf.mxu1 }
 0xbb9   : > { %v7519_v32 = vadd.f32 %v7518_v1, %v12997_v12 }
 0xbba   : > { %v7783_v16 = vadd.f32 %v7782_v36, %v7694_v21 }
 0xbbb   : > { %v7608_v48 = vadd.f32 %v7607_v45, %v7519_v32  ;;  %7557 = vmatmul.bf16.gmra.mxu0 %v14064_v15  ;;  %7646 = vmatmul.bf16.gmra.mxu1 %v14065_v22  ;;  %v10263_v22 = vld [vmem:[#allocation8 + $0x398] sm:$0xf0] }
 0xbbc   : > { %v8222_v27 = vmax.f32 %v7783_v16, 0.0  ;;  %7735 = vmatmul.bf16.gmra.mxu2 %v14066_v17  ;;  %7824 = vmatmul.bf16.gmra.mxu3 %v14067_v41  ;;  %v10689_v16 = vld [vmem:[#allocation8 + $0x38c] sm:$0xf] }
 0xbbd   : > { %v10266_v17 = vor.u32 %v10689_v16, %v10263_v22 }
 0xbbe   : > { %v13012_v26 = vpack.c.bf16 %v8222_v27, %v8218_v6 }
 0xbbf   : > { %v7696_v28 = vpop.f32.mrf.mxu2  ;;  %v7785_v39 = vpop.f32.mrf.mxu3  ;;  %8130 = vmatpush.bf16.msra.mxu3 %v10266_v17 }
 0xbc0   : > { %14068 = vst [vmem:[#allocation38_spill] sm:$0xff] %v13012_v26  ;;  %v7697_v36 = vadd.f32 %v7696_v28, %v7608_v48  ;;  %v7520_v21 = vpop.f32.mrf.mxu0  ;;  %v7609_v1 = vpop.f32.mrf.mxu1  ;;  %v14069_v48 = vld [vmem:[#allocation48_spill] sm:$0xff]  ;;  %v14070_v28 = vld [vmem:[#allocation67_spill] sm:$0xff] }
 0xbc1   : > { %v7521_v45 = vadd.f32 %v7520_v21, %v12997_v12 }
 0xbc2   : > { %v7786_v32 = vadd.f32 %v7785_v39, %v7697_v36  ;;  %v14071_v36 = vld [vmem:[#allocation84_spill] sm:$0xff] }
 0xbc3   : > { %v7610_v43 = vadd.f32 %v7609_v1, %v7521_v45  ;;  %v14072_v1 = vld [vmem:[#allocation27_spill] sm:$0xff] }
 0xbc4   : > { %v8226_v21 = vmax.f32 %v7786_v32, 0.0 }
 0xbc7   : > { %v7698_v15 = vpop.f32.mrf.mxu2  ;;  %v7787_v41 = vpop.f32.mrf.mxu3 }
 0xbc8   : > { %v7699_v57 = vadd.f32 %v7698_v15, %v7610_v43  ;;  %v7523_v7 = vpop.f32.mrf.mxu0  ;;  %v7612_v6 = vpop.f32.mrf.mxu1 }
 0xbc9   : > { %v7524_v27 = vadd.f32 %v7523_v7, %v12997_v12 }
 0xbca   : > { %v7788_v38 = vadd.f32 %v7787_v41, %v7699_v57 }
 0xbcb   : > { %v7613_v2 = vadd.f32 %v7612_v6, %v7524_v27  ;;  %7562 = vmatmul.bf16.gmra.mxu0 %v14069_v48  ;;  %7651 = vmatmul.bf16.gmra.mxu1 %v14070_v28 }
 0xbcc   : > { %v8230_v39 = vmax.f32 %v7788_v38, 0.0  ;;  %7740 = vmatmul.bf16.gmra.mxu2 %v14071_v36  ;;  %7829 = vmatmul.bf16.gmra.mxu3 %v14072_v1 }
 0xbce   : > { %v13020_v22 = vpack.c.bf16 %v8230_v39, %v8226_v21  ;;  %v14074_v21 = vld [vmem:[#allocation49_spill] sm:$0xff] }
 0xbcf   : > { %v7701_v17 = vpop.f32.mrf.mxu2  ;;  %v7790_v15 = vpop.f32.mrf.mxu3  ;;  %v14075_v39 = vld [vmem:[#allocation77_spill] sm:$0xff] }
 0xbd0   : > { %14073 = vst [vmem:[#allocation74_spill] sm:$0xff] %v13020_v22  ;;  %v7702_v45 = vadd.f32 %v7701_v17, %v7613_v2  ;;  %v7525_v43 = vpop.f32.mrf.mxu0  ;;  %v7614_v16 = vpop.f32.mrf.mxu1 }
 0xbd1   : > { %v7526_v57 = vadd.f32 %v7525_v43, %v12997_v12  ;;  %v14077_v43 = vld [vmem:[#allocation17_spill] sm:$0xff] }
 0xbd2   : > { %v7791_v41 = vadd.f32 %v7790_v15, %v7702_v45  ;;  %v10653_v15 = vld [vmem:[#allocation8 + $0x26c] sm:$0xf]  ;;  %v10119_v45 = vld [vmem:[#allocation8 + $0x278] sm:$0xf0] }
 0xbd3   : > { %v7615_v7 = vadd.f32 %v7614_v16, %v7526_v57  ;;  %v10122_v16 = vor.u32 %v10653_v15, %v10119_v45 }
 0xbd4   : > { %v8234_v2 = vmax.f32 %v7791_v41, 0.0 }
 0xbd5   : > { %8042 = vmatpush.bf16.msra.mxu2 %v10122_v16 }
 0xbd7   : > { %v7703_v6 = vpop.f32.mrf.mxu2  ;;  %v7792_v27 = vpop.f32.mrf.mxu3 }
 0xbd8   : > { %v7704_v28 = vadd.f32 %v7703_v6, %v7615_v7  ;;  %v7528_v32 = vpop.f32.mrf.mxu0  ;;  %v7617_v38 = vpop.f32.mrf.mxu1 }
 0xbd9   : > { %v7529_v36 = vadd.f32 %v7528_v32, %v12997_v12 }
 0xbda   : > { %v7793_v48 = vadd.f32 %v7792_v27, %v7704_v28 }
 0xbdb   : > { %v7618_v1 = vadd.f32 %v7617_v38, %v7529_v36  ;;  %7567 = vmatmul.bf16.gmra.mxu0 %v14074_v21  ;;  %7656 = vmatmul.bf16.gmra.mxu1 %v14075_v39  ;;  %v10247_v39 = vld [vmem:[#allocation8 + $0x378] sm:$0xf0] }
 0xbdc   : > { %v8238_v17 = vmax.f32 %v7793_v48, 0.0  ;;  %7745 = vmatmul.bf16.gmra.mxu2 %v14076_v60  ;;  %7834 = vmatmul.bf16.gmra.mxu3 %v14077_v43  ;;  %v10685_v48 = vld [vmem:[#allocation8 + $0x36c] sm:$0xf] }
 0xbdd   : > { %v10250_v60 = vor.u32 %v10685_v48, %v10247_v39 }
 0xbde   : > { %v13028_v57 = vpack.c.bf16 %v8238_v17, %v8234_v2 }
 0xbdf   : > { %v7706_v7 = vpop.f32.mrf.mxu2  ;;  %v7795_v6 = vpop.f32.mrf.mxu3  ;;  %8131 = vmatpush.bf16.msra.mxu3 %v10250_v60 }
 0xbe0   : > { %v7707_v28 = vadd.f32 %v7706_v7, %v7618_v1  ;;  %v7530_v36 = vpop.f32.mrf.mxu0  ;;  %v7619_v27 = vpop.f32.mrf.mxu1  ;;  %v14078_v1 = vld [vmem:[#allocation50_spill] sm:$0xff]  ;;  %v14079_v7 = vld [vmem:[#allocation56_spill] sm:$0xff] }
 0xbe1   : > { %v7531_v32 = vadd.f32 %v7530_v36, %v12997_v12 }
 0xbe2   : > { %v7796_v38 = vadd.f32 %v7795_v6, %v7707_v28  ;;  %v14080_v28 = vld [vmem:[#allocation86_spill] sm:$0xff] }
 0xbe3   : > { %v7620_v41 = vadd.f32 %v7619_v27, %v7531_v32  ;;  %v14081_v27 = vld [vmem:[#allocation40_spill] sm:$0xff] }
 0xbe4   : > { %v8242_v36 = vmax.f32 %v7796_v38, 0.0 }
 0xbe7   : > { %v7708_v21 = vpop.f32.mrf.mxu2  ;;  %v7797_v43 = vpop.f32.mrf.mxu3 }
 0xbe8   : > { %v7709_v52 = vadd.f32 %v7708_v21, %v7620_v41  ;;  %v7533_v15 = vpop.f32.mrf.mxu0  ;;  %v7622_v2 = vpop.f32.mrf.mxu1 }
 0xbe9   : > { %v7534_v17 = vadd.f32 %v7533_v15, %v12997_v12 }
 0xbea   : > { %v7798_v45 = vadd.f32 %v7797_v43, %v7709_v52 }
 0xbeb   : > { %v7623_v16 = vadd.f32 %v7622_v2, %v7534_v17  ;;  %7572 = vmatmul.bf16.gmra.mxu0 %v14078_v1  ;;  %7661 = vmatmul.bf16.gmra.mxu1 %v14079_v7  ;;  %v14085_v1 = vld [vmem:[#allocation19_spill] sm:$0xff] }
 0xbec   : > { %v8246_v6 = vmax.f32 %v7798_v45, 0.0  ;;  %7750 = vmatmul.bf16.gmra.mxu2 %v14080_v28  ;;  %7839 = vmatmul.bf16.gmra.mxu3 %v14081_v27  ;;  %v14082_v27 = vld [vmem:[#allocation51_spill] sm:$0xff] }
 0xbee   : > { %v13036_v39 = vpack.c.bf16 %v8246_v6, %v8242_v36  ;;  %v14083_v36 = vld [vmem:[#allocation68_spill] sm:$0xff] }
 0xbef   : > { %v7711_v60 = vpop.f32.mrf.mxu2  ;;  %v7800_v21 = vpop.f32.mrf.mxu3 }
 0xbf0   : > { %v7712_v32 = vadd.f32 %v7711_v60, %v7623_v16  ;;  %v7535_v41 = vpop.f32.mrf.mxu0  ;;  %v7624_v48 = vpop.f32.mrf.mxu1  ;;  %v14084_v60 = vld [vmem:[#allocation87_spill] sm:$0xff] }
 0xbf1   : > { %v7536_v52 = vadd.f32 %v7535_v41, %v12997_v12 }
 0xbf2   : > { %v7801_v43 = vadd.f32 %v7800_v21, %v7712_v32  ;;  %v10649_v21 = vld [vmem:[#allocation8 + $0x24c] sm:$0xf]  ;;  %v10103_v32 = vld [vmem:[#allocation8 + $0x258] sm:$0xf0] }
 0xbf3   : > { %v7625_v15 = vadd.f32 %v7624_v48, %v7536_v52  ;;  %v10106_v41 = vor.u32 %v10649_v21, %v10103_v32  ;;  %v10215_v21 = vld [vmem:[#allocation8 + $0x338] sm:$0xf0] }
 0xbf4   : > { %v8250_v6 = vmax.f32 %v7801_v43, 0.0 }
 0xbf5   : > { %8043 = vmatpush.bf16.msra.mxu2 %v10106_v41  ;;  %v10641_v41 = vld [vmem:[#allocation8 + $0x20c] sm:$0xf] }
 0xbf6   : > { %v10074_v58 = vor.u32 %v10641_v41, %v10071_v54  ;;  %v14090_v41 = vld [vmem:[#allocation36_spill] sm:$0xff] }
 0xbf7   : > { %v7713_v2 = vpop.f32.mrf.mxu2  ;;  %v7802_v17 = vpop.f32.mrf.mxu3 }
 0xbf8   : > { %v7714_v7 = vadd.f32 %v7713_v2, %v7625_v15  ;;  %v13039_v38 = vpop.f32.mrf.mxu0  ;;  %v13041_v45 = vpop.f32.mrf.mxu1  ;;  %v10231_v2 = vld [vmem:[#allocation8 + $0x358] sm:$0xf0] }
 0xbfa   : > { %v7803_v28 = vadd.f32 %v7802_v17, %v7714_v7  ;;  %v10681_v7 = vld [vmem:[#allocation8 + $0x34c] sm:$0xf] }
 0xbfb   : > { %7577 = vmatmul.bf16.gmra.mxu0 %v14082_v27  ;;  %7666 = vmatmul.bf16.gmra.mxu1 %v14083_v36  ;;  %v10677_v36 = vld [vmem:[#allocation8 + $0x32c] sm:$0xf] }
 0xbfc   : > { %v8254_v16 = vmax.f32 %v7803_v28, 0.0  ;;  %7755 = vmatmul.bf16.gmra.mxu2 %v14084_v60  ;;  %7844 = vmatmul.bf16.gmra.mxu3 %v14085_v1  ;;  %v10234_v28 = vor.u32 %v10681_v7, %v10231_v2  ;;  %v10645_v60 = vld [vmem:[#allocation8 + $0x22c] sm:$0xf]  ;;  %v10087_v1 = vld [vmem:[#allocation8 + $0x238] sm:$0xf0] }
 0xbfd   : > { %v10090_v27 = vor.u32 %v10645_v60, %v10087_v1  ;;  %v10199_v7 = vld [vmem:[#allocation8 + $0x318] sm:$0xf0]  ;;  %v14087_v1 = vld [vmem:[#allocation57_spill] sm:$0xff] }
 0xbfe   : > { %v13047_v48 = vpack.c.bf16 %v8254_v16, %v8250_v6  ;;  %8132 = vmatpush.bf16.msra.mxu3 %v10234_v28  ;;  %v10218_v6 = vor.u32 %v10677_v36, %v10215_v21  ;;  %v10202_v2 = vor.u32 %v10673_v4, %v10199_v7  ;;  %v14086_v28 = vld [vmem:[#allocation63_spill] sm:$0xff]  ;;  %v14088_v36 = vld [vmem:[#allocation78_spill] sm:$0xff]  ;;  %v14092_v4 = vld [vmem:[#allocation25_spill] sm:$0xff] }
 0xbff   : > { %v13049_v52 = vpop.f32.mrf.mxu2  ;;  %v13051_v15 = vpop.f32.mrf.mxu3  ;;  %8044 = vmatpush.bf16.msra.mxu2 %v10090_v27  ;;  %v14089_v27 = vld [vmem:[#allocation31_spill] sm:$0xff] }
 0xc00   : > { %v13053_v17 = vpop.f32.mrf.mxu0  ;;  %v13055_v43 = vpop.f32.mrf.mxu1  ;;  %v14093_v7 = vld [vmem:[#allocation59_spill] sm:$0xff] }
 0xc02   : > { %8133 = vmatpush.bf16.msra.mxu3 %v10218_v6 }
 0xc03   : > { %8045 = vmatpush.bf16.msra.mxu2 %v10074_v58  ;;  %v14091_v58 = vld [vmem:[#allocation29_spill] sm:$0xff] }
 0xc06   : > { %8134 = vmatpush.bf16.msra.mxu3 %v10202_v2 }
 0xc07   : > { %v13057_v16 = vpop.f32.mrf.mxu2  ;;  %v13059_v32 = vpop.f32.mrf.mxu3 }
 0xc08   : > { %v7543_v55 = vpop.f32.mrf.mxu0  ;;  %v7632_v40 = vpop.f32.mrf.mxu1 }
 0xc0b   : > { %7582 = vmatmul.bf16.gmra.mxu0 %v14086_v28  ;;  %7671 = vmatmul.bf16.gmra.mxu1 %v14087_v1 }
 0xc0c   : > { %7760 = vmatmul.bf16.gmra.mxu2 %v14088_v36  ;;  %7849 = vmatmul.bf16.gmra.mxu3 %v14089_v27 }
 0xc0f   : > { %v7721_v60 = vpop.f32.mrf.mxu2  ;;  %v7810_v21 = vpop.f32.mrf.mxu3 }
 0xc10   : > { %v7545_v6 = vpop.f32.mrf.mxu0  ;;  %v7634_v61 = vpop.f32.mrf.mxu1 }
 0xc11   : > { %v7546_v42 = vadd.f32 %v7545_v6, %v12997_v12 }
 0xc17   : > { %v7723_v19 = vpop.f32.mrf.mxu2  ;;  %v7812_v14 = vpop.f32.mrf.mxu3 }
 0xc18   : > { %v7548_v18 = vpop.f32.mrf.mxu0  ;;  %v7637_v54 = vpop.f32.mrf.mxu1 }
 0xc19   : > { %v7549_v36 = vadd.f32 %v7548_v18, %v12997_v12 }
 0xc1b   : > { %7587 = vmatmul.bf16.gmra.mxu0 %v14090_v41  ;;  %7676 = vmatmul.bf16.gmra.mxu1 %v14091_v58  ;;  %v7638_v51 = vadd.f32 %v7637_v54, %v7549_v36  ;;  %v7544_v41 = vadd.f32 %v7543_v55, %v12997_v12 }
 0xc1c   : > { %7765 = vmatmul.bf16.gmra.mxu2 %v14092_v4  ;;  %7854 = vmatmul.bf16.gmra.mxu3 %v14093_v7  ;;  %v7635_v4 = vadd.f32 %v7634_v61, %v7546_v42 }
 0xc1d   : > { %v7633_v22 = vadd.f32 %v7632_v40, %v7544_v41 }
 0xc1e   : > { %v7724_v31 = vadd.f32 %v7723_v19, %v7635_v4 }
 0xc1f   : > { %v7726_v27 = vpop.f32.mrf.mxu2  ;;  %v7815_v2 = vpop.f32.mrf.mxu3 }
 0xc20   : > { %v7550_v1 = vpop.f32.mrf.mxu0  ;;  %v7639_v28 = vpop.f32.mrf.mxu1  ;;  %v7727_v29 = vadd.f32 %v7726_v27, %v7638_v51  ;;  %v7722_v51 = vadd.f32 %v7721_v60, %v7633_v22 }
 0xc21   : > { %v7551_v50 = vadd.f32 %v7550_v1, %v12997_v12 }
 0xc22   : > { %v7816_v53 = vadd.f32 %v7815_v2, %v7727_v29  ;;  %v14094_v29 = vld [vmem:[#allocation73_spill] sm:$0xff]  ;;  %v7811_v61 = vadd.f32 %v7810_v21, %v7722_v51 }
 0xc23   : > { %v7640_v49 = vadd.f32 %v7639_v28, %v7551_v50  ;;  %v7541_v50 = vadd.f32 %v13053_v17, %v12997_v12  ;;  %v14095_v28 = vld [vmem:[#allocation52_spill] sm:$0xff] }
 0xc24   : > { %v8274_v55 = vmax.f32 %v7816_v53, 0.0 }
 0xc25   : > { %v7630_v19 = vadd.f32 %v13055_v43, %v7541_v50 }
 0xc27   : > { %v7728_v58 = vpop.f32.mrf.mxu2  ;;  %v7817_v10 = vpop.f32.mrf.mxu3 }
 0xc28   : > { %v7729_v7 = vadd.f32 %v7728_v58, %v7640_v49  ;;  %v7553_v26 = vpop.f32.mrf.mxu0  ;;  %v7642_v18 = vpop.f32.mrf.mxu1 }
 0xc29   : > { %v7554_v35 = vadd.f32 %v7553_v26, %v12997_v12 }
 0xc2a   : > { %v7818_v36 = vadd.f32 %v7817_v10, %v7729_v7  ;;  %v7539_v10 = vadd.f32 %v13039_v38, %v12997_v12 }
 0xc2b   : > { %v7643_v54 = vadd.f32 %v7642_v18, %v7554_v35  ;;  %7868 = vmatmul.bf16.vlgmr.msra.gmra.mxu0 %v13954_v46  ;;  %7957 = vmatmul.bf16.vlgmr.msra.gmra.mxu1 %v13955_v11  ;;  %v7813_v46 = vadd.f32 %v7812_v14, %v7724_v31  ;;  %v8266_v14 = vmax.f32 %v7811_v61, 0.0 }
 0xc2c   : > { %v8278_v42 = vmax.f32 %v7818_v36, 0.0  ;;  %8046 = vmatmul.bf16.vlgmr.msra.gmra.mxu2 %v13956_v5  ;;  %8135 = vmatmul.bf16.vlgmr.msra.gmra.mxu3 %v12578_v23  ;;  %v7628_v26 = vadd.f32 %v13041_v45, %v7539_v10 }
 0xc2d   : > { %8477 = vmatpush.bf16.xpose.msra.mxu0 %v14094_v29  ;;  %8490 = vmatpush.bf16.xpose.msra.mxu1 %v13004_v3  ;;  %v7719_v3 = vadd.f32 %v13057_v16, %v7630_v19  ;;  %v8270_v22 = vmax.f32 %v7813_v46, 0.0 }
 0xc2e   : > { %v8376_v49 = vpack.c.bf16 %v8278_v42, %v8274_v55  ;;  %v7717_v31 = vadd.f32 %v13049_v52, %v7628_v26 }
 0xc2f   : > { %v7731_v11 = vpop.f32.mrf.mxu2  ;;  %v7820_v35 = vpop.f32.mrf.mxu3  ;;  %v7808_v43 = vadd.f32 %v13059_v32, %v7719_v3  ;;  %v8372_v1 = vpack.c.bf16 %v8270_v22, %v8266_v14 }
 0xc30   : > { %v7732_v53 = vadd.f32 %v7731_v11, %v7643_v54  ;;  %8451 = vmatpush.bf16.xpose.msrb.mxu2 %v8376_v49  ;;  %v7555_v40 = vpop.f32.mrf.mxu0  ;;  %v7644_v5 = vpop.f32.mrf.mxu1  ;;  %v7806_v21 = vadd.f32 %v13051_v15, %v7717_v31  ;;  %v14096_v15 = vld [vmem:[#allocation35_spill] sm:$0xff] }
 0xc31   : > { %v7556_v23 = vadd.f32 %v7555_v40, %v12997_v12  ;;  %v8262_v58 = vmax.f32 %v7808_v43, 0.0 }
 0xc32   : > { %v7821_v17 = vadd.f32 %v7820_v35, %v7732_v53 }
 0xc33   : > { %v7645_v38 = vadd.f32 %v7644_v5, %v7556_v23 }
 0xc34   : > { %v8282_v32 = vmax.f32 %v7821_v17, 0.0 }
 0xc35   : > { %8478 = vmatpush.bf16.xpose.msra.mxu0 %v14095_v28  ;;  %8491 = vmatpush.bf16.xpose.msra.mxu1 %v12988_v47  ;;  %v8258_v47 = vmax.f32 %v7806_v21, 0.0 }
 0xc37   : > { %v7733_v27 = vpop.f32.mrf.mxu2  ;;  %v7822_v60 = vpop.f32.mrf.mxu3  ;;  %v8368_v2 = vpack.c.bf16 %v8262_v58, %v8258_v47  ;;  %v14105_v47 = vld [vmem:[#allocation38_spill] sm:$0xff] }
 0xc38   : > { %v7734_v45 = vadd.f32 %v7733_v27, %v7645_v38  ;;  %8452 = vmatpush.bf16.xpose.msrb.mxu2 %v8372_v1  ;;  %v7558_v16 = vpop.f32.mrf.mxu0  ;;  %v7647_v6 = vpop.f32.mrf.mxu1  ;;  %v14101_v1 = vld [vmem:[#allocation64_spill] sm:$0xff] }
 0xc39   : > { %v7559_v41 = vadd.f32 %v7558_v16, %v12997_v12 }
 0xc3a   : > { %v7823_v52 = vadd.f32 %v7822_v60, %v7734_v45  ;;  %v14102_v45 = vld [vmem:[#allocation74_spill] sm:$0xff] }
 0xc3b   : > { %v7648_v4 = vadd.f32 %v7647_v6, %v7559_v41  ;;  %7873 = vmatmul.bf16.gmra.mxu0 %v13958_v8  ;;  %7962 = vmatmul.bf16.gmra.mxu1 %v13959_v20 }
 0xc3c   : > { %v8286_v7 = vmax.f32 %v7823_v52, 0.0  ;;  %8051 = vmatmul.bf16.gmra.mxu2 %v13960_v34  ;;  %8140 = vmatmul.bf16.gmra.mxu3 %v14037_v56  ;;  %v14097_v34 = vld [vmem:[#allocation34_spill] sm:$0xff] }
 0xc3d   : > { %8479 = vmatpush.bf16.xpose.msra.mxu0 %v14096_v15  ;;  %8492 = vmatpush.bf16.xpose.msra.mxu1 %v12980_v24 }
 0xc3e   : > { %v13100_v18 = vpack.c.bf16 %v8286_v7, %v8282_v32 }
 0xc3f   : > { %v7736_v36 = vpop.f32.mrf.mxu2  ;;  %v7825_v54 = vpop.f32.mrf.mxu3 }
 0xc40   : > { %v7737_v50 = vadd.f32 %v7736_v36, %v7648_v4  ;;  %8453 = vmatpush.bf16.xpose.msrb.mxu2 %v8368_v2  ;;  %v7560_v8 = vpop.f32.mrf.mxu0  ;;  %v7649_v20 = vpop.f32.mrf.mxu1 }
 0xc41   : > { %v7561_v51 = vadd.f32 %v7560_v8, %v12997_v12 }
 0xc42   : > { %v7826_v55 = vadd.f32 %v7825_v54, %v7737_v50  ;;  %v14106_v54 = vld [vmem:[#allocation42_spill] sm:$0xff]  ;;  %v14107_v50 = vld [vmem:[#allocation65_spill] sm:$0xff] }
 0xc43   : > { %v7650_v42 = vadd.f32 %v7649_v20, %v7561_v51  ;;  %v14108_v51 = vld [vmem:[#allocation23_spill] sm:$0xff] }
 0xc44   : > { %v8290_v19 = vmax.f32 %v7826_v55, 0.0  ;;  %v14109_v55 = vld [vmem:[#allocation71_spill] sm:$0xff] }
 0xc45   : > { %8480 = vmatpush.bf16.xpose.msra.mxu0 %v14097_v34  ;;  %8493 = vmatpush.bf16.xpose.msra.mxu1 %v12972_v0  ;;  %v14098_v0 = vld [vmem:[#allocation22_spill] sm:$0xff] }
 0xc47   : > { %v7738_v56 = vpop.f32.mrf.mxu2  ;;  %v7827_v29 = vpop.f32.mrf.mxu3 }
 0xc48   : > { %v7739_v24 = vadd.f32 %v7738_v56, %v7650_v42  ;;  %8454 = vmatpush.bf16.xpose.msrb.mxu2 %v13047_v48  ;;  %v7563_v10 = vpop.f32.mrf.mxu0  ;;  %v7652_v46 = vpop.f32.mrf.mxu1 }
 0xc49   : > { %v7564_v49 = vadd.f32 %v7563_v10, %v12997_v12 }
 0xc4a   : > { %v7828_v11 = vadd.f32 %v7827_v29, %v7739_v24 }
 0xc4b   : > { %v7653_v35 = vadd.f32 %v7652_v46, %v7564_v49  ;;  %7878 = vmatmul.bf16.gmra.mxu0 %v13962_v59  ;;  %7967 = vmatmul.bf16.gmra.mxu1 %v13963_v62 }
 0xc4c   : > { %v8294_v61 = vmax.f32 %v7828_v11, 0.0  ;;  %8056 = vmatmul.bf16.gmra.mxu2 %v13964_v37  ;;  %8145 = vmatmul.bf16.gmra.mxu3 %v12594_v13  ;;  %v14099_v37 = vld [vmem:[#allocation30_spill] sm:$0xff] }
 0xc4d   : > { %8481 = vmatpush.bf16.xpose.msra.mxu0 %v14098_v0  ;;  %8494 = vmatpush.bf16.xpose.msra.mxu1 %v12964_v63 }
 0xc4e   : > { %v13113_v48 = vpack.c.bf16 %v8294_v61, %v8290_v19 }
 0xc4f   : > { %v7741_v53 = vpop.f32.mrf.mxu2  ;;  %v7830_v40 = vpop.f32.mrf.mxu3 }
 0xc50   : > { %v7742_v5 = vadd.f32 %v7741_v53, %v7653_v35  ;;  %8455 = vmatpush.bf16.xpose.msrb.mxu2 %v13036_v39  ;;  %v7565_v59 = vpop.f32.mrf.mxu0  ;;  %v7654_v23 = vpop.f32.mrf.mxu1 }
 0xc51   : > { %v7566_v62 = vadd.f32 %v7565_v59, %v12997_v12  ;;  %v14111_v59 = vld [vmem:[#allocation75_spill] sm:$0xff] }
 0xc52   : > { %v7831_v26 = vadd.f32 %v7830_v40, %v7742_v5  ;;  %v14110_v5 = vld [vmem:[#allocation43_spill] sm:$0xff] }
 0xc53   : > { %v7655_v3 = vadd.f32 %v7654_v23, %v7566_v62 }
 0xc54   : > { %v8298_v28 = vmax.f32 %v7831_v26, 0.0  ;;  %v14112_v26 = vld [vmem:[#allocation58_spill] sm:$0xff] }
 0xc55   : > { %8482 = vmatpush.bf16.xpose.msra.mxu0 %v14099_v37  ;;  %8495 = vmatpush.bf16.xpose.msra.mxu1 %v12953_v33  ;;  %v14100_v33 = vld [vmem:[#allocation28_spill] sm:$0xff] }
 0xc57   : > { %v7743_v13 = vpop.f32.mrf.mxu2  ;;  %v7832_v22 = vpop.f32.mrf.mxu3 }
 0xc58   : > { %v7744_v63 = vadd.f32 %v7743_v13, %v7655_v3  ;;  %8456 = vmatpush.bf16.xpose.msrb.mxu2 %v13028_v57  ;;  %v7568_v17 = vpop.f32.mrf.mxu0  ;;  %v7657_v38 = vpop.f32.mrf.mxu1  ;;  %v14113_v3 = vld [vmem:[#allocation79_spill] sm:$0xff] }
 0xc59   : > { %v7569_v31 = vadd.f32 %v7568_v17, %v12997_v12 }
 0xc5a   : > { %v7833_v39 = vadd.f32 %v7832_v22, %v7744_v63 }
 0xc5b   : > { %v7658_v14 = vadd.f32 %v7657_v38, %v7569_v31  ;;  %7883 = vmatmul.bf16.gmra.mxu0 %v13966_v9  ;;  %7972 = vmatmul.bf16.gmra.mxu1 %v13967_v30 }
 0xc5c   : > { %v8302_v43 = vmax.f32 %v7833_v39, 0.0  ;;  %8061 = vmatmul.bf16.gmra.mxu2 %v14044_v25  ;;  %8150 = vmatmul.bf16.gmra.mxu3 %v14045_v44  ;;  %v14103_v25 = vld [vmem:[#allocation33_spill] sm:$0xff] }
 0xc5d   : > { %8483 = vmatpush.bf16.xpose.msra.mxu0 %v14100_v33  ;;  %8496 = vmatpush.bf16.xpose.msra.mxu1 %v14101_v1  ;;  %v14104_v44 = vld [vmem:[#allocation37_spill] sm:$0xff]  ;;  %v14116_v33 = vld [vmem:[#allocation70_spill] sm:$0xff] }
 0xc5e   : > { %v13127_v57 = vpack.c.bf16 %v8302_v43, %v8298_v28  ;;  %v14114_v28 = vld [vmem:[#allocation44_spill] sm:$0xff]  ;;  %v14115_v43 = vld [vmem:[#allocation54_spill] sm:$0xff] }
 0xc5f   : > { %v7746_v27 = vpop.f32.mrf.mxu2  ;;  %v7835_v60 = vpop.f32.mrf.mxu3  ;;  %v14117_v1 = vld [vmem:[#allocation26_spill] sm:$0xff] }
 0xc60   : > { %v7747_v21 = vadd.f32 %v7746_v27, %v7658_v14  ;;  %8457 = vmatpush.bf16.xpose.msrb.mxu2 %v14102_v45  ;;  %v7570_v9 = vpop.f32.mrf.mxu0  ;;  %v7659_v16 = vpop.f32.mrf.mxu1 }
 0xc61   : > { %v7571_v30 = vadd.f32 %v7570_v9, %v12997_v12 }
 0xc62   : > { %v7836_v6 = vadd.f32 %v7835_v60, %v7747_v21 }
 0xc63   : > { %v7660_v41 = vadd.f32 %v7659_v16, %v7571_v30 }
 0xc64   : > { %v8306_v8 = vmax.f32 %v7836_v6, 0.0 }
 0xc65   : > { %8484 = vmatpush.bf16.xpose.msra.mxu0 %v14103_v25  ;;  %8497 = vmatpush.bf16.xpose.msra.mxu1 %v14104_v44  ;;  %v14119_v25 = vld [vmem:[#allocation66_spill] sm:$0xff]  ;;  %v14120_v44 = vld [vmem:[#allocation81_spill] sm:$0xff] }
 0xc67   : > { %v7748_v58 = vpop.f32.mrf.mxu2  ;;  %v7837_v52 = vpop.f32.mrf.mxu3 }
 0xc68   : > { %v7749_v4 = vadd.f32 %v7748_v58, %v7660_v41  ;;  %8458 = vmatpush.bf16.xpose.msrb.mxu2 %v14105_v47  ;;  %v7573_v32 = vpop.f32.mrf.mxu0  ;;  %v7662_v7 = vpop.f32.mrf.mxu1  ;;  %v14118_v41 = vld [vmem:[#allocation45_spill] sm:$0xff]  ;;  %v14121_v58 = vld [vmem:[#allocation16_spill] sm:$0xff] }
 0xc69   : > { %v7574_v15 = vadd.f32 %v7573_v32, %v12997_v12 }
 0xc6a   : > { %v7838_v2 = vadd.f32 %v7837_v52, %v7749_v4 }
 0xc6b   : > { %v7663_v36 = vadd.f32 %v7662_v7, %v7574_v15  ;;  %7888 = vmatmul.bf16.gmra.mxu0 %v14106_v54  ;;  %7977 = vmatmul.bf16.gmra.mxu1 %v14107_v50  ;;  %v14122_v50 = vld [vmem:[#allocation62_spill] sm:$0xff] }
 0xc6c   : > { %v8310_v20 = vmax.f32 %v7838_v2, 0.0  ;;  %8066 = vmatmul.bf16.gmra.mxu2 %v14108_v51  ;;  %8155 = vmatmul.bf16.gmra.mxu3 %v14109_v55 }
 0xc6e   : > { %v13139_v42 = vpack.c.bf16 %v8310_v20, %v8306_v8  ;;  %v13172_v8 = vperm.slane %v14122_v50, 3 }
 0xc6f   : > { %v7751_v34 = vpop.f32.mrf.mxu2  ;;  %v7840_v56 = vpop.f32.mrf.mxu3 }
 0xc70   : > { %v7752_v29 = vadd.f32 %v7751_v34, %v7663_v36  ;;  %v7575_v24 = vpop.f32.mrf.mxu0  ;;  %v7664_v10 = vpop.f32.mrf.mxu1 }
 0xc71   : > { %v7576_v46 = vadd.f32 %v7575_v24, %v12997_v12 }
 0xc72   : > { %v7841_v49 = vadd.f32 %v7840_v56, %v7752_v29 }
 0xc73   : > { %v7665_v11 = vadd.f32 %v7664_v10, %v7576_v46 }
 0xc74   : > { %v8314_v23 = vmax.f32 %v7841_v49, 0.0 }
 0xc77   : > { %v7753_v35 = vpop.f32.mrf.mxu2  ;;  %v7842_v19 = vpop.f32.mrf.mxu3 }
 0xc78   : > { %v7754_v61 = vadd.f32 %v7753_v35, %v7665_v11  ;;  %v13142_v0 = vpop.f32.mrf.mxu0  ;;  %v13144_v53 = vpop.f32.mrf.mxu1 }
 0xc7a   : > { %v7843_v40 = vadd.f32 %v7842_v19, %v7754_v61 }
 0xc7b   : > { %7893 = vmatmul.bf16.gmra.mxu0 %v14110_v5  ;;  %7982 = vmatmul.bf16.gmra.mxu1 %v14111_v59  ;;  %v14124_v5 = vld [vmem:[#allocation76_spill] sm:$0xff] }
 0xc7c   : > { %v8318_v62 = vmax.f32 %v7843_v40, 0.0  ;;  %8071 = vmatmul.bf16.gmra.mxu2 %v14112_v26  ;;  %8160 = vmatmul.bf16.gmra.mxu3 %v14113_v3  ;;  %v14123_v40 = vld [vmem:[#allocation46_spill] sm:$0xff] }
 0xc7d   : > { %v14125_v3 = vld [vmem:[#allocation82_spill] sm:$0xff] }
 0xc7e   : > { %v13150_v37 = vpack.c.bf16 %v8318_v62, %v8314_v23 }
 0xc7f   : > { %v13152_v13 = vpop.f32.mrf.mxu2  ;;  %v13154_v22 = vpop.f32.mrf.mxu3 }
 0xc80   : > { %v7580_v63 = vpop.f32.mrf.mxu0  ;;  %v7669_v17 = vpop.f32.mrf.mxu1 }
 0xc81   : > { %v7581_v59 = vadd.f32 %v7580_v63, %v12997_v12 }
 0xc87   : > { %v13156_v38 = vpop.f32.mrf.mxu2  ;;  %v13158_v31 = vpop.f32.mrf.mxu3 }
 0xc88   : > { %v7583_v39 = vpop.f32.mrf.mxu0  ;;  %v7672_v14 = vpop.f32.mrf.mxu1 }
 0xc89   : > { %v7584_v20 = vadd.f32 %v7583_v39, %v12997_v12  ;;  %v14126_v39 = vld [vmem:[#allocation72_spill] sm:$0xff] }
 0xc8b   : > { %7898 = vmatmul.bf16.gmra.mxu0 %v14114_v28  ;;  %7987 = vmatmul.bf16.gmra.mxu1 %v14115_v43  ;;  %v7673_v11 = vadd.f32 %v7672_v14, %v7584_v20  ;;  %v7579_v28 = vadd.f32 %v13142_v0, %v12997_v12  ;;  %v14129_v20 = vld [vmem:[#allocation83_spill] sm:$0xff] }
 0xc8c   : > { %8076 = vmatmul.bf16.gmra.mxu2 %v14116_v33  ;;  %8165 = vmatmul.bf16.gmra.mxu3 %v14117_v1 }
 0xc8f   : > { %v7761_v27 = vpop.f32.mrf.mxu2  ;;  %v7850_v60 = vpop.f32.mrf.mxu3 }
 0xc90   : > { %v7585_v21 = vpop.f32.mrf.mxu0  ;;  %v7674_v45 = vpop.f32.mrf.mxu1  ;;  %v7762_v23 = vadd.f32 %v7761_v27, %v7673_v11 }
 0xc91   : > { %v7586_v36 = vadd.f32 %v7585_v21, %v12997_v12  ;;  %v7670_v21 = vadd.f32 %v7669_v17, %v7581_v59 }
 0xc93   : > { %v7675_v56 = vadd.f32 %v7674_v45, %v7586_v36  ;;  %v7851_v45 = vadd.f32 %v7850_v60, %v7762_v23  ;;  %v14127_v36 = vld [vmem:[#allocation47_spill] sm:$0xff] }
 0xc95   : > { %v8330_v0 = vmax.f32 %v7851_v45, 0.0 }
 0xc97   : > { %v7763_v9 = vpop.f32.mrf.mxu2  ;;  %v7852_v16 = vpop.f32.mrf.mxu3 }
 0xc98   : > { %v7588_v30 = vpop.f32.mrf.mxu0  ;;  %v7677_v6 = vpop.f32.mrf.mxu1  ;;  %v7764_v35 = vadd.f32 %v7763_v9, %v7675_v56 }
 0xc99   : > { %v7589_v52 = vadd.f32 %v7588_v30, %v12997_v12 }
 0xc9a   : > { %v7853_v14 = vadd.f32 %v7852_v16, %v7764_v35 }
 0xc9b   : > { %7903 = vmatmul.bf16.gmra.mxu0 %v14118_v41  ;;  %7992 = vmatmul.bf16.gmra.mxu1 %v14119_v25  ;;  %v7678_v15 = vadd.f32 %v7677_v6, %v7589_v52  ;;  %v7668_v6 = vadd.f32 %v13144_v53, %v7579_v28  ;;  %v7759_v41 = vadd.f32 %v13156_v38, %v7670_v21 }
 0xc9c   : > { %8081 = vmatmul.bf16.gmra.mxu2 %v14120_v44  ;;  %8170 = vmatmul.bf16.gmra.mxu3 %v14121_v58  ;;  %v8334_v25 = vmax.f32 %v7853_v14, 0.0  ;;  %v14133_v14 = vld [vmem:[#allocation84_spill] sm:$0xff] }
 0xc9d   : > { %v7848_v16 = vadd.f32 %v13158_v31, %v7759_v41 }
 0xc9e   : > { %v8404_v17 = vpack.c.bf16 %v8334_v25, %v8330_v0 }
 0xc9f   : > { %v7766_v4 = vpop.f32.mrf.mxu2  ;;  %v7855_v47 = vpop.f32.mrf.mxu3  ;;  %v8326_v38 = vmax.f32 %v7848_v16, 0.0 }
 0xca0   : > { %v7590_v32 = vpop.f32.mrf.mxu0  ;;  %v7679_v7 = vpop.f32.mrf.mxu1  ;;  %v7767_v54 = vadd.f32 %v7766_v4, %v7678_v15 }
 0xca1   : > { %v7591_v2 = vadd.f32 %v7590_v32, %v12997_v12  ;;  %v7757_v12 = vadd.f32 %v13152_v13, %v7668_v6  ;;  %v14128_v13 = vld [vmem:[#allocation55_spill] sm:$0xff] }
 0xca2   : > { %v7856_v29 = vadd.f32 %v7855_v47, %v7767_v54 }
 0xca3   : > { %v7680_v51 = vadd.f32 %v7679_v7, %v7591_v2  ;;  %v7846_v4 = vadd.f32 %v13154_v22, %v7757_v12 }
 0xca4   : > { %v8338_v62 = vmax.f32 %v7856_v29, 0.0 }
 0xca5   : > { %v8322_v54 = vmax.f32 %v7846_v4, 0.0  ;;  %v14137_v4 = vld [vmem:[#allocation85_spill] sm:$0xff] }
 0xca7   : > { %v7768_v55 = vpop.f32.mrf.mxu2  ;;  %v7857_v34 = vpop.f32.mrf.mxu3  ;;  %v8400_v22 = vpack.c.bf16 %v8326_v38, %v8322_v54 }
 0xca8   : > { %v7769_v24 = vadd.f32 %v7768_v55, %v7680_v51  ;;  %v7869_v10 = vpop.f32.mrf.mxu0  ;;  %v7958_v46 = vpop.f32.mrf.mxu1  ;;  %v14130_v51 = vld [vmem:[#allocation80_spill] sm:$0xff] }
 0xca9   : > { %v7870_v49 = vadd.f32 %v7869_v10, %v13172_v8 }
 0xcaa   : > { %v7858_v19 = vadd.f32 %v7857_v34, %v7769_v24 }
 0xcab   : > { %v7959_v61 = vadd.f32 %v7958_v46, %v7870_v49  ;;  %7908 = vmatmul.bf16.gmra.mxu0 %v14123_v40  ;;  %7997 = vmatmul.bf16.gmra.mxu1 %v14124_v5 }
 0xcac   : > { %v8342_v26 = vmax.f32 %v7858_v19, 0.0  ;;  %8086 = vmatmul.bf16.gmra.mxu2 %v14125_v3  ;;  %8175 = vmatmul.bf16.gmra.mxu3 %v14126_v39  ;;  %v14132_v3 = vld [vmem:[#allocation67_spill] sm:$0xff] }
 0xcae   : > { %v8408_v43 = vpack.c.bf16 %v8342_v26, %v8338_v62  ;;  %v14131_v26 = vld [vmem:[#allocation48_spill] sm:$0xff] }
 0xcaf   : > { %v8047_v33 = vpop.f32.mrf.mxu2  ;;  %v8136_v1 = vpop.f32.mrf.mxu3 }
 0xcb0   : > { %v8048_v9 = vadd.f32 %v8047_v33, %v7959_v61  ;;  %8503 = vmatpush.bf16.xpose.msra.mxu2 %v8408_v43  ;;  %v7871_v30 = vpop.f32.mrf.mxu0  ;;  %v7960_v63 = vpop.f32.mrf.mxu1  ;;  %v14134_v43 = vld [vmem:[#allocation27_spill] sm:$0xff] }
 0xcb1   : > { %v7872_v27 = vadd.f32 %v7871_v30, %v13172_v8 }
 0xcb2   : > { %v8137_v44 = vadd.f32 %v8136_v1, %v8048_v9 }
 0xcb3   : > { %v7961_v58 = vadd.f32 %v7960_v63, %v7872_v27 }
 0xcb4   : > { %v8219_v31 = vmax.f32 %v8137_v44, 0.0 }
 0xcb7   : > { %v8049_v60 = vpop.f32.mrf.mxu2  ;;  %v8138_v52 = vpop.f32.mrf.mxu3 }
 0xcb8   : > { %v8050_v47 = vadd.f32 %v8049_v60, %v7961_v58  ;;  %8504 = vmatpush.bf16.xpose.msra.mxu2 %v8404_v17  ;;  %v7874_v32 = vpop.f32.mrf.mxu0  ;;  %v7963_v7 = vpop.f32.mrf.mxu1  ;;  %v14135_v17 = vld [vmem:[#allocation49_spill] sm:$0xff] }
 0xcb9   : > { %v7875_v53 = vadd.f32 %v7874_v32, %v13172_v8 }
 0xcba   : > { %v8139_v15 = vadd.f32 %v8138_v52, %v8050_v47  ;;  %v14138_v47 = vld [vmem:[#allocation17_spill] sm:$0xff] }
 0xcbb   : > { %v7964_v2 = vadd.f32 %v7963_v7, %v7875_v53  ;;  %7913 = vmatmul.bf16.gmra.mxu0 %v14127_v36  ;;  %8002 = vmatmul.bf16.gmra.mxu1 %v14128_v13 }
 0xcbc   : > { %v8223_v50 = vmax.f32 %v8139_v15, 0.0  ;;  %8091 = vmatmul.bf16.gmra.mxu2 %v14129_v20  ;;  %8180 = vmatmul.bf16.gmra.mxu3 %v14130_v51 }
 0xcbe   : > { %v13194_v55 = vpack.c.bf16 %v8223_v50, %v8219_v31 }
 0xcbf   : > { %v8052_v34 = vpop.f32.mrf.mxu2  ;;  %v8141_v56 = vpop.f32.mrf.mxu3 }
 0xcc0   : > { %v8053_v29 = vadd.f32 %v8052_v34, %v7964_v2  ;;  %8505 = vmatpush.bf16.xpose.msra.mxu2 %v8400_v22  ;;  %v7876_v24 = vpop.f32.mrf.mxu0  ;;  %v7965_v10 = vpop.f32.mrf.mxu1 }
 0xcc1   : > { %v7877_v46 = vadd.f32 %v7876_v24, %v13172_v8 }
 0xcc2   : > { %v8142_v49 = vadd.f32 %v8141_v56, %v8053_v29  ;;  %v14139_v29 = vld [vmem:[#allocation50_spill] sm:$0xff] }
 0xcc3   : > { %v7966_v11 = vadd.f32 %v7965_v10, %v7877_v46  ;;  %v14141_v46 = vld [vmem:[#allocation86_spill] sm:$0xff] }
 0xcc4   : > { %v8227_v39 = vmax.f32 %v8142_v49, 0.0  ;;  %v14142_v49 = vld [vmem:[#allocation40_spill] sm:$0xff] }
 0xcc7   : > { %v8054_v35 = vpop.f32.mrf.mxu2  ;;  %v8143_v19 = vpop.f32.mrf.mxu3 }
 0xcc8   : > { %v8055_v61 = vadd.f32 %v8054_v35, %v7966_v11  ;;  %8506 = vmatpush.bf16.xpose.msra.mxu2 %v13150_v37  ;;  %v7879_v40 = vpop.f32.mrf.mxu0  ;;  %v7968_v5 = vpop.f32.mrf.mxu1 }
 0xcc9   : > { %v7880_v59 = vadd.f32 %v7879_v40, %v13172_v8 }
 0xcca   : > { %v8144_v23 = vadd.f32 %v8143_v19, %v8055_v61 }
 0xccb   : > { %v7969_v62 = vadd.f32 %v7968_v5, %v7880_v59  ;;  %7918 = vmatmul.bf16.gmra.mxu0 %v14131_v26  ;;  %8007 = vmatmul.bf16.gmra.mxu1 %v14132_v3  ;;  %v14143_v3 = vld [vmem:[#allocation51_spill] sm:$0xff] }
 0xccc   : > { %v8231_v28 = vmax.f32 %v8144_v23, 0.0  ;;  %8096 = vmatmul.bf16.gmra.mxu2 %v14133_v14  ;;  %8185 = vmatmul.bf16.gmra.mxu3 %v14134_v43  ;;  %v14146_v14 = vld [vmem:[#allocation19_spill] sm:$0xff] }
 0xcce   : > { %v13203_v33 = vpack.c.bf16 %v8231_v28, %v8227_v39  ;;  %v14144_v39 = vld [vmem:[#allocation68_spill] sm:$0xff]  ;;  %v14145_v28 = vld [vmem:[#allocation87_spill] sm:$0xff] }
 0xccf   : > { %v8057_v1 = vpop.f32.mrf.mxu2  ;;  %v8146_v37 = vpop.f32.mrf.mxu3 }
 0xcd0   : > { %v8058_v21 = vadd.f32 %v8057_v1, %v7969_v62  ;;  %8507 = vmatpush.bf16.xpose.msra.mxu2 %v13139_v42  ;;  %v7881_v45 = vpop.f32.mrf.mxu0  ;;  %v7970_v9 = vpop.f32.mrf.mxu1  ;;  %v14136_v42 = vld [vmem:[#allocation77_spill] sm:$0xff] }
 0xcd1   : > { %v7882_v30 = vadd.f32 %v7881_v45, %v13172_v8 }
 0xcd2   : > { %v8147_v63 = vadd.f32 %v8146_v37, %v8058_v21 }
 0xcd3   : > { %v7971_v27 = vadd.f32 %v7970_v9, %v7882_v30 }
 0xcd4   : > { %v8235_v60 = vmax.f32 %v8147_v63, 0.0 }
 0xcd7   : > { %v8059_v6 = vpop.f32.mrf.mxu2  ;;  %v8148_v41 = vpop.f32.mrf.mxu3 }
 0xcd8   : > { %v8060_v25 = vadd.f32 %v8059_v6, %v7971_v27  ;;  %8508 = vmatpush.bf16.xpose.msra.mxu2 %v13127_v57  ;;  %v7884_v44 = vpop.f32.mrf.mxu0  ;;  %v7973_v58 = vpop.f32.mrf.mxu1  ;;  %v14147_v27 = vld [vmem:[#allocation63_spill] sm:$0xff]  ;;  %v14148_v6 = vld [vmem:[#allocation57_spill] sm:$0xff] }
 0xcd9   : > { %v7885_v12 = vadd.f32 %v7884_v44, %v13172_v8 }
 0xcda   : > { %v8149_v0 = vadd.f32 %v8148_v41, %v8060_v25  ;;  %v14149_v41 = vld [vmem:[#allocation78_spill] sm:$0xff]  ;;  %v14150_v25 = vld [vmem:[#allocation31_spill] sm:$0xff] }
 0xcdb   : > { %v7974_v16 = vadd.f32 %v7973_v58, %v7885_v12  ;;  %7923 = vmatmul.bf16.gmra.mxu0 %v14135_v17  ;;  %8012 = vmatmul.bf16.gmra.mxu1 %v14136_v42 }
 0xcdc   : > { %v8239_v52 = vmax.f32 %v8149_v0, 0.0  ;;  %8101 = vmatmul.bf16.gmra.mxu2 %v14137_v4  ;;  %8190 = vmatmul.bf16.gmra.mxu3 %v14138_v47  ;;  %v14152_v4 = vld [vmem:[#allocation29_spill] sm:$0xff] }
 0xcdd   : > { %v14153_v47 = vld [vmem:[#allocation25_spill] sm:$0xff] }
 0xcde   : > { %v13213_v32 = vpack.c.bf16 %v8239_v52, %v8235_v60  ;;  %v14151_v52 = vld [vmem:[#allocation36_spill] sm:$0xff] }
 0xcdf   : > { %v8062_v7 = vpop.f32.mrf.mxu2  ;;  %v8151_v57 = vpop.f32.mrf.mxu3 }
 0xce0   : > { %v8063_v53 = vadd.f32 %v8062_v7, %v7974_v16  ;;  %8509 = vmatpush.bf16.xpose.msra.mxu2 %v13113_v48  ;;  %v7886_v38 = vpop.f32.mrf.mxu0  ;;  %v7975_v15 = vpop.f32.mrf.mxu1  ;;  %v14140_v48 = vld [vmem:[#allocation56_spill] sm:$0xff]  ;;  %v14154_v7 = vld [vmem:[#allocation59_spill] sm:$0xff] }
 0xce1   : > { %v7887_v2 = vadd.f32 %v7886_v38, %v13172_v8 }
 0xce2   : > { %v8152_v36 = vadd.f32 %v8151_v57, %v8063_v53 }
 0xce3   : > { %v7976_v13 = vadd.f32 %v7975_v15, %v7887_v2 }
 0xce4   : > { %v8243_v24 = vmax.f32 %v8152_v36, 0.0 }
 0xce7   : > { %v8064_v54 = vpop.f32.mrf.mxu2  ;;  %v8153_v31 = vpop.f32.mrf.mxu3 }
 0xce8   : > { %v8065_v50 = vadd.f32 %v8064_v54, %v7976_v13  ;;  %8510 = vmatpush.bf16.xpose.msra.mxu2 %v13100_v18  ;;  %v7889_v20 = vpop.f32.mrf.mxu0  ;;  %v7978_v51 = vpop.f32.mrf.mxu1 }
 0xce9   : > { %v7890_v22 = vadd.f32 %v7889_v20, %v13172_v8 }
 0xcea   : > { %v8154_v34 = vadd.f32 %v8153_v31, %v8065_v50 }
 0xceb   : > { %v7979_v56 = vadd.f32 %v7978_v51, %v7890_v22  ;;  %7928 = vmatmul.bf16.gmra.mxu0 %v14139_v29  ;;  %8017 = vmatmul.bf16.gmra.mxu1 %v14140_v48 }
 0xcec   : > { %v8247_v10 = vmax.f32 %v8154_v34, 0.0  ;;  %8106 = vmatmul.bf16.gmra.mxu2 %v14141_v46  ;;  %8195 = vmatmul.bf16.gmra.mxu3 %v14142_v49 }
 0xcee   : > { %v13223_v11 = vpack.c.bf16 %v8247_v10, %v8243_v24 }
 0xcef   : > { %v8067_v35 = vpop.f32.mrf.mxu2  ;;  %v8156_v18 = vpop.f32.mrf.mxu3 }
 0xcf0   : > { %v8068_v19 = vadd.f32 %v8067_v35, %v7979_v56  ;;  %v13225_v61 = vpop.f32.mrf.mxu0  ;;  %v13227_v40 = vpop.f32.mrf.mxu1 }
 0xcf2   : > { %v13229_v5 = vadd.f32 %v8156_v18, %v8068_v19 }
 0xcf7   : > { %v13231_v59 = vpop.f32.mrf.mxu2  ;;  %v13233_v23 = vpop.f32.mrf.mxu3 }
 0xcf8   : > { %v7894_v62 = vpop.f32.mrf.mxu0  ;;  %v13235_v26 = vpop.f32.mrf.mxu1 }
 0xcfb   : > { %7933 = vmatmul.bf16.gmra.mxu0 %v14143_v3  ;;  %8022 = vmatmul.bf16.gmra.mxu1 %v14144_v39 }
 0xcfc   : > { %8111 = vmatmul.bf16.gmra.mxu2 %v14145_v28  ;;  %8200 = vmatmul.bf16.gmra.mxu3 %v14146_v14  ;;  %v7895_v14 = vadd.f32 %v7894_v62, %v13172_v8  ;;  %v7892_v62 = vadd.f32 %v13225_v61, %v13172_v8 }
 0xcff   : > { %v13241_v43 = vpop.f32.mrf.mxu2  ;;  %v13243_v1 = vpop.f32.mrf.mxu3 }
 0xd00   : > { %v7896_v37 = vpop.f32.mrf.mxu0  ;;  %v7985_v21 = vpop.f32.mrf.mxu1 }
 0xd01   : > { %v7897_v19 = vadd.f32 %v7896_v37, %v13172_v8 }
 0xd07   : > { %v8074_v45 = vpop.f32.mrf.mxu2  ;;  %v13245_v9 = vpop.f32.mrf.mxu3 }
 0xd08   : > { %v7899_v30 = vpop.f32.mrf.mxu0  ;;  %v7988_v63 = vpop.f32.mrf.mxu1 }
 0xd09   : > { %v7900_v50 = vadd.f32 %v7899_v30, %v13172_v8 }
 0xd0b   : > { %7938 = vmatmul.bf16.gmra.mxu0 %v14147_v27  ;;  %8027 = vmatmul.bf16.gmra.mxu1 %v14148_v6  ;;  %v7989_v46 = vadd.f32 %v7988_v63, %v7900_v50 }
 0xd0c   : > { %8116 = vmatmul.bf16.gmra.mxu2 %v14149_v41  ;;  %8205 = vmatmul.bf16.gmra.mxu3 %v14150_v25  ;;  %v7986_v25 = vadd.f32 %v7985_v21, %v7897_v19 }
 0xd0e   : > { %v8075_v37 = vadd.f32 %v8074_v45, %v7986_v25 }
 0xd0f   : > { %v8077_v44 = vpop.f32.mrf.mxu2  ;;  %v8166_v58 = vpop.f32.mrf.mxu3 }
 0xd10   : > { %v7901_v12 = vpop.f32.mrf.mxu0  ;;  %v7990_v0 = vpop.f32.mrf.mxu1  ;;  %v8078_v3 = vadd.f32 %v8077_v44, %v7989_v46  ;;  %v8164_v21 = vadd.f32 %v13245_v9, %v8075_v37 }
 0xd11   : > { %v7902_v54 = vadd.f32 %v7901_v12, %v13172_v8 }
 0xd12   : > { %v8167_v12 = vadd.f32 %v8166_v58, %v8078_v3 }
 0xd13   : > { %v7991_v34 = vadd.f32 %v7990_v0, %v7902_v54 }
 0xd17   : > { %v8079_v16 = vpop.f32.mrf.mxu2  ;;  %v8168_v17 = vpop.f32.mrf.mxu3 }
 0xd18   : > { %v7904_v42 = vpop.f32.mrf.mxu0  ;;  %v7993_v60 = vpop.f32.mrf.mxu1  ;;  %v8080_v49 = vadd.f32 %v8079_v16, %v7991_v34 }
 0xd19   : > { %v7905_v57 = vadd.f32 %v7904_v42, %v13172_v8 }
 0xd1a   : > { %v8169_v30 = vadd.f32 %v8168_v17, %v8080_v49 }
 0xd1b   : > { %7943 = vmatmul.bf16.gmra.mxu0 %v14151_v52  ;;  %8032 = vmatmul.bf16.gmra.mxu1 %v14152_v4  ;;  %v7994_v36 = vadd.f32 %v7993_v60, %v7905_v57  ;;  %v7984_v60 = vadd.f32 %v13235_v26, %v7895_v14 }
 0xd1c   : > { %8121 = vmatmul.bf16.gmra.mxu2 %v14153_v47  ;;  %8210 = vmatmul.bf16.gmra.mxu3 %v14154_v7  ;;  %v8271_v44 = vmax.f32 %v8169_v30, 0.0  ;;  %v8267_v47 = vmax.f32 %v8167_v12, 0.0 }
 0xd1d   : > { %v8073_v17 = vadd.f32 %v13241_v43, %v7984_v60 }
 0xd1e   : > { %v8373_v58 = vpack.c.bf16 %v8271_v44, %v8267_v47 }
 0xd1f   : > { %v8082_v53 = vpop.f32.mrf.mxu2  ;;  %v8171_v38 = vpop.f32.mrf.mxu3 }
 0xd20   : > { %v7906_v15 = vpop.f32.mrf.mxu0  ;;  %v7995_v2 = vpop.f32.mrf.mxu1  ;;  %v8083_v31 = vadd.f32 %v8082_v53, %v7994_v36  ;;  %v7981_v53 = vadd.f32 %v13227_v40, %v7892_v62  ;;  %v8263_v36 = vmax.f32 %v8164_v21, 0.0 }
 0xd21   : > { %v7907_v13 = vadd.f32 %v7906_v15, %v13172_v8 }
 0xd22   : > { %v8172_v56 = vadd.f32 %v8171_v38, %v8083_v31  ;;  %v8162_v38 = vadd.f32 %v13243_v1, %v8073_v17  ;;  %v8070_v61 = vadd.f32 %v13231_v59, %v7981_v53 }
 0xd23   : > { %v7996_v20 = vadd.f32 %v7995_v2, %v7907_v13 }
 0xd24   : > { %v8275_v39 = vmax.f32 %v8172_v56, 0.0  ;;  %v8259_v54 = vmax.f32 %v8162_v38, 0.0  ;;  %v8159_v50 = vadd.f32 %v13233_v23, %v8070_v61 }
 0xd26   : > { %v8369_v40 = vpack.c.bf16 %v8263_v36, %v8259_v54  ;;  %v8255_v59 = vmax.f32 %v8159_v50, 0.0 }
 0xd27   : > { %v8084_v51 = vpop.f32.mrf.mxu2  ;;  %v8173_v22 = vpop.f32.mrf.mxu3 }
 0xd28   : > { %v8085_v29 = vadd.f32 %v8084_v51, %v7996_v20  ;;  %v7909_v48 = vpop.f32.mrf.mxu0  ;;  %v7998_v24 = vpop.f32.mrf.mxu1 }
 0xd29   : > { %v7910_v10 = vadd.f32 %v7909_v48, %v13172_v8 }
 0xd2a   : > { %v8174_v35 = vadd.f32 %v8173_v22, %v8085_v29 }
 0xd2b   : > { %v7999_v18 = vadd.f32 %v7998_v24, %v7910_v10  ;;  %v8251_v10 = vmax.f32 %v13229_v5, 0.0 }
 0xd2c   : > { %v8279_v28 = vmax.f32 %v8174_v35, 0.0 }
 0xd2d   : > { %v8365_v46 = vpack.c.bf16 %v8255_v59, %v8251_v10 }
 0xd2e   : > { %v8377_v27 = vpack.c.bf16 %v8279_v28, %v8275_v39 }
 0xd2f   : > { %v8087_v6 = vpop.f32.mrf.mxu2  ;;  %v8176_v41 = vpop.f32.mrf.mxu3 }
 0xd30   : > { %v8088_v0 = vadd.f32 %v8087_v6, %v7999_v18  ;;  %8464 = vmatpush.bf16.xpose.msrb.mxu3 %v8377_v27  ;;  %v7911_v42 = vpop.f32.mrf.mxu0  ;;  %v8000_v63 = vpop.f32.mrf.mxu1 }
 0xd31   : > { %v7912_v16 = vadd.f32 %v7911_v42, %v13172_v8 }
 0xd32   : > { %v8177_v52 = vadd.f32 %v8176_v41, %v8088_v0 }
 0xd33   : > { %v8001_v4 = vadd.f32 %v8000_v63, %v7912_v16 }
 0xd34   : > { %v8283_v9 = vmax.f32 %v8177_v52, 0.0 }
 0xd37   : > { %v8089_v7 = vpop.f32.mrf.mxu2  ;;  %v8178_v57 = vpop.f32.mrf.mxu3 }
 0xd38   : > { %v8090_v26 = vadd.f32 %v8089_v7, %v8001_v4  ;;  %8465 = vmatpush.bf16.xpose.msrb.mxu3 %v8373_v58  ;;  %v7914_v45 = vpop.f32.mrf.mxu0  ;;  %v8003_v15 = vpop.f32.mrf.mxu1 }
 0xd39   : > { %v7915_v2 = vadd.f32 %v7914_v45, %v13172_v8 }
 0xd3a   : > { %v8179_v43 = vadd.f32 %v8178_v57, %v8090_v26 }
 0xd3b   : > { %v8004_v13 = vadd.f32 %v8003_v15, %v7915_v2 }
 0xd3c   : > { %v8287_v31 = vmax.f32 %v8179_v43, 0.0 }
 0xd3e   : > { %v13273_v20 = vpack.c.bf16 %v8287_v31, %v8283_v9 }
 0xd3f   : > { %v8092_v1 = vpop.f32.mrf.mxu2  ;;  %v8181_v51 = vpop.f32.mrf.mxu3 }
 0xd40   : > { %v8093_v22 = vadd.f32 %v8092_v1, %v8004_v13  ;;  %8466 = vmatpush.bf16.xpose.msrb.mxu3 %v8369_v40  ;;  %v7916_v34 = vpop.f32.mrf.mxu0  ;;  %v8005_v56 = vpop.f32.mrf.mxu1 }
 0xd41   : > { %v7917_v29 = vadd.f32 %v7916_v34, %v13172_v8 }
 0xd42   : > { %v8182_v48 = vadd.f32 %v8181_v51, %v8093_v22 }
 0xd43   : > { %v8006_v24 = vadd.f32 %v8005_v56, %v7917_v29 }
 0xd44   : > { %v8291_v14 = vmax.f32 %v8182_v48, 0.0 }
 0xd47   : > { %v8094_v49 = vpop.f32.mrf.mxu2  ;;  %v8183_v35 = vpop.f32.mrf.mxu3 }
 0xd48   : > { %v8095_v23 = vadd.f32 %v8094_v49, %v8006_v24  ;;  %8467 = vmatpush.bf16.xpose.msrb.mxu3 %v8365_v46  ;;  %v7919_v18 = vpop.f32.mrf.mxu0  ;;  %v8008_v19 = vpop.f32.mrf.mxu1 }
 0xd49   : > { %v7920_v3 = vadd.f32 %v7919_v18, %v13172_v8 }
 0xd4a   : > { %v8184_v39 = vadd.f32 %v8183_v35, %v8095_v23 }
 0xd4b   : > { %v8009_v28 = vadd.f32 %v8008_v19, %v7920_v3 }
 0xd4c   : > { %v8295_v30 = vmax.f32 %v8184_v39, 0.0 }
 0xd4e   : > { %v13278_v27 = vpack.c.bf16 %v8295_v30, %v8291_v14 }
 0xd4f   : > { %v8097_v6 = vpop.f32.mrf.mxu2  ;;  %v8186_v41 = vpop.f32.mrf.mxu3 }
 0xd50   : > { %v8098_v25 = vadd.f32 %v8097_v6, %v8009_v28  ;;  %8468 = vmatpush.bf16.xpose.msrb.mxu3 %v13223_v11  ;;  %v7921_v5 = vpop.f32.mrf.mxu0  ;;  %v8010_v12 = vpop.f32.mrf.mxu1 }
 0xd51   : > { %v7922_v0 = vadd.f32 %v7921_v5, %v13172_v8 }
 0xd52   : > { %v8187_v42 = vadd.f32 %v8186_v41, %v8098_v25 }
 0xd53   : > { %v8011_v63 = vadd.f32 %v8010_v12, %v7922_v0 }
 0xd54   : > { %v8299_v47 = vmax.f32 %v8187_v42, 0.0 }
 0xd57   : > { %v8099_v16 = vpop.f32.mrf.mxu2  ;;  %v8188_v60 = vpop.f32.mrf.mxu3 }
 0xd58   : > { %v8100_v37 = vadd.f32 %v8099_v16, %v8011_v63  ;;  %8469 = vmatpush.bf16.xpose.msrb.mxu3 %v13213_v32  ;;  %v7924_v44 = vpop.f32.mrf.mxu0  ;;  %v8013_v52 = vpop.f32.mrf.mxu1 }
 0xd59   : > { %v7925_v4 = vadd.f32 %v7924_v44, %v13172_v8 }
 0xd5a   : > { %v8189_v62 = vadd.f32 %v8188_v60, %v8100_v37 }
 0xd5b   : > { %v8014_v17 = vadd.f32 %v8013_v52, %v7925_v4 }
 0xd5c   : > { %v8303_v21 = vmax.f32 %v8189_v62, 0.0 }
 0xd5e   : > { %v13284_v11 = vpack.c.bf16 %v8303_v21, %v8299_v47 }
 0xd5f   : > { %v8102_v58 = vpop.f32.mrf.mxu2  ;;  %v8191_v7 = vpop.f32.mrf.mxu3 }
 0xd60   : > { %v8103_v57 = vadd.f32 %v8102_v58, %v8014_v17  ;;  %8470 = vmatpush.bf16.xpose.msrb.mxu3 %v13203_v33  ;;  %v7926_v53 = vpop.f32.mrf.mxu0  ;;  %v8015_v38 = vpop.f32.mrf.mxu1 }
 0xd61   : > { %v7927_v26 = vadd.f32 %v7926_v53, %v13172_v8 }
 0xd62   : > { %v8192_v32 = vadd.f32 %v8191_v7, %v8103_v57 }
 0xd63   : > { %v8016_v45 = vadd.f32 %v8015_v38, %v7927_v26 }
 0xd64   : > { %v8307_v31 = vmax.f32 %v8192_v32, 0.0 }
 0xd67   : > { %v8104_v15 = vpop.f32.mrf.mxu2  ;;  %v8193_v2 = vpop.f32.mrf.mxu3 }
 0xd68   : > { %v8105_v61 = vadd.f32 %v8104_v15, %v8016_v45  ;;  %8471 = vmatpush.bf16.xpose.msrb.mxu3 %v13194_v55  ;;  %v7929_v36 = vpop.f32.mrf.mxu0  ;;  %v8018_v43 = vpop.f32.mrf.mxu1 }
 0xd69   : > { %v7930_v13 = vadd.f32 %v7929_v36, %v13172_v8 }
 0xd6a   : > { %v8194_v54 = vadd.f32 %v8193_v2, %v8105_v61 }
 0xd6b   : > { %v8019_v9 = vadd.f32 %v8018_v43, %v7930_v13 }
 0xd6c   : > { %v8311_v50 = vmax.f32 %v8194_v54, 0.0 }
 0xd6e   : > { %v13290_v33 = vpack.c.bf16 %v8311_v50, %v8307_v31 }
 0xd6f   : > { %v8107_v40 = vpop.f32.mrf.mxu2  ;;  %v8196_v1 = vpop.f32.mrf.mxu3 }
 0xd70   : > { %v8108_v51 = vadd.f32 %v8107_v40, %v8019_v9  ;;  %v7931_v22 = vpop.f32.mrf.mxu0  ;;  %v8020_v34 = vpop.f32.mrf.mxu1 }
 0xd71   : > { %v7932_v56 = vadd.f32 %v7931_v22, %v13172_v8 }
 0xd72   : > { %v8197_v29 = vadd.f32 %v8196_v1, %v8108_v51 }
 0xd73   : > { %v8021_v59 = vadd.f32 %v8020_v34, %v7932_v56  ;;  %v8345_v56 = vld [vmem:[%s13357_s9 + $0x8] sm:$0xff] }
 0xd74   : > { %v8315_v35 = vmax.f32 %v8197_v29, 0.0 }
 0xd77   : > { %v8109_v55 = vpop.f32.mrf.mxu2  ;;  %v8198_v48 = vpop.f32.mrf.mxu3 }
 0xd78   : > { %v8110_v24 = vadd.f32 %v8109_v55, %v8021_v59  ;;  %v7934_v10 = vpop.f32.mrf.mxu0  ;;  %v8023_v46 = vpop.f32.mrf.mxu1  ;;  %v8415_v55 = vunpack.c.l.b16 %v8345_v56 }
 0xd79   : > { %v7935_v9 = vadd.f32 %v7934_v10, %v13172_v8  ;;  %v8344_v10 = vld [vmem:[%s13357_s9] sm:$0xff] }
 0xd7a   : > { %v8199_v49 = vadd.f32 %v8198_v48, %v8110_v24  ;;  %v8416_v48 = vunpack.c.h.b16 %v8345_v56 }
 0xd7b   : > { %v8024_v51 = vadd.f32 %v8023_v46, %v7935_v9  ;;  %v8413_v46 = vunpack.c.l.b16 %v8344_v10 }
 0xd7c   : > { %v8319_v23 = vmax.f32 %v8199_v49, 0.0 }
 0xd7e   : > { %v13293_v18 = vpack.c.bf16 %v8319_v23, %v8315_v35  ;;  %v8419_v35 = vpack.c.b16 %v8415_v55, %v8415_v55 }
 0xd7f   : > { %v8112_v19 = vpop.f32.mrf.mxu2  ;;  %v8201_v3 = vpop.f32.mrf.mxu3 }
 0xd80   : > { %v7936_v39 = vpop.f32.mrf.mxu0  ;;  %v8025_v28 = vpop.f32.mrf.mxu1  ;;  %v8113_v29 = vadd.f32 %v8112_v19, %v8024_v51  ;;  %8459 = vmatmul.bf16.vlgmr.msrb.gmra.mxu2 %v8419_v35 }
 0xd81   : > { %v7937_v36 = vadd.f32 %v7936_v39, %v13172_v8 }
 0xd82   : > { %v8202_v23 = vadd.f32 %v8201_v3, %v8113_v29  ;;  %v8410_v3 = vstv %s438_s27 }
 0xd83   : > { %v8026_v40 = vadd.f32 %v8025_v28, %v7937_v36  ;;  %v8417_v28 = vpack.c.b16 %v8413_v46, %v8413_v46 }
 0xd84   : > { %v8323_v19 = vmax.f32 %v8202_v23, 0.0 }
 0xd85   : > { %8433 = vmatmul.bf16.vlgmr.msrb.gmra.mxu0 %v8417_v28 }
 0xd87   : > { %v8114_v14 = vpop.f32.mrf.mxu2  ;;  %v8203_v30 = vpop.f32.mrf.mxu3 }
 0xd88   : > { %v7939_v6 = vpop.f32.mrf.mxu0  ;;  %v8028_v41 = vpop.f32.mrf.mxu1  ;;  %v8115_v22 = vadd.f32 %v8114_v14, %v8026_v40  ;;  %v8414_v14 = vunpack.c.h.b16 %v8344_v10 }
 0xd89   : > { %v7940_v7 = vadd.f32 %v7939_v6, %v13172_v8 }
 0xd8a   : > { %v8204_v24 = vadd.f32 %v8203_v30, %v8115_v22  ;;  %v8418_v6 = vpack.c.b16 %v8414_v14, %v8414_v14 }
 0xd8b   : > { %v8029_v15 = vadd.f32 %v8028_v41, %v7940_v7 }
 0xd8c   : > { %v8327_v39 = vmax.f32 %v8204_v24, 0.0  ;;  %8446 = vmatmul.bf16.vlgmr.msrb.gmra.mxu1 %v8418_v6 }
 0xd8e   : > { %v8401_v30 = vpack.c.bf16 %v8327_v39, %v8323_v19 }
 0xd8f   : > { %v8117_v25 = vpop.f32.mrf.mxu2  ;;  %v8206_v5 = vpop.f32.mrf.mxu3 }
 0xd90   : > { %v7941_v12 = vpop.f32.mrf.mxu0  ;;  %v8030_v0 = vpop.f32.mrf.mxu1  ;;  %v8118_v43 = vadd.f32 %v8117_v25, %v8029_v15  ;;  %8511 = vmatmul.bf16.vlgmr.msra.gmra.mxu2 %v8419_v35 }
 0xd91   : > { %v7942_v47 = vadd.f32 %v7941_v12, %v13172_v8 }
 0xd92   : > { %v8207_v1 = vadd.f32 %v8206_v5, %v8118_v43 }
 0xd93   : > { %v8031_v38 = vadd.f32 %v8030_v0, %v7942_v47 }
 0xd94   : > { %v8331_v59 = vmax.f32 %v8207_v1, 0.0 }
 0xd95   : > { %8485 = vmatmul.bf16.vlgmr.msra.gmra.mxu0 %v8417_v28 }
 0xd97   : > { %v8119_v42 = vpop.f32.mrf.mxu2  ;;  %v8208_v63 = vpop.f32.mrf.mxu3 }
 0xd98   : > { %v7944_v16 = vpop.f32.mrf.mxu0  ;;  %v8033_v60 = vpop.f32.mrf.mxu1  ;;  %v8120_v2 = vadd.f32 %v8119_v42, %v8031_v38 }
 0xd99   : > { %v7945_v37 = vadd.f32 %v7944_v16, %v13172_v8 }
 0xd9a   : > { %v8209_v31 = vadd.f32 %v8208_v63, %v8120_v2 }
 0xd9b   : > { %v8034_v62 = vadd.f32 %v8033_v60, %v7945_v37 }
 0xd9c   : > { %v8335_v34 = vmax.f32 %v8209_v31, 0.0  ;;  %8498 = vmatmul.bf16.vlgmr.msra.gmra.mxu1 %v8418_v6 }
 0xd9e   : > { %v8405_v49 = vpack.c.bf16 %v8335_v34, %v8331_v59 }
 0xd9f   : > { %v8122_v44 = vpop.f32.mrf.mxu2  ;;  %v8211_v52 = vpop.f32.mrf.mxu3 }
 0xda0   : > { %v7946_v4 = vpop.f32.mrf.mxu0  ;;  %v8123_v21 = vadd.f32 %v8122_v44, %v8034_v62  ;;  %v8035_v58 = vpop.f32.mrf.mxu1 }
 0xda1   : > { %v7947_v17 = vadd.f32 %v7946_v4, %v13172_v8  ;;  %v8420_v8 = vpack.c.b16 %v8416_v48, %v8416_v48 }
 0xda2   : > { %v8212_v26 = vadd.f32 %v8211_v52, %v8123_v21 }
 0xda3   : > { %v8036_v57 = vadd.f32 %v8035_v58, %v7947_v17  ;;  %8472 = vmatmul.bf16.vlgmr.msrb.gmra.mxu3 %v8420_v8 }
 0xda4   : > { %v8339_v13 = vmax.f32 %v8212_v26, 0.0 }
 0xda7   : > { %v8124_v53 = vpop.f32.mrf.mxu2  ;;  %v8213_v45 = vpop.f32.mrf.mxu3 }
 0xda8   : > { %v8125_v32 = vadd.f32 %v8124_v53, %v8036_v57 }
 0xdaa   : > { %v8214_v61 = vadd.f32 %v8213_v45, %v8125_v32 }
 0xdac   : > { %v8343_v54 = vmax.f32 %v8214_v61, 0.0 }
 0xdae   : > { %v8409_v50 = vpack.c.bf16 %v8343_v54, %v8339_v13 }
 0xdb0   : > { %8516 = vmatpush.bf16.xpose.msra.mxu3 %v8409_v50 }
 0xdb8   : > { %8517 = vmatpush.bf16.xpose.msra.mxu3 %v8405_v49 }
 0xdc0   : > { %8518 = vmatpush.bf16.xpose.msra.mxu3 %v8401_v30 }
 0xdc8   : > { %8519 = vmatpush.bf16.xpose.msra.mxu3 %v13293_v18 }
 0xdd0   : > { %8520 = vmatpush.bf16.xpose.msra.mxu3 %v13290_v33 }
 0xdd8   : > { %8521 = vmatpush.bf16.xpose.msra.mxu3 %v13284_v11 }
 0xde0   : > { %8522 = vmatpush.bf16.xpose.msra.mxu3 %v13278_v27 }
 0xde8   : > { %8523 = vmatpush.bf16.xpose.msra.mxu3 %v13273_v20 }
 0xdef   : > { %8524 = vmatmul.bf16.vlgmr.msra.gmra.mxu3 %v8420_v8 }
 0xe02   : > { %v8434_v41 = vpop.f32.mrf.mxu0 }
 0xe03   : > { %v8435_v25 = vadd.f32 %v8434_v41, %v8410_v3  ;;  %v8460_v18 = vpop.f32.mrf.mxu2 }
 0xe09   : > { %v8447_v5 = vpop.f32.mrf.mxu1 }
 0xe0a   : > { %v8448_v12 = vadd.f32 %v8447_v5, %v8435_v25  ;;  %v8436_v11 = vpop.f32.mrf.mxu0 }
 0xe0b   : > { %v8462_v20 = vpop.f32.mrf.mxu2 }
 0xe0c   : > { %v8461_v33 = vadd.f32 %v8460_v18, %v8448_v12 }
 0xe11   : > { %v8449_v27 = vpop.f32.mrf.mxu1 }
 0xe12   : > { %v8486_v16 = vpop.f32.mrf.mxu0 }
 0xe13   : > { %v8512_v37 = vpop.f32.mrf.mxu2  ;;  %v8487_v62 = vadd.f32 %v8486_v16, %v8410_v3 }
 0xe19   : > { %v8499_v60 = vpop.f32.mrf.mxu1 }
 0xe1a   : > { %v8488_v44 = vpop.f32.mrf.mxu0  ;;  %v8500_v17 = vadd.f32 %v8499_v60, %v8487_v62 }
 0xe1b   : > { %v8514_v4 = vpop.f32.mrf.mxu2 }
 0xe1c   : > { %v8513_v47 = vadd.f32 %v8512_v37, %v8500_v17 }
 0xe21   : > { %v8501_v52 = vpop.f32.mrf.mxu1 }
 0xe26   : > { %v8473_v0 = vpop.f32.mrf.mxu3 }
 0xe27   : > { %v8474_v42 = vadd.f32 %v8473_v0, %v8461_v33 }
 0xe29   : > { %8529 = vst [vmem:[%s431_s17] sm:$0xff] %v8474_v42 }
 0xe2e   : > { %v8475_v63 = vpop.f32.mrf.mxu3 }
 0xe72   : > { %v8525_v21 = vpop.f32.mrf.mxu3 }
 0xe73   : > { %v8526_v58 = vadd.f32 %v8525_v21, %v8513_v47 }
 0xe75   : > { %8530 = vst [vmem:[%s431_s17 + $0x8] sm:$0xff] %v8526_v58 }
 0xe76   : > { %10898 = shalt.err (!%p10895_p8)
}
 0xe77   : > { %10717 = dma.vmem_to_hbm [thread:$0]  (%p11049_p5), %s8546_s12, 256, %s8548_s13, %s8532_s15  }
 0xe7a   : > { %v8527_v7 = vpop.f32.mrf.mxu3 }
 0xe7b PF: > { %p10739_p9 = scmp.ge.s32.totalorder %s10941_s22, 2  ;;  %s8559_s30 = sand.u32 1, %s10929_s19  }
 0xe7c   : > { %s8560_s17 = scalar_lea.sflag [#allocation5], %s8559_s30 }
 0xe7d   : > { %p10730_p10 = pnand %p10739_p9, %p11053_p6 }
 0xe7f   : > { %p10731_p11 = pneg %p10730_p10 }
 0xe81   : > { %10924 = dma.done.wait (%p10731_p11), %s8560_s17, 256  }
 0xe82   : > { %10926 = vsyncadd (%p10731_p11), %s8560_s17, 4294967040  ;;  %s14155_s18 = sld [smem:[#allocation13_spill]]  ;;  %p24_p12 = scmp.ge.s32.totalorder %s11036_s24, 4  }
 0xe83   : > { %s14156_s21 = sld [smem:[#allocation14_spill]]  ;;  %s14157_s19 = smov %s10933_s20 }
 0xe84   : > { %s14159_s22 = smov %s11036_s24  ;;  %26 = sbr.rel (!%p24_p12) target bundleno = 9 (0x9), region = 112 }
 0xe88   : > { %s14158_s20 = smov %s14155_s18 }
 0xe89   :  { %8566 = vsyncpa [#allocation4], 1 }
 0xe8a   :  { %8568 = vsyncpa [#allocation4 + $0x1], 1 }
 0xe8b   :  { %8569 = vsyncpa [#allocation7], 1 }
 0xe8c   :  { %8570 = vsyncpa [#allocation5], 1 }
 0xe8d   :  { %8572 = vsyncpa [#allocation5 + $0x1], 1 }

</bundles_post_ra>
